<compile_context>
chip_gen: v7x
topology: tpu7x:2x2x1
jax: 0.10.0
libtpu: 0.0.40
codegen_flags: <defaults>
</compile_context>

<pallas_src>
import jax
import jax.numpy as jnp
from jax.experimental import pallas as pl
from jax.experimental.pallas import tpu as pltpu

_LANE = 128


# ---------------------------------------------------------------------------
# In-kernel helpers.
# ---------------------------------------------------------------------------
def _fill_reflect_pad(pad_ref, src):
    """Write reflect-pad(1) of `src` (H, W, C) into pad_ref (H+2, W+2, C) VMEM scratch."""
    H, W = src.shape[0], src.shape[1]
    # Rows -1 / H reflect to rows 1 / H-2; build the whole (H+2, W, C) slab once and write
    # it with a single wide store.
    v = jnp.concatenate([src[1:2, :, :], src, src[H - 2:H - 1, :, :]], axis=0)
    pad_ref[:, 1:W + 1, :] = v
    # Columns -1 / W reflect to columns 1 / W-2 (corners come from the row-reflected slab).
    pad_ref[:, 0:1, :] = v[:, 1:2, :]
    pad_ref[:, W + 1:W + 2, :] = v[:, W - 2:W - 1, :]


def _conv3x3_bn_relu(pad_ref, patch_ref, w_ref, scale_ref, bias_ref):
    """3x3 'valid' conv on the padded input + folded BN + ReLU -> (H*W, Cout_pad) f32.

    pad_ref  : (H+2, W+2, C)   bf16 VMEM scratch (already filled).
    patch_ref: (H*W, 9*C)      bf16 VMEM scratch (im2col buffer).
    w_ref    : (9*C, Cout_pad) bf16 (HWIO weight flattened row-major over (dy, dx, cin)).
    """
    HP, WP, C = pad_ref.shape
    H, W = HP - 2, WP - 2
    # Single im2col matmul: 9 shifted windows side by side on the lane dim, one MXU call.
    # With C padded to a full lane tile (conv2) the tap copies are unmasked/lane-dense;
    # the remaining sublane relayout of the shifted windows is small next to the MXU slack.
    k = 0
    for dy in range(3):
        for dx in range(3):
            tap = pad_ref[dy:dy + H, dx:dx + W, :]                       # (H, W, C) bf16
            patch_ref[:, k * C:(k + 1) * C] = tap.reshape(H * W, C)
            k += 1
    acc = jnp.dot(patch_ref[...], w_ref[...],
                  preferred_element_type=jnp.float32)                    # (H*W, Cout_pad)
    return jnp.maximum(acc * scale_ref[...] + bias_ref[...], 0.0)        # folded BN + ReLU


def _encoder_block_kernel(x_ref, w1_ref, s1_ref, b1_ref, w2_ref, s2_ref, b2_ref,
                          x_out_ref, p_out_ref,
                          pad1_ref, pad2_ref, patch1_ref, patch2_ref):
    H, W, _ = x_ref.shape
    Cout = x_out_ref.shape[0]
    Cpad = pad2_ref.shape[-1]
    Ho, Wo = H // 2, W // 2

    # conv1 + BN + ReLU
    _fill_reflect_pad(pad1_ref, x_ref[...].astype(pad1_ref.dtype))
    y1 = _conv3x3_bn_relu(pad1_ref, patch1_ref, w1_ref, s1_ref, b1_ref)  # (H*W, Cpad) f32

    # conv2 + BN + ReLU; y1 goes straight into conv2's padded bf16 buffer (VMEM only).
    _fill_reflect_pad(pad2_ref, y1.astype(pad2_ref.dtype).reshape(H, W, Cpad))
    y2 = _conv3x3_bn_relu(pad2_ref, patch2_ref, w2_ref, s2_ref, b2_ref)  # (H*W, Cpad) f32

    # x output in NCHW-flattened (Cout, H*W) layout: one XLU transpose, then lane-dense
    # 256-wide stores and no XLA transpose outside the kernel.
    x_out_ref[...] = jnp.transpose(y2)[:Cout, :]

    # 2x2 max-pool on the VPU: pairwise max over W neighbours, then over H neighbours,
    # with channels staying on the (dense) lane dim throughout.  Exact in f32.
    yc = y2.reshape(H * Wo, 2, Cpad)
    cmax = jnp.maximum(yc[:, 0, :], yc[:, 1, :])                         # (H*Wo, Cpad)
    cr = cmax.reshape(Ho, 2 * Wo, Cpad)
    pooled = jnp.maximum(cr[:, :Wo, :], cr[:, Wo:, :])                   # (Ho, Wo, Cpad)
    p_out_ref[...] = jnp.transpose(pooled.reshape(Ho * Wo, Cpad))[:Cout, :]


# ---------------------------------------------------------------------------
# Wrapper.
# ---------------------------------------------------------------------------
def encoder_block_forward(x_nchw, params):
    """Matches encoder_block.forward (eval mode). Returns (x, p) in NCHW."""
    # TODO(synk): nn.Dropout is identity in eval mode; training-mode dropout not implemented.
    # TODO(synk): for a full UNet the (small) NCHW->NHWC input transpose would be hoisted to
    # the network boundary; outputs already come back in NCHW layout.
    x = jnp.transpose(x_nchw, (0, 2, 3, 1)).astype(jnp.float32)          # NCHW -> NHWC
    N, H, W, Cin = x.shape
    Cout = params["w1"].shape[-1]
    # TODO(synk): PyTorch MaxPool2d(2,2) floors odd sizes; only even H, W supported here.
    assert H % 2 == 0 and W % 2 == 0, "maxpool path assumes even H, W"
    # TODO(synk): large images (e.g. 128x128x64 UNet stages) should add a row-strip grid axis
    # with a 2-row halo so per-step scratch fits v7x's 32 MiB scoped VMEM default.
    Ho, Wo = H // 2, W // 2
    Cpad = ((Cout + _LANE - 1) // _LANE) * _LANE

    # Weights / folded-BN params, channel-padded to a full lane tile (zero pads are inert).
    w1 = params["w1"].astype(jnp.bfloat16).reshape(9 * Cin, Cout)
    w1 = jnp.pad(w1, ((0, 0), (0, Cpad - Cout)))                         # (9*Cin, Cpad)
    w2 = jnp.pad(params["w2"].astype(jnp.bfloat16),
                 ((0, 0), (0, 0), (0, Cpad - Cout), (0, Cpad - Cout)))
    w2 = w2.reshape(9 * Cpad, Cpad)                                      # (9*Cpad, Cpad)

    def _padded_row(v):
        return jnp.pad(v.astype(jnp.float32), (0, Cpad - Cout)).reshape(1, Cpad)

    s1, b1 = _padded_row(params["scale1"]), _padded_row(params["bias1"])
    s2, b2 = _padded_row(params["scale2"]), _padded_row(params["bias2"])

    def _const_spec(a):
        return pl.BlockSpec(a.shape, lambda n: (0, 0))

    flops = 2 * N * H * W * 9 * (Cin * Cout + Cout * Cout)
    bytes_accessed = (x.size * 4 + w1.size * 2 + w2.size * 2
                      + N * Cout * H * W * 4 + N * Cout * Ho * Wo * 4)

    x_out, p_out = pl.pallas_call(
        _encoder_block_kernel,
        out_shape=(
            jax.ShapeDtypeStruct((N, Cout, H * W), jnp.float32),
            jax.ShapeDtypeStruct((N, Cout, Ho * Wo), jnp.float32),
        ),
        grid=(N,),
        in_specs=[
            pl.BlockSpec((None, H, W, Cin), lambda n: (n, 0, 0, 0)),
            _const_spec(w1), _const_spec(s1), _const_spec(b1),
            _const_spec(w2), _const_spec(s2), _const_spec(b2),
        ],
        out_specs=(
            pl.BlockSpec((None, Cout, H * W), lambda n: (n, 0, 0)),
            pl.BlockSpec((None, Cout, Ho * Wo), lambda n: (n, 0, 0)),
        ),
        scratch_shapes=[
            pltpu.VMEM((H + 2, W + 2, Cin), jnp.bfloat16),    # reflect-padded conv1 input
            pltpu.VMEM((H + 2, W + 2, Cpad), jnp.bfloat16),   # reflect-padded conv2 input
            pltpu.VMEM((H * W, 9 * Cin), jnp.bfloat16),       # im2col buffer, conv1
            pltpu.VMEM((H * W, 9 * Cpad), jnp.bfloat16),      # im2col buffer, conv2
        ],
        compiler_params=pltpu.CompilerParams(
            dimension_semantics=("parallel",),
            vmem_limit_bytes=32 * 1024 * 1024,
        ),
        cost_estimate=pl.CostEstimate(
            flops=flops, transcendentals=0, bytes_accessed=bytes_accessed),
    )(x, w1, s1, b1, w2, s2, b2)

    # (N, Cout, H*W) is already NCHW-flattened: only free reshapes remain.
    return x_out.reshape(N, Cout, H, W), p_out.reshape(N, Cout, Ho, Wo)


# ---------------------------------------------------------------------------
# Parameter construction (deterministic, synthetic) and a pure-JAX reference.
# ---------------------------------------------------------------------------
def make_params(key, in_c, out_c):
    ks = jax.random.split(key, 12)
    eps = 1e-5

    def bn_fold(conv_b, gamma, beta, mean, var):
        s = gamma / jnp.sqrt(var + eps)
        return s, (conv_b - mean) * s + beta

    # conv1: in_c -> out_c ; conv2: out_c -> out_c  (HWIO weight layout)
    w1 = 0.1 * jax.random.normal(ks[0], (3, 3, in_c, out_c), jnp.float32)
    b1 = 0.1 * jax.random.normal(ks[1], (out_c,), jnp.float32)
    g1 = 1.0 + 0.1 * jax.random.normal(ks[2], (out_c,), jnp.float32)
    be1 = 0.1 * jax.random.normal(ks[3], (out_c,), jnp.float32)
    m1 = 0.1 * jax.random.normal(ks[4], (out_c,), jnp.float32)
    v1 = jnp.abs(jax.random.normal(ks[5], (out_c,), jnp.float32)) + 0.5

    w2 = 0.1 * jax.random.normal(ks[6], (3, 3, out_c, out_c), jnp.float32)
    b2 = 0.1 * jax.random.normal(ks[7], (out_c,), jnp.float32)
    g2 = 1.0 + 0.1 * jax.random.normal(ks[8], (out_c,), jnp.float32)
    be2 = 0.1 * jax.random.normal(ks[9], (out_c,), jnp.float32)
    m2 = 0.1 * jax.random.normal(ks[10], (out_c,), jnp.float32)
    v2 = jnp.abs(jax.random.normal(ks[11], (out_c,), jnp.float32)) + 0.5

    s1, sb1 = bn_fold(b1, g1, be1, m1, v1)
    s2, sb2 = bn_fold(b2, g2, be2, m2, v2)
    return dict(w1=w1, scale1=s1, bias1=sb1, w2=w2, scale2=s2, bias2=sb2)


def _reference_forward(x_nchw, params):
    """Pure-JAX f32 reference of the encoder block (eval mode)."""
    x = jnp.transpose(x_nchw, (0, 2, 3, 1)).astype(jnp.float32)

    def conv_bn_relu(h, w, s, b):
        hp = jnp.pad(h, ((0, 0), (1, 1), (1, 1), (0, 0)), mode="reflect")
        y = jax.lax.conv_general_dilated(
            hp, w, window_strides=(1, 1), padding="VALID",
            dimension_numbers=("NHWC", "HWIO", "NHWC"))
        return jnp.maximum(y * s + b, 0.0)

    x1 = conv_bn_relu(x, params["w1"], params["scale1"], params["bias1"])
    x2 = conv_bn_relu(x1, params["w2"], params["scale2"], params["bias2"])
    p = jax.lax.reduce_window(x2, -jnp.inf, jax.lax.max,
                              (1, 2, 2, 1), (1, 2, 2, 1), "VALID")
    return jnp.transpose(x2, (0, 3, 1, 2)), jnp.transpose(p, (0, 3, 1, 2))


if __name__ == "__main__":
    N, IN_C, OUT_C, H, W = 2, 4, 8, 16, 16
    key = jax.random.PRNGKey(0)
    k_x, k_p = jax.random.split(key)
    x = jax.random.normal(k_x, (N, IN_C, H, W), jnp.float32)
    params = make_params(k_p, IN_C, OUT_C)

    x_full, p_pooled = jax.jit(encoder_block_forward)(x, params)
    jax.block_until_ready((x_full, p_pooled))

    assert x_full.shape == (N, OUT_C, H, W)
    assert p_pooled.shape == (N, OUT_C, H // 2, W // 2)

    # Numerical check against a pure-JAX f32 reference (bf16 MXU -> loose tolerance).
    x_ref, p_ref = _reference_forward(x, params)
    assert jnp.allclose(x_full, x_ref, atol=0.1, rtol=0.1), \
        float(jnp.max(jnp.abs(x_full - x_ref)))
    assert jnp.allclose(p_pooled, p_ref, atol=0.1, rtol=0.1), \
        float(jnp.max(jnp.abs(p_pooled - p_ref)))

    print("KERNEL_OK")
</pallas_src>

<mosaic_0001>
module attributes {stable_mosaic.version = 11 : i64} {
  func.func @_encoder_block_kernel(%arg0: i32, %arg1: memref<1x16x16x4xf32, #tpu.memory_space<vmem>>, %arg2: memref<36x128xbf16, #tpu.memory_space<vmem>>, %arg3: memref<1x128xf32, #tpu.memory_space<vmem>>, %arg4: memref<1x128xf32, #tpu.memory_space<vmem>>, %arg5: memref<1152x128xbf16, #tpu.memory_space<vmem>>, %arg6: memref<1x128xf32, #tpu.memory_space<vmem>>, %arg7: memref<1x128xf32, #tpu.memory_space<vmem>>, %arg8: memref<1x8x256xf32, #tpu.memory_space<vmem>>, %arg9: memref<1x8x64xf32, #tpu.memory_space<vmem>>, %arg10: memref<18x18x4xbf16, #tpu.memory_space<vmem>>, %arg11: memref<18x18x128xbf16, #tpu.memory_space<vmem>>, %arg12: memref<256x36xbf16, #tpu.memory_space<vmem>>, %arg13: memref<256x1152xbf16, #tpu.memory_space<vmem>>) attributes {dimension_semantics = [#tpu.dimension_semantics<parallel>], iteration_bounds = array<i64: 2>, scalar_prefetch = 0 : i64, scratch_operands = 4 : i64, tpu.core_type = #tpu.core_type<tc>, window_params = [{transform_indices = @transform_0, window_bounds = array<i64: 1, 16, 16, 4>}, {pipeline_mode = #tpu.pipeline_mode<synchronous>, transform_indices = @transform_1, window_bounds = array<i64: 36, 128>}, {pipeline_mode = #tpu.pipeline_mode<synchronous>, transform_indices = @transform_2, window_bounds = array<i64: 1, 128>}, {pipeline_mode = #tpu.pipeline_mode<synchronous>, transform_indices = @transform_3, window_bounds = array<i64: 1, 128>}, {pipeline_mode = #tpu.pipeline_mode<synchronous>, transform_indices = @transform_4, window_bounds = array<i64: 1152, 128>}, {pipeline_mode = #tpu.pipeline_mode<synchronous>, transform_indices = @transform_5, window_bounds = array<i64: 1, 128>}, {pipeline_mode = #tpu.pipeline_mode<synchronous>, transform_indices = @transform_6, window_bounds = array<i64: 1, 128>}, {transform_indices = @transform_7, window_bounds = array<i64: 1, 8, 256>}, {transform_indices = @transform_8, window_bounds = array<i64: 1, 8, 64>}]} {
    %c0 = arith.constant 0 : index
    %c0_0 = arith.constant 0 : index
    %c0_1 = arith.constant 0 : index
    %c0_2 = arith.constant 0 : index
    %0 = vector.load %arg1[%c0, %c0_0, %c0_1, %c0_2] : memref<1x16x16x4xf32, #tpu.memory_space<vmem>>, vector<1x16x16x4xf32>
    %1 = vector.shape_cast %0 : vector<1x16x16x4xf32> to vector<16x16x4xf32>
    %2 = arith.truncf %1 : vector<16x16x4xf32> to vector<16x16x4xbf16>
    %3 = vector.extract_strided_slice %2 {offsets = [1, 0, 0], sizes = [1, 16, 4], strides = [1, 1, 1]} : vector<16x16x4xbf16> to vector<1x16x4xbf16>
    %4 = vector.extract_strided_slice %2 {offsets = [14, 0, 0], sizes = [1, 16, 4], strides = [1, 1, 1]} : vector<16x16x4xbf16> to vector<1x16x4xbf16>
    %5 = tpu.concatenate %3, %2, %4 in 0 : vector<1x16x4xbf16>, vector<16x16x4xbf16>, vector<1x16x4xbf16> -> vector<18x16x4xbf16>
    %c0_3 = arith.constant 0 : index
    %c1 = arith.constant 1 : index
    %c0_4 = arith.constant 0 : index
    %6 = vector.load %arg10[%c0_3, %c1, %c0_4] : memref<18x18x4xbf16, #tpu.memory_space<vmem>>, vector<18x16x4xbf16>
    tpu.vector_store %arg10[%c0_3, %c1, %c0_4], %5 {strides = array<i32>} : memref<18x18x4xbf16, #tpu.memory_space<vmem>>, vector<18x16x4xbf16>,
    %7 = vector.extract_strided_slice %5 {offsets = [0, 1, 0], sizes = [18, 1, 4], strides = [1, 1, 1]} : vector<18x16x4xbf16> to vector<18x1x4xbf16>
    %c0_5 = arith.constant 0 : index
    %c0_6 = arith.constant 0 : index
    %c0_7 = arith.constant 0 : index
    %8 = vector.load %arg10[%c0_5, %c0_6, %c0_7] : memref<18x18x4xbf16, #tpu.memory_space<vmem>>, vector<18x1x4xbf16>
    tpu.vector_store %arg10[%c0_5, %c0_6, %c0_7], %7 {strides = array<i32>} : memref<18x18x4xbf16, #tpu.memory_space<vmem>>, vector<18x1x4xbf16>,
    %9 = vector.extract_strided_slice %5 {offsets = [0, 14, 0], sizes = [18, 1, 4], strides = [1, 1, 1]} : vector<18x16x4xbf16> to vector<18x1x4xbf16>
    %c0_8 = arith.constant 0 : index
    %c17 = arith.constant 17 : index
    %c0_9 = arith.constant 0 : index
    %10 = vector.load %arg10[%c0_8, %c17, %c0_9] : memref<18x18x4xbf16, #tpu.memory_space<vmem>>, vector<18x1x4xbf16>
    tpu.vector_store %arg10[%c0_8, %c17, %c0_9], %9 {strides = array<i32>} : memref<18x18x4xbf16, #tpu.memory_space<vmem>>, vector<18x1x4xbf16>,
    %c0_10 = arith.constant 0 : index
    %c0_11 = arith.constant 0 : index
    %c0_12 = arith.constant 0 : index
    %11 = vector.load %arg10[%c0_10, %c0_11, %c0_12] : memref<18x18x4xbf16, #tpu.memory_space<vmem>>, vector<16x16x4xbf16>
    %12 = vector.shape_cast %11 : vector<16x16x4xbf16> to vector<256x4xbf16>
    %c0_13 = arith.constant 0 : index
    %c0_14 = arith.constant 0 : index
    %13 = vector.load %arg12[%c0_13, %c0_14] : memref<256x36xbf16, #tpu.memory_space<vmem>>, vector<256x4xbf16>
    tpu.vector_store %arg12[%c0_13, %c0_14], %12 {strides = array<i32>} : memref<256x36xbf16, #tpu.memory_space<vmem>>, vector<256x4xbf16>,
    %c0_15 = arith.constant 0 : index
    %c1_16 = arith.constant 1 : index
    %c0_17 = arith.constant 0 : index
    %14 = vector.load %arg10[%c0_15, %c1_16, %c0_17] : memref<18x18x4xbf16, #tpu.memory_space<vmem>>, vector<16x16x4xbf16>
    %15 = vector.shape_cast %14 : vector<16x16x4xbf16> to vector<256x4xbf16>
    %c0_18 = arith.constant 0 : index
    %c4 = arith.constant 4 : index
    %16 = vector.load %arg12[%c0_18, %c4] : memref<256x36xbf16, #tpu.memory_space<vmem>>, vector<256x4xbf16>
    tpu.vector_store %arg12[%c0_18, %c4], %15 {strides = array<i32>} : memref<256x36xbf16, #tpu.memory_space<vmem>>, vector<256x4xbf16>,
    %c0_19 = arith.constant 0 : index
    %c2 = arith.constant 2 : index
    %c0_20 = arith.constant 0 : index
    %17 = vector.load %arg10[%c0_19, %c2, %c0_20] : memref<18x18x4xbf16, #tpu.memory_space<vmem>>, vector<16x16x4xbf16>
    %18 = vector.shape_cast %17 : vector<16x16x4xbf16> to vector<256x4xbf16>
    %c0_21 = arith.constant 0 : index
    %c8 = arith.constant 8 : index
    %19 = vector.load %arg12[%c0_21, %c8] : memref<256x36xbf16, #tpu.memory_space<vmem>>, vector<256x4xbf16>
    tpu.vector_store %arg12[%c0_21, %c8], %18 {strides = array<i32>} : memref<256x36xbf16, #tpu.memory_space<vmem>>, vector<256x4xbf16>,
    %c1_22 = arith.constant 1 : index
    %c0_23 = arith.constant 0 : index
    %c0_24 = arith.constant 0 : index
    %20 = vector.load %arg10[%c1_22, %c0_23, %c0_24] : memref<18x18x4xbf16, #tpu.memory_space<vmem>>, vector<16x16x4xbf16>
    %21 = vector.shape_cast %20 : vector<16x16x4xbf16> to vector<256x4xbf16>
    %c0_25 = arith.constant 0 : index
    %c12 = arith.constant 12 : index
    %22 = vector.load %arg12[%c0_25, %c12] : memref<256x36xbf16, #tpu.memory_space<vmem>>, vector<256x4xbf16>
    tpu.vector_store %arg12[%c0_25, %c12], %21 {strides = array<i32>} : memref<256x36xbf16, #tpu.memory_space<vmem>>, vector<256x4xbf16>,
    %c1_26 = arith.constant 1 : index
    %c1_27 = arith.constant 1 : index
    %c0_28 = arith.constant 0 : index
    %23 = vector.load %arg10[%c1_26, %c1_27, %c0_28] : memref<18x18x4xbf16, #tpu.memory_space<vmem>>, vector<16x16x4xbf16>
    %24 = vector.shape_cast %23 : vector<16x16x4xbf16> to vector<256x4xbf16>
    %c0_29 = arith.constant 0 : index
    %c16 = arith.constant 16 : index
    %25 = vector.load %arg12[%c0_29, %c16] : memref<256x36xbf16, #tpu.memory_space<vmem>>, vector<256x4xbf16>
    tpu.vector_store %arg12[%c0_29, %c16], %24 {strides = array<i32>} : memref<256x36xbf16, #tpu.memory_space<vmem>>, vector<256x4xbf16>,
    %c1_30 = arith.constant 1 : index
    %c2_31 = arith.constant 2 : index
    %c0_32 = arith.constant 0 : index
    %26 = vector.load %arg10[%c1_30, %c2_31, %c0_32] : memref<18x18x4xbf16, #tpu.memory_space<vmem>>, vector<16x16x4xbf16>
    %27 = vector.shape_cast %26 : vector<16x16x4xbf16> to vector<256x4xbf16>
    %c0_33 = arith.constant 0 : index
    %c20 = arith.constant 20 : index
    %28 = vector.load %arg12[%c0_33, %c20] : memref<256x36xbf16, #tpu.memory_space<vmem>>, vector<256x4xbf16>
    tpu.vector_store %arg12[%c0_33, %c20], %27 {strides = array<i32>} : memref<256x36xbf16, #tpu.memory_space<vmem>>, vector<256x4xbf16>,
    %c2_34 = arith.constant 2 : index
    %c0_35 = arith.constant 0 : index
    %c0_36 = arith.constant 0 : index
    %29 = vector.load %arg10[%c2_34, %c0_35, %c0_36] : memref<18x18x4xbf16, #tpu.memory_space<vmem>>, vector<16x16x4xbf16>
    %30 = vector.shape_cast %29 : vector<16x16x4xbf16> to vector<256x4xbf16>
    %c0_37 = arith.constant 0 : index
    %c24 = arith.constant 24 : index
    %31 = vector.load %arg12[%c0_37, %c24] : memref<256x36xbf16, #tpu.memory_space<vmem>>, vector<256x4xbf16>
    tpu.vector_store %arg12[%c0_37, %c24], %30 {strides = array<i32>} : memref<256x36xbf16, #tpu.memory_space<vmem>>, vector<256x4xbf16>,
    %c2_38 = arith.constant 2 : index
    %c1_39 = arith.constant 1 : index
    %c0_40 = arith.constant 0 : index
    %32 = vector.load %arg10[%c2_38, %c1_39, %c0_40] : memref<18x18x4xbf16, #tpu.memory_space<vmem>>, vector<16x16x4xbf16>
    %33 = vector.shape_cast %32 : vector<16x16x4xbf16> to vector<256x4xbf16>
    %c0_41 = arith.constant 0 : index
    %c28 = arith.constant 28 : index
    %34 = vector.load %arg12[%c0_41, %c28] : memref<256x36xbf16, #tpu.memory_space<vmem>>, vector<256x4xbf16>
    tpu.vector_store %arg12[%c0_41, %c28], %33 {strides = array<i32>} : memref<256x36xbf16, #tpu.memory_space<vmem>>, vector<256x4xbf16>,
    %c2_42 = arith.constant 2 : index
    %c2_43 = arith.constant 2 : index
    %c0_44 = arith.constant 0 : index
    %35 = vector.load %arg10[%c2_42, %c2_43, %c0_44] : memref<18x18x4xbf16, #tpu.memory_space<vmem>>, vector<16x16x4xbf16>
    %36 = vector.shape_cast %35 : vector<16x16x4xbf16> to vector<256x4xbf16>
    %c0_45 = arith.constant 0 : index
    %c32 = arith.constant 32 : index
    %37 = vector.load %arg12[%c0_45, %c32] : memref<256x36xbf16, #tpu.memory_space<vmem>>, vector<256x4xbf16>
    tpu.vector_store %arg12[%c0_45, %c32], %36 {strides = array<i32>} : memref<256x36xbf16, #tpu.memory_space<vmem>>, vector<256x4xbf16>,
    %c0_46 = arith.constant 0 : index
    %c0_47 = arith.constant 0 : index
    %38 = vector.load %arg12[%c0_46, %c0_47] : memref<256x36xbf16, #tpu.memory_space<vmem>>, vector<256x36xbf16>
    %c0_48 = arith.constant 0 : index
    %c0_49 = arith.constant 0 : index
    %39 = vector.load %arg2[%c0_48, %c0_49] : memref<36x128xbf16, #tpu.memory_space<vmem>>, vector<36x128xbf16>
    %cst = arith.constant dense<0.000000e+00> : vector<256x128xf32>
    %40 = tpu.matmul %38, %39, %cst {dimension_numbers = #tpu.dot_dimension_numbers<[1], [0], [0], [1], [0, 0, 1, 1], [], []>} : vector<256x36xbf16>, vector<36x128xbf16>, vector<256x128xf32> -> vector<256x128xf32>
    %c0_50 = arith.constant 0 : index
    %c0_51 = arith.constant 0 : index
    %41 = vector.load %arg3[%c0_50, %c0_51] : memref<1x128xf32, #tpu.memory_space<vmem>>, vector<1x128xf32>
    %42 = vector.broadcast %41 : vector<1x128xf32> to vector<256x128xf32>
    %43 = arith.mulf %40, %42 : vector<256x128xf32>
    %c0_52 = arith.constant 0 : index
    %c0_53 = arith.constant 0 : index
    %44 = vector.load %arg4[%c0_52, %c0_53] : memref<1x128xf32, #tpu.memory_space<vmem>>, vector<1x128xf32>
    %45 = vector.broadcast %44 : vector<1x128xf32> to vector<256x128xf32>
    %46 = arith.addf %43, %45 : vector<256x128xf32>
    %cst_54 = arith.constant 0.000000e+00 : f32
    %47 = vector.broadcast %cst_54 : f32 to vector<256x128xf32>
    %48 = arith.maximumf %46, %47 : vector<256x128xf32>
    %49 = arith.truncf %48 : vector<256x128xf32> to vector<256x128xbf16>
    %50 = vector.shape_cast %49 : vector<256x128xbf16> to vector<16x16x128xbf16>
    %51 = vector.extract_strided_slice %50 {offsets = [1, 0, 0], sizes = [1, 16, 128], strides = [1, 1, 1]} : vector<16x16x128xbf16> to vector<1x16x128xbf16>
    %52 = vector.extract_strided_slice %50 {offsets = [14, 0, 0], sizes = [1, 16, 128], strides = [1, 1, 1]} : vector<16x16x128xbf16> to vector<1x16x128xbf16>
    %53 = tpu.concatenate %51, %50, %52 in 0 : vector<1x16x128xbf16>, vector<16x16x128xbf16>, vector<1x16x128xbf16> -> vector<18x16x128xbf16>
    %c0_55 = arith.constant 0 : index
    %c1_56 = arith.constant 1 : index
    %c0_57 = arith.constant 0 : index
    %54 = vector.load %arg11[%c0_55, %c1_56, %c0_57] : memref<18x18x128xbf16, #tpu.memory_space<vmem>>, vector<18x16x128xbf16>
    tpu.vector_store %arg11[%c0_55, %c1_56, %c0_57], %53 {strides = array<i32>} : memref<18x18x128xbf16, #tpu.memory_space<vmem>>, vector<18x16x128xbf16>,
    %55 = vector.extract_strided_slice %53 {offsets = [0, 1, 0], sizes = [18, 1, 128], strides = [1, 1, 1]} : vector<18x16x128xbf16> to vector<18x1x128xbf16>
    %c0_58 = arith.constant 0 : index
    %c0_59 = arith.constant 0 : index
    %c0_60 = arith.constant 0 : index
    %56 = vector.load %arg11[%c0_58, %c0_59, %c0_60] : memref<18x18x128xbf16, #tpu.memory_space<vmem>>, vector<18x1x128xbf16>
    tpu.vector_store %arg11[%c0_58, %c0_59, %c0_60], %55 {strides = array<i32>} : memref<18x18x128xbf16, #tpu.memory_space<vmem>>, vector<18x1x128xbf16>,
    %57 = vector.extract_strided_slice %53 {offsets = [0, 14, 0], sizes = [18, 1, 128], strides = [1, 1, 1]} : vector<18x16x128xbf16> to vector<18x1x128xbf16>
    %c0_61 = arith.constant 0 : index
    %c17_62 = arith.constant 17 : index
    %c0_63 = arith.constant 0 : index
    %58 = vector.load %arg11[%c0_61, %c17_62, %c0_63] : memref<18x18x128xbf16, #tpu.memory_space<vmem>>, vector<18x1x128xbf16>
    tpu.vector_store %arg11[%c0_61, %c17_62, %c0_63], %57 {strides = array<i32>} : memref<18x18x128xbf16, #tpu.memory_space<vmem>>, vector<18x1x128xbf16>,
    %c0_64 = arith.constant 0 : index
    %c0_65 = arith.constant 0 : index
    %c0_66 = arith.constant 0 : index
    %59 = vector.load %arg11[%c0_64, %c0_65, %c0_66] : memref<18x18x128xbf16, #tpu.memory_space<vmem>>, vector<16x16x128xbf16>
    %60 = vector.shape_cast %59 : vector<16x16x128xbf16> to vector<256x128xbf16>
    %c0_67 = arith.constant 0 : index
    %c0_68 = arith.constant 0 : index
    %61 = vector.load %arg13[%c0_67, %c0_68] : memref<256x1152xbf16, #tpu.memory_space<vmem>>, vector<256x128xbf16>
    tpu.vector_store %arg13[%c0_67, %c0_68], %60 {strides = array<i32>} : memref<256x1152xbf16, #tpu.memory_space<vmem>>, vector<256x128xbf16>,
    %c0_69 = arith.constant 0 : index
    %c1_70 = arith.constant 1 : index
    %c0_71 = arith.constant 0 : index
    %62 = vector.load %arg11[%c0_69, %c1_70, %c0_71] : memref<18x18x128xbf16, #tpu.memory_space<vmem>>, vector<16x16x128xbf16>
    %63 = vector.shape_cast %62 : vector<16x16x128xbf16> to vector<256x128xbf16>
    %c0_72 = arith.constant 0 : index
    %c128 = arith.constant 128 : index
    %64 = vector.load %arg13[%c0_72, %c128] : memref<256x1152xbf16, #tpu.memory_space<vmem>>, vector<256x128xbf16>
    tpu.vector_store %arg13[%c0_72, %c128], %63 {strides = array<i32>} : memref<256x1152xbf16, #tpu.memory_space<vmem>>, vector<256x128xbf16>,
    %c0_73 = arith.constant 0 : index
    %c2_74 = arith.constant 2 : index
    %c0_75 = arith.constant 0 : index
    %65 = vector.load %arg11[%c0_73, %c2_74, %c0_75] : memref<18x18x128xbf16, #tpu.memory_space<vmem>>, vector<16x16x128xbf16>
    %66 = vector.shape_cast %65 : vector<16x16x128xbf16> to vector<256x128xbf16>
    %c0_76 = arith.constant 0 : index
    %c256 = arith.constant 256 : index
    %67 = vector.load %arg13[%c0_76, %c256] : memref<256x1152xbf16, #tpu.memory_space<vmem>>, vector<256x128xbf16>
    tpu.vector_store %arg13[%c0_76, %c256], %66 {strides = array<i32>} : memref<256x1152xbf16, #tpu.memory_space<vmem>>, vector<256x128xbf16>,
    %c1_77 = arith.constant 1 : index
    %c0_78 = arith.constant 0 : index
    %c0_79 = arith.constant 0 : index
    %68 = vector.load %arg11[%c1_77, %c0_78, %c0_79] : memref<18x18x128xbf16, #tpu.memory_space<vmem>>, vector<16x16x128xbf16>
    %69 = vector.shape_cast %68 : vector<16x16x128xbf16> to vector<256x128xbf16>
    %c0_80 = arith.constant 0 : index
    %c384 = arith.constant 384 : index
    %70 = vector.load %arg13[%c0_80, %c384] : memref<256x1152xbf16, #tpu.memory_space<vmem>>, vector<256x128xbf16>
    tpu.vector_store %arg13[%c0_80, %c384], %69 {strides = array<i32>} : memref<256x1152xbf16, #tpu.memory_space<vmem>>, vector<256x128xbf16>,
    %c1_81 = arith.constant 1 : index
    %c1_82 = arith.constant 1 : index
    %c0_83 = arith.constant 0 : index
    %71 = vector.load %arg11[%c1_81, %c1_82, %c0_83] : memref<18x18x128xbf16, #tpu.memory_space<vmem>>, vector<16x16x128xbf16>
    %72 = vector.shape_cast %71 : vector<16x16x128xbf16> to vector<256x128xbf16>
    %c0_84 = arith.constant 0 : index
    %c512 = arith.constant 512 : index
    %73 = vector.load %arg13[%c0_84, %c512] : memref<256x1152xbf16, #tpu.memory_space<vmem>>, vector<256x128xbf16>
    tpu.vector_store %arg13[%c0_84, %c512], %72 {strides = array<i32>} : memref<256x1152xbf16, #tpu.memory_space<vmem>>, vector<256x128xbf16>,
    %c1_85 = arith.constant 1 : index
    %c2_86 = arith.constant 2 : index
    %c0_87 = arith.constant 0 : index
    %74 = vector.load %arg11[%c1_85, %c2_86, %c0_87] : memref<18x18x128xbf16, #tpu.memory_space<vmem>>, vector<16x16x128xbf16>
    %75 = vector.shape_cast %74 : vector<16x16x128xbf16> to vector<256x128xbf16>
    %c0_88 = arith.constant 0 : index
    %c640 = arith.constant 640 : index
    %76 = vector.load %arg13[%c0_88, %c640] : memref<256x1152xbf16, #tpu.memory_space<vmem>>, vector<256x128xbf16>
    tpu.vector_store %arg13[%c0_88, %c640], %75 {strides = array<i32>} : memref<256x1152xbf16, #tpu.memory_space<vmem>>, vector<256x128xbf16>,
    %c2_89 = arith.constant 2 : index
    %c0_90 = arith.constant 0 : index
    %c0_91 = arith.constant 0 : index
    %77 = vector.load %arg11[%c2_89, %c0_90, %c0_91] : memref<18x18x128xbf16, #tpu.memory_space<vmem>>, vector<16x16x128xbf16>
    %78 = vector.shape_cast %77 : vector<16x16x128xbf16> to vector<256x128xbf16>
    %c0_92 = arith.constant 0 : index
    %c768 = arith.constant 768 : index
    %79 = vector.load %arg13[%c0_92, %c768] : memref<256x1152xbf16, #tpu.memory_space<vmem>>, vector<256x128xbf16>
    tpu.vector_store %arg13[%c0_92, %c768], %78 {strides = array<i32>} : memref<256x1152xbf16, #tpu.memory_space<vmem>>, vector<256x128xbf16>,
    %c2_93 = arith.constant 2 : index
    %c1_94 = arith.constant 1 : index
    %c0_95 = arith.constant 0 : index
    %80 = vector.load %arg11[%c2_93, %c1_94, %c0_95] : memref<18x18x128xbf16, #tpu.memory_space<vmem>>, vector<16x16x128xbf16>
    %81 = vector.shape_cast %80 : vector<16x16x128xbf16> to vector<256x128xbf16>
    %c0_96 = arith.constant 0 : index
    %c896 = arith.constant 896 : index
    %82 = vector.load %arg13[%c0_96, %c896] : memref<256x1152xbf16, #tpu.memory_space<vmem>>, vector<256x128xbf16>
    tpu.vector_store %arg13[%c0_96, %c896], %81 {strides = array<i32>} : memref<256x1152xbf16, #tpu.memory_space<vmem>>, vector<256x128xbf16>,
    %c2_97 = arith.constant 2 : index
    %c2_98 = arith.constant 2 : index
    %c0_99 = arith.constant 0 : index
    %83 = vector.load %arg11[%c2_97, %c2_98, %c0_99] : memref<18x18x128xbf16, #tpu.memory_space<vmem>>, vector<16x16x128xbf16>
    %84 = vector.shape_cast %83 : vector<16x16x128xbf16> to vector<256x128xbf16>
    %c0_100 = arith.constant 0 : index
    %c1024 = arith.constant 1024 : index
    %85 = vector.load %arg13[%c0_100, %c1024] : memref<256x1152xbf16, #tpu.memory_space<vmem>>, vector<256x128xbf16>
    tpu.vector_store %arg13[%c0_100, %c1024], %84 {strides = array<i32>} : memref<256x1152xbf16, #tpu.memory_space<vmem>>, vector<256x128xbf16>,
    %c0_101 = arith.constant 0 : index
    %c0_102 = arith.constant 0 : index
    %86 = vector.load %arg13[%c0_101, %c0_102] : memref<256x1152xbf16, #tpu.memory_space<vmem>>, vector<256x1152xbf16>
    %c0_103 = arith.constant 0 : index
    %c0_104 = arith.constant 0 : index
    %87 = vector.load %arg5[%c0_103, %c0_104] : memref<1152x128xbf16, #tpu.memory_space<vmem>>, vector<1152x128xbf16>
    %cst_105 = arith.constant dense<0.000000e+00> : vector<256x128xf32>
    %88 = tpu.matmul %86, %87, %cst_105 {dimension_numbers = #tpu.dot_dimension_numbers<[1], [0], [0], [1], [0, 0, 1, 1], [], []>} : vector<256x1152xbf16>, vector<1152x128xbf16>, vector<256x128xf32> -> vector<256x128xf32>
    %c0_106 = arith.constant 0 : index
    %c0_107 = arith.constant 0 : index
    %89 = vector.load %arg6[%c0_106, %c0_107] : memref<1x128xf32, #tpu.memory_space<vmem>>, vector<1x128xf32>
    %90 = vector.broadcast %89 : vector<1x128xf32> to vector<256x128xf32>
    %91 = arith.mulf %88, %90 : vector<256x128xf32>
    %c0_108 = arith.constant 0 : index
    %c0_109 = arith.constant 0 : index
    %92 = vector.load %arg7[%c0_108, %c0_109] : memref<1x128xf32, #tpu.memory_space<vmem>>, vector<1x128xf32>
    %93 = vector.broadcast %92 : vector<1x128xf32> to vector<256x128xf32>
    %94 = arith.addf %91, %93 : vector<256x128xf32>
    %cst_110 = arith.constant 0.000000e+00 : f32
    %95 = vector.broadcast %cst_110 : f32 to vector<256x128xf32>
    %96 = arith.maximumf %94, %95 : vector<256x128xf32>
    %97 = tpu.transpose %96, [1, 0] : vector<256x128xf32> -> vector<128x256xf32>
    %98 = vector.extract_strided_slice %97 {offsets = [0, 0], sizes = [8, 256], strides = [1, 1]} : vector<128x256xf32> to vector<8x256xf32>
    %c0_111 = arith.constant 0 : index
    %c0_112 = arith.constant 0 : index
    %c0_113 = arith.constant 0 : index
    %99 = vector.load %arg8[%c0_111, %c0_112, %c0_113] : memref<1x8x256xf32, #tpu.memory_space<vmem>>, vector<1x8x256xf32>
    %100 = vector.shape_cast %99 : vector<1x8x256xf32> to vector<8x256xf32>
    %101 = vector.shape_cast %98 : vector<8x256xf32> to vector<1x8x256xf32>
    tpu.vector_store %arg8[%c0_111, %c0_112, %c0_113], %101 {strides = array<i32>} : memref<1x8x256xf32, #tpu.memory_space<vmem>>, vector<1x8x256xf32>,
    %102 = vector.shape_cast %96 : vector<256x128xf32> to vector<128x2x128xf32>
    %103 = vector.extract_strided_slice %102 {offsets = [0, 0, 0], sizes = [128, 1, 128], strides = [1, 1, 1]} : vector<128x2x128xf32> to vector<128x1x128xf32>
    %104 = vector.shape_cast %103 : vector<128x1x128xf32> to vector<128x128xf32>
    %105 = vector.extract_strided_slice %102 {offsets = [0, 1, 0], sizes = [128, 1, 128], strides = [1, 1, 1]} : vector<128x2x128xf32> to vector<128x1x128xf32>
    %106 = vector.shape_cast %105 : vector<128x1x128xf32> to vector<128x128xf32>
    %107 = arith.maximumf %104, %106 : vector<128x128xf32>
    %108 = vector.shape_cast %107 : vector<128x128xf32> to vector<8x16x128xf32>
    %109 = vector.extract_strided_slice %108 {offsets = [0, 0, 0], sizes = [8, 8, 128], strides = [1, 1, 1]} : vector<8x16x128xf32> to vector<8x8x128xf32>
    %110 = vector.extract_strided_slice %108 {offsets = [0, 8, 0], sizes = [8, 8, 128], strides = [1, 1, 1]} : vector<8x16x128xf32> to vector<8x8x128xf32>
    %111 = arith.maximumf %109, %110 : vector<8x8x128xf32>
    %112 = vector.shape_cast %111 : vector<8x8x128xf32> to vector<64x128xf32>
    %113 = tpu.transpose %112, [1, 0] : vector<64x128xf32> -> vector<128x64xf32>
    %114 = vector.extract_strided_slice %113 {offsets = [0, 0], sizes = [8, 64], strides = [1, 1]} : vector<128x64xf32> to vector<8x64xf32>
    %c0_114 = arith.constant 0 : index
    %c0_115 = arith.constant 0 : index
    %c0_116 = arith.constant 0 : index
    %115 = vector.load %arg9[%c0_114, %c0_115, %c0_116] : memref<1x8x64xf32, #tpu.memory_space<vmem>>, vector<1x8x64xf32>
    %116 = vector.shape_cast %115 : vector<1x8x64xf32> to vector<8x64xf32>
    %117 = vector.shape_cast %114 : vector<8x64xf32> to vector<1x8x64xf32>
    tpu.vector_store %arg9[%c0_114, %c0_115, %c0_116], %117 {strides = array<i32>} : memref<1x8x64xf32, #tpu.memory_space<vmem>>, vector<1x8x64xf32>,
    return
  }
  func.func @transform_0(%arg0: i32) -> (i32, i32, i32, i32) {
    %c0_i32 = arith.constant 0 : i32
    %c0_i32_0 = arith.constant 0 : i32
    %c0_i32_1 = arith.constant 0 : i32
    %c0_i32_2 = arith.constant 0 : i32
    return %arg0, %c0_i32, %c0_i32_0, %c0_i32_1 : i32, i32, i32, i32
  }
  func.func @transform_1(%arg0: i32) -> (i32, i32) {
    %c0_i32 = arith.constant 0 : i32
    %c0_i32_0 = arith.constant 0 : i32
    %c0_i32_1 = arith.constant 0 : i32
    return %c0_i32, %c0_i32_0 : i32, i32
  }
  func.func @transform_2(%arg0: i32) -> (i32, i32) {
    %c0_i32 = arith.constant 0 : i32
    %c0_i32_0 = arith.constant 0 : i32
    %c0_i32_1 = arith.constant 0 : i32
    return %c0_i32, %c0_i32_0 : i32, i32
  }
  func.func @transform_3(%arg0: i32) -> (i32, i32) {
    %c0_i32 = arith.constant 0 : i32
    %c0_i32_0 = arith.constant 0 : i32
    %c0_i32_1 = arith.constant 0 : i32
    return %c0_i32, %c0_i32_0 : i32, i32
  }
  func.func @transform_4(%arg0: i32) -> (i32, i32) {
    %c0_i32 = arith.constant 0 : i32
    %c0_i32_0 = arith.constant 0 : i32
    %c0_i32_1 = arith.constant 0 : i32
    return %c0_i32, %c0_i32_0 : i32, i32
  }
  func.func @transform_5(%arg0: i32) -> (i32, i32) {
    %c0_i32 = arith.constant 0 : i32
    %c0_i32_0 = arith.constant 0 : i32
    %c0_i32_1 = arith.constant 0 : i32
    return %c0_i32, %c0_i32_0 : i32, i32
  }
  func.func @transform_6(%arg0: i32) -> (i32, i32) {
    %c0_i32 = arith.constant 0 : i32
    %c0_i32_0 = arith.constant 0 : i32
    %c0_i32_1 = arith.constant 0 : i32
    return %c0_i32, %c0_i32_0 : i32, i32
  }
  func.func @transform_7(%arg0: i32) -> (i32, i32, i32) {
    %c0_i32 = arith.constant 0 : i32
    %c0_i32_0 = arith.constant 0 : i32
    %c0_i32_1 = arith.constant 0 : i32
    return %arg0, %c0_i32, %c0_i32_0 : i32, i32, i32
  }
  func.func @transform_8(%arg0: i32) -> (i32, i32, i32) {
    %c0_i32 = arith.constant 0 : i32
    %c0_i32_0 = arith.constant 0 : i32
    %c0_i32_1 = arith.constant 0 : i32
    return %arg0, %c0_i32, %c0_i32_0 : i32, i32, i32
  }
}

</mosaic_0001>

<bundles_post_ra>
// kernel: encoder_block_forward.1
= control target key start
LH: loop header
LB: loop body
LE: loop exit
PB: predicated region body
PF: predicated region fallthrough
CT: control target
= control target key end

     0   :  { %s13304_s27 = smov 0   ;;  %s17862_s0 = inlined_call_operand.vmem [shape: f32[2,16,16,4], index: 0, kind: input, shape index: {}]   ;;  %s17863_s1 = inlined_call_operand.vmem [shape: bf16[36,128], index: 1, kind: input, shape index: {}]   ;;  %s17864_s2 = inlined_call_operand.vmem [shape: f32[1,128], index: 2, kind: input, shape index: {}]   ;;  %s17865_s3 = inlined_call_operand.vmem [shape: f32[1,128], index: 3, kind: input, shape index: {}]   ;;  %s17866_s4 = inlined_call_operand.vmem [shape: bf16[1152,128], index: 4, kind: input, shape index: {}]   ;;  %s17867_s5 = inlined_call_operand.vmem [shape: f32[1,128], index: 5, kind: input, shape index: {}]   ;;  %s17868_s6 = inlined_call_operand.vmem [shape: f32[1,128], index: 6, kind: input, shape index: {}]   ;;  %s17869_s7 = inlined_call_operand.vmem [shape: f32[2,8,256], index: 7, kind: output, shape index: {0}]   ;;  %s17870_s8 = inlined_call_operand.vmem [shape: f32[2,8,64], index: 8, kind: output, shape index: {1}]  }
   0x1 LB: > { %s11648_s28 = sadd.s32 4294967295, %s13248_s27   ;;  %p11652_p0 = scmp.ge.s32.totalorder %s13248_s27, 1  ;;  %s13248_s27 = sphi %s13304_s27, %s19_s27  }
   0x2   : > { %p265_p1 = scmp.lt.s32.totalorder %s13248_s27, 3 }
   0x4   : > { %p266_p2 = pnand %p11652_p0, %p265_p1 }
   0x6   : > { %269 = sbr.rel (%p266_p2) target bundleno = 1453 (0x5ad), region = 48 }
   0xd   : > { %p303_p3 = scmp.lt.s32.totalorder %s11648_s28, 1  ;;  %vm17871_vm0 = vsmask.f32 256  ;;  %vm447_vm1 = vsmask.f32 4368  ;;  %vm17873_vm2 = vcmask 27648  }
   0xe   : > { %vm17872_vm3 = vsmask.f32 7938  ;;  %vm13337_vm4 = vmor %vm17871_vm0, %vm447_vm1  ;;  %vm777_vm5 = vcmask 24576   ;;  %v789_v23 = vld [vmem:[#allocation2 + $0x18] sm:$0xf]  ;;  %vm1895_vm8 = vcmask 1042432  }
   0xf   : > { %s18121_s28 = smov (!%p303_p3, %s11648_s28), 1  ;;  %vm13346_vm6 = vmand %vm17873_vm2, %vm17872_vm3  ;;  %v782_v32 = vld [vmem:[#allocation2 + $0xc] sm:$0xf]  ;;  %v796_v43 = vld [vmem:[#allocation2 + $0x24] sm:$0xf]  ;;  %vm1896_vm9 = vcmask 1046532  }
  0x10   : > { %s12387_s29 = sshll.u32 %s18121_s28, 8  ;;  %v772_v44 = vld [vmem:[#allocation2] sm:$0xf]  ;;  %v779_v49 = vld [vmem:[#allocation2 + $0x8] sm:$0x1]  ;;  %vm13386_vm7 = vmand %vm777_vm5, %vm17871_vm0  ;;  %s13250_s11 = smov 12  }
  0x11   : > { %s13318_s10 = scalar_lea.vmem %s17862_s0, %s12387_s29  ;;  %v786_v50 = vld [vmem:[#allocation2 + $0x14] sm:$0x1]  ;;  %v793_v55 = vld [vmem:[#allocation2 + $0x20] sm:$0x1]  ;;  %v800_v56 = vld [vmem:[#allocation2 + $0x2c] sm:$0x1] }
  0x12   : > { %v320_v0 = vld [vmem:[%s13318_s10 + $0x10] sm:$0xff]  ;;  %v321_v1 = vld [vmem:[%s13318_s10 + $0x18] sm:$0xff]  ;;  %v318_v2 = vld [vmem:[%s13318_s10] sm:$0xff]  ;;  %s13251_s12 = smov 24   ;;  %vm1299_vm12 = vsmask.f32 3328 }
  0x13   : > { %v12389_v3 = vpack.c.bf16 %v320_v0, %v320_v0  ;;  %v12390_v4 = vpack.c.bf16 %v321_v1, %v321_v1  ;;  %v319_v5 = vld [vmem:[%s13318_s10 + $0x8] sm:$0xff]  ;;  %v13324_v6 = vpack.c.bf16 %v318_v2, %v318_v2  ;;  %v322_v7 = vld [vmem:[%s13318_s10 + $0x20] sm:$0xff]  ;;  %v324_v37 = vld [vmem:[%s13318_s10 + $0x30] sm:$0xff]  ;;  %vm1300_vm13 = vsmask.f32 7440  ;;  %s13252_s13 = smov 20  }
  0x14   : > { %v13327_v8 = vpack.c.bf16 %v319_v5, %v319_v5  ;;  %v13329_v9 = vpack.c.bf16 %v322_v7, %v322_v7  ;;  %v323_v14 = vld [vmem:[%s13318_s10 + $0x28] sm:$0xff]  ;;  %v325_v38 = vld [vmem:[%s13318_s10 + $0x38] sm:$0xff]  ;;  %v13380_v53 = vpack.c.bf16 %v324_v37, %v324_v37  ;;  %v326_v62 = vld [vmem:[%s13318_s10 + $0x40] sm:$0xff]  ;;  %s13253_s14 = smov 8   ;;  %s13254_s15 = smov 32   ;;  %vm1234_vm15 = vcmask 31744  }
  0x15   : > { %v450_v10 = vshrl.u32 %v12389_v3, 16  ;;  %v453_v11 = vshll.u32 %v12389_v3, 16  ;;  %v458_v12 = vshrl.u32 %v12390_v4, 16  ;;  %v461_v13 = vshll.u32 %v12390_v4, 16  ;;  %vm13449_vm10 = vmand %vm777_vm5, %vm17872_vm3  ;;  %s13255_s16 = smov 4   ;;  %s13256_s17 = smov 16  }
  0x16   : > { %v467_v15 = vshrl.u32 %v13324_v6, 16  ;;  %v470_v16 = vshll.u32 %v13324_v6, 16  ;;  %v475_v17 = vshrl.u32 %v13327_v8, 16  ;;  %v478_v21 = vshll.u32 %v13327_v8, 16  ;;  %v327_v8 = vld [vmem:[%s13318_s10 + $0x48] sm:$0xff]  ;;  %vm13496_vm11 = vmor %vm1895_vm8, %vm1896_vm9  ;;  %s13257_s18 = smov 28  }
  0x17   : > { %v452_v19 = vrot.slane %v450_v10, 7  ;;  %v13341_v20 = vrot.slane %v458_v12, 7  ;;  %v13352_v26 = vpack.c.bf16 %v323_v14, %v323_v14  ;;  %v484_v27 = vshrl.u32 %v13329_v9, 16  ;;  %vm13590_vm14 = vmor %vm1299_vm12, %vm1300_vm13 }
  0x18   : > { %v469_v24 = vrot.slane %v467_v15, 7  ;;  %v477_v25 = vrot.slane %v475_v17, 7  ;;  %v13356_v31 = vrot.slane %v450_v10, 4  ;;  %v13359_v34 = vrot.slane %v461_v13, 7  ;;  %v803_v10 = vld [vmem:[#allocation2 + $0x30] sm:$0xf] }
  0x19   : > { %v455_v28 = vor.u32 %v453_v11, %v452_v19  ;;  %v456_v29 = vrot.slane %v452_v19, 4  ;;  %v463_v30 = vor.u32 %v461_v13, %v13341_v20  ;;  %v465_v33 = vrot.slane %v13341_v20, 4 }
  0x1a   : > { %v472_v35 = vor.u32 %v470_v16, %v469_v24  ;;  %v473_v36 = vrot.slane %v469_v24, 4  ;;  %v480_v41 = vor.u32 %v478_v21, %v477_v25  ;;  %v482_v42 = vrot.slane %v477_v25, 4  ;;  %v807_v16 = vld [vmem:[#allocation2 + $0x38] sm:$0x1] }
  0x1b   : > { %v464_v39 = vsel %vm13337_vm4, %v456_v29, %v463_v30  ;;  %v790_v40 = vsel %vm13346_vm6, %v455_v28, %v789_v23  ;;  %v486_v46 = vrot.slane %v484_v27, 7  ;;  %v487_v47 = vshll.u32 %v13329_v9, 16 }
  0x1c   : > { %776 = vst.msk [vmem:[#allocation2 + $0x4] sm:$0xf] %vm17873_vm2, %v464_v39  ;;  %791 = vst [vmem:[#allocation2 + $0x18] sm:$0xf] %v790_v40  ;;  %v783_v45 = vsel %vm13346_vm6, %v472_v35, %v782_v32  ;;  %v492_v48 = vshrl.u32 %v13352_v26, 16  ;;  %v481_v51 = vsel %vm13337_vm4, %v473_v36, %v480_v41  ;;  %v495_v52 = vshll.u32 %v13352_v26, 16 }
  0x1d   : > { %792 = vst.msk [vmem:[#allocation2 + $0x1c] sm:$0xf] %vm17873_vm2, %v464_v39  ;;  %784 = vst [vmem:[#allocation2 + $0xc] sm:$0xf] %v783_v45  ;;  %v13382_v54 = vpack.c.bf16 %v325_v38, %v325_v38  ;;  %v489_v58 = vor.u32 %v487_v47, %v486_v46  ;;  %v490_v59 = vrot.slane %v486_v46, 4  ;;  %v773_v61 = vsel %vm13346_vm6, %v455_v28, %v772_v44 }
  0x1e   : > { %785 = vst.msk [vmem:[#allocation2 + $0x10] sm:$0xf] %vm17873_vm2, %v481_v51  ;;  %v494_v60 = vrot.slane %v492_v48, 7  ;;  %v902_v63 = vrot.slane %v13356_v31, 4  ;;  %v501_v0 = vshrl.u32 %v13380_v53, 16  ;;  %v504_v1 = vshll.u32 %v13380_v53, 16 }
  0x1f   : > { %v509_v2 = vshrl.u32 %v13382_v54, 16  ;;  %774 = vst [vmem:[#allocation2] sm:$0xf] %v773_v61  ;;  %v797_v5 = vsel %vm13346_vm6, %v489_v58, %v796_v43  ;;  %v512_v7 = vshll.u32 %v13382_v54, 16  ;;  %v780_v13 = vsel %vm13386_vm7, %v465_v33, %v779_v49 }
  0x20   : > { %v497_v3 = vor.u32 %v495_v52, %v494_v60  ;;  %v499_v4 = vrot.slane %v494_v60, 4  ;;  %798 = vst [vmem:[#allocation2 + $0x24] sm:$0xf] %v797_v5  ;;  %v503_v11 = vrot.slane %v501_v0, 7  ;;  %v787_v14 = vsel %vm13386_vm7, %v482_v42, %v786_v50  ;;  %781 = vst [vmem:[#allocation2 + $0x8] sm:$0x1] %v780_v13 }
  0x21   : > { %v511_v12 = vrot.slane %v509_v2, 7  ;;  %v11704_v17 = vrot.slane %v478_v21, 11  ;;  %788 = vst [vmem:[#allocation2 + $0x14] sm:$0x1] %v787_v14  ;;  %v794_v20 = vsel %vm13386_vm7, %v465_v33, %v793_v55  ;;  %v13419_v21 = vpack.c.bf16 %v326_v62, %v326_v62  ;;  %v810_v50 = vld [vmem:[#allocation2 + $0x3c] sm:$0xf] }
  0x22   : > { %v498_v19 = vsel %vm13337_vm4, %v490_v59, %v497_v3  ;;  %v801_v23 = vsel %vm13386_vm7, %v499_v4, %v800_v56  ;;  %v506_v25 = vor.u32 %v504_v1, %v503_v11  ;;  %795 = vst [vmem:[#allocation2 + $0x20] sm:$0x1] %v794_v20  ;;  %v507_v32 = vrot.slane %v503_v11, 4 }
  0x23   : > { %v955_v24 = vld [vmem:[#allocation2 + $0x18] sm:$0x1]  ;;  %799 = vst.msk [vmem:[#allocation2 + $0x28] sm:$0xf] %vm17873_vm2, %v498_v19  ;;  %v514_v28 = vor.u32 %v512_v7, %v511_v12  ;;  %802 = vst [vmem:[#allocation2 + $0x2c] sm:$0x1] %v801_v23  ;;  %v13474_v55 = vpack.c.bf16 %v327_v8, %v327_v8 }
  0x24   : > { %v956_v29 = vsel %vm13386_vm7, %v902_v63, %v955_v24  ;;  %v952_v30 = vld [vmem:[#allocation2 + $0xc] sm:$0x1]  ;;  %v516_v33 = vrot.slane %v511_v12, 4  ;;  %v13425_v35 = vld [vmem:[#allocation2 + $0x4] sm:$0xf]  ;;  %v804_v37 = vsel %vm13346_vm6, %v506_v25, %v803_v10  ;;  %v518_v40 = vshrl.u32 %v13419_v21, 16 }
  0x25   : > { %957 = vst [vmem:[#allocation2 + $0x18] sm:$0x1] %v956_v29  ;;  %v953_v36 = vsel %vm13386_vm7, %v467_v15, %v952_v30  ;;  %v1900_v38 = vrot.slane %v13425_v35, 5  ;;  %v13434_v39 = vld [vmem:[#allocation2 + $0xc] sm:$0xe]  ;;  %v1004_v41 = vrot.slane %v13359_v34, 4  ;;  %v515_v42 = vsel %vm13337_vm4, %v507_v32, %v514_v28 }
  0x26   : > { %954 = vst [vmem:[#allocation2 + $0xc] sm:$0x1] %v953_v36  ;;  %805 = vst [vmem:[#allocation2 + $0x30] sm:$0xf] %v804_v37  ;;  %v13440_v6 = vld [vmem:[#allocation2] sm:$0xe]  ;;  %v808_v15 = vsel %vm13386_vm7, %v516_v33, %v807_v16 }
  0x27   : > { %v13442_v43 = vld [vmem:[#allocation2 + $0x10] sm:$0xf]  ;;  %v521_v44 = vshll.u32 %v13419_v21, 16  ;;  %v13455_v34 = vrot.slane %v495_v52, 11  ;;  %806 = vst.msk [vmem:[#allocation2 + $0x34] sm:$0xf] %vm17873_vm2, %v515_v42 }
  0x28   : > { %v13458_v46 = vrot.slane %v512_v7, 11  ;;  %v11814_v47 = vrot.slane %v13434_v39, 9  ;;  %v13461_v48 = vld [vmem:[#allocation2 + $0xc] sm:$0xe]  ;;  %809 = vst [vmem:[#allocation2 + $0x38] sm:$0x1] %v808_v15 }
  0x29   : > { %v13465_v49 = vrot.slane %v518_v40, 7  ;;  %v958_v51 = vld [vmem:[#allocation2 + $0x24] sm:$0x1]  ;;  %v11750_v54 = vrot.slane %v13440_v6, 9  ;;  %v13470_v26 = vrot.slane %v1900_v38, 4  ;;  %v2944_v60 = vrot.slane %v13442_v43, 5 }
  0x2a   : > { %v13472_v52 = vld [vmem:[#allocation2 + $0x10] sm:$0xf]  ;;  %v959_v56 = vsel %vm13386_vm7, %v484_v27, %v958_v51  ;;  %v1052_v58 = vld [vmem:[#allocation2 + $0x8] sm:$0x1]  ;;  %v1055_v59 = vld [vmem:[#allocation2 + $0x14] sm:$0x1] }
  0x2b   : > { %v11751_v61 = vrot.slane %v13461_v48, 9  ;;  %960 = vst [vmem:[#allocation2 + $0x24] sm:$0x1] %v959_v56  ;;  %v1053_v62 = vsel %vm13449_vm10, %v1004_v41, %v1052_v58  ;;  %v1056_v1 = vsel %vm13449_vm10, %v11704_v17, %v1055_v59  ;;  %v1907_v2 = vrot.slane %v13472_v52, 5  ;;  %v1058_v27 = vld [vmem:[#allocation2 + $0x20] sm:$0x1] }
  0x2c   : > { %v523_v9 = vor.u32 %v521_v44, %v13465_v49  ;;  %1054 = vst [vmem:[#allocation2 + $0x8] sm:$0x1] %v1053_v62  ;;  %1057 = vst [vmem:[#allocation2 + $0x14] sm:$0x1] %v1056_v1  ;;  %v3890_v3 = vld [vmem:[#allocation2 + $0x18] sm:$0xe]  ;;  %v1059_v7 = vsel %vm13449_vm10, %v1004_v41, %v1058_v27  ;;  %v2945_v43 = vsel %vm13496_vm11, %v11814_v47, %v2944_v60 }
  0x2d   : > { %v3891_v4 = vld [vmem:[#allocation2 + $0x1c] sm:$0xf]  ;;  %v526_v10 = vshrl.u32 %v13474_v55, 16  ;;  %v328_v12 = vld [vmem:[%s13318_s10 + $0x50] sm:$0xff]  ;;  %v2946_v16 = vrot.slane %v2944_v60, 4  ;;  %v1909_v17 = vrot.slane %v1907_v2, 4 }
  0x2e   : > { %v13065_v5 = vld [vmem:[#allocation2 + $0x18] sm:$0xff]   ;;  %v811_v11 = vsel %vm13346_vm6, %v523_v9, %v810_v50  ;;  %v13066_v13 = vld [vmem:[#allocation2 + $0xc] sm:$0xff]   ;;  %1060 = vst [vmem:[#allocation2 + $0x20] sm:$0x1] %v1059_v7  ;;  %v3988_v19 = vrot.slane %v3891_v4, 5  ;;  %v11878_v28 = vrot.slane %v3890_v3, 9  ;;  %v13509_v42 = vpack.c.bf16 %v328_v12, %v328_v12 }
  0x2f   : > { %812 = vst [vmem:[#allocation2 + $0x3c] sm:$0xf] %v811_v11  ;;  %2238 = vrot.lane.b32.xlu1 %v13065_v5, %s13250_s11  ;;  %v961_v20 = vld [vmem:[#allocation2 + $0x30] sm:$0x1]  ;;  %v2849_v23 = vld [vmem:[#allocation2 + $0x18] sm:$0xe]  ;;  %2236 = vrot.lane.b32.xlu0 %v13066_v13, %s13250_s11 }
  0x30   : > { %v13068_v24 = vld [vmem:[#allocation2 + $0x18] sm:$0xff]   ;;  %v962_v25 = vsel %vm13386_vm7, %v501_v0, %v961_v20  ;;  %v11815_v30 = vrot.slane %v2849_v23, 9  ;;  %v1061_v36 = vld [vmem:[#allocation2 + $0x2c] sm:$0x1]  ;;  %v13515_v0 = vsel %vm13496_vm11, %v11750_v54, %v1900_v38  ;;  %v3990_v15 = vrot.slane %v3988_v19, 4 }
  0x31   : > { %v2850_v8 = vld [vmem:[#allocation2 + $0x1c] sm:$0xf]  ;;  %v1805_v29 = vld [vmem:[#allocation2 + $0x18] sm:$0xe]  ;;  %963 = vst [vmem:[#allocation2 + $0x30] sm:$0x1] %v962_v25  ;;  %v1062_v41 = vsel %vm13449_vm10, %v13455_v34, %v1061_v36  ;;  %v13523_v38 = vsel %vm13496_vm11, %v11751_v61, %v1907_v2  ;;  %v13527_v52 = vsel %vm13496_vm11, %v11878_v28, %v3988_v19 }
  0x32   : > { %v2951_v32 = vrot.slane %v2850_v8, 5  ;;  %v1806_v33 = vld [vmem:[#allocation2 + $0x1c] sm:$0xf]  ;;  %v13067_v37 = vld [vmem:[#allocation2 + $0x24] sm:$0xff]   ;;  %v11752_v44 = vrot.slane %v1805_v29, 9  ;;  %vm1782_vm1 = vcmask 64544  }
  0x33   : > { %v1914_v39 = vrot.slane %v1806_v33, 5  ;;  %v1801_v53 = vld [vmem:[#allocation2 + $0x8] sm:$0x1]  ;;  %v2848_v6 = vld [vmem:[#allocation2 + $0x14] sm:$0x1]  ;;  %3282 = vrot.lane.b32.xlu1 %v13067_v37, %s13251_s12  ;;  %3280 = vrot.lane.b32.xlu0 %v13068_v24, %s13251_s12  ;;  %vm2106_vm5 = vcmask 97344  }
  0x34   : > { %1063 = vst [vmem:[#allocation2 + $0x2c] sm:$0x1] %v1062_v41  ;;  %v13070_v34 = vld [vmem:[#allocation2 + $0x24] sm:$0xff]   ;;  %v1903_v48 = vrot.slane %v1801_v53, 5  ;;  %v2947_v50 = vrot.slane %v2848_v6, 5  ;;  %v2953_v51 = vrot.slane %v2951_v32, 4  ;;  %v13531_v58 = vsel %vm13496_vm11, %v11815_v30, %v2951_v32 }
  0x35   : > { %v1804_v35 = vld [vmem:[#allocation2 + $0x14] sm:$0x1]  ;;  %v3892_v54 = vld [vmem:[#allocation2 + $0x20] sm:$0x1]  ;;  %v1916_v59 = vrot.slane %v1914_v39, 4  ;;  %v13545_v4 = vsel %vm13496_vm11, %v11752_v44, %v1914_v39  ;;  %vm2284_vm8 = vcmask 130144  }
  0x36   : > { %v1910_v47 = vrot.slane %v1804_v35, 5  ;;  %v2851_v56 = vld [vmem:[#allocation2 + $0x20] sm:$0x1]  ;;  %v1904_v60 = vsel %vm13496_vm11, %v13470_v26, %v1903_v48  ;;  %v2948_v61 = vsel %vm13496_vm11, %v2946_v16, %v2947_v50  ;;  %v3991_v62 = vrot.slane %v3892_v54, 5  ;;  %v3893_v9 = vld [vmem:[#allocation2 + $0x24] sm:$0xe] }
  0x37   : > { %v2954_v1 = vrot.slane %v2851_v56, 5  ;;  %v1807_v2 = vld [vmem:[#allocation2 + $0x20] sm:$0x1]  ;;  %v11766_v27 = vcombine.low %v13515_v0, %v1904_v60  ;;  %v3894_v7 = vld [vmem:[#allocation2 + $0x28] sm:$0xf]  ;;  %2240 = vrot.lane.b32.xlu0 %v13070_v34, %s13250_s11  ;;  %v11830_v12 = vcombine.low %v2945_v43, %v2948_v61  ;;  %vm17874_vm9 = vcmask 162944  }
  0x38   : > { %v13541_v3 = vsel %vm13496_vm11, %v1909_v17, %v1910_v47  ;;  %v1917_v5 = vrot.slane %v1807_v2, 5  ;;  %v949_v26 = vld [vmem:[#allocation2] sm:$0x1]  ;;  %v13069_v11 = vld [vmem:[#allocation2 + $0x30] sm:$0xff]   ;;  %v3992_v13 = vsel %vm13496_vm11, %v3990_v15, %v3991_v62  ;;  %v11879_v17 = vrot.slane %v3893_v9, 9 }
  0x39   : > { %v13552_v16 = vsel %vm13496_vm11, %v2953_v51, %v2954_v1  ;;  %v1252_v19 = vld [vmem:[#allocation2 + $0x4] sm:$0xf]  ;;  %v11767_v20 = vcombine.low %v13523_v38, %v13541_v3  ;;  %v11894_v23 = vcombine.low %v13527_v52, %v3992_v13  ;;  %v3995_v25 = vrot.slane %v3894_v7, 5  ;;  %v1253_v28 = vld [vmem:[#allocation2 + $0x8] sm:$0x1]  ;;  %2242 = vrot.lane.b32.xlu1 %v13069_v11, %s13250_s11 }
  0x3a   : > { %v11831_v24 = vcombine.low %v13531_v58, %v13552_v16  ;;  %v1808_v8 = vld [vmem:[#allocation2 + $0x24] sm:$0xe]  ;;  %v1918_v29 = vsel %vm13496_vm11, %v1916_v59, %v1917_v5  ;;  %v950_v32 = vsel %vm13386_vm7, %v902_v63, %v949_v26  ;;  %v1312_v33 = vshll.u32 %v1252_v19, 16  ;;  %v1809_v37 = vld [vmem:[#allocation2 + $0x28] sm:$0xf] }
  0x3b   : > { %v3895_v30 = vld [vmem:[#allocation2 + $0x2c] sm:$0x1]  ;;  %v1316_v36 = vshrl.u32 %v1252_v19, 16  ;;  %v13568_v39 = vsel %vm13496_vm11, %v11879_v17, %v3995_v25  ;;  %v3997_v41 = vrot.slane %v3995_v25, 4  ;;  %951 = vst [vmem:[#allocation2] sm:$0x1] %v950_v32  ;;  %3102 = vrot.lane.b32.xlu0 %v11830_v12, %s13252_s13  ;;  %v11768_v34 = vcombine.low %v13545_v4, %v1918_v29 }
  0x3c   : > { %v3998_v53 = vrot.slane %v3895_v30, 5  ;;  %v1322_v0 = vshll.u32 %v1253_v28, 16  ;;  %v1810_v6 = vld [vmem:[#allocation2 + $0x2c] sm:$0x1]  ;;  %v13571_v43 = vrot.slane %v1312_v33, 5  ;;  %v11753_v15 = vrot.slane %v1808_v8, 9 }
  0x3d   : > { %v1318_v31 = vrot.slane %v1316_v36, 4  ;;  %v1921_v63 = vrot.slane %v1809_v37, 5  ;;  %v1254_v44 = vld [vmem:[#allocation2 + $0xc] sm:$0xf]  ;;  %v1924_v35 = vrot.slane %v1810_v6, 5  ;;  %2058 = vrot.lane.b32.xlu1 %v11766_v27, %s13253_s14  ;;  %vm3150_vm12 = vcmask 195744  }
  0x3e   : > { %v13576_v48 = vsel %vm13496_vm11, %v3997_v41, %v3998_v53  ;;  %v13578_v50 = vrot.slane %v1322_v0, 5  ;;  %v1255_v38 = vld [vmem:[#allocation2 + $0x10] sm:$0xf]  ;;  %v1256_v51 = vld [vmem:[#allocation2 + $0x14] sm:$0x1]  ;;  %v1327_v61 = vshrl.u32 %v1254_v44, 16 }
  0x3f   : > { %v11895_v47 = vcombine.low %v13568_v39, %v13576_v48  ;;  %v1319_v54 = vor.u32 %v1318_v31, %v13571_v43  ;;  %v13586_v52 = vsel %vm13496_vm11, %v11753_v15, %v1921_v63  ;;  %v1923_v56 = vrot.slane %v1921_v63, 4  ;;  %v2304_v59 = vld [vmem:[#allocation2 + $0x18] sm:$0xf]  ;;  %4146 = vrot.lane.b32.xlu0 %v11894_v23, %s13254_s15  ;;  %v2305_v4 = vld [vmem:[#allocation2 + $0x1c] sm:$0xf] }
  0x40   : > { %v1330_v62 = vshll.u32 %v1254_v44, 16  ;;  %v1336_v1 = vshll.u32 %v1255_v38, 16  ;;  %v1340_v2 = vshrl.u32 %v1255_v38, 16  ;;  %v1346_v3 = vshll.u32 %v1256_v51, 16  ;;  %v2306_v13 = vld [vmem:[#allocation2 + $0x20] sm:$0x1] }
  0x41   : > { %v1320_v9 = vrot.slane %v1319_v54, 4  ;;  %v13597_v27 = vsel %vm13496_vm11, %v1923_v56, %v1924_v35  ;;  %v2374_v5 = vshrl.u32 %v2304_v59, 16  ;;  %v1329_v26 = vrot.slane %v1327_v61, 4  ;;  %2060 = vrot.lane.b32.xlu1 %v11767_v20, %s13253_s14  ;;  %v2301_v41 = vld [vmem:[#allocation2 + $0xc] sm:$0xf] }
  0x42   : > { %v11769_v7 = vcombine.low %v13586_v52, %v13597_v27  ;;  %v1332_v11 = vrot.slane %v1330_v62, 5  ;;  %v1338_v12 = vrot.slane %v1336_v1, 5  ;;  %v1251_v17 = vld [vmem:[#allocation2] sm:$0xf]  ;;  %v1342_v23 = vrot.slane %v1340_v2, 4 }
  0x43   : > { %v1325_v19 = vsel %vm13590_vm14, %v1320_v9, %v13578_v50  ;;  %v1348_v25 = vrot.slane %v1346_v3, 5  ;;  %v2376_v28 = vrot.slane %v2374_v5, 4  ;;  %v1303_v8 = vshrl.u32 %v1251_v17, 16  ;;  %2062 = vrot.lane.b32.xlu0 %v11768_v34, %s13253_s14  ;;  %v2302_v31 = vld [vmem:[#allocation2 + $0x10] sm:$0xf] }
  0x44   : > { %v1306_v29 = vshll.u32 %v1251_v17, 16  ;;  %v1333_v30 = vor.u32 %v1332_v11, %v1329_v26  ;;  %v2377_v32 = vshll.u32 %v2304_v59, 16  ;;  %v1343_v33 = vor.u32 %v1342_v23, %v1338_v12  ;;  %v2303_v56 = vld [vmem:[#allocation2 + $0x14] sm:$0x1]  ;;  %v3348_v62 = vld [vmem:[#allocation2 + $0x24] sm:$0xf] }
  0x45   : > { %v2383_v36 = vshll.u32 %v2305_v4, 16  ;;  %v2387_v37 = vshrl.u32 %v2305_v4, 16  ;;  %v2393_v39 = vshll.u32 %v2306_v13, 16  ;;  %v1305_v20 = vrot.slane %v1303_v8, 4  ;;  %3104 = vrot.lane.b32.xlu1 %v11831_v24, %s13252_s13  ;;  %v3345_v8 = vld [vmem:[#allocation2 + $0x18] sm:$0xf] }
  0x46   : > { %v1308_v53 = vrot.slane %v1306_v29, 5  ;;  %v1334_v0 = vrot.slane %v1333_v30, 4  ;;  %v2379_v6 = vrot.slane %v2377_v32, 5  ;;  %v1344_v15 = vrot.slane %v1343_v33, 4 }
  0x47   : > { %v2385_v63 = vrot.slane %v2383_v36, 5  ;;  %v2389_v44 = vrot.slane %v2387_v37, 4  ;;  %v2395_v48 = vrot.slane %v2393_v39, 5  ;;  %v2350_v38 = vshrl.u32 %v2301_v41, 16 }
  0x48   : > { %v1309_v34 = vor.u32 %v1308_v53, %v1305_v20  ;;  %v1339_v50 = vsel %vm13590_vm14, %v1334_v0, %v1338_v12  ;;  %v2380_v35 = vor.u32 %v2379_v6, %v2376_v28  ;;  %v1349_v51 = vsel %vm13590_vm14, %v1344_v15, %v1348_v25  ;;  %v3349_v12 = vld [vmem:[#allocation2 + $0x28] sm:$0xf]  ;;  %v3350_v28 = vld [vmem:[#allocation2 + $0x2c] sm:$0x1]  ;;  %v3346_v20 = vld [vmem:[#allocation2 + $0x1c] sm:$0xf] }
  0x49   : > { %v2390_v54 = vor.u32 %v2389_v44, %v2385_v63  ;;  %v2353_v59 = vshll.u32 %v2301_v41, 16  ;;  %v2359_v61 = vshll.u32 %v2302_v31, 16  ;;  %v11735_v16 = vcombine.low %v1339_v50, %v1349_v51  ;;  %4148 = vrot.lane.b32.xlu1 %v11895_v47, %s13254_s15  ;;  %v3347_v44 = vld [vmem:[#allocation2 + $0x20] sm:$0x1] }
  0x4a   : > { %v1310_v58 = vrot.slane %v1309_v34, 4  ;;  %v2381_v24 = vrot.slane %v2380_v35, 4  ;;  %v2352_v1 = vrot.slane %v2350_v38, 4  ;;  %v2363_v4 = vshrl.u32 %v2302_v31, 16 }
  0x4b   : > { %v2391_v2 = vrot.slane %v2390_v54, 4  ;;  %v2355_v9 = vrot.slane %v2353_v59, 5  ;;  %v2361_v3 = vrot.slane %v2359_v61, 5  ;;  %v2369_v11 = vshll.u32 %v2303_v56, 16 }
  0x4c   : > { %v1315_v5 = vsel %vm13590_vm14, %v1310_v58, %v13571_v43  ;;  %v2386_v26 = vsel %vm13590_vm14, %v2381_v24, %v2385_v63  ;;  %v3418_v13 = vshrl.u32 %v3348_v62, 16  ;;  %v2365_v47 = vrot.slane %v2363_v4, 4  ;;  %v1262_v58 = vld [vmem:[#allocation2 + $0x2c] sm:$0x1] }
  0x4d   : > { %v11734_v17 = vcombine.low %v1315_v5, %v1325_v19  ;;  %v2396_v23 = vsel %vm13590_vm14, %v2391_v2, %v2395_v48  ;;  %v2356_v25 = vor.u32 %v2355_v9, %v2352_v1  ;;  %v2371_v30 = vrot.slane %v2369_v11, 5  ;;  %2064 = vrot.lane.b32.xlu1 %v11769_v7, %s13253_s14  ;;  %v1260_v7 = vld [vmem:[#allocation2 + $0x24] sm:$0xf] }
  0x4e   : > { %v11799_v29 = vcombine.low %v2386_v26, %v2396_v23  ;;  %v3420_v32 = vrot.slane %v3418_v13, 4  ;;  %v3421_v33 = vshll.u32 %v3348_v62, 16  ;;  %v2366_v19 = vor.u32 %v2365_v47, %v2361_v3  ;;  %v1261_v62 = vld [vmem:[#allocation2 + $0x28] sm:$0xf]  ;;  %v1258_v23 = vld [vmem:[#allocation2 + $0x1c] sm:$0xf] }
  0x4f   : > { %1734 = vrot.lane.b32.xlu0 %v11734_v17, %s13255_s16  ;;  %v2357_v43 = vrot.slane %v2356_v25, 4  ;;  %v3427_v36 = vshll.u32 %v3349_v12, 16  ;;  %v3431_v37 = vshrl.u32 %v3349_v12, 16  ;;  %v3437_v41 = vshll.u32 %v3350_v28, 16 }
  0x50   : > { %v3423_v39 = vrot.slane %v3421_v33, 5  ;;  %v3394_v53 = vshrl.u32 %v3345_v8, 16  ;;  %v3397_v0 = vshll.u32 %v3345_v8, 16  ;;  %v2367_v31 = vrot.slane %v2366_v19, 4  ;;  %v1259_v33 = vld [vmem:[#allocation2 + $0x20] sm:$0x1] }
  0x51   : > { %v2362_v6 = vsel %vm13590_vm14, %v2357_v43, %v2361_v3  ;;  %v3429_v15 = vrot.slane %v3427_v36, 5  ;;  %v3433_v63 = vrot.slane %v3431_v37, 4  ;;  %v3439_v34 = vrot.slane %v3437_v41, 5  ;;  %2783 = vrot.lane.b32.xlu1 %v11799_v29, %s13256_s17  ;;  %v2307_v41 = vld [vmem:[#allocation2 + $0x24] sm:$0xf] }
  0x52   : > { %v3424_v48 = vor.u32 %v3423_v39, %v3420_v32  ;;  %v3396_v52 = vrot.slane %v3394_v53, 4  ;;  %v3399_v27 = vrot.slane %v3397_v0, 5  ;;  %v2372_v50 = vsel %vm13590_vm14, %v2367_v31, %v2371_v30 }
  0x53   : > { %1736 = vrot.lane.b32.xlu0 %v11735_v16, %s13255_s16  ;;  %v3434_v35 = vor.u32 %v3433_v63, %v3429_v15  ;;  %v3403_v38 = vshll.u32 %v3346_v20, 16  ;;  %v3407_v51 = vshrl.u32 %v3346_v20, 16  ;;  %v11798_v54 = vcombine.low %v2362_v6, %v2372_v50  ;;  %v1257_v16 = vld [vmem:[#allocation2 + $0x18] sm:$0xf] }
  0x54   : > { %v3425_v56 = vrot.slane %v3424_v48, 4  ;;  %v3400_v59 = vor.u32 %v3399_v27, %v3396_v52  ;;  %v3413_v61 = vshll.u32 %v3347_v44, 16  ;;  %v1375_v9 = vshrl.u32 %v1260_v7, 16  ;;  %v2308_v48 = vld [vmem:[#allocation2 + $0x28] sm:$0xf] }
  0x55   : > { %v3435_v24 = vrot.slane %v3434_v35, 4  ;;  %v3405_v1 = vrot.slane %v3403_v38, 5  ;;  %v3409_v2 = vrot.slane %v3407_v51, 4  ;;  %v1378_v26 = vshll.u32 %v1260_v7, 16  ;;  %v2309_v7 = vld [vmem:[#allocation2 + $0x2c] sm:$0x1] }
  0x56   : > { %v3430_v3 = vsel %vm13590_vm14, %v3425_v56, %v3429_v15  ;;  %v3401_v4 = vrot.slane %v3400_v59, 4  ;;  %v3415_v5 = vrot.slane %v3413_v61, 5  ;;  %v1377_v13 = vrot.slane %v1375_v9, 4  ;;  %v1064_v56 = vld [vmem:[#allocation2 + $0x38] sm:$0x1] }
  0x57   : > { %2781 = vrot.lane.b32.xlu0 %v11798_v54, %s13256_s17  ;;  %v3440_v11 = vsel %vm13590_vm14, %v3435_v24, %v3439_v34  ;;  %v3410_v12 = vor.u32 %v3409_v2, %v3405_v1  ;;  %v1384_v17 = vshll.u32 %v1261_v62, 16  ;;  %v1380_v28 = vrot.slane %v1378_v26, 5  ;;  %v2310_v59 = vld [vmem:[#allocation2 + $0x30] sm:$0xf] }
  0x58   : > { %v11863_v25 = vcombine.low %v3430_v3, %v3440_v11  ;;  %v3406_v47 = vsel %vm13590_vm14, %v3401_v4, %v3405_v1  ;;  %v1388_v8 = vshrl.u32 %v1261_v62, 16  ;;  %v1394_v32 = vshll.u32 %v1262_v58, 16  ;;  %v2311_v1 = vld [vmem:[#allocation2 + $0x34] sm:$0xf]  ;;  %v2852_v4 = vld [vmem:[#allocation2 + $0x24] sm:$0xe] }
  0x59   : > { %v3411_v29 = vrot.slane %v3410_v12, 4  ;;  %v1386_v30 = vrot.slane %v1384_v17, 5  ;;  %v1351_v43 = vshrl.u32 %v1257_v16, 16  ;;  %v1381_v19 = vor.u32 %v1380_v28, %v1377_v13  ;;  %v2853_v13 = vld [vmem:[#allocation2 + $0x28] sm:$0xf] }
  0x5a   : > { %3827 = vrot.lane.b32.xlu1 %v11863_v25, %s13257_s18  ;;  %v1390_v36 = vrot.slane %v1388_v8, 4  ;;  %v1354_v37 = vshll.u32 %v1257_v16, 16  ;;  %v1360_v39 = vshll.u32 %v1258_v23, 16  ;;  %v1396_v53 = vrot.slane %v1394_v32, 5  ;;  %v2854_v28 = vld [vmem:[#allocation2 + $0x2c] sm:$0x1] }
  0x5b   : > { %v3416_v20 = vsel %vm13590_vm14, %v3411_v29, %v3415_v5  ;;  %v1353_v0 = vrot.slane %v1351_v43, 4  ;;  %v1364_v6 = vshrl.u32 %v1258_v23, 16  ;;  %v1382_v15 = vrot.slane %v1381_v19, 4  ;;  %v2855_v8 = vld [vmem:[#allocation2 + $0x30] sm:$0xe] }
  0x5c   : > { %v11862_v31 = vcombine.low %v3406_v47, %v3416_v20  ;;  %v1391_v63 = vor.u32 %v1390_v36, %v1386_v30  ;;  %v1356_v44 = vrot.slane %v1354_v37, 5  ;;  %v1362_v34 = vrot.slane %v1360_v39, 5  ;;  %v2856_v43 = vld [vmem:[#allocation2 + $0x34] sm:$0xf] }
  0x5d   : > { %v1366_v52 = vrot.slane %v1364_v6, 4  ;;  %v1370_v27 = vshll.u32 %v1259_v33, 16  ;;  %v2398_v50 = vshrl.u32 %v2307_v41, 16  ;;  %v1387_v35 = vsel %vm13590_vm14, %v1382_v15, %v1386_v30 }
  0x5e   : > { %3825 = vrot.lane.b32.xlu0 %v11862_v31, %s13257_s18  ;;  %v1392_v38 = vrot.slane %v1391_v63, 4  ;;  %v1357_v51 = vor.u32 %v1356_v44, %v1353_v0  ;;  %v2401_v54 = vshll.u32 %v2307_v41, 16  ;;  %v2407_v24 = vshll.u32 %v2308_v48, 16 }
  0x5f   : > { %v1367_v61 = vor.u32 %v1366_v52, %v1362_v34  ;;  %v1372_v62 = vrot.slane %v1370_v27, 5  ;;  %v2400_v58 = vrot.slane %v2398_v50, 4  ;;  %v2411_v3 = vshrl.u32 %v2308_v48, 16  ;;  %v964_v52 = vld [vmem:[#allocation2 + $0x3c] sm:$0x1] }
  0x60   : > { %v1397_v2 = vsel %vm13590_vm14, %v1392_v38, %v1396_v53  ;;  %v1358_v9 = vrot.slane %v1357_v51, 4  ;;  %v2403_v16 = vrot.slane %v2401_v54, 5  ;;  %v2409_v11 = vrot.slane %v2407_v24, 5 }
  0x61   : > { %v11737_v5 = vcombine.low %v1387_v35, %v1397_v2  ;;  %v1368_v26 = vrot.slane %v1367_v61, 4  ;;  %v2417_v12 = vshll.u32 %v2309_v7, 16  ;;  %v2413_v25 = vrot.slane %v2411_v3, 4 }
  0x62   : > { %v1363_v17 = vsel %vm13590_vm14, %v1358_v9, %v1362_v34  ;;  %v2404_v23 = vor.u32 %v2403_v16, %v2400_v58  ;;  %v1065_v47 = vsel %vm13449_vm10, %v13458_v46, %v1064_v56  ;;  %v2422_v32 = vshrl.u32 %v2310_v59, 16 }
  0x63   : > { %1740 = vrot.lane.b32.xlu1 %v11737_v5, %s13255_s16  ;;  %v1373_v29 = vsel %vm13590_vm14, %v1368_v26, %v1372_v62  ;;  %v2419_v30 = vrot.slane %v2417_v12, 5  ;;  %1066 = vst [vmem:[#allocation2 + $0x38] sm:$0x1] %v1065_v47  ;;  %v2425_v33 = vshll.u32 %v2310_v59, 16  ;;  %v2414_v37 = vor.u32 %v2413_v25, %v2409_v11  ;;  %v3351_v59 = vld [vmem:[#allocation2 + $0x30] sm:$0xf] }
  0x64   : > { %v11736_v19 = vcombine.low %v1363_v17, %v1373_v29  ;;  %v2405_v36 = vrot.slane %v2404_v23, 4  ;;  %v2431_v39 = vshll.u32 %v2311_v1, 16  ;;  %v2424_v41 = vrot.slane %v2422_v32, 4  ;;  %v3897_v17 = vld [vmem:[#allocation2 + $0x34] sm:$0xf] }
  0x65   : > { %v2427_v20 = vrot.slane %v2425_v33, 5  ;;  %v2435_v53 = vshrl.u32 %v2311_v1, 16  ;;  %v11816_v46 = vrot.slane %v2852_v4, 9  ;;  %v2415_v6 = vrot.slane %v2414_v37, 4  ;;  %v3352_v4 = vld [vmem:[#allocation2 + $0x34] sm:$0xf] }
  0x66   : > { %1738 = vrot.lane.b32.xlu0 %v11736_v19, %s13255_s16  ;;  %v2410_v0 = vsel %vm13590_vm14, %v2405_v36, %v2409_v11  ;;  %v2433_v31 = vrot.slane %v2431_v39, 5  ;;  %v2958_v15 = vrot.slane %v2853_v13, 5  ;;  %v2961_v48 = vrot.slane %v2854_v28, 5  ;;  %v814_v13 = vld [vmem:[#allocation2 + $0x44] sm:$0x1]  ;;  %v13071_v29 = vld [vmem:[#allocation2 + $0x30] sm:$0xff]  }
  0x67   : > { %v2428_v63 = vor.u32 %v2427_v20, %v2424_v41  ;;  %v2437_v44 = vrot.slane %v2435_v53, 4  ;;  %v11817_v34 = vrot.slane %v2855_v8, 9  ;;  %v2420_v27 = vsel %vm13590_vm14, %v2415_v6, %v2419_v30 }
  0x68   : > { %v2959_v7 = vsel %vm13496_vm11, %v11816_v46, %v2958_v15  ;;  %v2960_v50 = vrot.slane %v2958_v15, 4  ;;  %v2965_v35 = vrot.slane %v2856_v43, 5  ;;  %v11800_v38 = vcombine.low %v2410_v0, %v2420_v27  ;;  %v329_v15 = vld [vmem:[%s13318_s10 + $0x58] sm:$0xff] }
  0x69   : > { %v2429_v51 = vrot.slane %v2428_v63, 4  ;;  %v2438_v54 = vor.u32 %v2437_v44, %v2433_v31  ;;  %v528_v56 = vrot.slane %v526_v10, 7  ;;  %v524_v1 = vrot.slane %v13465_v49, 4  ;;  %v330_v63 = vld [vmem:[%s13318_s10 + $0x60] sm:$0xff] }
  0x6a   : > { %v2312_v61 = vld [vmem:[#allocation2 + $0x38] sm:$0x1]  ;;  %v2962_v62 = vsel %vm13496_vm11, %v2960_v50, %v2961_v48  ;;  %v13669_v24 = vsel %vm13496_vm11, %v11817_v34, %v2965_v35  ;;  %v529_v2 = vshll.u32 %v13474_v55, 16  ;;  %2785 = vrot.lane.b32.xlu0 %v11800_v38, %s13256_s17  ;;  %v2967_v10 = vrot.slane %v2965_v35, 4  ;;  %v3896_v55 = vld [vmem:[#allocation2 + $0x30] sm:$0xe] }
  0x6b   : > { %v2857_v58 = vld [vmem:[#allocation2 + $0x38] sm:$0x1]  ;;  %v2439_v9 = vrot.slane %v2438_v54, 4  ;;  %v2441_v16 = vshll.u32 %v2312_v61, 16  ;;  %v11832_v3 = vcombine.low %v2959_v7, %v2962_v62  ;;  %v2434_v5 = vsel %vm13590_vm14, %v2429_v51, %v2433_v31  ;;  %v1264_v35 = vld [vmem:[#allocation2 + $0x34] sm:$0xf] }
  0x6c   : > { %v2968_v26 = vrot.slane %v2857_v58, 5  ;;  %v531_v11 = vor.u32 %v529_v2, %v528_v56  ;;  %v965_v12 = vsel %vm13386_vm7, %v518_v40, %v964_v52  ;;  %v3353_v49 = vld [vmem:[#allocation2 + $0x38] sm:$0x1]  ;;  %v533_v25 = vrot.slane %v528_v56, 4  ;;  %v1263_v40 = vld [vmem:[#allocation2 + $0x30] sm:$0xf] }
  0x6d   : > { %v2443_v23 = vrot.slane %v2441_v16, 5  ;;  %966 = vst [vmem:[#allocation2 + $0x3c] sm:$0x1] %v965_v12  ;;  %v3442_v47 = vshrl.u32 %v3351_v59, 16  ;;  %v3445_v28 = vshll.u32 %v3351_v59, 16  ;;  %v13682_v32 = vrot.slane %v529_v2, 11 }
  0x6e   : > { %v3898_v8 = vld [vmem:[#allocation2 + $0x38] sm:$0x1]  ;;  %v532_v30 = vsel %vm13337_vm4, %v524_v1, %v531_v11  ;;  %v3451_v21 = vshll.u32 %v3352_v4, 16  ;;  %v3455_v33 = vshrl.u32 %v3352_v4, 16  ;;  %3106 = vrot.lane.b32.xlu0 %v11832_v3, %s13252_s13  ;;  %v2969_v19 = vsel %vm13496_vm11, %v2967_v10, %v2968_v26  ;;  %v331_v51 = vld [vmem:[%s13318_s10 + $0x68] sm:$0xff] }
  0x6f   : > { %v2444_v43 = vsel %vm13590_vm14, %v2439_v9, %v2443_v23  ;;  %813 = vst.msk [vmem:[#allocation2 + $0x40] sm:$0xf] %vm17873_vm2, %v532_v30  ;;  %v3444_v36 = vrot.slane %v3442_v47, 4  ;;  %v3447_v37 = vrot.slane %v3445_v28, 5  ;;  %v3461_v53 = vshll.u32 %v3353_v49, 16  ;;  %v332_v23 = vld [vmem:[%s13318_s10 + $0x70] sm:$0xff] }
  0x70   : > { %v11801_v39 = vcombine.low %v2434_v5, %v2444_v43  ;;  %v3453_v41 = vrot.slane %v3451_v21, 5  ;;  %v3457_v20 = vrot.slane %v3455_v33, 4  ;;  %v815_v0 = vsel %vm13386_vm7, %v533_v25, %v814_v13  ;;  %v13708_v9 = vld [vmem:[#allocation2 + $0x3c] sm:$0xe]  ;;  %v1265_v16 = vld [vmem:[#allocation2 + $0x38] sm:$0x1] }
  0x71   : > { %v3448_v46 = vor.u32 %v3447_v37, %v3444_v36  ;;  %v11880_v6 = vrot.slane %v3896_v55, 9  ;;  %v4002_v31 = vrot.slane %v3897_v17, 5  ;;  %v11833_v44 = vcombine.low %v13669_v24, %v2969_v19  ;;  %816 = vst [vmem:[#allocation2 + $0x44] sm:$0x1] %v815_v0 }
  0x72   : > { %2787 = vrot.lane.b32.xlu1 %v11801_v39, %s13256_s17  ;;  %v3458_v48 = vor.u32 %v3457_v20, %v3453_v41  ;;  %v3463_v34 = vrot.slane %v3461_v53, 5  ;;  %v4005_v52 = vrot.slane %v3898_v8, 5  ;;  %3284 = vrot.lane.b32.xlu0 %v13071_v29, %s13251_s12  ;;  %v1399_v38 = vshrl.u32 %v1263_v40, 16 }
  0x73   : > { %v3449_v27 = vrot.slane %v3448_v46, 4  ;;  %v4003_v7 = vsel %vm13496_vm11, %v11880_v6, %v4002_v31  ;;  %v4004_v50 = vrot.slane %v4002_v31, 4  ;;  %v1402_v59 = vshll.u32 %v1263_v40, 16  ;;  %v1812_v31 = vld [vmem:[#allocation2 + $0x34] sm:$0xf] }
  0x74   : > { %v3459_v54 = vrot.slane %v3458_v48, 4  ;;  %v3354_v56 = vld [vmem:[#allocation2 + $0x3c] sm:$0xf]  ;;  %v13700_v61 = vpack.c.bf16 %v329_v15, %v329_v15  ;;  %v13702_v62 = vpack.c.bf16 %v330_v63, %v330_v63  ;;  %v1401_v26 = vrot.slane %v1399_v38, 4 }
  0x75   : > { %v3454_v58 = vsel %vm13590_vm14, %v3449_v27, %v3453_v41  ;;  %v3466_v24 = vshrl.u32 %v3354_v56, 16  ;;  %v3469_v1 = vshll.u32 %v3354_v56, 16  ;;  %v4006_v2 = vsel %vm13496_vm11, %v4004_v50, %v4005_v52  ;;  %v1266_v29 = vld [vmem:[#allocation2 + $0x3c] sm:$0xf]  ;;  %v1811_v41 = vld [vmem:[#allocation2 + $0x30] sm:$0xe] }
  0x76   : > { %3108 = vrot.lane.b32.xlu1 %v11833_v44, %s13252_s13  ;;  %v13072_v3 = vld [vmem:[#allocation2 + $0x3c] sm:$0xff]   ;;  %v3464_v10 = vsel %vm13590_vm14, %v3459_v54, %v3463_v34  ;;  %v11896_v5 = vcombine.low %v4003_v7, %v4006_v2  ;;  %v13713_v11 = vpack.c.bf16 %v331_v51, %v331_v51  ;;  %v1404_v28 = vrot.slane %v1402_v59, 5  ;;  %v1813_v50 = vld [vmem:[#allocation2 + $0x38] sm:$0x1] }
  0x77   : > { %v3355_v4 = vld [vmem:[#allocation2 + $0x40] sm:$0xf]  ;;  %v11864_v12 = vcombine.low %v3454_v58, %v3464_v10  ;;  %v3468_v49 = vrot.slane %v3466_v24, 4  ;;  %v3471_v13 = vrot.slane %v3469_v1, 5  ;;  %v1408_v8 = vshll.u32 %v1264_v35, 16 }
  0x78   : > { %v3475_v55 = vshll.u32 %v3355_v4, 16  ;;  %v3900_v17 = vld [vmem:[#allocation2 + $0x40] sm:$0xf]  ;;  %v3479_v25 = vshrl.u32 %v3355_v4, 16  ;;  %v1067_v30 = vld [vmem:[#allocation2 + $0x44] sm:$0x1]  ;;  %v13724_v20 = vpack.c.bf16 %v332_v23, %v332_v23  ;;  %v1405_v46 = vor.u32 %v1404_v28, %v1401_v26 }
  0x79   : > { %v4009_v47 = vrot.slane %v3900_v17, 5  ;;  %3829 = vrot.lane.b32.xlu0 %v11864_v12, %s13257_s18  ;;  %v3472_v21 = vor.u32 %v3471_v13, %v3468_v49  ;;  %v1412_v40 = vshrl.u32 %v1264_v35, 16  ;;  %v1418_v43 = vshll.u32 %v1265_v16, 16  ;;  %v1267_v39 = vld [vmem:[#allocation2 + $0x40] sm:$0xf]  ;;  %v333_v12 = vld [vmem:[%s13318_s10 + $0x78] sm:$0xff] }
  0x7a   : > { %v13717_v33 = vrot.slane %v3475_v55, 5  ;;  %3286 = vrot.lane.b32.xlu1 %v13072_v3, %s13251_s12  ;;  %v1068_v19 = vsel %vm13449_vm10, %v13682_v32, %v1067_v30  ;;  %v3481_v36 = vrot.slane %v3479_v25, 4  ;;  %v11881_v37 = vrot.slane %v13708_v9, 9  ;;  %v13729_v32 = vld [vmem:[#allocation2 + $0x3c] sm:$0xe] }
  0x7b   : > { %1069 = vst [vmem:[#allocation2 + $0x44] sm:$0x1] %v1068_v19  ;;  %v4011_v53 = vrot.slane %v4009_v47, 4  ;;  %v1410_v0 = vrot.slane %v1408_v8, 5  ;;  %v1414_v6 = vrot.slane %v1412_v40, 4  ;;  %v13726_v15 = vrot.slane %v3472_v21, 4 }
  0x7c   : > { %v3482_v63 = vor.u32 %v3481_v36, %v13717_v33  ;;  %v1423_v44 = vshrl.u32 %v1266_v29, 16  ;;  %v1426_v48 = vshll.u32 %v1266_v29, 16  ;;  %v1406_v34 = vrot.slane %v1405_v46, 4  ;;  %v1815_v56 = vld [vmem:[#allocation2 + $0x40] sm:$0xf] }
  0x7d   : > { %4150 = vrot.lane.b32.xlu0 %v11896_v5, %s13254_s15  ;;  %v1415_v52 = vor.u32 %v1414_v6, %v1410_v0  ;;  %v1420_v27 = vrot.slane %v1418_v43, 5  ;;  %v1432_v7 = vshll.u32 %v1267_v39, 16  ;;  %v1436_v54 = vshrl.u32 %v1267_v39, 16  ;;  %v2313_v46 = vld [vmem:[#allocation2 + $0x3c] sm:$0xf] }
  0x7e   : > { %v3483_v35 = vrot.slane %v3482_v63, 4  ;;  %v1425_v38 = vrot.slane %v1423_v44, 4  ;;  %v1428_v51 = vrot.slane %v1426_v48, 5  ;;  %v1411_v59 = vsel %vm13590_vm14, %v1406_v34, %v1410_v0  ;;  %v2314_v63 = vld [vmem:[#allocation2 + $0x40] sm:$0xf] }
  0x7f   : > { %v1416_v58 = vrot.slane %v1415_v52, 4  ;;  %v1434_v24 = vrot.slane %v1432_v7, 5  ;;  %v11754_v1 = vrot.slane %v1811_v41, 9  ;;  %v1438_v9 = vrot.slane %v1436_v54, 4  ;;  %v13073_v34 = vld [vmem:[#allocation2 + $0x3c] sm:$0xff]  }
  0x80   : > { %v1429_v2 = vor.u32 %v1428_v51, %v1425_v38  ;;  %v1928_v16 = vrot.slane %v1812_v31, 5  ;;  %v1931_v3 = vrot.slane %v1813_v50, 5  ;;  %v11755_v4 = vrot.slane %v13729_v32, 9  ;;  %v2858_v54 = vld [vmem:[#allocation2 + $0x3c] sm:$0xe] }
  0x81   : > { %v1421_v10 = vsel %vm13590_vm14, %v1416_v58, %v1420_v27  ;;  %v1935_v5 = vrot.slane %v1815_v56, 5  ;;  %v535_v26 = vshrl.u32 %v13509_v42, 16  ;;  %v3478_v13 = vsel %vm13590_vm14, %v13726_v15, %v13717_v33  ;;  %v817_v15 = vld [vmem:[#allocation2 + $0x48] sm:$0xf] }
  0x82   : > { %v3356_v49 = vld [vmem:[#allocation2 + $0x44] sm:$0x1]  ;;  %v13745_v17 = vsel %vm13496_vm11, %v11881_v37, %v4009_v47  ;;  %v11738_v23 = vcombine.low %v1411_v59, %v1421_v10  ;;  %v1439_v28 = vor.u32 %v1438_v9, %v1434_v24  ;;  %v1430_v30 = vrot.slane %v1429_v2, 4  ;;  %v821_v10 = vld [vmem:[#allocation2 + $0x50] sm:$0x1] }
  0x83   : > { %v3901_v55 = vld [vmem:[#allocation2 + $0x44] sm:$0x1]  ;;  %v3485_v8 = vshll.u32 %v3356_v49, 16  ;;  %v1929_v19 = vsel %vm13496_vm11, %v11754_v1, %v1928_v16  ;;  %v1930_v33 = vrot.slane %v1928_v16, 4  ;;  %v1937_v36 = vrot.slane %v1935_v5, 4 }
  0x84   : > { %v1268_v25 = vld [vmem:[#allocation2 + $0x44] sm:$0x1]  ;;  %v4012_v29 = vrot.slane %v3901_v55, 5  ;;  %1742 = vrot.lane.b32.xlu0 %v11738_v23, %s13255_s16  ;;  %v1440_v43 = vrot.slane %v1439_v28, 4  ;;  %v1435_v37 = vsel %vm13590_vm14, %v1430_v30, %v1434_v24  ;;  %v537_v31 = vrot.slane %v535_v26, 7 }
  0x85   : > { %v1442_v21 = vshll.u32 %v1268_v25, 16  ;;  %v1816_v40 = vld [vmem:[#allocation2 + $0x44] sm:$0x1]  ;;  %v3487_v39 = vrot.slane %v3485_v8, 5  ;;  %v1932_v0 = vsel %vm13496_vm11, %v1930_v33, %v1931_v3  ;;  %v13758_v44 = vpack.c.bf16 %v333_v12, %v333_v12  ;;  %v2859_v24 = vld [vmem:[#allocation2 + $0x40] sm:$0xf] }
  0x86   : > { %v4013_v47 = vsel %vm13496_vm11, %v4011_v53, %v4012_v29  ;;  %v1938_v6 = vrot.slane %v1816_v40, 5  ;;  %v11770_v32 = vcombine.low %v1929_v19, %v1932_v0  ;;  %v538_v52 = vshll.u32 %v13509_v42, 16  ;;  %v2315_v51 = vld [vmem:[#allocation2 + $0x44] sm:$0x1] }
  0x87   : > { %v1444_v41 = vrot.slane %v1442_v21, 5  ;;  %v3488_v48 = vsel %vm13590_vm14, %v3483_v35, %v3487_v39  ;;  %v11897_v7 = vcombine.low %v13745_v17, %v4013_v47  ;;  %v13768_v38 = vsel %vm13496_vm11, %v11755_v4, %v1935_v5  ;;  %v2860_v1 = vld [vmem:[#allocation2 + $0x44] sm:$0x1]  ;;  %v13088_v47 = vld [vmem:[%s17863_s1 + $0x8] sm:$0xff]  }
  0x88   : > { %v11865_v27 = vcombine.low %v3478_v13, %v3488_v48  ;;  %2066 = vrot.lane.b32.xlu0 %v11770_v32, %s13253_s14  ;;  %v13773_v35 = vsel %vm13496_vm11, %v1937_v36, %v1938_v6  ;;  %v540_v56 = vor.u32 %v538_v52, %v537_v31  ;;  %v543_v59 = vshrl.u32 %v13700_v61, 16  ;;  %v13086_v13 = vld [vmem:[%s17863_s1] sm:$0xff]   ;;  %v824_v52 = vld [vmem:[#allocation2 + $0x54] sm:$0xf] }
  0x89   : > { %v1445_v53 = vsel %vm13590_vm14, %v1440_v43, %v1444_v41  ;;  %v546_v58 = vshll.u32 %v13700_v61, 16  ;;  %v2446_v2 = vshrl.u32 %v2313_v46, 16  ;;  %v2449_v9 = vshll.u32 %v2313_v46, 16  ;;  %12944 = vmatprep.subr.bf16.mxu0 %v13086_v13 }
  0x8a   : > { %v11739_v50 = vcombine.low %v1435_v37, %v1445_v53  ;;  %3831 = vrot.lane.b32.xlu1 %v11865_v27, %s13257_s18  ;;  %v2455_v16 = vshll.u32 %v2314_v63, 16  ;;  %v2459_v3 = vshrl.u32 %v2314_v63, 16  ;;  %v541_v4 = vrot.slane %v537_v31, 4  ;;  %12945 = vmatpush3.bf16.msra.mxu0 %v13086_v13 }
  0x8b   : > { %v545_v5 = vrot.slane %v543_v59, 7  ;;  %v818_v12 = vsel %vm13346_vm6, %v540_v56, %v817_v15  ;;  %v2465_v49 = vshll.u32 %v2315_v51, 16  ;;  %v2448_v61 = vrot.slane %v2446_v2, 4  ;;  %12946 = vmatprep.subr.bf16.mxu0 %v13088_v47 }
  0x8c   : > { %819 = vst [vmem:[#allocation2 + $0x48] sm:$0xf] %v818_v12  ;;  %v2451_v55 = vrot.slane %v2449_v9, 5  ;;  %v2457_v17 = vrot.slane %v2455_v16, 5  ;;  %v2461_v23 = vrot.slane %v2459_v3, 4  ;;  %2244 = vrot.lane.b32.xlu0 %v13073_v34, %s13250_s11  ;;  %v11818_v29 = vrot.slane %v2858_v54, 9 }
  0x8d   : > { %v548_v25 = vor.u32 %v546_v58, %v545_v5  ;;  %v550_v28 = vrot.slane %v545_v5, 4  ;;  %v2467_v8 = vrot.slane %v2465_v49, 5  ;;  %v2972_v40 = vrot.slane %v2859_v24, 5 }
  0x8e   : > { %4152 = vrot.lane.b32.xlu1 %v11897_v7, %s13254_s15  ;;  %v2452_v30 = vor.u32 %v2451_v55, %v2448_v61  ;;  %v2462_v21 = vor.u32 %v2461_v23, %v2457_v17  ;;  %v2975_v43 = vrot.slane %v2860_v1, 5  ;;  %v552_v36 = vshrl.u32 %v13702_v62, 16  ;;  %12947 = vmatpush3.bf16.msra.mxu0 %v13088_v47  ;;  %v828_v1 = vld [vmem:[#allocation2 + $0x5c] sm:$0x1] }
  0x8f   : > { %v549_v19 = vsel %vm13337_vm4, %v541_v4, %v548_v25  ;;  %v822_v33 = vsel %vm13386_vm7, %v550_v28, %v821_v10  ;;  %v555_v39 = vshll.u32 %v13702_v62, 16  ;;  %v11771_v37 = vcombine.low %v13768_v38, %v13773_v35 }
  0x90   : > { %820 = vst.msk [vmem:[#allocation2 + $0x4c] sm:$0xf] %vm17873_vm2, %v549_v19  ;;  %v2453_v41 = vrot.slane %v2452_v30, 4  ;;  %v2463_v46 = vrot.slane %v2462_v21, 4  ;;  %823 = vst [vmem:[#allocation2 + $0x50] sm:$0x1] %v822_v33  ;;  %v2973_v6 = vsel %vm13496_vm11, %v11818_v29, %v2972_v40 }
  0x91   : > { %v2974_v0 = vrot.slane %v2972_v40, 4  ;;  %v554_v31 = vrot.slane %v552_v36, 7  ;;  %v560_v15 = vshrl.u32 %v13713_v11, 16  ;;  %v569_v63 = vshrl.u32 %v13724_v20, 16 }
  0x92   : > { %1744 = vrot.lane.b32.xlu1 %v11739_v50, %s13255_s16  ;;  %v2458_v48 = vsel %vm13590_vm14, %v2453_v41, %v2457_v17  ;;  %v2468_v53 = vsel %vm13590_vm14, %v2463_v46, %v2467_v8  ;;  %v563_v34 = vshll.u32 %v13713_v11, 16  ;;  %v11708_v7 = vrot.slane %v546_v58, 11 }
  0x93   : > { %v2976_v32 = vsel %vm13496_vm11, %v2974_v0, %v2975_v43  ;;  %v967_v27 = vld [vmem:[#allocation2 + $0x48] sm:$0x1]  ;;  %v11802_v38 = vcombine.low %v2458_v48, %v2468_v53  ;;  %v13811_v51 = vld [vmem:[#allocation2 + $0x48] sm:$0xe]  ;;  %v557_v54 = vor.u32 %v555_v39, %v554_v31  ;;  %v572_v50 = vshll.u32 %v13724_v20, 16 }
  0x94   : > { %v968_v35 = vsel %vm13386_vm7, %v535_v26, %v967_v27  ;;  %v11834_v56 = vcombine.low %v2973_v6, %v2976_v32  ;;  %v558_v59 = vrot.slane %v554_v31, 4  ;;  %v562_v24 = vrot.slane %v560_v15, 7  ;;  %v13818_v11 = vld [vmem:[#allocation2 + $0x48] sm:$0xe]  ;;  %v831_v26 = vld [vmem:[#allocation2 + $0x60] sm:$0xf] }
  0x95   : > { %969 = vst [vmem:[#allocation2 + $0x48] sm:$0x1] %v968_v35  ;;  %2789 = vrot.lane.b32.xlu0 %v11802_v38, %s13256_s17  ;;  %v11819_v58 = vrot.slane %v13811_v51, 9  ;;  %v825_v2 = vsel %vm13346_vm6, %v557_v54, %v824_v52  ;;  %v13824_v9 = vrot.slane %v563_v34, 11  ;;  %v13828_v42 = vrot.slane %v569_v63, 7  ;;  %v334_v6 = vld [vmem:[%s13318_s10 + $0x80] sm:$0xff] }
  0x96   : > { %2068 = vrot.lane.b32.xlu1 %v11771_v37, %s13253_s14  ;;  %v565_v16 = vor.u32 %v563_v34, %v562_v24  ;;  %v567_v3 = vrot.slane %v562_v24, 4  ;;  %826 = vst [vmem:[#allocation2 + $0x54] sm:$0xf] %v825_v2  ;;  %v11882_v10 = vrot.slane %v13818_v11, 9  ;;  %v13832_v4 = vld [vmem:[#allocation2 + $0x48] sm:$0xe] }
  0x97   : > { %v577_v5 = vshrl.u32 %v13758_v44, 16  ;;  %v1070_v12 = vld [vmem:[#allocation2 + $0x50] sm:$0x1]  ;;  %v2317_v49 = vld [vmem:[#allocation2 + $0x4c] sm:$0xf]  ;;  %v574_v13 = vor.u32 %v572_v50, %v13828_v42  ;;  %v11756_v21 = vrot.slane %v13832_v4, 9 }
  0x98   : > { %v1071_v61 = vsel %vm13449_vm10, %v11708_v7, %v1070_v12  ;;  %v2479_v55 = vshll.u32 %v2317_v49, 16  ;;  %v2483_v17 = vshrl.u32 %v2317_v49, 16  ;;  %v2862_v23 = vld [vmem:[#allocation2 + $0x4c] sm:$0xf]  ;;  %v566_v25 = vsel %vm13337_vm4, %v558_v59, %v565_v16 }
  0x99   : > { %1072 = vst [vmem:[#allocation2 + $0x50] sm:$0x1] %v1071_v61  ;;  %3110 = vrot.lane.b32.xlu0 %v11834_v56, %s13252_s13  ;;  %v2979_v28 = vrot.slane %v2862_v23, 5  ;;  %827 = vst.msk [vmem:[#allocation2 + $0x58] sm:$0xf] %vm17873_vm2, %v566_v25  ;;  %v829_v29 = vsel %vm13386_vm7, %v567_v3, %v828_v1  ;;  %v832_v40 = vsel %vm13346_vm6, %v574_v13, %v831_v26  ;;  %v575_v46 = vrot.slane %v13828_v42, 4 }
  0x9a   : > { %v3358_v8 = vld [vmem:[#allocation2 + $0x4c] sm:$0xf]  ;;  %v13849_v43 = vrot.slane %v2479_v55, 5  ;;  %v2485_v19 = vrot.slane %v2483_v17, 4  ;;  %830 = vst [vmem:[#allocation2 + $0x5c] sm:$0x1] %v829_v29  ;;  %v13868_v16 = vpack.c.bf16 %v334_v6, %v334_v6 }
  0x9b   : > { %v13844_v30 = vld [vmem:[#allocation2 + $0x4c] sm:$0xf]  ;;  %v3499_v33 = vshll.u32 %v3358_v8, 16  ;;  %v3503_v39 = vshrl.u32 %v3358_v8, 16  ;;  %833 = vst [vmem:[#allocation2 + $0x60] sm:$0xf] %v832_v40 }
  0x9c   : > { %v2981_v47 = vrot.slane %v2979_v28, 4  ;;  %v4016_v37 = vrot.slane %v13844_v30, 5  ;;  %v13852_v41 = vld [vmem:[#allocation2 + $0x4c] sm:$0xf]  ;;  %v580_v0 = vshll.u32 %v13758_v44, 16  ;;  %v2486_v48 = vor.u32 %v2485_v19, %v13849_v43 }
  0x9d   : > { %v13074_v31 = vld [vmem:[#allocation2 + $0x48] sm:$0xff]   ;;  %v13858_v53 = vrot.slane %v3499_v33, 5  ;;  %v3505_v27 = vrot.slane %v3503_v39, 4  ;;  %v970_v38 = vld [vmem:[#allocation2 + $0x54] sm:$0x1]  ;;  %v1456_v50 = vshll.u32 %v13852_v41, 16  ;;  %v2980_v30 = vsel %vm13496_vm11, %v11819_v58, %v2979_v28 }
  0x9e   : > { %v2316_v15 = vld [vmem:[#allocation2 + $0x48] sm:$0xf]  ;;  %2246 = vrot.lane.b32.xlu1 %v13074_v31, %s13250_s11  ;;  %v2487_v7 = vrot.slane %v2486_v48, 4  ;;  %v971_v59 = vsel %vm13386_vm7, %v552_v36, %v970_v38  ;;  %v4018_v61 = vrot.slane %v4016_v37, 4  ;;  %vm3328_vm13 = vcmask 228544  }
  0x9f   : > { %v2470_v32 = vshrl.u32 %v2316_v15, 16  ;;  %v2473_v34 = vshll.u32 %v2316_v15, 16  ;;  %v13075_v52 = vld [vmem:[#allocation2 + $0x48] sm:$0xff]   ;;  %972 = vst [vmem:[#allocation2 + $0x54] sm:$0x1] %v971_v59  ;;  %v3506_v26 = vor.u32 %v3505_v27, %v13858_v53  ;;  %vm17875_vm0 = vcmask 261344  }
  0xa0   : > { %v3357_v54 = vld [vmem:[#allocation2 + $0x48] sm:$0xf]  ;;  %3288 = vrot.lane.b32.xlu0 %v13075_v52, %s13251_s12  ;;  %v2318_v1 = vld [vmem:[#allocation2 + $0x50] sm:$0x1]  ;;  %v3361_v19 = vld [vmem:[#allocation2 + $0x58] sm:$0xf] }
  0xa1   : > { %v2472_v35 = vrot.slane %v2470_v32, 4  ;;  %v2475_v56 = vrot.slane %v2473_v34, 5  ;;  %v3490_v24 = vshrl.u32 %v3357_v54, 16  ;;  %v2863_v2 = vld [vmem:[#allocation2 + $0x50] sm:$0x1]  ;;  %v2489_v12 = vshll.u32 %v2318_v1, 16  ;;  %v13870_v8 = vpop.permute.xlu1 %2238  ;;  %v13879_v39 = vpop.permute.xlu0 %2236 }
  0xa2   : > { %v2982_v49 = vrot.slane %v2863_v2, 5  ;;  %v3359_v13 = vld [vmem:[#allocation2 + $0x50] sm:$0x1]  ;;  %v3493_v17 = vshll.u32 %v3357_v54, 16  ;;  %v3507_v23 = vrot.slane %v3506_v26, 4  ;;  %v3523_v48 = vshll.u32 %v3361_v19, 16 }
  0xa3   : > { %v2476_v3 = vor.u32 %v2475_v56, %v2472_v35  ;;  %v3492_v55 = vrot.slane %v3490_v24, 4  ;;  %v3509_v62 = vshll.u32 %v3359_v13, 16  ;;  %v1073_v25 = vld [vmem:[#allocation2 + $0x5c] sm:$0x1]  ;;  %v2491_v29 = vrot.slane %v2489_v12, 5 }
  0xa4   : > { %v1074_v40 = vsel %vm13449_vm10, %v13824_v9, %v1073_v25  ;;  %v3904_v33 = vld [vmem:[#allocation2 + $0x50] sm:$0x1]  ;;  %v2983_v6 = vsel %vm13496_vm11, %v2981_v47, %v2982_v49  ;;  %v3495_v31 = vrot.slane %v3493_v17, 5  ;;  %v3905_v32 = vld [vmem:[#allocation2 + $0x54] sm:$0xe]  ;;  %v3527_v9 = vshrl.u32 %v3361_v19, 16 }
  0xa5   : > { %v2477_v36 = vrot.slane %v2476_v3, 4  ;;  %v3511_v15 = vrot.slane %v3509_v62, 5  ;;  %1075 = vst [vmem:[#allocation2 + $0x5c] sm:$0x1] %v1074_v40  ;;  %v2492_v58 = vsel %vm13590_vm14, %v2487_v7, %v2491_v29  ;;  %v4019_v28 = vrot.slane %v3904_v33, 5  ;;  %v13898_v24 = vpop.permute.xlu0 %3280 }
  0xa6   : > { %v3496_v52 = vor.u32 %v3495_v31, %v3492_v55  ;;  %v13888_v27 = vrot.slane %v3523_v48, 5  ;;  %v13894_v47 = vsel %vm13496_vm11, %v11882_v10, %v4016_v37  ;;  %v3906_v38 = vld [vmem:[#allocation2 + $0x58] sm:$0xf]  ;;  %v1269_v54 = vld [vmem:[#allocation2 + $0x48] sm:$0xf]  ;;  %v11835_v35 = vcombine.low %v2980_v30, %v2983_v6  ;;  %v13903_v37 = vpop.permute.xlu1 %3282 }
  0xa7   : > { %v2482_v51 = vsel %vm13590_vm14, %v2477_v36, %v13849_v43  ;;  %v3512_v43 = vsel %vm13590_vm14, %v3507_v23, %v3511_v15  ;;  %v3360_v56 = vld [vmem:[#allocation2 + $0x54] sm:$0xf]  ;;  %v3529_v7 = vrot.slane %v3527_v9, 4  ;;  %v11883_v59 = vrot.slane %v3905_v32, 9  ;;  %v1271_v12 = vld [vmem:[#allocation2 + $0x50] sm:$0x1] }
  0xa8   : > { %v11803_v34 = vcombine.low %v2482_v51, %v2492_v58  ;;  %v3497_v1 = vrot.slane %v3496_v52, 4  ;;  %v3514_v2 = vshrl.u32 %v3360_v56, 16  ;;  %v3517_v11 = vshll.u32 %v3360_v56, 16  ;;  %v1272_v25 = vld [vmem:[#allocation2 + $0x54] sm:$0xf] }
  0xa9   : > { %v4020_v10 = vsel %vm13496_vm11, %v4018_v61, %v4019_v28  ;;  %v3530_v26 = vor.u32 %v3529_v7, %v13888_v27  ;;  %v4023_v3 = vrot.slane %v3906_v38, 5  ;;  %v1447_v49 = vshrl.u32 %v1269_v54, 16  ;;  %v13914_v33 = vpop.permute.xlu0 %2240  ;;  %v13076_v6 = vld [vmem:[#allocation2 + $0x54] sm:$0xff]   ;;  %v1818_v28 = vld [vmem:[#allocation2 + $0x4c] sm:$0xf] }
  0xaa   : > { %2791 = vrot.lane.b32.xlu1 %v11803_v34, %s13256_s17  ;;  %v1450_v13 = vshll.u32 %v1269_v54, 16  ;;  %v3502_v55 = vsel %vm13590_vm14, %v3497_v1, %v13858_v53  ;;  %v3516_v17 = vrot.slane %v3514_v2, 4  ;;  %v3519_v23 = vrot.slane %v3517_v11, 5  ;;  %v1273_v58 = vld [vmem:[#allocation2 + $0x58] sm:$0xf] }
  0xab   : > { %v13911_v62 = vrot.slane %v1456_v50, 5  ;;  %v11866_v61 = vcombine.low %v3502_v55, %v3512_v43  ;;  %v3531_v29 = vrot.slane %v3530_v26, 4  ;;  %v11898_v30 = vcombine.low %v13894_v47, %v4020_v10  ;;  %v13921_v54 = vpop.permute.xlu1 %2242  ;;  %v1819_v26 = vld [vmem:[#allocation2 + $0x50] sm:$0x1]  ;;  %v1820_v55 = vld [vmem:[#allocation2 + $0x54] sm:$0xe] }
  0xac   : > { %v3362_v36 = vld [vmem:[#allocation2 + $0x5c] sm:$0x1]  ;;  %v4025_v19 = vrot.slane %v4023_v3, 4  ;;  %v3520_v53 = vor.u32 %v3519_v23, %v3516_v17  ;;  %v1449_v48 = vrot.slane %v1447_v49, 4  ;;  %v1452_v50 = vrot.slane %v1450_v13, 5 }
  0xad   : > { %v3907_v40 = vld [vmem:[#allocation2 + $0x5c] sm:$0x1]  ;;  %v3533_v31 = vshll.u32 %v3362_v36, 16  ;;  %3833 = vrot.lane.b32.xlu0 %v11866_v61, %s13257_s18  ;;  %v1460_v32 = vshrl.u32 %v13852_v41, 16  ;;  %v1466_v51 = vshll.u32 %v1271_v12, 16  ;;  %v1471_v9 = vshrl.u32 %v1272_v25, 16  ;;  %v13925_v41 = vpop.permute.xlu0 %3102 }
  0xae   : > { %3112 = vrot.lane.b32.xlu1 %v11835_v35, %s13252_s13  ;;  %v4026_v15 = vrot.slane %v3907_v40, 5  ;;  %v3521_v34 = vrot.slane %v3520_v53, 4  ;;  %v4024_v47 = vsel %vm13496_vm11, %v11883_v59, %v4023_v3  ;;  %v1474_v38 = vshll.u32 %v1272_v25, 16  ;;  %v1274_v1 = vld [vmem:[#allocation2 + $0x5c] sm:$0x1] }
  0xaf   : > { %v3535_v52 = vrot.slane %v3533_v31, 5  ;;  %v1453_v43 = vor.u32 %v1452_v50, %v1449_v48  ;;  %v1462_v56 = vrot.slane %v1460_v32, 4  ;;  %v1468_v7 = vrot.slane %v1466_v51, 5  ;;  %v1821_v36 = vld [vmem:[#allocation2 + $0x58] sm:$0xf]  ;;  %v13943_v48 = vpop.permute.xlu1 %2058 }
  0xb0   : > { %v4027_v35 = vsel %vm13496_vm11, %v4025_v19, %v4026_v15  ;;  %v3526_v2 = vsel %vm13590_vm14, %v3521_v34, %v13888_v27  ;;  %v1473_v11 = vrot.slane %v1471_v9, 4  ;;  %v1476_v10 = vrot.slane %v1474_v38, 5  ;;  %v2319_v38 = vld [vmem:[#allocation2 + $0x54] sm:$0xf] }
  0xb1   : > { %v3536_v59 = vsel %vm13590_vm14, %v3531_v29, %v3535_v52  ;;  %4154 = vrot.lane.b32.xlu0 %v11898_v30, %s13254_s15  ;;  %v1454_v12 = vrot.slane %v1453_v43, 4  ;;  %v1463_v49 = vor.u32 %v1462_v56, %v13911_v62  ;;  %v1480_v13 = vshll.u32 %v1273_v58, 16  ;;  %v13947_v9 = vpop.permute.xlu0 %4146  ;;  %v2320_v56 = vld [vmem:[#allocation2 + $0x58] sm:$0xf] }
  0xb2   : > { %3290 = vrot.lane.b32.xlu1 %v13076_v6, %s13251_s12  ;;  %v11867_v3 = vcombine.low %v3526_v2, %v3536_v59  ;;  %v1477_v17 = vor.u32 %v1476_v10, %v1473_v11  ;;  %v1484_v23 = vshrl.u32 %v1273_v58, 16  ;;  %v1490_v25 = vshll.u32 %v1274_v1, 16  ;;  %v1822_v6 = vld [vmem:[#allocation2 + $0x5c] sm:$0x1]  ;;  %v973_v58 = vld [vmem:[#allocation2 + $0x60] sm:$0x1] }
  0xb3   : > { %v1942_v61 = vrot.slane %v1818_v28, 5  ;;  %v1459_v27 = vsel %vm13590_vm14, %v1454_v12, %v13911_v62  ;;  %v1464_v29 = vrot.slane %v1463_v49, 4  ;;  %v1482_v40 = vrot.slane %v1480_v13, 5  ;;  %17919 = vst [vmem:[#allocation6_spill] sm:$0xff] %v13947_v9  ;;  %v835_v1 = vld [vmem:[#allocation2 + $0x68] sm:$0x1] }
  0xb4   : > { %v1945_v19 = vrot.slane %v1819_v26, 5  ;;  %v11899_v30 = vcombine.low %v4024_v47, %v4027_v35  ;;  %v1478_v53 = vrot.slane %v1477_v17, 4  ;;  %v1486_v31 = vrot.slane %v1484_v23, 4  ;;  %v2864_v26 = vld [vmem:[#allocation2 + $0x54] sm:$0xe] }
  0xb5   : > { %v1943_v15 = vsel %vm13496_vm11, %v11756_v21, %v1942_v61  ;;  %v1469_v50 = vsel %vm13590_vm14, %v1464_v29, %v1468_v7  ;;  %v1944_v62 = vrot.slane %v1942_v61, 4  ;;  %v11757_v32 = vrot.slane %v1820_v55, 9  ;;  %v2321_v7 = vld [vmem:[#allocation2 + $0x5c] sm:$0x1]  ;;  %v13969_v61 = vpop.permute.xlu1 %2060 }
  0xb6   : > { %3835 = vrot.lane.b32.xlu1 %v11867_v3, %s13257_s18  ;;  %v1949_v51 = vrot.slane %v1821_v36, 5  ;;  %v11740_v28 = vcombine.low %v1459_v27, %v1469_v50  ;;  %v1487_v34 = vor.u32 %v1486_v31, %v1482_v40  ;;  %v1492_v52 = vrot.slane %v1490_v25, 5  ;;  %v2865_v3 = vld [vmem:[#allocation2 + $0x58] sm:$0xf] }
  0xb7   : > { %v1952_v47 = vrot.slane %v1822_v6, 5  ;;  %v1946_v4 = vsel %vm13496_vm11, %v1944_v62, %v1945_v19  ;;  %v579_v43 = vrot.slane %v577_v5, 7  ;;  %v1483_v2 = vsel %vm13590_vm14, %v1478_v53, %v1482_v40  ;;  %v2866_v5 = vld [vmem:[#allocation2 + $0x5c] sm:$0x1]  ;;  %v13975_v40 = vpop.permute.xlu0 %2062  ;;  %v13077_v19 = vld [vmem:[#allocation2 + $0x54] sm:$0xff]   ;;  %v335_v62 = vld [vmem:[%s13318_s10 + $0x88] sm:$0xff] }
  0xb8   : > { %v1950_v21 = vsel %vm13496_vm11, %v11757_v32, %v1949_v51  ;;  %v1951_v35 = vrot.slane %v1949_v51, 4  ;;  %1746 = vrot.lane.b32.xlu0 %v11740_v28, %s13255_s16  ;;  %v1488_v59 = vrot.slane %v1487_v34, 4  ;;  %v11772_v11 = vcombine.low %v1943_v15, %v1946_v4 }
  0xb9   : > { %v974_v10 = vsel %vm13386_vm7, %v569_v63, %v973_v58  ;;  %v582_v49 = vor.u32 %v580_v0, %v579_v43  ;;  %v584_v13 = vrot.slane %v579_v43, 4  ;;  %v2494_v55 = vshrl.u32 %v2319_v38, 16 }
  0xba   : > { %4156 = vrot.lane.b32.xlu1 %v11899_v30, %s13254_s15  ;;  %v1953_v12 = vsel %vm13496_vm11, %v1951_v35, %v1952_v47  ;;  %975 = vst [vmem:[#allocation2 + $0x60] sm:$0x1] %v974_v10  ;;  %v1493_v17 = vsel %vm13590_vm14, %v1488_v59, %v1492_v52  ;;  %v2497_v20 = vshll.u32 %v2319_v38, 16  ;;  %v2503_v25 = vshll.u32 %v2320_v56, 16  ;;  %v838_v10 = vld [vmem:[#allocation2 + $0x6c] sm:$0xf] }
  0xbb   : > { %v11773_v23 = vcombine.low %v1950_v21, %v1953_v12  ;;  %v11741_v63 = vcombine.low %v1483_v2, %v1493_v17  ;;  %v583_v36 = vsel %vm13337_vm4, %v575_v46, %v582_v49  ;;  %v2496_v27 = vrot.slane %v2494_v55, 4  ;;  %v14006_v55 = vld [vmem:[#allocation2 + $0x60] sm:$0xe] }
  0xbc   : > { %v2507_v29 = vshrl.u32 %v2320_v56, 16  ;;  %2070 = vrot.lane.b32.xlu0 %v11772_v11, %s13253_s14  ;;  %834 = vst.msk [vmem:[#allocation2 + $0x64] sm:$0xf] %vm17873_vm2, %v583_v36  ;;  %v2499_v6 = vrot.slane %v2497_v20, 5  ;;  %v2505_v30 = vrot.slane %v2503_v25, 5  ;;  %v2513_v53 = vshll.u32 %v2321_v7, 16 }
  0xbd   : > { %v836_v31 = vsel %vm13386_vm7, %v584_v13, %v835_v1  ;;  %v11820_v46 = vrot.slane %v2864_v26, 9  ;;  %v2986_v15 = vrot.slane %v2865_v3, 5  ;;  %v2989_v50 = vrot.slane %v2866_v5, 5 }
  0xbe   : > { %1748 = vrot.lane.b32.xlu1 %v11741_v63, %s13255_s16  ;;  %v2509_v42 = vrot.slane %v2507_v29, 4  ;;  %837 = vst [vmem:[#allocation2 + $0x68] sm:$0x1] %v836_v31  ;;  %v11710_v32 = vrot.slane %v580_v0, 11  ;;  %v2500_v51 = vor.u32 %v2499_v6, %v2496_v27  ;;  %v2515_v58 = vrot.slane %v2513_v53, 5  ;;  %v13994_v0 = vpop.permute.xlu1 %3104 }
  0xbf   : > { %v586_v28 = vshrl.u32 %v13868_v16, 16  ;;  %v2988_v52 = vrot.slane %v2986_v15, 4  ;;  %v589_v47 = vshll.u32 %v13868_v16, 16  ;;  %v2987_v21 = vsel %vm13496_vm11, %v11820_v46, %v2986_v15  ;;  %v842_v46 = vld [vmem:[#allocation2 + $0x74] sm:$0x1] }
  0xc0   : > { %v2510_v34 = vor.u32 %v2509_v42, %v2505_v30  ;;  %2248 = vrot.lane.b32.xlu0 %v13077_v19, %s13250_s11  ;;  %v2501_v38 = vrot.slane %v2500_v51, 4  ;;  %v12406_v35 = vpack.c.bf16 %v335_v62, %v335_v62  ;;  %v14016_v15 = vld [vmem:[#allocation2 + $0x60] sm:$0xe]  ;;  %vm4194_vm3 = vcmask 294144  }
  0xc1   : > { %v2322_v4 = vld [vmem:[#allocation2 + $0x60] sm:$0xf]  ;;  %v13992_v44 = vrot.slane %v586_v28, 7  ;;  %v2990_v1 = vsel %vm13496_vm11, %v2988_v52, %v2989_v50  ;;  %v13999_v2 = vpop.permute.xlu0 %1734 }
  0xc2   : > { %2072 = vrot.lane.b32.xlu1 %v11773_v23, %s13253_s14  ;;  %v2511_v43 = vrot.slane %v2510_v34, 4  ;;  %v2518_v56 = vshrl.u32 %v2322_v4, 16  ;;  %v2521_v7 = vshll.u32 %v2322_v4, 16  ;;  %v2506_v59 = vsel %vm13590_vm14, %v2501_v38, %v2505_v30  ;;  %v3363_v26 = vld [vmem:[#allocation2 + $0x60] sm:$0xf]  ;;  %v14018_v50 = vpop.permute.xlu1 %4148 }
  0xc3   : > { %v591_v11 = vor.u32 %v589_v47, %v13992_v44  ;;  %v13078_v3 = vld [vmem:[#allocation2 + $0x60] sm:$0xff]   ;;  %v11836_v13 = vcombine.low %v2987_v21, %v2990_v1  ;;  %v594_v29 = vshrl.u32 %v12406_v35, 16  ;;  %v597_v19 = vshll.u32 %v12406_v35, 16  ;;  %17920 = vst [vmem:[#allocation7_spill] sm:$0xff] %v14018_v50 }
  0xc4   : > { %v2516_v5 = vsel %vm13590_vm14, %v2511_v43, %v2515_v58  ;;  %v2323_v12 = vld [vmem:[#allocation2 + $0x64] sm:$0xf]  ;;  %v2520_v49 = vrot.slane %v2518_v56, 4  ;;  %v2523_v20 = vrot.slane %v2521_v7, 5  ;;  %v3538_v34 = vshrl.u32 %v3363_v26, 16  ;;  %v336_v43 = vld [vmem:[%s13318_s10 + $0x90] sm:$0xff] }
  0xc5   : > { %v11804_v17 = vcombine.low %v2506_v59, %v2516_v5  ;;  %v1076_v23 = vld [vmem:[#allocation2 + $0x68] sm:$0x1]  ;;  %v2527_v25 = vshll.u32 %v2323_v12, 16  ;;  %v2531_v63 = vshrl.u32 %v2323_v12, 16  ;;  %v2868_v27 = vld [vmem:[#allocation2 + $0x64] sm:$0xf]  ;;  %v839_v6 = vsel %vm13346_vm6, %v591_v11, %v838_v10  ;;  %v14020_v62 = vpop.permute.xlu0 %1736 }
  0xc6   : > { %2250 = vrot.lane.b32.xlu1 %v13078_v3, %s13250_s11  ;;  %v1077_v36 = vsel %vm13449_vm10, %v11710_v32, %v1076_v23  ;;  %v2524_v30 = vor.u32 %v2523_v20, %v2520_v49  ;;  %v2993_v42 = vrot.slane %v2868_v27, 5  ;;  %840 = vst [vmem:[#allocation2 + $0x6c] sm:$0xf] %v839_v6  ;;  %v592_v32 = vrot.slane %v13992_v44, 4  ;;  %v3364_v58 = vld [vmem:[#allocation2 + $0x64] sm:$0xf] }
  0xc7   : > { %2793 = vrot.lane.b32.xlu0 %v11804_v17, %s13256_s17  ;;  %1078 = vst [vmem:[#allocation2 + $0x68] sm:$0x1] %v1077_v36  ;;  %v14014_v53 = vrot.slane %v2527_v25, 5  ;;  %v2533_v31 = vrot.slane %v2531_v63, 4  ;;  %v596_v51 = vrot.slane %v594_v29, 7  ;;  %v3541_v52 = vshll.u32 %v3363_v26, 16  ;;  %v14040_v63 = vpop.permute.xlu1 %2064 }
  0xc8   : > { %v14023_v47 = vrot.slane %v2524_v30, 4  ;;  %v11821_v4 = vrot.slane %v14006_v55, 9  ;;  %v14027_v21 = vrot.slane %v597_v19, 11  ;;  %v14029_v35 = vld [vmem:[#allocation2 + $0x60] sm:$0xf]  ;;  %v3540_v59 = vrot.slane %v3538_v34, 4 }
  0xc9   : > { %v2534_v38 = vor.u32 %v2533_v31, %v14014_v53  ;;  %v13079_v56 = vld [vmem:[#allocation2 + $0x60] sm:$0xff]   ;;  %v599_v7 = vor.u32 %v597_v19, %v596_v51  ;;  %v601_v1 = vrot.slane %v596_v51, 4  ;;  %v3543_v44 = vrot.slane %v3541_v52, 5  ;;  %v14042_v36 = vpop.permute.xlu0 %2781  ;;  %v337_v51 = vld [vmem:[%s13318_s10 + $0x98] sm:$0xff] }
  0xca   : > { %v3909_v11 = vld [vmem:[#allocation2 + $0x64] sm:$0xf]  ;;  %v2995_v26 = vrot.slane %v2993_v42, 4  ;;  %v3547_v3 = vshll.u32 %v3364_v58, 16  ;;  %v3551_v5 = vshrl.u32 %v3364_v58, 16  ;;  %v11884_v17 = vrot.slane %v14016_v15, 9 }
  0xcb   : > { %v2535_v10 = vrot.slane %v2534_v38, 4  ;;  %3114 = vrot.lane.b32.xlu0 %v11836_v13, %s13252_s13  ;;  %v600_v12 = vsel %vm13337_vm4, %v592_v32, %v599_v7  ;;  %v3544_v49 = vor.u32 %v3543_v44, %v3540_v59  ;;  %v843_v55 = vsel %vm13386_vm7, %v601_v1, %v842_v46  ;;  %v338_v44 = vld [vmem:[%s13318_s10 + $0xa0] sm:$0xff] }
  0xcc   : > { %841 = vst.msk [vmem:[#allocation2 + $0x70] sm:$0xf] %vm17873_vm2, %v600_v12  ;;  %v3549_v23 = vrot.slane %v3547_v3, 5  ;;  %v3553_v20 = vrot.slane %v3551_v5, 4  ;;  %844 = vst [vmem:[#allocation2 + $0x74] sm:$0x1] %v843_v55  ;;  %v14044_v6 = vpack.c.bf16 %v336_v43, %v336_v43  ;;  %v2994_v58 = vsel %vm13496_vm11, %v11821_v4, %v2993_v42  ;;  %v14071_v12 = vpop.permute.xlu1 %2783 }
  0xcd   : > { %v4030_v25 = vrot.slane %v3909_v11, 5  ;;  %v1495_v13 = vshrl.u32 %v14029_v35, 16  ;;  %v976_v19 = vld [vmem:[#allocation2 + $0x6c] sm:$0x1]  ;;  %v3545_v32 = vrot.slane %v3544_v49, 4  ;;  %v2530_v16 = vsel %vm13590_vm14, %v14023_v47, %v14014_v53 }
  0xce   : > { %v2324_v27 = vld [vmem:[#allocation2 + $0x68] sm:$0x1]  ;;  %v977_v46 = vsel %vm13386_vm7, %v586_v28, %v976_v19  ;;  %v3554_v34 = vor.u32 %v3553_v20, %v3549_v23  ;;  %v14062_v4 = vpack.c.bf16 %v337_v51, %v337_v51  ;;  %v1276_v47 = vld [vmem:[#allocation2 + $0x64] sm:$0xf] }
  0xcf   : > { %v2869_v29 = vld [vmem:[#allocation2 + $0x68] sm:$0x1]  ;;  %v2537_v30 = vshll.u32 %v2324_v27, 16  ;;  %3292 = vrot.lane.b32.xlu0 %v13079_v56, %s13251_s12  ;;  %978 = vst [vmem:[#allocation2 + $0x6c] sm:$0x1] %v977_v46  ;;  %v4032_v43 = vrot.slane %v4030_v25, 4  ;;  %v3550_v1 = vsel %vm13590_vm14, %v3545_v32, %v3549_v23  ;;  %v4031_v53 = vsel %vm13496_vm11, %v11884_v17, %v4030_v25 }
  0xd0   : > { %v2996_v31 = vrot.slane %v2869_v29, 5  ;;  %v3365_v15 = vld [vmem:[#allocation2 + $0x68] sm:$0x1]  ;;  %v3555_v59 = vrot.slane %v3554_v34, 4  ;;  %v1497_v5 = vrot.slane %v1495_v13, 4  ;;  %v14073_v49 = vpop.permute.xlu0 %3825  ;;  %v1504_v32 = vshll.u32 %v1276_v47, 16 }
  0xd1   : > { %v3557_v52 = vshll.u32 %v3365_v15, 16  ;;  %v3910_v38 = vld [vmem:[#allocation2 + $0x68] sm:$0x1]  ;;  %v2539_v56 = vrot.slane %v2537_v30, 5  ;;  %17921 = vst [vmem:[#allocation8_spill] sm:$0xff] %v14073_v49  ;;  %v1508_v51 = vshrl.u32 %v1276_v47, 16 }
  0xd2   : > { %v2997_v28 = vsel %vm13496_vm11, %v2995_v26, %v2996_v31  ;;  %v4033_v7 = vrot.slane %v3910_v38, 5  ;;  %v339_v11 = vld [vmem:[%s13318_s10 + $0xa8] sm:$0xff]  ;;  %v1498_v26 = vshll.u32 %v14029_v35, 16 }
  0xd3   : > { %v3559_v42 = vrot.slane %v3557_v52, 5  ;;  %v2540_v3 = vsel %vm13590_vm14, %v2535_v10, %v2539_v56  ;;  %v11837_v23 = vcombine.low %v2994_v58, %v2997_v28  ;;  %v1079_v27 = vld [vmem:[#allocation2 + $0x74] sm:$0x1]  ;;  %v3367_v29 = vld [vmem:[#allocation2 + $0x70] sm:$0xf]  ;;  %v1510_v47 = vrot.slane %v1508_v51, 4 }
  0xd4   : > { %v11805_v55 = vcombine.low %v2530_v16, %v2540_v3  ;;  %v4034_v10 = vsel %vm13496_vm11, %v4032_v43, %v4033_v7  ;;  %v1080_v17 = vsel %vm13449_vm10, %v14027_v21, %v1079_v27  ;;  %v3571_v35 = vshll.u32 %v3367_v29, 16  ;;  %v3911_v13 = vld [vmem:[#allocation2 + $0x6c] sm:$0xe]  ;;  %v3912_v30 = vld [vmem:[#allocation2 + $0x70] sm:$0xf] }
  0xd5   : > { %v3560_v20 = vsel %vm13590_vm14, %v3555_v59, %v3559_v42  ;;  %v3575_v25 = vshrl.u32 %v3367_v29, 16  ;;  %1081 = vst [vmem:[#allocation2 + $0x74] sm:$0x1] %v1080_v17  ;;  %v4037_v31 = vrot.slane %v3912_v30, 5  ;;  %v1277_v46 = vld [vmem:[#allocation2 + $0x68] sm:$0x1]  ;;  %v11900_v52 = vcombine.low %v4031_v53, %v4034_v10 }
  0xd6   : > { %v11868_v19 = vcombine.low %v3550_v1, %v3560_v20  ;;  %2795 = vrot.lane.b32.xlu1 %v11805_v55, %s13256_s17  ;;  %v1500_v15 = vrot.slane %v1498_v26, 5  ;;  %v3366_v58 = vld [vmem:[#allocation2 + $0x6c] sm:$0xf]  ;;  %v14084_v34 = vrot.slane %v3571_v35, 5  ;;  %v1279_v38 = vld [vmem:[#allocation2 + $0x70] sm:$0xf]  ;;  %v14086_v21 = vpack.c.bf16 %v338_v44, %v338_v44  ;;  %v14090_v26 = vpop.permute.xlu1 %3827 }
  0xd7   : > { %v14088_v43 = vpack.c.bf16 %v339_v11, %v339_v11  ;;  %v3562_v16 = vshrl.u32 %v3366_v58, 16  ;;  %v3565_v56 = vshll.u32 %v3366_v58, 16  ;;  %v3577_v28 = vrot.slane %v3575_v25, 4  ;;  %v1278_v1 = vld [vmem:[#allocation2 + $0x6c] sm:$0xf] }
  0xd8   : > { %3837 = vrot.lane.b32.xlu0 %v11868_v19, %s13257_s18  ;;  %v11885_v7 = vrot.slane %v3911_v13, 9  ;;  %v4039_v59 = vrot.slane %v4037_v31, 4  ;;  %v1501_v42 = vor.u32 %v1500_v15, %v1497_v5  ;;  %v1506_v3 = vrot.slane %v1504_v32, 5  ;;  %v14092_v55 = vpop.permute.xlu0 %1738  ;;  %v13080_v53 = vld [vmem:[#allocation2 + $0x6c] sm:$0xff]   ;;  %v1823_v58 = vld [vmem:[#allocation2 + $0x60] sm:$0xe] }
  0xd9   : > { %v3564_v44 = vrot.slane %v3562_v16, 4  ;;  %v3567_v20 = vrot.slane %v3565_v56, 5  ;;  %v3578_v11 = vor.u32 %v3577_v28, %v14084_v34  ;;  %v1514_v27 = vshll.u32 %v1277_v46, 16  ;;  %v2870_v49 = vld [vmem:[#allocation2 + $0x6c] sm:$0xe] }
  0xda   : > { %3116 = vrot.lane.b32.xlu1 %v11837_v23, %s13252_s13  ;;  %v1502_v29 = vrot.slane %v1501_v42, 4  ;;  %v1511_v10 = vor.u32 %v1510_v47, %v1506_v3  ;;  %v1519_v19 = vshrl.u32 %v1278_v1, 16  ;;  %v1522_v5 = vshll.u32 %v1278_v1, 16 }
  0xdb   : > { %v3568_v17 = vor.u32 %v3567_v20, %v3564_v44  ;;  %v3579_v35 = vrot.slane %v3578_v11, 4  ;;  %v1516_v25 = vrot.slane %v1514_v27, 5  ;;  %v1528_v13 = vshll.u32 %v1279_v38, 16  ;;  %v14108_v11 = vpop.permute.xlu1 %1740 }
  0xdc   : > { %4158 = vrot.lane.b32.xlu0 %v11900_v52, %s13254_s15  ;;  %v3368_v30 = vld [vmem:[#allocation2 + $0x74] sm:$0x1]  ;;  %v14099_v23 = vsel %vm13496_vm11, %v11885_v7, %v4037_v31  ;;  %v1507_v32 = vsel %vm13590_vm14, %v1502_v29, %v1506_v3  ;;  %v1512_v46 = vrot.slane %v1511_v10, 4  ;;  %v1521_v51 = vrot.slane %v1519_v19, 4  ;;  %v1824_v52 = vld [vmem:[#allocation2 + $0x64] sm:$0xf]  ;;  %v14104_v47 = vpop.permute.xlu0 %2785 }
  0xdd   : > { %v3913_v15 = vld [vmem:[#allocation2 + $0x74] sm:$0x1]  ;;  %v3569_v16 = vrot.slane %v3568_v17, 4  ;;  %v3581_v56 = vshll.u32 %v3368_v30, 16  ;;  %v1524_v42 = vrot.slane %v1522_v5, 5  ;;  %v1530_v7 = vrot.slane %v1528_v13, 5 }
  0xde   : > { %3294 = vrot.lane.b32.xlu1 %v13080_v53, %s13251_s12  ;;  %v4040_v28 = vrot.slane %v3913_v15, 5  ;;  %v1280_v1 = vld [vmem:[#allocation2 + $0x74] sm:$0x1]  ;;  %v1517_v31 = vsel %vm13590_vm14, %v1512_v46, %v1516_v25  ;;  %v1532_v44 = vshrl.u32 %v1279_v38, 16  ;;  %v1825_v3 = vld [vmem:[#allocation2 + $0x68] sm:$0x1] }
  0xdf   : > { %v1538_v20 = vshll.u32 %v1280_v1, 16  ;;  %v3574_v53 = vsel %vm13590_vm14, %v3569_v16, %v14084_v34  ;;  %v3583_v27 = vrot.slane %v3581_v56, 5  ;;  %v11742_v10 = vcombine.low %v1507_v32, %v1517_v31  ;;  %v1826_v19 = vld [vmem:[#allocation2 + $0x6c] sm:$0xe]  ;;  %v1827_v38 = vld [vmem:[#allocation2 + $0x70] sm:$0xf] }
  0xe0   : > { %v4041_v29 = vsel %vm13496_vm11, %v4039_v59, %v4040_v28  ;;  %v1525_v17 = vor.u32 %v1524_v42, %v1521_v51  ;;  %v1534_v25 = vrot.slane %v1532_v44, 4  ;;  %v1828_v30 = vld [vmem:[#allocation2 + $0x74] sm:$0x1]  ;;  %v11758_v46 = vrot.slane %v1823_v58, 9  ;;  %v14119_v56 = vpop.permute.xlu0 %3106  ;;  %v13084_v51 = vld [vmem:[#allocation2 + $0xc] sm:$0xff]   ;;  %v13089_v42 = vld [vmem:[#allocation2 + $0x24] sm:$0xff]  }
  0xe1   : > { %v11901_v5 = vcombine.low %v14099_v23, %v4041_v29  ;;  %v1540_v13 = vrot.slane %v1538_v20, 5  ;;  %v3584_v15 = vsel %vm13590_vm14, %v3579_v35, %v3583_v27  ;;  %1750 = vrot.lane.b32.xlu0 %v11742_v10, %s13255_s16  ;;  %v1956_v34 = vrot.slane %v1824_v52, 5  ;;  %v13083_v23 = vld [vmem:[#allocation2] sm:$0xff]   ;;  %v13090_v31 = vld [vmem:[#allocation2 + $0x18] sm:$0xff]   ;;  %v13094_v29 = vld [vmem:[#allocation2 + $0x30] sm:$0xff]   ;;  %1236 = vst.msk [vmem:[#allocation4 + $0x8] sm:$0xff] %vm1234_vm15, %v13084_v51 }
  0xe2   : > { %v1959_v16 = vrot.slane %v1825_v3, 5  ;;  %v11869_v59 = vcombine.low %v3574_v53, %v3584_v15  ;;  %v1526_v32 = vrot.slane %v1525_v17, 4  ;;  %v1535_v28 = vor.u32 %v1534_v25, %v1530_v7  ;;  %v845_v15 = vld [vmem:[#allocation2 + $0x78] sm:$0xf]  ;;  %v2327_v50 = vld [vmem:[#allocation2 + $0x74] sm:$0x1] }
  0xe3   : > { %v11759_v1 = vrot.slane %v1826_v19, 9  ;;  %v1957_v44 = vsel %vm13496_vm11, %v11758_v46, %v1956_v34  ;;  %v1958_v20 = vrot.slane %v1956_v34, 4  ;;  %v1963_v35 = vrot.slane %v1827_v38, 5  ;;  %v13095_v19 = vld [vmem:[#allocation2 + $0x3c] sm:$0xff]   ;;  %v14137_v46 = vld [vmem:[#allocation2 + $0x70] sm:$0xf] }
  0xe4   : > { %v1966_v27 = vrot.slane %v1828_v30, 5  ;;  %3839 = vrot.lane.b32.xlu1 %v11869_v59, %s13257_s18  ;;  %v1531_v58 = vsel %vm13590_vm14, %v1526_v32, %v1530_v7  ;;  %v1536_v52 = vrot.slane %v1535_v28, 4  ;;  %v603_v3 = vshrl.u32 %v14044_v6, 16  ;;  %v14128_v10 = vpop.permute.xlu1 %2787  ;;  %v2325_v7 = vld [vmem:[#allocation2 + $0x6c] sm:$0xf]  ;;  %v14139_v34 = vpop.permute.xlu0 %3284  ;;  %1235 = vst.msk [vmem:[#allocation4] sm:$0xff] %vm1234_vm15, %v13083_v23 }
  0xe5   : > { %v606_v53 = vshll.u32 %v14044_v6, 16  ;;  %v1960_v17 = vsel %vm13496_vm11, %v1958_v20, %v1959_v16  ;;  %v14134_v25 = vsel %vm13496_vm11, %v11759_v1, %v1963_v35  ;;  %v1965_v38 = vrot.slane %v1963_v35, 4  ;;  %v849_v1 = vld [vmem:[#allocation2 + $0x80] sm:$0x1]  ;;  %1238 = vst.msk [vmem:[#allocation4 + $0x18] sm:$0xff] %vm1234_vm15, %v13089_v42  ;;  %1237 = vst.msk [vmem:[#allocation4 + $0x10] sm:$0xff] %vm1234_vm15, %v13090_v31 }
  0xe6   : > { %v611_v30 = vshrl.u32 %v14062_v4, 16  ;;  %v1541_v59 = vsel %vm13590_vm14, %v1536_v52, %v1540_v13  ;;  %v11774_v32 = vcombine.low %v1957_v44, %v1960_v17  ;;  %v605_v16 = vrot.slane %v603_v3, 7  ;;  %v13081_v44 = vld [vmem:[#allocation2 + $0x6c] sm:$0xff]   ;;  %1239 = vst.msk [vmem:[#allocation4 + $0x20] sm:$0xff] %vm1234_vm15, %v13094_v29  ;;  %1240 = vst.msk [vmem:[#allocation4 + $0x28] sm:$0xff] %vm1234_vm15, %v13095_v19  ;;  %v13101_v23 = vld [vmem:[#allocation2 + $0x54] sm:$0xff]  }
  0xe7   : > { %v614_v28 = vshll.u32 %v14062_v4, 16  ;;  %v11743_v20 = vcombine.low %v1531_v58, %v1541_v59  ;;  %v14148_v35 = vsel %vm13496_vm11, %v1965_v38, %v1966_v27  ;;  %v2871_v27 = vld [vmem:[#allocation2 + $0x70] sm:$0xf]  ;;  %v14158_v58 = vld [vmem:[#allocation2 + $0x74] sm:$0x1]  ;;  %1783 = vst.msk [vmem:[#allocation4] sm:$0xff] %vm1782_vm1, %v13999_v2 }
  0xe8   : > { %v613_v9 = vrot.slane %v611_v30, 7  ;;  %4160 = vrot.lane.b32.xlu1 %v11901_v5, %s13254_s15  ;;  %2074 = vrot.lane.b32.xlu0 %v11774_v32, %s13253_s14  ;;  %v11775_v13 = vcombine.low %v14134_v25, %v14148_v35  ;;  %v608_v52 = vor.u32 %v606_v53, %v605_v16  ;;  %v609_v4 = vrot.slane %v605_v16, 4  ;;  %v13100_v5 = vld [vmem:[#allocation2 + $0x48] sm:$0xff]   ;;  %v14164_v30 = vpop.permute.xlu1 %3108  ;;  %1784 = vst.msk [vmem:[#allocation4 + $0x8] sm:$0xff] %vm1782_vm1, %v14020_v62 }
  0xe9   : > { %v14154_v17 = vrot.slane %v614_v28, 11  ;;  %v2542_v42 = vshrl.u32 %v2325_v7, 16  ;;  %v2545_v31 = vshll.u32 %v2325_v7, 16  ;;  %v2551_v29 = vshll.u32 %v14137_v46, 16  ;;  %1786 = vst.msk [vmem:[#allocation4 + $0x18] sm:$0xff] %vm1782_vm1, %v14108_v11  ;;  %1785 = vst.msk [vmem:[#allocation4 + $0x10] sm:$0xff] %vm1782_vm1, %v14092_v55 }
  0xea   : > { %v616_v53 = vor.u32 %v614_v28, %v613_v9  ;;  %v618_v38 = vrot.slane %v613_v9, 4  ;;  %v846_v51 = vsel %vm13346_vm6, %v608_v52, %v845_v15  ;;  %1241 = vst.msk [vmem:[#allocation4 + $0x30] sm:$0xff] %vm1234_vm15, %v13100_v5  ;;  %v2555_v2 = vshrl.u32 %v14137_v46, 16  ;;  %1242 = vst.msk [vmem:[#allocation4 + $0x38] sm:$0xff] %vm1234_vm15, %v13101_v23 }
  0xeb   : > { %847 = vst [vmem:[#allocation2 + $0x78] sm:$0xf] %v846_v51  ;;  %2107 = vst.msk [vmem:[#allocation4] sm:$0xff] %vm2106_vm5, %v13943_v48  ;;  %v2561_v19 = vshll.u32 %v2327_v50, 16  ;;  %v14191_v55 = vpop.permute.xlu0 %3829  ;;  %v2544_v48 = vrot.slane %v2542_v42, 4  ;;  %v2547_v50 = vrot.slane %v2545_v31, 5 }
  0xec   : > { %v617_v9 = vsel %vm13337_vm4, %v609_v4, %v616_v53  ;;  %v850_v62 = vsel %vm13386_vm7, %v618_v38, %v849_v1  ;;  %2108 = vst.msk [vmem:[#allocation4 + $0x8] sm:$0xff] %vm2106_vm5, %v13969_v61  ;;  %2110 = vst.msk [vmem:[#allocation4 + $0x18] sm:$0xff] %vm2106_vm5, %v14040_v63  ;;  %1752 = vrot.lane.b32.xlu1 %v11743_v20, %s13255_s16  ;;  %2252 = vrot.lane.b32.xlu0 %v13081_v44, %s13250_s11  ;;  %v2553_v11 = vrot.slane %v2551_v29, 5  ;;  %v3287_v28 = vpop.permute.xlu1 %3286  ;;  %v13091_v42 = vld [vmem:[%s17863_s1 + $0x10] ss:$0 sps:$4 sm:$0x33]  }
  0xed   : > { %2109 = vst.msk [vmem:[#allocation4 + $0x10] sm:$0xff] %vm2106_vm5, %v13975_v40  ;;  %851 = vst [vmem:[#allocation2 + $0x80] sm:$0x1] %v850_v62  ;;  %v11822_v61 = vrot.slane %v2870_v49, 9  ;;  %v2557_v15 = vrot.slane %v2555_v2, 4  ;;  %v2563_v63 = vrot.slane %v2561_v19, 5  ;;  %v2548_v46 = vor.u32 %v2547_v50, %v2544_v48 }
  0xee   : > { %848 = vst.msk [vmem:[#allocation2 + $0x7c] sm:$0xf] %vm17873_vm2, %v617_v9  ;;  %v3000_v7 = vrot.slane %v2871_v27, 5  ;;  %v3003_v40 = vrot.slane %v14158_v58, 5  ;;  %v620_v49 = vshrl.u32 %v14086_v21, 16  ;;  %v17922_v48 = vld [vmem:[#allocation8_spill] sm:$0xff] }
  0xef   : > { %v2558_v59 = vor.u32 %v2557_v15, %v2553_v11  ;;  %2286 = vst.msk [vmem:[#allocation4 + $0x8] sm:$0xff] %vm2284_vm8, %v13870_v8  ;;  %2285 = vst.msk [vmem:[#allocation4] sm:$0xff] %vm2284_vm8, %v13879_v39  ;;  %v2549_v1 = vrot.slane %v2548_v46, 4  ;;  %v623_v8 = vshll.u32 %v14086_v21, 16  ;;  %v628_v39 = vshrl.u32 %v14088_v43, 16  ;;  %v17923_v15 = vld [vmem:[#allocation7_spill] sm:$0xff] }
  0xf0   : > { %v14200_v32 = vsel %vm13496_vm11, %v11822_v61, %v3000_v7  ;;  %v3002_v16 = vrot.slane %v3000_v7, 4  ;;  %2288 = vst.msk [vmem:[#allocation4 + $0x18] sm:$0xff] %vm2284_vm8, %v13921_v54  ;;  %2287 = vst.msk [vmem:[#allocation4 + $0x10] sm:$0xff] %vm2284_vm8, %v13914_v33  ;;  %2076 = vrot.lane.b32.xlu1 %v11775_v13, %s13253_s14  ;;  %v631_v54 = vshll.u32 %v14088_v43, 16  ;;  %v14226_v33 = vpop.permute.xlu0 %4150  ;;  %v852_v43 = vld [vmem:[#allocation2 + $0x84] sm:$0xf] }
  0xf1   : > { %2831 = vst.msk [vmem:[#allocation4 + $0x8] sm:$0xff] %vm17874_vm9, %v14071_v12  ;;  %2830 = vst.msk [vmem:[#allocation4] sm:$0xff] %vm17874_vm9, %v14042_v36  ;;  %v2559_v25 = vrot.slane %v2558_v59, 4  ;;  %v622_v36 = vrot.slane %v620_v49, 7 }
  0xf2   : > { %2832 = vst.msk [vmem:[#allocation4 + $0x10] sm:$0xff] %vm17874_vm9, %v14104_v47  ;;  %2833 = vst.msk [vmem:[#allocation4 + $0x18] sm:$0xff] %vm17874_vm9, %v14128_v10  ;;  %v14230_v12 = vsel %vm13496_vm11, %v3002_v16, %v3003_v40  ;;  %v979_v47 = vld [vmem:[#allocation2 + $0x78] sm:$0x1]  ;;  %v2554_v10 = vsel %vm13590_vm14, %v2549_v1, %v2553_v11  ;;  %v14244_v20 = vld [vmem:[#allocation2 + $0x78] sm:$0xe] }
  0xf3   : > { %3152 = vst.msk [vmem:[#allocation4 + $0x8] sm:$0xff] %vm3150_vm12, %v13994_v0  ;;  %3151 = vst.msk [vmem:[#allocation4] sm:$0xff] %vm3150_vm12, %v13925_v41  ;;  %v630_v0 = vrot.slane %v628_v39, 7  ;;  %v980_v41 = vsel %vm13386_vm7, %v603_v3, %v979_v47  ;;  %v625_v44 = vor.u32 %v623_v8, %v622_v36  ;;  %v856_v3 = vld [vmem:[#allocation2 + $0x8c] sm:$0x1]  ;;  %v626_v58 = vrot.slane %v622_v36, 4 }
  0xf4   : > { %3153 = vst.msk [vmem:[#allocation4 + $0x10] sm:$0xff] %vm3150_vm12, %v14119_v56  ;;  %3154 = vst.msk [vmem:[#allocation4 + $0x18] sm:$0xff] %vm3150_vm12, %v14164_v30  ;;  %v2564_v56 = vsel %vm13590_vm14, %v2559_v25, %v2563_v63  ;;  %v1082_v35 = vld [vmem:[#allocation2 + $0x80] sm:$0x1]  ;;  %v14267_v53 = vrot.slane %v631_v54, 11  ;;  %v11823_v29 = vrot.slane %v14244_v20, 9 }
  0xf5   : > { %3330 = vst.msk [vmem:[#allocation4 + $0x8] sm:$0xff] %vm3328_vm13, %v13903_v37  ;;  %3329 = vst.msk [vmem:[#allocation4] sm:$0xff] %vm3328_vm13, %v13898_v24  ;;  %v2329_v13 = vld [vmem:[#allocation2 + $0x7c] sm:$0xf]  ;;  %v11838_v37 = vcombine.low %v14200_v32, %v14230_v12  ;;  %v11806_v24 = vcombine.low %v2554_v10, %v2564_v56  ;;  %v633_v5 = vor.u32 %v631_v54, %v630_v0  ;;  %v635_v51 = vrot.slane %v630_v0, 4  ;;  %v17924_v63 = vld [vmem:[#allocation6_spill] sm:$0xff] }
  0xf6   : > { %3331 = vst.msk [vmem:[#allocation4 + $0x10] sm:$0xff] %vm3328_vm13, %v14139_v34  ;;  %3332 = vst.msk [vmem:[#allocation4 + $0x18] sm:$0xff] %vm3328_vm13, %v3287_v28  ;;  %v1083_v34 = vsel %vm13449_vm10, %v14154_v17, %v1082_v35  ;;  %v2575_v52 = vshll.u32 %v2329_v13, 16  ;;  %v2579_v6 = vshrl.u32 %v2329_v13, 16  ;;  %v14264_v4 = vld [vmem:[#allocation2 + $0x7c] sm:$0xf]  ;;  %v853_v17 = vsel %vm13346_vm6, %v625_v44, %v852_v43  ;;  %v1743_v31 = vpop.permute.xlu0 %1742 }
  0xf7   : > { %981 = vst [vmem:[#allocation2 + $0x78] sm:$0x1] %v980_v41  ;;  %1084 = vst [vmem:[#allocation2 + $0x80] sm:$0x1] %v1083_v34  ;;  %v3007_v27 = vrot.slane %v14264_v4, 5  ;;  %2797 = vrot.lane.b32.xlu0 %v11806_v24, %s13256_s17  ;;  %v634_v9 = vsel %vm13337_vm4, %v626_v58, %v633_v5  ;;  %v340_v40 = vld [vmem:[%s13318_s10 + $0xb0] sm:$0xff] }
  0xf8   : > { %v3370_v38 = vld [vmem:[#allocation2 + $0x7c] sm:$0xf]  ;;  %v14270_v30 = vrot.slane %v2575_v52, 5  ;;  %v2581_v23 = vrot.slane %v2579_v6, 4  ;;  %854 = vst [vmem:[#allocation2 + $0x84] sm:$0xf] %v853_v17  ;;  %v14323_v24 = vpack.c.bf16 %v340_v40, %v340_v40 }
  0xf9   : > { %v14280_v2 = vld [vmem:[#allocation2 + $0x78] sm:$0xe]  ;;  %v14282_v19 = vld [vmem:[#allocation2 + $0x7c] sm:$0xf]  ;;  %1787 = vst.msk [vmem:[#allocation4 + $0x20] sm:$0xff] %vm1782_vm1, %v1743_v31  ;;  %v3595_v50 = vshll.u32 %v3370_v38, 16 }
  0xfa   : > { %v2582_v62 = vor.u32 %v2581_v23, %v14270_v30  ;;  %855 = vst.msk [vmem:[#allocation2 + $0x88] sm:$0xf] %vm17873_vm2, %v634_v9  ;;  %v3599_v11 = vshrl.u32 %v3370_v38, 16  ;;  %v14295_v61 = vrot.slane %v3007_v27, 4  ;;  %v4044_v7 = vrot.slane %v14282_v19, 5  ;;  %v341_v16 = vld [vmem:[%s13318_s10 + $0xb8] sm:$0xff]  ;;  %v2067_v54 = vpop.permute.xlu0 %2066 }
  0xfb   : > { %3875 = vst.msk [vmem:[#allocation4 + $0x8] sm:$0xff] %vm17875_vm0, %v14090_v26  ;;  %3874 = vst.msk [vmem:[#allocation4] sm:$0xff] %vm17875_vm0, %v17922_v48  ;;  %v857_v26 = vsel %vm13386_vm7, %v635_v51, %v856_v3  ;;  %vm4296_vm2 = vcmask 1041408   ;;  %3118 = vrot.lane.b32.xlu0 %v11838_v37, %s13252_s13  ;;  %v11886_v59 = vrot.slane %v14280_v2, 9  ;;  %v342_v28 = vld [vmem:[%s13318_s10 + $0xc0] sm:$0xff]  ;;  %v14325_v34 = vpack.c.bf16 %v341_v16, %v341_v16 }
  0xfc   : > { %3876 = vst.msk [vmem:[#allocation4 + $0x10] sm:$0xff] %vm17875_vm0, %v14191_v55  ;;  %v14308_v55 = vrot.slane %v3595_v50, 5  ;;  %v3601_v46 = vrot.slane %v3599_v11, 4  ;;  %858 = vst [vmem:[#allocation2 + $0x8c] sm:$0x1] %v857_v26  ;;  %13046 = vmatprep.subr.msk.bf16.mxu0 %vm4296_vm2, %v13091_v42  ;;  %v4298_v32 = vsel %vm4296_vm2, %v13091_v42, 0  ;;  %v3832_v47 = vpop.permute.xlu1 %3831  ;;  %v14332_v5 = vpack.c.bf16 %v342_v28, %v342_v28 }
  0xfd   : > { %4196 = vst.msk [vmem:[#allocation4 + $0x8] sm:$0xff] %vm4194_vm3, %v17923_v15  ;;  %4195 = vst.msk [vmem:[#allocation4] sm:$0xff] %vm4194_vm3, %v17924_v63  ;;  %v14313_v39 = vrot.slane %v2582_v62, 4  ;;  %12949 = vmatpush3.bf16.msra.mxu0 %v4298_v32  ;;  %v14320_v56 = vrot.slane %v4044_v7, 4  ;;  %v14340_v51 = vsel %vm13496_vm11, %v11823_v29, %v3007_v27  ;;  %v14342_v31 = vld [vmem:[#allocation2 + $0x7c] sm:$0xf] }
  0xfe   : > { %4197 = vst.msk [vmem:[#allocation4 + $0x10] sm:$0xff] %vm4194_vm3, %v14226_v33  ;;  %v13082_v1 = vld [vmem:[#allocation2 + $0x78] sm:$0xff]   ;;  %v2330_v25 = vld [vmem:[#allocation2 + $0x80] sm:$0x1]  ;;  %v3602_v43 = vor.u32 %v3601_v46, %v14308_v55  ;;  %v2245_v38 = vpop.permute.xlu0 %2244  ;;  %v343_v26 = vld [vmem:[%s13318_s10 + $0xc8] sm:$0xff]  ;;  %vm4247_vm2 = vcmask 293888  }
  0xff   : > { %v2328_v8 = vld [vmem:[#allocation2 + $0x78] sm:$0xf]  ;;  %v2875_v36 = vld [vmem:[#allocation2 + $0x80] sm:$0x1]  ;;  %2111 = vst.msk [vmem:[#allocation4 + $0x20] sm:$0xff] %vm2106_vm5, %v2067_v54  ;;  %2254 = vrot.lane.b32.xlu1 %v13082_v1, %s13250_s11  ;;  %v2585_v10 = vshll.u32 %v2330_v25, 16 }
 0x100   : > { %v2566_v33 = vshrl.u32 %v2328_v8, 16  ;;  %v2569_v12 = vshll.u32 %v2328_v8, 16  ;;  %v3010_v0 = vrot.slane %v2875_v36, 5  ;;  %v13085_v41 = vld [vmem:[#allocation2 + $0x78] sm:$0xff]   ;;  %3877 = vst.msk [vmem:[#allocation4 + $0x18] sm:$0xff] %vm17875_vm0, %v3832_v47  ;;  %v3603_v21 = vrot.slane %v3602_v43, 4  ;;  %v4153_v9 = vpop.permute.xlu1 %4152 }
 0x101   : > { %v982_v37 = vld [vmem:[#allocation2 + $0x84] sm:$0x1]  ;;  %v3369_v44 = vld [vmem:[#allocation2 + $0x78] sm:$0xf]  ;;  %v2587_v52 = vrot.slane %v2585_v10, 5  ;;  %3296 = vrot.lane.b32.xlu0 %v13085_v41, %s13251_s12  ;;  %2289 = vst.msk [vmem:[#allocation4 + $0x20] sm:$0xff] %vm2284_vm8, %v2245_v38 }
 0x102   : > { %v2568_v35 = vrot.slane %v2566_v33, 4  ;;  %v2571_v13 = vrot.slane %v2569_v12, 5  ;;  %v983_v6 = vsel %vm13386_vm7, %v620_v49, %v982_v37  ;;  %v3371_v3 = vld [vmem:[#allocation2 + $0x80] sm:$0x1]  ;;  %v3586_v58 = vshrl.u32 %v3369_v44, 16  ;;  %4198 = vst.msk [vmem:[#allocation4 + $0x18] sm:$0xff] %vm4194_vm3, %v4153_v9 }
 0x103   : > { %984 = vst [vmem:[#allocation2 + $0x84] sm:$0x1] %v983_v6  ;;  %v3589_v17 = vshll.u32 %v3369_v44, 16  ;;  %v3373_v42 = vld [vmem:[#allocation2 + $0x88] sm:$0xf]  ;;  %v2588_v4 = vsel %vm13590_vm14, %v14313_v39, %v2587_v52  ;;  %v3605_v62 = vshll.u32 %v3371_v3, 16  ;;  %v3011_v40 = vsel %vm13496_vm11, %v14295_v61, %v3010_v0 }
 0x104   : > { %v2572_v23 = vor.u32 %v2571_v13, %v2568_v35  ;;  %v3916_v49 = vld [vmem:[#allocation2 + $0x80] sm:$0x1]  ;;  %v3588_v20 = vrot.slane %v3586_v58, 4  ;;  %v1085_v48 = vld [vmem:[#allocation2 + $0x8c] sm:$0x1]  ;;  %v3619_v27 = vshll.u32 %v3373_v42, 16  ;;  %v1745_v25 = vpop.permute.xlu1 %1744  ;;  %v14363_v61 = vpack.c.bf16 %v343_v26, %v343_v26 }
 0x105   : > { %v3591_v50 = vrot.slane %v3589_v17, 5  ;;  %v1086_v11 = vsel %vm13449_vm10, %v14267_v53, %v1085_v48  ;;  %v3623_v15 = vshrl.u32 %v3373_v42, 16  ;;  %v3917_v63 = vld [vmem:[#allocation2 + $0x84] sm:$0xe]  ;;  %v3607_v46 = vrot.slane %v3605_v62, 5  ;;  %1788 = vst.msk [vmem:[#allocation4 + $0x28] sm:$0xff] %vm1782_vm1, %v1745_v25 }
 0x106   : > { %v2573_v29 = vrot.slane %v2572_v23, 4  ;;  %1087 = vst [vmem:[#allocation2 + $0x8c] sm:$0x1] %v1086_v11  ;;  %v14356_v32 = vrot.slane %v3619_v27, 5  ;;  %v4047_v16 = vrot.slane %v3916_v49, 5  ;;  %v1552_v36 = vshll.u32 %v14342_v31, 16 }
 0x107   : > { %v3918_v28 = vld [vmem:[#allocation2 + $0x88] sm:$0xf]  ;;  %v3592_v8 = vor.u32 %v3591_v50, %v3588_v20  ;;  %v3625_v39 = vrot.slane %v3623_v15, 4  ;;  %v1281_v54 = vld [vmem:[#allocation2 + $0x78] sm:$0xf]  ;;  %v3608_v47 = vsel %vm13590_vm14, %v3603_v21, %v3607_v46  ;;  %v11839_v0 = vcombine.low %v14340_v51, %v3011_v40  ;;  %v2790_v52 = vpop.permute.xlu0 %2789  ;;  %v4213_v40 = vld [vmem:[#allocation4 + $0x10] sm:$0xff] }
 0x108   : > { %v2578_v1 = vsel %vm13590_vm14, %v2573_v29, %v14270_v30  ;;  %v4051_v53 = vrot.slane %v3918_v28, 5  ;;  %v1543_v12 = vshrl.u32 %v1281_v54, 16  ;;  %v11887_v30 = vrot.slane %v3917_v63, 9  ;;  %v1283_v44 = vld [vmem:[#allocation2 + $0x80] sm:$0x1]  ;;  %v2069_v23 = vpop.permute.xlu1 %2068  ;;  %2834 = vst.msk [vmem:[#allocation4 + $0x20] sm:$0xff] %vm17874_vm9, %v2790_v52 }
 0x109   : > { %v11807_v33 = vcombine.low %v2578_v1, %v2588_v4  ;;  %v3593_v43 = vrot.slane %v3592_v8, 4  ;;  %v3626_v10 = vor.u32 %v3625_v39, %v14356_v32  ;;  %v4045_v35 = vsel %vm13496_vm11, %v11886_v59, %v4044_v7  ;;  %2112 = vst.msk [vmem:[#allocation4 + $0x28] sm:$0xff] %vm2106_vm5, %v2069_v23  ;;  %v4212_v29 = vld [vmem:[#allocation4 + $0x8] sm:$0xff]  ;;  %v1285_v63 = vld [vmem:[#allocation2 + $0x88] sm:$0xf] }
 0x10a   : > { %v3372_v41 = vld [vmem:[#allocation2 + $0x84] sm:$0xf]  ;;  %v4048_v13 = vsel %vm13496_vm11, %v14320_v56, %v4047_v16  ;;  %v4053_v37 = vrot.slane %v4051_v53, 4  ;;  %v1545_v7 = vrot.slane %v1543_v12, 4  ;;  %v1546_v59 = vshll.u32 %v1281_v54, 16  ;;  %v4211_v56 = vld [vmem:[#allocation4] sm:$0xff] }
 0x10b   : > { %2799 = vrot.lane.b32.xlu1 %v11807_v33, %s13256_s17  ;;  %v3598_v6 = vsel %vm13590_vm14, %v3593_v43, %v14308_v55  ;;  %v3610_v3 = vshrl.u32 %v3372_v41, 16  ;;  %v3613_v58 = vshll.u32 %v3372_v41, 16  ;;  %v3627_v38 = vrot.slane %v3626_v10, 4  ;;  %v1284_v19 = vld [vmem:[#allocation2 + $0x84] sm:$0xf]  ;;  %v3111_v50 = vpop.permute.xlu0 %3110  ;;  %12950 = vmatprep.mubr.msk.bf16.mxu0 %vm4247_vm2, %v4211_v56 }
 0x10c   : > { %v11870_v2 = vcombine.low %v3598_v6, %v3608_v47  ;;  %v14383_v51 = vrot.slane %v1552_v36, 5  ;;  %v11902_v49 = vcombine.low %v4045_v35, %v4048_v13  ;;  %v14388_v9 = vsel %vm13496_vm11, %v11887_v30, %v4051_v53  ;;  %v13087_v4 = vld [vmem:[#allocation2 + $0x84] sm:$0xff]   ;;  %3155 = vst.msk [vmem:[#allocation4 + $0x20] sm:$0xff] %vm3150_vm12, %v3111_v50  ;;  %12951 = vmatmul.mubr.msk.bf16.vlgmr.msra.gmra.mrb[0].mxu0 %vm4247_vm2, %v4212_v29  ;;  %v1829_v43 = vld [vmem:[#allocation2 + $0x78] sm:$0xe] }
 0x10d   : > { %v3374_v17 = vld [vmem:[#allocation2 + $0x8c] sm:$0x1]  ;;  %v3612_v21 = vrot.slane %v3610_v3, 4  ;;  %v3615_v42 = vrot.slane %v3613_v58, 5  ;;  %v1548_v48 = vrot.slane %v1546_v59, 5  ;;  %v1556_v27 = vshrl.u32 %v14342_v31, 16  ;;  %12954 = vmatprep.mubr.msk.bf16.mxu0 %vm4247_vm2, %v4213_v40 }
 0x10e   : > { %v3919_v55 = vld [vmem:[#allocation2 + $0x8c] sm:$0x1]  ;;  %3841 = vrot.lane.b32.xlu0 %v11870_v2, %s13257_s18  ;;  %v3629_v20 = vshll.u32 %v3374_v17, 16  ;;  %v1562_v15 = vshll.u32 %v1283_v44, 16  ;;  %v1567_v26 = vshrl.u32 %v1284_v19, 16  ;;  %v1570_v36 = vshll.u32 %v1284_v19, 16 }
 0x10f   : > { %3120 = vrot.lane.b32.xlu1 %v11839_v0, %s13252_s13  ;;  %v4054_v62 = vrot.slane %v3919_v55, 5  ;;  %v3616_v11 = vor.u32 %v3615_v42, %v3612_v21  ;;  %v1549_v28 = vor.u32 %v1548_v48, %v1545_v7  ;;  %v1558_v1 = vrot.slane %v1556_v27, 4  ;;  %v1286_v8 = vld [vmem:[#allocation2 + $0x8c] sm:$0x1]  ;;  %v1830_v47 = vld [vmem:[#allocation2 + $0x7c] sm:$0xf] }
 0x110   : > { %v3631_v46 = vrot.slane %v3629_v20, 5  ;;  %v1564_v53 = vrot.slane %v1562_v15, 5  ;;  %v1569_v54 = vrot.slane %v1567_v26, 4  ;;  %v1576_v30 = vshll.u32 %v1285_v63, 16  ;;  %v1831_v35 = vld [vmem:[#allocation2 + $0x80] sm:$0x1]  ;;  %v2247_v13 = vpop.permute.xlu1 %2246 }
 0x111   : > { %v4055_v16 = vsel %vm13496_vm11, %v4053_v37, %v4054_v62  ;;  %v3617_v31 = vrot.slane %v3616_v11, 4  ;;  %v1550_v33 = vrot.slane %v1549_v28, 4  ;;  %v1559_v12 = vor.u32 %v1558_v1, %v14383_v51  ;;  %v1832_v3 = vld [vmem:[#allocation2 + $0x84] sm:$0xe]  ;;  %v1833_v58 = vld [vmem:[#allocation2 + $0x88] sm:$0xf] }
 0x112   : > { %v11903_v39 = vcombine.low %v14388_v9, %v4055_v16  ;;  %v3632_v25 = vsel %vm13590_vm14, %v3627_v38, %v3631_v46  ;;  %4162 = vrot.lane.b32.xlu0 %v11902_v49, %s13254_s15  ;;  %v1580_v0 = vshrl.u32 %v1285_v63, 16  ;;  %v1586_v41 = vshll.u32 %v1286_v8, 16  ;;  %2290 = vst.msk [vmem:[#allocation4 + $0x28] sm:$0xff] %vm2284_vm8, %v2247_v13  ;;  %v3289_v38 = vpop.permute.xlu0 %3288  ;;  %v1834_v7 = vld [vmem:[#allocation2 + $0x8c] sm:$0x1]  ;;  %v344_v26 = vld [vmem:[%s13318_s10 + $0xd0] sm:$0xff] }
 0x113   : > { %3298 = vrot.lane.b32.xlu1 %v13087_v4, %s13251_s12  ;;  %v3622_v10 = vsel %vm13590_vm14, %v3617_v31, %v14356_v32  ;;  %v1555_v44 = vsel %vm13590_vm14, %v1550_v33, %v14383_v51  ;;  %v1560_v52 = vrot.slane %v1559_v12, 4  ;;  %v1572_v6 = vrot.slane %v1570_v36, 5  ;;  %3333 = vst.msk [vmem:[#allocation4 + $0x20] sm:$0xff] %vm3328_vm13, %v3289_v38  ;;  %v4214_v21 = vld [vmem:[#allocation4 + $0x18] sm:$0xff]  ;;  %v2331_v27 = vld [vmem:[#allocation2 + $0x84] sm:$0xf] }
 0x114   : > { %v11871_v37 = vcombine.low %v3622_v10, %v3632_v25  ;;  %v1578_v32 = vrot.slane %v1576_v30, 5  ;;  %v1582_v19 = vrot.slane %v1580_v0, 4  ;;  %v1588_v23 = vrot.slane %v1586_v41, 5  ;;  %v2332_v63 = vld [vmem:[#allocation2 + $0x88] sm:$0xf]  ;;  %12955 = vmatmul.mubr.msk.bf16.gmra.mrb[4].mxu0 %vm4247_vm2, %v4214_v21 }
 0x115   : > { %v11760_v2 = vrot.slane %v1829_v43, 9  ;;  %v1565_v59 = vsel %vm13590_vm14, %v1560_v52, %v1564_v53  ;;  %v1573_v51 = vor.u32 %v1572_v6, %v1569_v54  ;;  %v1970_v56 = vrot.slane %v1830_v47, 5  ;;  %v859_v1 = vld [vmem:[#allocation2 + $0x90] sm:$0xf]  ;;  %v2333_v54 = vld [vmem:[#allocation2 + $0x8c] sm:$0x1] }
 0x116   : > { %v1973_v17 = vrot.slane %v1831_v35, 5  ;;  %v11744_v42 = vcombine.low %v1555_v44, %v1565_v59  ;;  %v1583_v49 = vor.u32 %v1582_v19, %v1578_v32  ;;  %v11761_v55 = vrot.slane %v1832_v3, 9  ;;  %v863_v25 = vld [vmem:[#allocation2 + $0x98] sm:$0x1]  ;;  %v2876_v43 = vld [vmem:[#allocation2 + $0x84] sm:$0xe] }
 0x117   : > { %3843 = vrot.lane.b32.xlu1 %v11871_v37, %s13257_s18  ;;  %v1977_v9 = vrot.slane %v1833_v58, 5  ;;  %v1574_v4 = vrot.slane %v1573_v51, 4  ;;  %v1971_v20 = vsel %vm13496_vm11, %v11760_v2, %v1970_v56  ;;  %v1972_v62 = vrot.slane %v1970_v56, 4  ;;  %v2877_v47 = vld [vmem:[#allocation2 + $0x88] sm:$0xf]  ;;  %v13107_v2 = vld [vmem:[#allocation2 + $0x6c] sm:$0xff]  }
 0x118   : > { %v1980_v48 = vrot.slane %v1834_v7, 5  ;;  %1754 = vrot.lane.b32.xlu0 %v11744_v42, %s13255_s16  ;;  %v1584_v29 = vrot.slane %v1583_v49, 4  ;;  %v637_v15 = vshrl.u32 %v14323_v24, 16  ;;  %v640_v16 = vshll.u32 %v14323_v24, 16  ;;  %v13092_v30 = vld [vmem:[#allocation2 + $0x84] sm:$0xff]   ;;  %1244 = vst.msk [vmem:[#allocation4 + $0x48] sm:$0xff] %vm1234_vm15, %v13107_v2 }
 0x119   : > { %v1978_v50 = vsel %vm13496_vm11, %v11761_v55, %v1977_v9  ;;  %v1979_v11 = vrot.slane %v1977_v9, 4  ;;  %v1579_v40 = vsel %vm13590_vm14, %v1574_v4, %v1578_v32  ;;  %v1974_v46 = vsel %vm13496_vm11, %v1972_v62, %v1973_v17  ;;  %v2878_v37 = vld [vmem:[#allocation2 + $0x8c] sm:$0x1] }
 0x11a   : > { %v645_v28 = vshrl.u32 %v14325_v34, 16  ;;  %v1589_v8 = vsel %vm13590_vm14, %v1584_v29, %v1588_v23  ;;  %v11776_v31 = vcombine.low %v1971_v20, %v1974_v46  ;;  %v648_v36 = vshll.u32 %v14325_v34, 16  ;;  %v13106_v34 = vld [vmem:[#allocation2 + $0x60] sm:$0xff]  }
 0x11b   : > { %4164 = vrot.lane.b32.xlu1 %v11903_v39, %s13254_s15  ;;  %v1981_v53 = vsel %vm13496_vm11, %v1979_v11, %v1980_v48  ;;  %v639_v39 = vrot.slane %v637_v15, 7  ;;  %v11745_v33 = vcombine.low %v1579_v40, %v1589_v8  ;;  %v14438_v10 = vpack.c.bf16 %v344_v26, %v344_v26  ;;  %1243 = vst.msk [vmem:[#allocation4 + $0x40] sm:$0xff] %vm1234_vm15, %v13106_v34  ;;  %v866_v11 = vld [vmem:[#allocation2 + $0x9c] sm:$0xf] }
 0x11c   : > { %v647_v12 = vrot.slane %v645_v28, 7  ;;  %2078 = vrot.lane.b32.xlu0 %v11776_v31, %s13253_s14  ;;  %v2590_v35 = vshrl.u32 %v2331_v27, 16  ;;  %v2593_v13 = vshll.u32 %v2331_v27, 16  ;;  %v2792_v44 = vpop.permute.xlu1 %2791  ;;  %v11777_v52 = vcombine.low %v1978_v50, %v1981_v53 }
 0x11d   : > { %v642_v0 = vor.u32 %v640_v16, %v639_v39  ;;  %v643_v41 = vrot.slane %v639_v39, 4  ;;  %v2599_v58 = vshll.u32 %v2332_v63, 16  ;;  %2835 = vst.msk [vmem:[#allocation4 + $0x28] sm:$0xff] %vm17874_vm9, %v2792_v44  ;;  %v2603_v23 = vshrl.u32 %v2332_v63, 16 }
 0x11e   : > { %v650_v6 = vor.u32 %v648_v36, %v647_v12  ;;  %v652_v3 = vrot.slane %v647_v12, 4  ;;  %v2592_v32 = vrot.slane %v2590_v35, 4  ;;  %v2595_v19 = vrot.slane %v2593_v13, 5 }
 0x11f   : > { %1756 = vrot.lane.b32.xlu1 %v11745_v33, %s13255_s16  ;;  %v860_v38 = vsel %vm13346_vm6, %v642_v0, %v859_v1  ;;  %v2601_v59 = vrot.slane %v2599_v58, 5  ;;  %v2609_v51 = vshll.u32 %v2333_v54, 16  ;;  %vm17925_vm9 = vcmask 27648   ;;  %v3834_v48 = vpop.permute.xlu0 %3833 }
 0x120   : > { %v651_v7 = vsel %vm13337_vm4, %v643_v41, %v650_v6  ;;  %861 = vst [vmem:[#allocation2 + $0x90] sm:$0xf] %v860_v38  ;;  %v864_v56 = vsel %vm13386_vm7, %v652_v3, %v863_v25  ;;  %2256 = vrot.lane.b32.xlu0 %v13092_v30, %s13250_s11  ;;  %v2596_v17 = vor.u32 %v2595_v19, %v2592_v32  ;;  %v2605_v21 = vrot.slane %v2603_v23, 4  ;;  %v3113_v55 = vpop.permute.xlu1 %3112 }
 0x121   : > { %862 = vst.msk [vmem:[#allocation2 + $0x94] sm:$0xf] %vm17925_vm9, %v651_v7  ;;  %865 = vst [vmem:[#allocation2 + $0x98] sm:$0x1] %v864_v56  ;;  %v11824_v42 = vrot.slane %v2876_v43, 9  ;;  %v3014_v49 = vrot.slane %v2877_v47, 5 }
 0x122   : > { %v2611_v9 = vrot.slane %v2609_v51, 5  ;;  %v3017_v4 = vrot.slane %v2878_v37, 5  ;;  %v654_v20 = vshrl.u32 %v14332_v5, 16  ;;  %v657_v62 = vshll.u32 %v14332_v5, 16  ;;  %3156 = vst.msk [vmem:[#allocation4 + $0x28] sm:$0xff] %vm3150_vm12, %v3113_v55 }
 0x123   : > { %2080 = vrot.lane.b32.xlu1 %v11777_v52, %s13253_s14  ;;  %v2597_v27 = vrot.slane %v2596_v17, 4  ;;  %v2606_v29 = vor.u32 %v2605_v21, %v2601_v59  ;;  %v3016_v50 = vrot.slane %v3014_v49, 4  ;;  %3878 = vst.msk [vmem:[#allocation4 + $0x20] sm:$0xff] %vm17875_vm0, %v3834_v48  ;;  %v662_v26 = vshrl.u32 %v14363_v61, 16  ;;  %v4155_v25 = vpop.permute.xlu0 %4154 }
 0x124   : > { %v656_v63 = vrot.slane %v654_v20, 7  ;;  %v665_v40 = vshll.u32 %v14363_v61, 16  ;;  %v671_v46 = vshrl.u32 %v14438_v10, 16  ;;  %v11714_v16 = vrot.slane %v648_v36, 11  ;;  %v3291_v8 = vpop.permute.xlu1 %3290  ;;  %v870_v36 = vld [vmem:[#allocation2 + $0xa4] sm:$0x1] }
 0x125   : > { %v2602_v28 = vsel %vm13590_vm14, %v2597_v27, %v2601_v59  ;;  %v2607_v1 = vrot.slane %v2606_v29, 4  ;;  %v3015_v31 = vsel %vm13496_vm11, %v11824_v42, %v3014_v49  ;;  %v664_v54 = vrot.slane %v662_v26, 7  ;;  %3334 = vst.msk [vmem:[#allocation4 + $0x28] sm:$0xff] %vm3328_vm13, %v3291_v8  ;;  %v345_v49 = vld [vmem:[%s13318_s10 + $0xd8] sm:$0xff]  ;;  %v873_v27 = vld [vmem:[#allocation2 + $0xa8] sm:$0xf] }
 0x126   : > { %v659_v53 = vor.u32 %v657_v62, %v656_v63  ;;  %v660_v39 = vrot.slane %v656_v63, 4  ;;  %v3018_v12 = vsel %vm13496_vm11, %v3016_v50, %v3017_v4  ;;  %v14474_v43 = vrot.slane %v671_v46, 7  ;;  %4199 = vst.msk [vmem:[#allocation4 + $0x20] sm:$0xff] %vm4194_vm3, %v4155_v25 }
 0x127   : > { %v985_v33 = vld [vmem:[#allocation2 + $0x90] sm:$0x1]  ;;  %v2612_v61 = vsel %vm13590_vm14, %v2607_v1, %v2611_v9  ;;  %v674_v47 = vshll.u32 %v14438_v10, 16  ;;  %v667_v13 = vor.u32 %v665_v40, %v664_v54  ;;  %v14486_v3 = vld [vmem:[#allocation2 + $0x90] sm:$0xe]  ;;  %v669_v32 = vrot.slane %v664_v54, 4 }
 0x128   : > { %v986_v30 = vsel %vm13386_vm7, %v637_v15, %v985_v33  ;;  %v11808_v0 = vcombine.low %v2602_v28, %v2612_v61  ;;  %v1088_v41 = vld [vmem:[#allocation2 + $0x98] sm:$0x1]  ;;  %v2335_v35 = vld [vmem:[#allocation2 + $0x94] sm:$0xf]  ;;  %v867_v37 = vsel %vm13346_vm6, %v659_v53, %v866_v11  ;;  %v3836_v24 = vpop.permute.xlu1 %3835  ;;  %v11840_v15 = vcombine.low %v3015_v31, %v3018_v12  ;;  %v14498_v51 = vld [vmem:[#allocation2 + $0x90] sm:$0xe] }
 0x129   : > { %987 = vst [vmem:[#allocation2 + $0x90] sm:$0x1] %v986_v30  ;;  %v1089_v44 = vsel %vm13449_vm10, %v11714_v16, %v1088_v41  ;;  %v2623_v52 = vshll.u32 %v2335_v35, 16  ;;  %v2627_v6 = vshrl.u32 %v2335_v35, 16  ;;  %v14488_v58 = vld [vmem:[#allocation2 + $0x94] sm:$0xf]  ;;  %v668_v38 = vsel %vm13337_vm4, %v660_v39, %v667_v13 }
 0x12a   : > { %868 = vst [vmem:[#allocation2 + $0x9c] sm:$0xf] %v867_v37  ;;  %2801 = vrot.lane.b32.xlu0 %v11808_v0, %s13256_s17  ;;  %1090 = vst [vmem:[#allocation2 + $0x98] sm:$0x1] %v1089_v44  ;;  %v3021_v34 = vrot.slane %v14488_v58, 5  ;;  %v14500_v56 = vrot.slane %v665_v40, 11  ;;  %v871_v17 = vsel %vm13386_vm7, %v669_v32, %v870_v36  ;;  %v676_v55 = vor.u32 %v674_v47, %v14474_v43  ;;  %v1747_v50 = vpop.permute.xlu0 %1746 }
 0x12b   : > { %v3376_v19 = vld [vmem:[#allocation2 + $0x94] sm:$0xf]  ;;  %3879 = vst.msk [vmem:[#allocation4 + $0x28] sm:$0xff] %vm17875_vm0, %v3836_v24  ;;  %v14495_v23 = vrot.slane %v2623_v52, 5  ;;  %v2629_v2 = vrot.slane %v2627_v6, 4  ;;  %v13110_v11 = vld [vmem:[#allocation2 + $0x78] sm:$0xff]   ;;  %v14534_v41 = vpack.c.bf16 %v345_v49, %v345_v49 }
 0x12c   : > { %869 = vst.msk [vmem:[#allocation2 + $0xa0] sm:$0xf] %vm17925_vm9, %v668_v38  ;;  %v3643_v7 = vshll.u32 %v3376_v19, 16  ;;  %v3647_v59 = vshrl.u32 %v3376_v19, 16  ;;  %v14504_v21 = vld [vmem:[#allocation2 + $0x94] sm:$0xf]  ;;  %v4157_v29 = vpop.permute.xlu1 %4156  ;;  %v874_v12 = vsel %vm13346_vm6, %v676_v55, %v873_v27 }
 0x12d   : > { %v14506_v42 = vld [vmem:[#allocation2 + $0x94] sm:$0xf]  ;;  %v2630_v9 = vor.u32 %v2629_v2, %v14495_v23  ;;  %872 = vst [vmem:[#allocation2 + $0xa4] sm:$0x1] %v871_v17  ;;  %v4058_v48 = vrot.slane %v14504_v21, 5  ;;  %v11825_v63 = vrot.slane %v14486_v3, 9 }
 0x12e   : > { %v14511_v4 = vrot.slane %v3643_v7, 5  ;;  %v3649_v62 = vrot.slane %v3647_v59, 4  ;;  %3122 = vrot.lane.b32.xlu0 %v11840_v15, %s13252_s13  ;;  %v3023_v26 = vrot.slane %v3021_v34, 4  ;;  %v11888_v40 = vrot.slane %v14498_v51, 9  ;;  %4200 = vst.msk [vmem:[#allocation4 + $0x28] sm:$0xff] %vm4194_vm3, %v4157_v29  ;;  %v346_v28 = vld [vmem:[%s13318_s10 + $0xe0] sm:$0xff]  ;;  %v2071_v35 = vpop.permute.xlu0 %2070 }
 0x12f   : > { %v1600_v16 = vshll.u32 %v14506_v42, 16  ;;  %1789 = vst.msk [vmem:[#allocation4 + $0x30] sm:$0xff] %vm1782_vm1, %v1747_v50  ;;  %v347_v1 = vld [vmem:[%s13318_s10 + $0xe8] sm:$0xff]  ;;  %v14524_v8 = vrot.slane %v2630_v9, 4  ;;  %v1604_v31 = vshrl.u32 %v14506_v42, 16  ;;  %v4215_v53 = vld [vmem:[#allocation4 + $0x20] sm:$0xff]  ;;  %v14540_v3 = vpack.c.bf16 %v346_v28, %v346_v28 }
 0x130   : > { %1245 = vst.msk [vmem:[#allocation4 + $0x50] sm:$0xff] %vm1234_vm15, %v13110_v11  ;;  %v13111_v39 = vld [vmem:[#allocation2 + $0x84] sm:$0xff]   ;;  %v13093_v54 = vld [vmem:[#allocation2 + $0x90] sm:$0xff]   ;;  %v3650_v33 = vor.u32 %v3649_v62, %v14511_v4  ;;  %v14529_v61 = vrot.slane %v4058_v48, 4  ;;  %12958 = vmatprep.mubr.msk.bf16.mxu0 %vm4247_vm2, %v4215_v53  ;;  %875 = vst [vmem:[#allocation2 + $0xa8] sm:$0xf] %v874_v12  ;;  %v1749_v6 = vpop.permute.xlu1 %1748  ;;  %v14547_v38 = vsel %vm13496_vm11, %v11825_v63, %v3021_v34 }
 0x131   : > { %v2334_v25 = vld [vmem:[#allocation2 + $0x90] sm:$0xf]  ;;  %v2336_v36 = vld [vmem:[#allocation2 + $0x98] sm:$0x1]  ;;  %1246 = vst.msk [vmem:[#allocation4 + $0x58] sm:$0xff] %vm1234_vm15, %v13111_v39  ;;  %2258 = vrot.lane.b32.xlu1 %v13093_v54, %s13250_s11  ;;  %v14538_v52 = vrot.slane %v1600_v16, 5  ;;  %v14550_v19 = vpack.c.bf16 %v347_v1, %v347_v1  ;;  %v14559_v34 = vsel %vm13496_vm11, %v11888_v40, %v4058_v48 }
 0x132   : > { %v2614_v47 = vshrl.u32 %v2334_v25, 16  ;;  %v2617_v30 = vshll.u32 %v2334_v25, 16  ;;  %v2881_v0 = vld [vmem:[#allocation2 + $0x98] sm:$0x1]  ;;  %v2633_v13 = vshll.u32 %v2336_v36, 16  ;;  %v13096_v44 = vld [vmem:[#allocation2 + $0x90] sm:$0xff]   ;;  %v2249_v62 = vpop.permute.xlu0 %2248 }
 0x133   : > { %v3024_v37 = vrot.slane %v2881_v0, 5  ;;  %2113 = vst.msk [vmem:[#allocation4 + $0x30] sm:$0xff] %vm2106_vm5, %v2071_v35  ;;  %v988_v32 = vld [vmem:[#allocation2 + $0x9c] sm:$0x1]  ;;  %3300 = vrot.lane.b32.xlu0 %v13096_v44, %s13251_s12  ;;  %v3375_v59 = vld [vmem:[#allocation2 + $0x90] sm:$0xf] }
 0x134   : > { %v2616_v24 = vrot.slane %v2614_v47, 4  ;;  %v2619_v15 = vrot.slane %v2617_v30, 5  ;;  %1790 = vst.msk [vmem:[#allocation4 + $0x38] sm:$0xff] %vm1782_vm1, %v1749_v6  ;;  %v2635_v2 = vrot.slane %v2633_v13, 5  ;;  %v989_v7 = vsel %vm13386_vm7, %v654_v20, %v988_v32  ;;  %v3377_v51 = vld [vmem:[#allocation2 + $0x98] sm:$0x1] }
 0x135   : > { %v3651_v58 = vrot.slane %v3650_v33, 4  ;;  %v14563_v21 = vsel %vm13496_vm11, %v3023_v26, %v3024_v37  ;;  %990 = vst [vmem:[#allocation2 + $0x9c] sm:$0x1] %v989_v7  ;;  %v3634_v49 = vshrl.u32 %v3375_v59, 16  ;;  %v3637_v55 = vshll.u32 %v3375_v59, 16  ;;  %v2073_v26 = vpop.permute.xlu1 %2072  ;;  %2291 = vst.msk [vmem:[#allocation4 + $0x30] sm:$0xff] %vm2284_vm8, %v2249_v62 }
 0x136   : > { %v2620_v17 = vor.u32 %v2619_v15, %v2616_v24  ;;  %v1091_v9 = vld [vmem:[#allocation2 + $0xa4] sm:$0x1]  ;;  %v3379_v5 = vld [vmem:[#allocation2 + $0xa0] sm:$0xf]  ;;  %v2636_v20 = vsel %vm13590_vm14, %v14524_v8, %v2635_v2  ;;  %v3653_v27 = vshll.u32 %v3377_v51, 16  ;;  %2114 = vst.msk [vmem:[#allocation4 + $0x38] sm:$0xff] %vm2106_vm5, %v2073_v26 }
 0x137   : > { %v1092_v48 = vsel %vm13449_vm10, %v14500_v56, %v1091_v9  ;;  %v3667_v29 = vshll.u32 %v3379_v5, 16  ;;  %v3922_v50 = vld [vmem:[#allocation2 + $0x98] sm:$0x1]  ;;  %v3923_v11 = vld [vmem:[#allocation2 + $0x9c] sm:$0xe]  ;;  %v3636_v16 = vrot.slane %v3634_v49, 4 }
 0x138   : > { %v14571_v63 = vld [vmem:[#allocation2 + $0x90] sm:$0xe]  ;;  %v2621_v40 = vrot.slane %v2620_v17, 4  ;;  %v3639_v28 = vrot.slane %v3637_v55, 5  ;;  %1093 = vst [vmem:[#allocation2 + $0xa4] sm:$0x1] %v1092_v48 }
 0x139   : > { %v3671_v1 = vshrl.u32 %v3379_v5, 16  ;;  %v3924_v53 = vld [vmem:[#allocation2 + $0xa0] sm:$0xf]  ;;  %v3655_v8 = vrot.slane %v3653_v27, 5  ;;  %v14575_v39 = vrot.slane %v3667_v29, 5  ;;  %v4061_v56 = vrot.slane %v3922_v50, 5  ;;  %v2251_v44 = vpop.permute.xlu1 %2250  ;;  %v2794_v15 = vpop.permute.xlu0 %2793 }
 0x13a   : > { %v1287_v54 = vld [vmem:[#allocation2 + $0x90] sm:$0xf]  ;;  %v1606_v25 = vrot.slane %v1604_v31, 4  ;;  %v2626_v33 = vsel %vm13590_vm14, %v2621_v40, %v14495_v23  ;;  %v3640_v12 = vor.u32 %v3639_v28, %v3636_v16  ;;  %v4065_v47 = vrot.slane %v3924_v53, 5  ;;  %v4216_v37 = vld [vmem:[#allocation4 + $0x28] sm:$0xff]  ;;  %2292 = vst.msk [vmem:[#allocation4 + $0x38] sm:$0xff] %vm2284_vm8, %v2251_v44 }
 0x13b   : > { %v3673_v36 = vrot.slane %v3671_v1, 4  ;;  %v11809_v30 = vcombine.low %v2626_v33, %v2636_v20  ;;  %v4062_v0 = vsel %vm13496_vm11, %v14529_v61, %v4061_v56  ;;  %v11889_v35 = vrot.slane %v3923_v11, 9  ;;  %v1289_v24 = vld [vmem:[#allocation2 + $0x98] sm:$0x1]  ;;  %12959 = vmatmul.mubr.msk.bf16.gmra.mrb[8].mxu0 %vm4247_vm2, %v4216_v37  ;;  %v1291_v50 = vld [vmem:[#allocation2 + $0xa0] sm:$0xf] }
 0x13c   : > { %v1591_v13 = vshrl.u32 %v1287_v54, 16  ;;  %v3641_v6 = vrot.slane %v3640_v12, 4  ;;  %v3656_v42 = vsel %vm13590_vm14, %v3651_v58, %v3655_v8  ;;  %v11762_v23 = vrot.slane %v14571_v63, 9  ;;  %v3378_v32 = vld [vmem:[#allocation2 + $0x9c] sm:$0xf]  ;;  %v13112_v44 = vld [vmem:[#allocation2 + $0x90] sm:$0xff]  }
 0x13d   : > { %v3674_v31 = vor.u32 %v3673_v36, %v14575_v39  ;;  %2803 = vrot.lane.b32.xlu1 %v11809_v30, %s13256_s17  ;;  %v11841_v61 = vcombine.low %v14547_v38, %v14563_v21  ;;  %v11904_v2 = vcombine.low %v14559_v34, %v4062_v0  ;;  %v4067_v7 = vrot.slane %v4065_v47, 4  ;;  %v1290_v55 = vld [vmem:[#allocation2 + $0x9c] sm:$0xf]  ;;  %v3115_v11 = vpop.permute.xlu0 %3114  ;;  %1247 = vst.msk [vmem:[#allocation4 + $0x60] sm:$0xff] %vm1234_vm15, %v13112_v44 }
 0x13e   : > { %v1607_v59 = vor.u32 %v1606_v25, %v14538_v52  ;;  %vm17926_vm9 = vcmask 162944   ;;  %v3646_v51 = vsel %vm13590_vm14, %v3641_v6, %v14511_v4  ;;  %v3658_v58 = vshrl.u32 %v3378_v32, 16  ;;  %v13097_v4 = vld [vmem:[#allocation2 + $0x9c] sm:$0xff]  }
 0x13f   : > { %2836 = vst.msk [vmem:[#allocation4 + $0x30] sm:$0xff] %vm17926_vm9, %v2794_v15  ;;  %v3661_v17 = vshll.u32 %v3378_v32, 16  ;;  %v3675_v49 = vrot.slane %v3674_v31, 4  ;;  %v11872_v9 = vcombine.low %v3646_v51, %v3656_v42  ;;  %v3380_v5 = vld [vmem:[#allocation2 + $0xa4] sm:$0x1]  ;;  %v14602_v38 = vsel %vm13496_vm11, %v11889_v35, %v4065_v47 }
 0x140   : > { %v3925_v62 = vld [vmem:[#allocation2 + $0xa4] sm:$0x1]  ;;  %v1593_v34 = vrot.slane %v1591_v13, 4  ;;  %v1594_v21 = vshll.u32 %v1287_v54, 16  ;;  %v3660_v20 = vrot.slane %v3658_v58, 4  ;;  %v3677_v48 = vshll.u32 %v3380_v5, 16 }
 0x141   : > { %v3663_v27 = vrot.slane %v3661_v17, 5  ;;  %v4068_v29 = vrot.slane %v3925_v62, 5  ;;  %3124 = vrot.lane.b32.xlu1 %v11841_v61, %s13252_s13  ;;  %3845 = vrot.lane.b32.xlu0 %v11872_v9, %s13257_s18  ;;  %v1608_v40 = vrot.slane %v1607_v59, 4  ;;  %v1610_v16 = vshll.u32 %v1289_v24, 16  ;;  %3157 = vst.msk [vmem:[#allocation4 + $0x30] sm:$0xff] %vm3150_vm12, %v3115_v11  ;;  %v3293_v37 = vpop.permute.xlu0 %3292  ;;  %v13113_v61 = vld [vmem:[#allocation2 + $0x9c] sm:$0xff]  }
 0x142   : > { %v1596_v26 = vrot.slane %v1594_v21, 5  ;;  %v1615_v28 = vshrl.u32 %v1290_v55, 16  ;;  %v3679_v53 = vrot.slane %v3677_v48, 5  ;;  %v1292_v56 = vld [vmem:[#allocation2 + $0xa4] sm:$0x1]  ;;  %v1618_v54 = vshll.u32 %v1290_v55, 16 }
 0x143   : > { %v3664_v1 = vor.u32 %v3663_v27, %v3660_v20  ;;  %v14609_v8 = vsel %vm13496_vm11, %v4067_v7, %v4068_v29  ;;  %v1612_v12 = vrot.slane %v1610_v16, 5  ;;  %v1836_v47 = vld [vmem:[#allocation2 + $0x94] sm:$0xf]  ;;  %v1624_v13 = vshll.u32 %v1291_v50, 16  ;;  %v1837_v15 = vld [vmem:[#allocation2 + $0x98] sm:$0x1] }
 0x144   : > { %v11905_v25 = vcombine.low %v14602_v38, %v14609_v8  ;;  %v1597_v33 = vor.u32 %v1596_v26, %v1593_v34  ;;  %v1617_v36 = vrot.slane %v1615_v28, 4  ;;  %v3680_v0 = vsel %vm13590_vm14, %v3675_v49, %v3679_v53  ;;  %3335 = vst.msk [vmem:[#allocation4 + $0x30] sm:$0xff] %vm3328_vm13, %v3293_v37  ;;  %v1838_v58 = vld [vmem:[#allocation2 + $0x9c] sm:$0xe]  ;;  %v1839_v17 = vld [vmem:[#allocation2 + $0xa0] sm:$0xf] }
 0x145   : > { %v3665_v30 = vrot.slane %v3664_v1, 4  ;;  %v1620_v35 = vrot.slane %v1618_v54, 5  ;;  %3302 = vrot.lane.b32.xlu1 %v13097_v4, %s13251_s12  ;;  %4166 = vrot.lane.b32.xlu0 %v11904_v2, %s13254_s15  ;;  %v1613_v42 = vsel %vm13590_vm14, %v1608_v40, %v1612_v12  ;;  %v1628_v31 = vshrl.u32 %v1291_v50, 16  ;;  %v1840_v5 = vld [vmem:[#allocation2 + $0xa4] sm:$0x1]  ;;  %1248 = vst.msk [vmem:[#allocation4 + $0x68] sm:$0xff] %vm1234_vm15, %v13113_v61 }
 0x146   : > { %v1598_v6 = vrot.slane %v1597_v33, 4  ;;  %v1634_v24 = vshll.u32 %v1292_v56, 16  ;;  %v1626_v59 = vrot.slane %v1624_v13, 5  ;;  %v1984_v51 = vrot.slane %v1836_v47, 5  ;;  %v991_v62 = vld [vmem:[#allocation2 + $0xa8] sm:$0x1] }
 0x147   : > { %v3670_v32 = vsel %vm13590_vm14, %v3665_v30, %v14575_v39  ;;  %v1621_v7 = vor.u32 %v1620_v35, %v1617_v36  ;;  %v1630_v55 = vrot.slane %v1628_v31, 4  ;;  %v2337_v27 = vld [vmem:[#allocation2 + $0x9c] sm:$0xf]  ;;  %v1987_v29 = vrot.slane %v1837_v15, 5  ;;  %v2338_v40 = vld [vmem:[#allocation2 + $0xa0] sm:$0xf] }
 0x148   : > { %v11873_v2 = vcombine.low %v3670_v32, %v3680_v0  ;;  %v1603_v49 = vsel %vm13590_vm14, %v1598_v6, %v14538_v52  ;;  %v1636_v9 = vrot.slane %v1634_v24, 5  ;;  %v1985_v21 = vsel %vm13496_vm11, %v11762_v23, %v1984_v51  ;;  %v2339_v53 = vld [vmem:[#allocation2 + $0xa4] sm:$0x1]  ;;  %v877_v56 = vld [vmem:[#allocation2 + $0xb0] sm:$0x1]  ;;  %v2796_v33 = vpop.permute.xlu1 %2795  ;;  %v13098_v6 = vld [vmem:[#allocation2 + $0x9c] sm:$0xff]  }
 0x149   : > { %v11746_v34 = vcombine.low %v1603_v49, %v1613_v42  ;;  %v1622_v39 = vrot.slane %v1621_v7, 4  ;;  %v1986_v20 = vrot.slane %v1984_v51, 4  ;;  %v1631_v48 = vor.u32 %v1630_v55, %v1626_v59  ;;  %v2882_v54 = vld [vmem:[#allocation2 + $0x9c] sm:$0xe]  ;;  %v2883_v30 = vld [vmem:[#allocation2 + $0xa0] sm:$0xf] }
 0x14a   : > { %3847 = vrot.lane.b32.xlu1 %v11873_v2, %s13257_s18  ;;  %v11763_v52 = vrot.slane %v1838_v58, 9  ;;  %v1991_v50 = vrot.slane %v1839_v17, 5  ;;  %v1994_v4 = vrot.slane %v1840_v5, 5  ;;  %v679_v26 = vshrl.u32 %v14534_v41, 16  ;;  %2837 = vst.msk [vmem:[#allocation4 + $0x38] sm:$0xff] %vm17926_vm9, %v2796_v33  ;;  %v3838_v0 = vpop.permute.xlu0 %3837 }
 0x14b   : > { %1758 = vrot.lane.b32.xlu0 %v11746_v34, %s13255_s16  ;;  %v1627_v11 = vsel %vm13590_vm14, %v1622_v39, %v1626_v59  ;;  %v682_v63 = vshll.u32 %v14534_v41, 16  ;;  %v1632_v23 = vrot.slane %v1631_v48, 4  ;;  %v1988_v16 = vsel %vm13496_vm11, %v1986_v20, %v1987_v29  ;;  %v2884_v37 = vld [vmem:[#allocation2 + $0xa4] sm:$0x1]  ;;  %3880 = vst.msk [vmem:[#allocation4 + $0x30] sm:$0xff] %vm17875_vm0, %v3838_v0 }
 0x14c   : > { %v1992_v28 = vsel %vm13496_vm11, %v11763_v52, %v1991_v50  ;;  %v1993_v1 = vrot.slane %v1991_v50, 4  ;;  %v11778_v12 = vcombine.low %v1985_v21, %v1988_v16  ;;  %v677_v36 = vrot.slane %v14474_v43, 4  ;;  %v3117_v15 = vpop.permute.xlu1 %3116 }
 0x14d   : > { %v681_v47 = vrot.slane %v679_v26, 7  ;;  %v992_v41 = vsel %vm13386_vm7, %v671_v46, %v991_v62  ;;  %v1637_v35 = vsel %vm13590_vm14, %v1632_v23, %v1636_v9  ;;  %v2638_v10 = vshrl.u32 %v2337_v27, 16  ;;  %3158 = vst.msk [vmem:[#allocation4 + $0x38] sm:$0xff] %vm3150_vm12, %v3117_v15  ;;  %v880_v23 = vld [vmem:[#allocation2 + $0xb4] sm:$0xf] }
 0x14e   : > { %4168 = vrot.lane.b32.xlu1 %v11905_v25, %s13254_s15  ;;  %v1995_v43 = vsel %vm13496_vm11, %v1993_v1, %v1994_v4  ;;  %993 = vst [vmem:[#allocation2 + $0xa8] sm:$0x1] %v992_v41  ;;  %v2641_v13 = vshll.u32 %v2337_v27, 16  ;;  %v11747_v46 = vcombine.low %v1627_v11, %v1637_v35  ;;  %v2647_v31 = vshll.u32 %v2338_v40, 16  ;;  %v4159_v51 = vpop.permute.xlu0 %4158 }
 0x14f   : > { %2082 = vrot.lane.b32.xlu0 %v11778_v12, %s13253_s14  ;;  %v11779_v44 = vcombine.low %v1992_v28, %v1995_v43  ;;  %v684_v42 = vor.u32 %v682_v63, %v681_v47  ;;  %v686_v38 = vrot.slane %v681_v47, 4  ;;  %v2640_v8 = vrot.slane %v2638_v10, 4  ;;  %4201 = vst.msk [vmem:[#allocation4 + $0x30] sm:$0xff] %vm4194_vm3, %v4159_v51 }
 0x150   : > { %v2643_v25 = vrot.slane %v2641_v13, 5  ;;  %v2651_v24 = vshrl.u32 %v2338_v40, 16  ;;  %v2657_v32 = vshll.u32 %v2339_v53, 16  ;;  %v11826_v59 = vrot.slane %v2882_v54, 9  ;;  %v3295_v20 = vpop.permute.xlu1 %3294  ;;  %v14680_v53 = vld [vmem:[#allocation2 + $0xa8] sm:$0xe] }
 0x151   : > { %v685_v61 = vsel %vm13337_vm4, %v677_v36, %v684_v42  ;;  %v878_v7 = vsel %vm13386_vm7, %v686_v38, %v877_v56  ;;  %vm17927_vm9 = vcmask 27648   ;;  %v2649_v17 = vrot.slane %v2647_v31, 5  ;;  %3336 = vst.msk [vmem:[#allocation4 + $0x38] sm:$0xff] %vm3328_vm13, %v3295_v20 }
 0x152   : > { %1760 = vrot.lane.b32.xlu1 %v11747_v46, %s13255_s16  ;;  %876 = vst.msk [vmem:[#allocation2 + $0xac] sm:$0xf] %vm17927_vm9, %v685_v61  ;;  %v2644_v58 = vor.u32 %v2643_v25, %v2640_v8  ;;  %v2653_v2 = vrot.slane %v2651_v24, 4  ;;  %879 = vst [vmem:[#allocation2 + $0xb0] sm:$0x1] %v878_v7  ;;  %v3028_v49 = vrot.slane %v2883_v30, 5 }
 0x153   : > { %2260 = vrot.lane.b32.xlu0 %v13098_v6, %s13250_s11  ;;  %v11716_v55 = vrot.slane %v682_v63, 11  ;;  %v2659_v9 = vrot.slane %v2657_v32, 5  ;;  %v3031_v5 = vrot.slane %v2884_v37, 5  ;;  %v688_v62 = vshrl.u32 %v14540_v3, 16  ;;  %v1751_v56 = vpop.permute.xlu0 %1750  ;;  %v884_v25 = vld [vmem:[#allocation2 + $0xbc] sm:$0x1] }
 0x154   : > { %v2645_v34 = vrot.slane %v2644_v58, 4  ;;  %v2654_v39 = vor.u32 %v2653_v2, %v2649_v17  ;;  %v3030_v21 = vrot.slane %v3028_v49, 4  ;;  %v3029_v48 = vsel %vm13496_vm11, %v11826_v59, %v3028_v49  ;;  %1791 = vst.msk [vmem:[#allocation4 + $0x40] sm:$0xff] %vm1782_vm1, %v1751_v56  ;;  %v898_v58 = vld [vmem:[#allocation2 + $0xd4] sm:$0x1] }
 0x155   : > { %v2340_v27 = vld [vmem:[#allocation2 + $0xa8] sm:$0xf]  ;;  %v690_v26 = vrot.slane %v688_v62, 7  ;;  %v691_v63 = vshll.u32 %v14540_v3, 16  ;;  %v696_v40 = vshrl.u32 %v14550_v19, 16  ;;  %v699_v6 = vshll.u32 %v14550_v19, 16 }
 0x156   : > { %2084 = vrot.lane.b32.xlu1 %v11779_v44, %s13253_s14  ;;  %v2650_v29 = vsel %vm13590_vm14, %v2645_v34, %v2649_v17  ;;  %v2655_v52 = vrot.slane %v2654_v39, 4  ;;  %v2662_v50 = vshrl.u32 %v2340_v27, 16  ;;  %v2665_v11 = vshll.u32 %v2340_v27, 16  ;;  %v3840_v37 = vpop.permute.xlu1 %3839  ;;  %v4217_v46 = vld [vmem:[#allocation4 + $0x30] sm:$0xff]  ;;  %v3381_v8 = vld [vmem:[#allocation2 + $0xa8] sm:$0xf] }
 0x157   : > { %v3032_v4 = vsel %vm13496_vm11, %v3030_v21, %v3031_v5  ;;  %v14682_v36 = vor.u32 %v691_v63, %v690_v26  ;;  %v698_v13 = vrot.slane %v696_v40, 7  ;;  %v694_v44 = vrot.slane %v690_v26, 4  ;;  %3881 = vst.msk [vmem:[#allocation4 + $0x38] sm:$0xff] %vm17875_vm0, %v3840_v37  ;;  %12962 = vmatprep.mubr.msk.bf16.mxu0 %vm4247_vm2, %v4217_v46  ;;  %v894_v19 = vld [vmem:[#allocation2 + $0xcc] sm:$0xf]  ;;  %vm17928_vm0 = vmmov %vm17927_vm9 }
 0x158   : > { %v2660_v16 = vsel %vm13590_vm14, %v2655_v52, %v2659_v9  ;;  %v2664_v28 = vrot.slane %v2662_v50, 4  ;;  %v2667_v1 = vrot.slane %v2665_v11, 5  ;;  %v11842_v30 = vcombine.low %v3029_v48, %v3032_v4  ;;  %v3926_v48 = vld [vmem:[#allocation2 + $0xa8] sm:$0xe] }
 0x159   : > { %v13099_v54 = vld [vmem:[#allocation2 + $0xa8] sm:$0xff]   ;;  %v11810_v33 = vcombine.low %v2650_v29, %v2660_v16  ;;  %v1094_v12 = vld [vmem:[#allocation2 + $0xb0] sm:$0x1]  ;;  %v881_v42 = vsel %vm13346_vm6, %v14682_v36, %v880_v23  ;;  %v14693_v38 = vrot.slane %v688_v62, 4  ;;  %v11827_v15 = vrot.slane %v14680_v53, 9 }
 0x15a   : > { %v1095_v3 = vsel %vm13449_vm10, %v11716_v55, %v1094_v12  ;;  %v2341_v47 = vld [vmem:[#allocation2 + $0xac] sm:$0xf]  ;;  %v2668_v41 = vor.u32 %v2667_v1, %v2664_v28  ;;  %2262 = vrot.lane.b32.xlu1 %v13099_v54, %s13250_s11  ;;  %882 = vst [vmem:[#allocation2 + $0xb4] sm:$0xf] %v881_v42  ;;  %v701_v59 = vor.u32 %v699_v6, %v698_v13  ;;  %v703_v51 = vrot.slane %v698_v13, 4  ;;  %v4161_v62 = vpop.permute.xlu1 %4160  ;;  %v2075_v34 = vpop.permute.xlu0 %2074 }
 0x15b   : > { %v2886_v0 = vld [vmem:[#allocation2 + $0xac] sm:$0xf]  ;;  %2805 = vrot.lane.b32.xlu0 %v11810_v33, %s13256_s17  ;;  %1096 = vst [vmem:[#allocation2 + $0xb0] sm:$0x1] %v1095_v3  ;;  %v2671_v35 = vshll.u32 %v2341_v47, 16  ;;  %v2675_v43 = vshrl.u32 %v2341_v47, 16  ;;  %v895_v23 = vsel %vm13346_vm6, %v14682_v36, %v894_v19 }
 0x15c   : > { %v3035_v10 = vrot.slane %v2886_v0, 5  ;;  %v3382_v61 = vld [vmem:[#allocation2 + $0xac] sm:$0xf]  ;;  %v14700_v32 = vrot.slane %v2668_v41, 4  ;;  %v930_v49 = vrot.slane %v14693_v38, 4  ;;  %v3682_v55 = vshrl.u32 %v3381_v8, 16 }
 0x15d   : > { %v14697_v31 = vrot.slane %v2671_v35, 5  ;;  %v2677_v24 = vrot.slane %v2675_v43, 4  ;;  %v13102_v2 = vld [vmem:[#allocation2 + $0xa8] sm:$0xff]   ;;  %v3685_v9 = vshll.u32 %v3381_v8, 16  ;;  %v702_v39 = vsel %vm13337_vm4, %v694_v44, %v701_v59  ;;  %4202 = vst.msk [vmem:[#allocation4 + $0x38] sm:$0xff] %vm4194_vm3, %v4161_v62 }
 0x15e   : > { %v3037_v7 = vrot.slane %v3035_v10, 4  ;;  %v14705_v5 = vld [vmem:[#allocation2 + $0xac] sm:$0xf]  ;;  %v14709_v21 = vrot.slane %v699_v6, 7  ;;  %v3691_v20 = vshll.u32 %v3382_v61, 16  ;;  %v3695_v27 = vshrl.u32 %v3382_v61, 16  ;;  %v1753_v33 = vpop.permute.xlu1 %1752  ;;  %v2253_v12 = vpop.permute.xlu0 %2252 }
 0x15f   : > { %v2678_v17 = vor.u32 %v2677_v24, %v14697_v31  ;;  %3126 = vrot.lane.b32.xlu0 %v11842_v30, %s13252_s13  ;;  %2115 = vst.msk [vmem:[#allocation4 + $0x40] sm:$0xff] %vm2106_vm5, %v2075_v34  ;;  %v3684_v52 = vrot.slane %v3682_v55, 4  ;;  %v3687_v50 = vrot.slane %v3685_v9, 5  ;;  %v885_v11 = vsel %vm13386_vm7, %v703_v51, %v884_v25  ;;  %896 = vst [vmem:[#allocation2 + $0xcc] sm:$0xf] %v895_v23 }
 0x160   : > { %883 = vst.msk [vmem:[#allocation2 + $0xb8] sm:$0xf] %vm17927_vm9, %v702_v39  ;;  %v14719_v63 = vsel %vm13496_vm11, %v11827_v15, %v3035_v10  ;;  %886 = vst [vmem:[#allocation2 + $0xbc] sm:$0x1] %v885_v11  ;;  %v899_v16 = vsel %vm13386_vm7, %v703_v51, %v898_v58  ;;  %v3693_v56 = vrot.slane %v3691_v20, 5  ;;  %v2674_v3 = vsel %vm13590_vm14, %v14700_v32, %v14697_v31 }
 0x161   : > { %v2679_v29 = vrot.slane %v2678_v17, 4  ;;  %897 = vst.msk [vmem:[#allocation2 + $0xd0] sm:$0xf] %vm17928_vm0, %v702_v39  ;;  %v3688_v53 = vor.u32 %v3687_v50, %v3684_v52  ;;  %900 = vst [vmem:[#allocation2 + $0xd4] sm:$0x1] %v899_v16  ;;  %v3697_v47 = vrot.slane %v3695_v27, 4 }
 0x162   : > { %v2342_v4 = vld [vmem:[#allocation2 + $0xb0] sm:$0x1]  ;;  %v994_v36 = vld [vmem:[#allocation2 + $0xb4] sm:$0x1]  ;;  %v4072_v30 = vrot.slane %v14705_v5, 5  ;;  %1792 = vst.msk [vmem:[#allocation4 + $0x48] sm:$0xff] %vm1782_vm1, %v1753_v33  ;;  %v2077_v15 = vpop.permute.xlu1 %2076 }
 0x163   : > { %v2887_v26 = vld [vmem:[#allocation2 + $0xb0] sm:$0x1]  ;;  %v2681_v28 = vshll.u32 %v2342_v4, 16  ;;  %3304 = vrot.lane.b32.xlu0 %v13102_v2, %s13251_s12  ;;  %2293 = vst.msk [vmem:[#allocation4 + $0x40] sm:$0xff] %vm2284_vm8, %v2253_v12  ;;  %v995_v35 = vsel %vm13386_vm7, %v930_v49, %v994_v36  ;;  %v3689_v43 = vrot.slane %v3688_v53, 4  ;;  %v11890_v10 = vrot.slane %v3926_v48, 9 }
 0x164   : > { %v3383_v40 = vld [vmem:[#allocation2 + $0xb0] sm:$0x1]  ;;  %v3038_v1 = vrot.slane %v2887_v26, 5  ;;  %996 = vst [vmem:[#allocation2 + $0xb4] sm:$0x1] %v995_v35  ;;  %v1032_v37 = vrot.slane %v14709_v21, 4  ;;  %v3698_v46 = vor.u32 %v3697_v47, %v3693_v56 }
 0x165   : > { %v3928_v54 = vld [vmem:[#allocation2 + $0xb0] sm:$0x1]  ;;  %v3701_v41 = vshll.u32 %v3383_v40, 16  ;;  %v2683_v0 = vrot.slane %v2681_v28, 5  ;;  %v1293_v6 = vld [vmem:[#allocation2 + $0xa8] sm:$0xf]  ;;  %v3694_v32 = vsel %vm13590_vm14, %v3689_v43, %v3693_v56  ;;  %v4073_v55 = vsel %vm13496_vm11, %v11890_v10, %v4072_v30 }
 0x166   : > { %v3039_v13 = vsel %vm13496_vm11, %v3037_v7, %v3038_v1  ;;  %v4074_v8 = vrot.slane %v4072_v30, 4  ;;  %v4075_v25 = vrot.slane %v3928_v54, 5  ;;  %v14743_v31 = vld [vmem:[#allocation2 + $0xb4] sm:$0xe]  ;;  %v1294_v24 = vld [vmem:[#allocation2 + $0xac] sm:$0xf] }
 0x167   : > { %v3703_v44 = vrot.slane %v3701_v41, 5  ;;  %v2684_v42 = vsel %vm13590_vm14, %v2679_v29, %v2683_v0  ;;  %v4218_v61 = vld [vmem:[#allocation4 + $0x38] sm:$0xff]  ;;  %v3699_v7 = vrot.slane %v3698_v46, 4  ;;  %v3385_v59 = vld [vmem:[#allocation2 + $0xb8] sm:$0xf]  ;;  %2116 = vst.msk [vmem:[#allocation4 + $0x48] sm:$0xff] %vm2106_vm5, %v2077_v15  ;;  %v11843_v51 = vcombine.low %v14719_v63, %v3039_v13 }
 0x168   : > { %v11811_v19 = vcombine.low %v2674_v3, %v2684_v42  ;;  %12963 = vmatmul.mubr.msk.bf16.gmra.mrb[12].mxu0 %vm4247_vm2, %v4218_v61  ;;  %v1097_v58 = vld [vmem:[#allocation2 + $0xbc] sm:$0x1]  ;;  %v3715_v17 = vshll.u32 %v3385_v59, 16  ;;  %v3719_v2 = vshrl.u32 %v3385_v59, 16  ;;  %v3930_v9 = vld [vmem:[#allocation2 + $0xb8] sm:$0xf]  ;;  %v4076_v34 = vsel %vm13496_vm11, %v4074_v8, %v4075_v25 }
 0x169   : > { %v3704_v5 = vsel %vm13590_vm14, %v3699_v7, %v3703_v44  ;;  %v1098_v62 = vsel %vm13449_vm10, %v1032_v37, %v1097_v58  ;;  %v4079_v39 = vrot.slane %v3930_v9, 5  ;;  %v1295_v20 = vld [vmem:[#allocation2 + $0xb0] sm:$0x1]  ;;  %v1639_v50 = vshrl.u32 %v1293_v6, 16  ;;  %v14765_v40 = vld [vmem:[#allocation2 + $0xb8] sm:$0xf]  ;;  %v2798_v54 = vpop.permute.xlu0 %2797 }
 0x16a   : > { %2807 = vrot.lane.b32.xlu1 %v11811_v19, %s13256_s17  ;;  %v348_v27 = vld [vmem:[%s13318_s10 + $0xf0] sm:$0xff]  ;;  %v11874_v48 = vcombine.low %v3694_v32, %v3704_v5  ;;  %1099 = vst [vmem:[#allocation2 + $0xbc] sm:$0x1] %v1098_v62  ;;  %v14762_v29 = vrot.slane %v3715_v17, 5  ;;  %v3721_v52 = vrot.slane %v3719_v2, 4  ;;  %v11891_v11 = vrot.slane %v14743_v31, 9 }
 0x16b   : > { %v4081_v4 = vrot.slane %v4079_v39, 4  ;;  %v1642_v26 = vshll.u32 %v1293_v6, 16  ;;  %v1648_v63 = vshll.u32 %v1294_v24, 16  ;;  %v13103_v23 = vld [vmem:[#allocation2 + $0xb4] sm:$0xff]   ;;  %v11906_v1 = vcombine.low %v4073_v55, %v4076_v34  ;;  %v1841_v59 = vld [vmem:[#allocation2 + $0xa8] sm:$0xe] }
 0x16c   : > { %3849 = vrot.lane.b32.xlu0 %v11874_v48, %s13257_s18  ;;  %v3384_v16 = vld [vmem:[#allocation2 + $0xb4] sm:$0xf]  ;;  %v3722_v28 = vor.u32 %v3721_v52, %v14762_v29  ;;  %v1641_v53 = vrot.slane %v1639_v50, 4  ;;  %v14769_v56 = vpack.c.bf16 %v348_v27, %v348_v27  ;;  %vm17929_vm0 = vcmask 162944   ;;  %v349_v25 = vld [vmem:[%s13318_s10 + $0xf8] sm:$0xff]  ;;  %v13114_v9 = vld [vmem:[#allocation2 + $0xa8] sm:$0xff]  }
 0x16d   : > { %v3706_v33 = vshrl.u32 %v3384_v16, 16  ;;  %v3709_v12 = vshll.u32 %v3384_v16, 16  ;;  %v1644_v3 = vrot.slane %v1642_v26, 5  ;;  %v14772_v36 = vrot.slane %v1648_v63, 5  ;;  %v1296_v47 = vld [vmem:[#allocation2 + $0xb4] sm:$0xf]  ;;  %v3119_v31 = vpop.permute.xlu0 %3118 }
 0x16e   : > { %3128 = vrot.lane.b32.xlu1 %v11843_v51, %s13252_s13  ;;  %2838 = vst.msk [vmem:[#allocation4 + $0x40] sm:$0xff] %vm17929_vm0, %v2798_v54  ;;  %v3723_v41 = vrot.slane %v3722_v28, 4  ;;  %v1652_v30 = vshrl.u32 %v1294_v24, 16  ;;  %v1658_v0 = vshll.u32 %v1295_v20, 16  ;;  %v1663_v35 = vshrl.u32 %v1296_v47, 16  ;;  %s12388_s10 = sshll.u32 %s18121_s28, 4 }
 0x16f   : > { %v3708_v43 = vrot.slane %v3706_v33, 4  ;;  %v3711_v10 = vrot.slane %v3709_v12, 5  ;;  %v1645_v13 = vor.u32 %v1644_v3, %v1641_v53  ;;  %v1666_v46 = vshll.u32 %v1296_v47, 16  ;;  %3159 = vst.msk [vmem:[#allocation4 + $0x40] sm:$0xff] %vm3150_vm12, %v3119_v31  ;;  %v1842_v20 = vld [vmem:[#allocation2 + $0xac] sm:$0xf] }
 0x170   : > { %4170 = vrot.lane.b32.xlu0 %v11906_v1, %s13254_s15  ;;  %v1654_v44 = vrot.slane %v1652_v30, 4  ;;  %v1660_v6 = vrot.slane %v1658_v0, 5  ;;  %v1665_v42 = vrot.slane %v1663_v35, 4  ;;  %v1672_v8 = vshll.u32 %v14765_v40, 16  ;;  %v1843_v27 = vld [vmem:[#allocation2 + $0xb0] sm:$0x1] }
 0x171   : > { %v3386_v15 = vld [vmem:[#allocation2 + $0xbc] sm:$0x1]  ;;  %v3712_v61 = vor.u32 %v3711_v10, %v3708_v43  ;;  %v14781_v19 = vsel %vm13496_vm11, %v11891_v11, %v4079_v39  ;;  %v1646_v32 = vrot.slane %v1645_v13, 4  ;;  %v1668_v7 = vrot.slane %v1666_v46, 5  ;;  %v2255_v48 = vpop.permute.xlu1 %2254  ;;  %v1844_v63 = vld [vmem:[#allocation2 + $0xb4] sm:$0xe] }
 0x172   : > { %3306 = vrot.lane.b32.xlu1 %v13103_v23, %s13251_s12  ;;  %v3931_v24 = vld [vmem:[#allocation2 + $0xbc] sm:$0x1]  ;;  %v3725_v51 = vshll.u32 %v3386_v15, 16  ;;  %v1655_v17 = vor.u32 %v1654_v44, %v14772_v36  ;;  %v1674_v55 = vrot.slane %v1672_v8, 5  ;;  %v1676_v39 = vshrl.u32 %v14765_v40, 16  ;;  %2294 = vst.msk [vmem:[#allocation4 + $0x48] sm:$0xff] %vm2284_vm8, %v2255_v48 }
 0x173   : > { %v4082_v58 = vrot.slane %v3931_v24, 5  ;;  %v1298_v2 = vld [vmem:[#allocation2 + $0xbc] sm:$0x1]  ;;  %v3713_v5 = vrot.slane %v3712_v61, 4  ;;  %v1651_v62 = vsel %vm13590_vm14, %v1646_v32, %v14772_v36  ;;  %v1669_v34 = vor.u32 %v1668_v7, %v1665_v42  ;;  %1249 = vst.msk [vmem:[#allocation4 + $0x70] sm:$0xff] %vm1234_vm15, %v13114_v9  ;;  %v13115_v23 = vld [vmem:[#allocation2 + $0xb4] sm:$0xff]   ;;  %v3297_v54 = vpop.permute.xlu0 %3296 }
 0x174   : > { %v3727_v52 = vrot.slane %v3725_v51, 5  ;;  %v1656_v11 = vrot.slane %v1655_v17, 4  ;;  %v1682_v26 = vshll.u32 %v1298_v2, 16  ;;  %v1678_v28 = vrot.slane %v1676_v39, 4  ;;  %v1845_v1 = vld [vmem:[#allocation2 + $0xb8] sm:$0xf] }
 0x175   : > { %v4083_v50 = vsel %vm13496_vm11, %v4081_v4, %v4082_v58  ;;  %v3718_v16 = vsel %vm13590_vm14, %v3713_v5, %v14762_v29  ;;  %v14797_v53 = vpack.c.bf16 %v349_v25, %v349_v25  ;;  %v1670_v12 = vrot.slane %v1669_v34, 4  ;;  %v1846_v36 = vld [vmem:[#allocation2 + $0xbc] sm:$0x1]  ;;  %3337 = vst.msk [vmem:[#allocation4 + $0x40] sm:$0xff] %vm3328_vm13, %v3297_v54  ;;  %v2343_v35 = vld [vmem:[#allocation2 + $0xb4] sm:$0xf] }
 0x176   : > { %v11907_v40 = vcombine.low %v14781_v19, %v4083_v50  ;;  %v3728_v4 = vsel %vm13590_vm14, %v3723_v41, %v3727_v52  ;;  %v1661_v33 = vsel %vm13590_vm14, %v1656_v11, %v1660_v6  ;;  %v11764_v3 = vrot.slane %v1841_v59, 9  ;;  %1250 = vst.msk [vmem:[#allocation4 + $0x78] sm:$0xff] %vm1234_vm15, %v13115_v23  ;;  %v887_v61 = vld [vmem:[#allocation2 + $0xc0] sm:$0xf]  ;;  %v2344_v24 = vld [vmem:[#allocation2 + $0xb8] sm:$0xf]  ;;  %vm17930_vm15 = vmmov %vm17929_vm0 }
 0x177   : > { %v11875_v29 = vcombine.low %v3718_v16, %v3728_v4  ;;  %v11748_v47 = vcombine.low %v1651_v62, %v1661_v33  ;;  %v1679_v30 = vor.u32 %v1678_v28, %v1674_v55  ;;  %v1684_v0 = vrot.slane %v1682_v26, 5  ;;  %v2345_v59 = vld [vmem:[#allocation2 + $0xbc] sm:$0x1]  ;;  %v891_v39 = vld [vmem:[#allocation2 + $0xc8] sm:$0x1]  ;;  %v13104_v23 = vld [vmem:[#allocation2 + $0xb4] sm:$0xff]  }
 0x178   : > { %v1998_v43 = vrot.slane %v1842_v20, 5  ;;  %v2001_v10 = vrot.slane %v1843_v27, 5  ;;  %v11765_v13 = vrot.slane %v1844_v63, 9  ;;  %v2005_v46 = vrot.slane %v1845_v1, 5  ;;  %v2889_v20 = vld [vmem:[#allocation2 + $0xb8] sm:$0xf] }
 0x179   : > { %3851 = vrot.lane.b32.xlu1 %v11875_v29, %s13257_s18  ;;  %1762 = vrot.lane.b32.xlu0 %v11748_v47, %s13255_s16  ;;  %v1680_v41 = vrot.slane %v1679_v30, 4  ;;  %v2008_v44 = vrot.slane %v1846_v36, 5  ;;  %v705_v6 = vshrl.u32 %v14769_v56, 16  ;;  %v708_v42 = vshll.u32 %v14769_v56, 16  ;;  %v2890_v26 = vld [vmem:[#allocation2 + $0xbc] sm:$0x1] }
 0x17a   : > { %v1675_v8 = vsel %vm13590_vm14, %v1670_v12, %v1674_v55  ;;  %v1999_v25 = vsel %vm13496_vm11, %v11764_v3, %v1998_v43  ;;  %v2000_v31 = vrot.slane %v1998_v43, 4  ;;  %v2007_v15 = vrot.slane %v2005_v46, 4  ;;  %v14823_v55 = vld [vmem:[#allocation2 + $0xb4] sm:$0xe]  ;;  %v1000_v63 = vld [vmem:[#allocation2 + $0xcc] sm:$0x1] }
 0x17b   : > { %v1685_v19 = vsel %vm13590_vm14, %v1680_v41, %v1684_v0  ;;  %v707_v32 = vrot.slane %v705_v6, 7  ;;  %v713_v7 = vshrl.u32 %v14797_v53, 16  ;;  %v2006_v58 = vsel %vm13496_vm11, %v11765_v13, %v2005_v46  ;;  %v1103_v12 = vld [vmem:[#allocation2 + $0xd4] sm:$0x1]  ;;  %v3391_v38 = vld [vmem:[#allocation2 + $0xd0] sm:$0xf] }
 0x17c   : > { %v2002_v51 = vsel %vm13496_vm11, %v2000_v31, %v2001_v10  ;;  %v716_v17 = vshll.u32 %v14797_v53, 16  ;;  %v2686_v2 = vshrl.u32 %v2343_v35, 16  ;;  %v11749_v9 = vcombine.low %v1675_v8, %v1685_v19 }
 0x17d   : > { %4172 = vrot.lane.b32.xlu1 %v11907_v40, %s13254_s15  ;;  %v11780_v5 = vcombine.low %v1999_v25, %v2002_v51  ;;  %v2009_v62 = vsel %vm13496_vm11, %v2007_v15, %v2008_v44  ;;  %v710_v34 = vor.u32 %v708_v42, %v707_v32  ;;  %v2800_v27 = vpop.permute.xlu1 %2799  ;;  %v711_v48 = vrot.slane %v707_v32, 4 }
 0x17e   : > { %v715_v52 = vrot.slane %v713_v7, 7  ;;  %v2688_v50 = vrot.slane %v2686_v2, 4  ;;  %v2689_v11 = vshll.u32 %v2343_v35, 16  ;;  %2839 = vst.msk [vmem:[#allocation4 + $0x48] sm:$0xff] %vm17930_vm15, %v2800_v27  ;;  %v2695_v40 = vshll.u32 %v2344_v24, 16 }
 0x17f   : > { %2086 = vrot.lane.b32.xlu0 %v11780_v5, %s13253_s14  ;;  %v888_v16 = vsel %vm13346_vm6, %v710_v34, %v887_v61  ;;  %v2699_v28 = vshrl.u32 %v2344_v24, 16  ;;  %v2705_v1 = vshll.u32 %v2345_v59, 16  ;;  %v11781_v53 = vcombine.low %v2006_v58, %v2009_v62  ;;  %v14865_v59 = vld [vmem:[#allocation2 + $0xd0] sm:$0xf] }
 0x180   : > { %v718_v54 = vor.u32 %v716_v17, %v715_v52  ;;  %v720_v4 = vrot.slane %v715_v52, 4  ;;  %889 = vst [vmem:[#allocation2 + $0xc0] sm:$0xf] %v888_v16  ;;  %v2691_v33 = vrot.slane %v2689_v11, 5  ;;  %v2697_v3 = vrot.slane %v2695_v40, 5  ;;  %v3842_v0 = vpop.permute.xlu0 %3841 }
 0x181   : > { %1764 = vrot.lane.b32.xlu1 %v11749_v9, %s13255_s16  ;;  %v2701_v36 = vrot.slane %v2699_v28, 4  ;;  %v11828_v29 = vrot.slane %v14823_v55, 9  ;;  %v3042_v47 = vrot.slane %v2889_v20, 5  ;;  %v3121_v30 = vpop.permute.xlu1 %3120  ;;  %v2707_v43 = vrot.slane %v2705_v1, 5 }
 0x182   : > { %v719_v22 = vsel %vm13337_vm4, %v711_v48, %v718_v54  ;;  %v2692_v35 = vor.u32 %v2691_v33, %v2688_v50  ;;  %v892_v10 = vsel %vm13386_vm7, %v720_v4, %v891_v39  ;;  %3160 = vst.msk [vmem:[#allocation4 + $0x48] sm:$0xff] %vm3150_vm12, %v3121_v30  ;;  %vm17931_vm6 = vcmask 261344  }
 0x183   : > { %3882 = vst.msk [vmem:[#allocation4 + $0x40] sm:$0xff] %vm17931_vm6, %v3842_v0  ;;  %2264 = vrot.lane.b32.xlu0 %v13104_v23, %s13250_s11  ;;  %v2702_v13 = vor.u32 %v2701_v36, %v2697_v3  ;;  %893 = vst [vmem:[#allocation2 + $0xc8] sm:$0x1] %v892_v10  ;;  %v3044_v46 = vrot.slane %v3042_v47, 4  ;;  %v3045_v41 = vrot.slane %v2890_v26, 5  ;;  %v1001_v44 = vsel %vm13386_vm7, %v930_v49, %v1000_v63 }
 0x184   : > { %890 = vst.msk [vmem:[#allocation2 + $0xc4] sm:$0xf] %vm17927_vm9, %v719_v22  ;;  %v2693_v42 = vrot.slane %v2692_v35, 4  ;;  %1002 = vst [vmem:[#allocation2 + $0xcc] sm:$0x1] %v1001_v44  ;;  %v1104_v8 = vsel %vm13449_vm10, %v1032_v37, %v1103_v12  ;;  %v4163_v15 = vpop.permute.xlu0 %4162  ;;  %v11717_v24 = vrot.slane %v716_v17, 11  ;;  %v3043_v37 = vsel %vm13496_vm11, %v11828_v29, %v3042_v47 }
 0x185   : > { %2088 = vrot.lane.b32.xlu1 %v11781_v53, %s13253_s14  ;;  %v2703_v25 = vrot.slane %v2702_v13, 4  ;;  %1105 = vst [vmem:[#allocation2 + $0xd4] sm:$0x1] %v1104_v8  ;;  %v3299_v31 = vpop.permute.xlu1 %3298  ;;  %4203 = vst.msk [vmem:[#allocation4 + $0x40] sm:$0xff] %vm4194_vm3, %v4163_v15  ;;  %v3046_v19 = vsel %vm13496_vm11, %v3044_v46, %v3045_v41  ;;  %v3763_v51 = vshll.u32 %v3391_v38, 16  ;;  %v3767_v58 = vshrl.u32 %v3391_v38, 16 }
 0x186   : > { %v2698_v61 = vsel %vm13590_vm14, %v2693_v42, %v2697_v3  ;;  %3338 = vst.msk [vmem:[#allocation4 + $0x48] sm:$0xff] %vm3328_vm13, %v3299_v31  ;;  %v11844_v9 = vcombine.low %v3043_v37, %v3046_v19  ;;  %vm17932_vm0 = vmmov %vm17931_vm6  ;;  %v4093_v20 = vrot.slane %v14865_v59, 5  ;;  %v13118_v59 = vld [vmem:[%s17866_s4 + $0xc8] sm:$0xff]  }
 0x187   : > { %v997_v49 = vld [vmem:[#allocation2 + $0xc0] sm:$0x1]  ;;  %v2708_v21 = vsel %vm13590_vm14, %v2703_v25, %v2707_v43  ;;  %v14881_v16 = vrot.slane %v3763_v51, 5  ;;  %v14883_v40 = vrot.slane %v3767_v58, 4  ;;  %v3932_v58 = vld [vmem:[#allocation2 + $0xc0] sm:$0xe]  ;;  %vm17936_vm6 = vmmov %vm17932_vm0 }
 0x188   : > { %v998_v32 = vsel %vm13386_vm7, %v705_v6, %v997_v49  ;;  %v11812_v7 = vcombine.low %v2698_v61, %v2708_v21  ;;  %v14871_v6 = vld [vmem:[#allocation2 + $0xc0] sm:$0xe]  ;;  %vm17933_vm7 = vmmov %vm17930_vm15 }
 0x189   : > { %999 = vst [vmem:[#allocation2 + $0xc0] sm:$0x1] %v998_v32  ;;  %v3844_v17 = vpop.permute.xlu1 %3843  ;;  %v11829_v36 = vrot.slane %v14871_v6, 9  ;;  %v3770_v15 = vor.u32 %v14883_v40, %v14881_v16  ;;  %vm17935_vm15 = vmmov %vm17932_vm0 }
 0x18a   : > { %2809 = vrot.lane.b32.xlu0 %v11812_v7, %s13256_s17  ;;  %v1100_v2 = vld [vmem:[#allocation2 + $0xc8] sm:$0x1]  ;;  %3883 = vst.msk [vmem:[#allocation4 + $0x48] sm:$0xff] %vm17932_vm0, %v3844_v17  ;;  %v1755_v27 = vpop.permute.xlu0 %1754  ;;  %vm17937_vm9 = vmmov %vm17933_vm7 }
 0x18b   : > { %v2347_v55 = vld [vmem:[#allocation2 + $0xc4] sm:$0xf]  ;;  %v1101_v56 = vsel %vm13449_vm10, %v11717_v24, %v1100_v2  ;;  %v3390_v45 = vld [vmem:[#allocation2 + $0xcc] sm:$0xf]  ;;  %1793 = vst.msk [vmem:[#allocation4 + $0x50] sm:$0xff] %vm1782_vm1, %v1755_v27  ;;  %vm17934_vm10 = vmmov %vm17933_vm7 }
 0x18c   : > { %v2719_v5 = vshll.u32 %v2347_v55, 16  ;;  %v2723_v57 = vshrl.u32 %v2347_v55, 16  ;;  %v14873_v62 = vld [vmem:[#allocation2 + $0xc4] sm:$0xf]  ;;  %1102 = vst [vmem:[#allocation2 + $0xc8] sm:$0x1] %v1101_v56  ;;  %vm17938_vm0 = vmmov %vm17933_vm7 }
 0x18d   : > { %v3049_v34 = vrot.slane %v14873_v62, 5  ;;  %v3388_v39 = vld [vmem:[#allocation2 + $0xc4] sm:$0xf]  ;;  %v4165_v26 = vpop.permute.xlu1 %4164  ;;  %v3754_v63 = vshrl.u32 %v3390_v45, 16  ;;  %v3757_v23 = vshll.u32 %v3390_v45, 16  ;;  %v4219_v28 = vld [vmem:[#allocation4 + $0x40] sm:$0xff] }
 0x18e   : > { %v14877_v48 = vrot.slane %v2719_v5, 5  ;;  %v2725_v52 = vrot.slane %v2723_v57, 4  ;;  %v3739_v50 = vshll.u32 %v3388_v39, 16  ;;  %v3743_v11 = vshrl.u32 %v3388_v39, 16  ;;  %3130 = vrot.lane.b32.xlu0 %v11844_v9, %s13252_s13  ;;  %4204 = vst.msk [vmem:[#allocation4 + $0x48] sm:$0xff] %vm4194_vm3, %v4165_v26  ;;  %12966 = vmatprep.mubr.msk.bf16.mxu0 %vm4247_vm2, %v4219_v28  ;;  %v2079_v29 = vpop.permute.xlu0 %2078 }
 0x18f   : > { %v14889_v4 = vld [vmem:[#allocation2 + $0xd4] sm:$0x1]  ;;  %v14891_v33 = vld [vmem:[#allocation2 + $0xc4] sm:$0xf]  ;;  %v3051_v0 = vrot.slane %v3049_v34, 4  ;;  %2117 = vst.msk [vmem:[#allocation4 + $0x50] sm:$0xff] %vm2106_vm5, %v2079_v29 }
 0x190   : > { %v2726_v1 = vor.u32 %v2725_v52, %v14877_v48  ;;  %v14887_v53 = vrot.slane %v3739_v50, 5  ;;  %v3745_v54 = vrot.slane %v3743_v11, 4  ;;  %v13105_v12 = vld [vmem:[#allocation2 + $0xc0] sm:$0xff]   ;;  %v3756_v46 = vrot.slane %v3754_v63, 4 }
 0x191   : > { %v2346_v3 = vld [vmem:[#allocation2 + $0xc0] sm:$0xf]  ;;  %v1757_v43 = vpop.permute.xlu1 %1756  ;;  %2266 = vrot.lane.b32.xlu1 %v13105_v12, %s13250_s11  ;;  %v3759_v41 = vrot.slane %v3757_v23, 5  ;;  %v3773_v44 = vshll.u32 %v14889_v4, 16  ;;  %v4086_v21 = vrot.slane %v14891_v33, 5  ;;  %v3050_v52 = vsel %vm13496_vm11, %v11829_v36, %v3049_v34 }
 0x192   : > { %v2710_v47 = vshrl.u32 %v2346_v3, 16  ;;  %v2713_v30 = vshll.u32 %v2346_v3, 16  ;;  %v13108_v22 = vld [vmem:[#allocation2 + $0xc0] sm:$0xff]   ;;  %v3746_v35 = vor.u32 %v3745_v54, %v14887_v53  ;;  %v2727_v10 = vrot.slane %v2726_v1, 4  ;;  %1794 = vst.msk [vmem:[#allocation4 + $0x58] sm:$0xff] %vm1782_vm1, %v1757_v43  ;;  %v2257_v37 = vpop.permute.xlu0 %2256 }
 0x193   : > { %v3387_v13 = vld [vmem:[#allocation2 + $0xc0] sm:$0xf]  ;;  %v2348_v42 = vld [vmem:[#allocation2 + $0xc8] sm:$0x1]  ;;  %3308 = vrot.lane.b32.xlu0 %v13108_v22, %s13251_s12  ;;  %2295 = vst.msk [vmem:[#allocation4 + $0x50] sm:$0xff] %vm2284_vm8, %v2257_v37  ;;  %v3760_v6 = vor.u32 %v3759_v41, %v3756_v46  ;;  %v11892_v11 = vrot.slane %v3932_v58, 9 }
 0x194   : > { %v2712_v8 = vrot.slane %v2710_v47, 4  ;;  %v2715_v25 = vrot.slane %v2713_v30, 5  ;;  %v2893_v31 = vld [vmem:[#allocation2 + $0xc8] sm:$0x1]  ;;  %v2729_v61 = vshll.u32 %v2348_v42, 16  ;;  %v3730_v49 = vshrl.u32 %v3387_v13, 16 }
 0x195   : > { %v3389_v38 = vld [vmem:[#allocation2 + $0xc8] sm:$0x1]  ;;  %v3733_v24 = vshll.u32 %v3387_v13, 16  ;;  %v3052_v32 = vrot.slane %v2893_v31, 5  ;;  %v3747_v7 = vrot.slane %v3746_v35, 4  ;;  %v2081_v17 = vpop.permute.xlu1 %2080  ;;  %v4220_v56 = vld [vmem:[#allocation4 + $0x48] sm:$0xff]  ;;  %v4087_v12 = vsel %vm13496_vm11, %v11892_v11, %v4086_v21 }
 0x196   : > { %v2716_v19 = vor.u32 %v2715_v25, %v2712_v8  ;;  %v3749_v51 = vshll.u32 %v3389_v38, 16  ;;  %v2731_v2 = vrot.slane %v2729_v61, 5  ;;  %v3732_v55 = vrot.slane %v3730_v49, 4  ;;  %2118 = vst.msk [vmem:[#allocation4 + $0x58] sm:$0xff] %vm2106_vm5, %v2081_v17  ;;  %v3934_v39 = vld [vmem:[#allocation2 + $0xc8] sm:$0x1]  ;;  %12967 = vmatmul.mubr.msk.bf16.gmra.mrb[16].mxu0 %vm4247_vm2, %v4220_v56 }
 0x197   : > { %v3735_v9 = vrot.slane %v3733_v24, 5  ;;  %v3053_v26 = vsel %vm13496_vm11, %v3051_v0, %v3052_v32  ;;  %v3771_v63 = vrot.slane %v3770_v15, 4  ;;  %v4088_v23 = vrot.slane %v4086_v21, 4  ;;  %v3935_v34 = vld [vmem:[#allocation2 + $0xcc] sm:$0xe]  ;;  %v13116_v8 = vld [vmem:[%s17866_s4 + $0xc0] sm:$0xff]  }
 0x198   : > { %v2717_v5 = vrot.slane %v2716_v19, 4  ;;  %v3751_v57 = vrot.slane %v3749_v51, 5  ;;  %v2732_v27 = vsel %vm13590_vm14, %v2727_v10, %v2731_v2  ;;  %v4089_v62 = vrot.slane %v3934_v39, 5  ;;  %v3937_v36 = vld [vmem:[#allocation2 + $0xd4] sm:$0x1]  ;;  %v13109_v0 = vld [vmem:[#allocation2 + $0xcc] sm:$0xff]   ;;  %12584 = vmatprep.subr.bf16.mxu0 %v13116_v8 }
 0x199   : > { %v3736_v50 = vor.u32 %v3735_v9, %v3732_v55  ;;  %v3761_v54 = vrot.slane %v3760_v6, 4  ;;  %v3775_v4 = vrot.slane %v3773_v44, 5  ;;  %v11845_v33 = vcombine.low %v3050_v52, %v3053_v26  ;;  %v13117_v25 = vld [vmem:[%s17866_s4 + $0x80] sm:$0xff]   ;;  %v13123_v61 = vld [vmem:[%s17866_s4 + $0x48] sm:$0xff]   ;;  %v13122_v49 = vld [vmem:[%s17866_s4 + $0xd0] sm:$0xff]  }
 0x19a   : > { %v2722_v45 = vsel %vm13590_vm14, %v2717_v5, %v14877_v48  ;;  %v3752_v1 = vsel %vm13590_vm14, %v3747_v7, %v3751_v57  ;;  %v4090_v3 = vsel %vm13496_vm11, %v4088_v23, %v4089_v62  ;;  %v11893_v22 = vrot.slane %v3935_v34, 9  ;;  %v13119_v31 = vld [vmem:[%s17866_s4 + $0x40] sm:$0xff]   ;;  %12585 = vmatpush3.bf16.msra.mxu0 %v13117_v25  ;;  %v13120_v38 = vld [vmem:[%s17866_s4 + $0x88] sm:$0xff]   ;;  %v13127_v21 = vld [vmem:[%s17866_s4 + $0x50] sm:$0xff]  }
 0x19b   : > { %v11813_v40 = vcombine.low %v2722_v45, %v2732_v27  ;;  %v3737_v28 = vrot.slane %v3736_v50, 4  ;;  %v11908_v30 = vcombine.low %v4087_v12, %v4090_v3  ;;  %v3776_v35 = vsel %vm13590_vm14, %v3771_v63, %v3775_v4  ;;  %v13121_v15 = vld [vmem:[%s17866_s4] sm:$0xff]   ;;  %12472 = vmatprep.subr.bf16.mxu1 %v13119_v31  ;;  %12586 = vmatprep.subr.bf16.mxu0 %v13118_v59  ;;  %v13125_v24 = vld [vmem:[%s17866_s4 + $0x8] sm:$0xff]   ;;  %v13124_v37 = vld [vmem:[%s17866_s4 + $0x90] sm:$0xff]  }
 0x19c   : > { %v2802_v47 = vpop.permute.xlu0 %2801  ;;  %v4095_v43 = vrot.slane %v4093_v20, 4  ;;  %v4096_v10 = vrot.slane %v3937_v36, 5  ;;  %12473 = vmatpush3.bf16.msra.mxu1 %v13121_v15  ;;  %v13126_v32 = vld [vmem:[%s17866_s4 + $0xd8] sm:$0xff]   ;;  %v13129_v7 = vld [vmem:[%s17866_s4 + $0x10] sm:$0xff]   ;;  %v13130_v55 = vld [vmem:[%s17866_s4 + $0xe0] sm:$0xff]  }
 0x19d   : > { %2811 = vrot.lane.b32.xlu1 %v11813_v40, %s13256_s17  ;;  %v3742_v48 = vsel %vm13590_vm14, %v3737_v28, %v14887_v53  ;;  %2840 = vst.msk [vmem:[#allocation4 + $0x50] sm:$0xff] %vm17933_vm7, %v2802_v47  ;;  %v3766_v53 = vsel %vm13590_vm14, %v3761_v54, %v14881_v16  ;;  %v4094_v16 = vsel %vm13496_vm11, %v11893_v22, %v4093_v20  ;;  %v13131_v51 = vld [vmem:[%s17866_s4 + $0x58] sm:$0xff]   ;;  %v13135_v56 = vld [vmem:[%s17866_s4 + $0x60] sm:$0xff]   ;;  %v13134_v39 = vld [vmem:[%s17866_s4 + $0xe8] sm:$0xff]  }
 0x19e   : > { %v11876_v29 = vcombine.low %v3742_v48, %v3752_v1  ;;  %v11877_v46 = vcombine.low %v3766_v53, %v3776_v35  ;;  %v4097_v41 = vsel %vm13496_vm11, %v4095_v43, %v4096_v10  ;;  %12474 = vmatprep.subr.bf16.mxu1 %v13123_v61  ;;  %12587 = vmatpush3.bf16.msra.mxu0 %v13120_v38  ;;  %v13128_v58 = vld [vmem:[%s17866_s4 + $0x98] sm:$0xff]   ;;  %v13132_v5 = vld [vmem:[%s17866_s4 + $0xa0] sm:$0xff]   ;;  %v13139_v52 = vld [vmem:[%s17866_s4 + $0x68] sm:$0xff]  }
 0x19f   : > { %v11909_v20 = vcombine.low %v4094_v16, %v4097_v41  ;;  %12588 = vmatprep.subr.bf16.mxu0 %v13122_v49  ;;  %v13133_v9 = vld [vmem:[%s17866_s4 + $0x18] sm:$0xff]   ;;  %v13137_v27 = vld [vmem:[%s17866_s4 + $0x20] sm:$0xff]   ;;  %v13136_v50 = vld [vmem:[%s17866_s4 + $0xa8] sm:$0xff]  }
 0x1a0   : > { %3853 = vrot.lane.b32.xlu0 %v11876_v29, %s13257_s18  ;;  %v3123_v13 = vpop.permute.xlu0 %3122  ;;  %12475 = vmatpush3.bf16.msra.mxu1 %v13125_v24  ;;  %v13138_v45 = vld [vmem:[%s17866_s4 + $0xf0] sm:$0xff]   ;;  %v13141_v26 = vld [vmem:[%s17866_s4 + $0x28] sm:$0xff]   ;;  %v13142_v62 = vld [vmem:[%s17866_s4 + $0xf8] sm:$0xff]  }
 0x1a1   : > { %3132 = vrot.lane.b32.xlu1 %v11845_v33, %s13252_s13  ;;  %3161 = vst.msk [vmem:[#allocation4 + $0x50] sm:$0xff] %vm3150_vm12, %v3123_v13  ;;  %12476 = vmatprep.subr.bf16.mxu1 %v13127_v21  ;;  %v13144_v23 = vld [vmem:[%s17866_s4 + $0x70] sm:$0xff]   ;;  %v13147_v34 = vld [vmem:[%s17866_s4 + $0x78] sm:$0xff]   ;;  %vm17939_vm7 = vmmov %vm17936_vm6  ;;  %s11657_s13 = sshll.u32 %s18121_s28, 3 }
 0x1a2   : > { %12589 = vmatpush3.bf16.msra.mxu0 %v13124_v37  ;;  %v13140_v40 = vld [vmem:[%s17866_s4 + $0xb0] sm:$0xff]   ;;  %v13145_v33 = vld [vmem:[%s17866_s4 + $0xb8] sm:$0xff]   ;;  %v15080_v41 = vld [vmem:[%s17865_s3] ss:$0 sm:$0xff]  ;;  %s316_s17 = scalar_lea.vmem %s17870_s8, %s11657_s13 }
 0x1a3   : > { %v2259_v44 = vpop.permute.xlu1 %2258  ;;  %12590 = vmatprep.subr.bf16.mxu0 %v13126_v32  ;;  %v13146_v54 = vld [vmem:[%s17866_s4 + $0x30] sm:$0xff]   ;;  %v13149_v12 = vld [vmem:[%s17866_s4 + $0x38] sm:$0xff]  }
 0x1a4   : > { %4174 = vrot.lane.b32.xlu0 %v11908_v30, %s13254_s15  ;;  %2296 = vst.msk [vmem:[#allocation4 + $0x58] sm:$0xff] %vm2284_vm8, %v2259_v44  ;;  %12477 = vmatpush3.bf16.msra.mxu1 %v13129_v7 }
 0x1a5   : > { %3310 = vrot.lane.b32.xlu1 %v13109_v0, %s13251_s12  ;;  %v3301_v42 = vpop.permute.xlu0 %3300  ;;  %12478 = vmatprep.subr.bf16.mxu1 %v13131_v51  ;;  %s17757_s12 = scalar_lea.vmem %s17869_s7, %s12388_s10 }
 0x1a6   : > { %3339 = vst.msk [vmem:[#allocation4 + $0x50] sm:$0xff] %vm3328_vm13, %v3301_v42  ;;  %12591 = vmatpush3.bf16.msra.mxu0 %v13128_v58 }
 0x1a7   : > { %12592 = vmatprep.subr.bf16.mxu0 %v13130_v55 }
 0x1a8   : > { %12479 = vmatpush3.bf16.msra.mxu1 %v13133_v9 }
 0x1a9   : > { %3855 = vrot.lane.b32.xlu1 %v11877_v46, %s13257_s18  ;;  %12480 = vmatprep.subr.bf16.mxu1 %v13135_v56  ;;  %v15074_v46 = vld [vmem:[%s17864_s2] ss:$0 sm:$0xff] }
 0x1aa   : > { %12593 = vmatpush3.bf16.msra.mxu0 %v13132_v5 }
 0x1ab   : > { %12594 = vmatprep.subr.bf16.mxu0 %v13134_v39 }
 0x1ac   : > { %12481 = vmatpush3.bf16.msra.mxu1 %v13137_v27 }
 0x1ad   : > { %4176 = vrot.lane.b32.xlu1 %v11909_v20, %s13254_s15  ;;  %12482 = vmatprep.subr.bf16.mxu1 %v13139_v52 }
 0x1ae   : > { %12595 = vmatpush3.bf16.msra.mxu0 %v13136_v50 }
 0x1af   : > { %v2804_v19 = vpop.permute.xlu1 %2803  ;;  %12596 = vmatprep.subr.bf16.mxu0 %v13138_v45 }
 0x1b0   : > { %2841 = vst.msk [vmem:[#allocation4 + $0x58] sm:$0xff] %vm17934_vm10, %v2804_v19  ;;  %12483 = vmatpush3.bf16.msra.mxu1 %v13141_v26  ;;  %vm17940_vm10 = vmmov %vm17936_vm6 }
 0x1b1   : > { %12484 = vmatprep.subr.bf16.mxu1 %v13144_v23 }
 0x1b2   : > { %12597 = vmatpush3.bf16.msra.mxu0 %v13140_v40 }
 0x1b3   : > { %v3125_v17 = vpop.permute.xlu1 %3124  ;;  %v3846_v2 = vpop.permute.xlu0 %3845  ;;  %12598 = vmatprep.subr.bf16.mxu0 %v13142_v62 }
 0x1b4   : > { %3162 = vst.msk [vmem:[#allocation4 + $0x58] sm:$0xff] %vm3150_vm12, %v3125_v17  ;;  %12485 = vmatpush3.bf16.msra.mxu1 %v13146_v54 }
 0x1b5   : > { %3884 = vst.msk [vmem:[#allocation4 + $0x50] sm:$0xff] %vm17935_vm15, %v3846_v2  ;;  %12486 = vmatprep.subr.bf16.mxu1 %v13147_v34  ;;  %vm4987_vm15 = vcmask 1043456  }
 0x1b6   : > { %12599 = vmatpush3.bf16.msra.mxu0 %v13145_v33  ;;  %v4998_v33 = vld [vmem:[#allocation3 + $0xc] sm:$0xf] }
 0x1b7   : > { %v3303_v57 = vpop.permute.xlu1 %3302  ;;  %v4167_v6 = vpop.permute.xlu0 %4166 }
 0x1b8   : > { %3340 = vst.msk [vmem:[#allocation4 + $0x58] sm:$0xff] %vm3328_vm13, %v3303_v57  ;;  %12487 = vmatpush3.bf16.msra.mxu1 %v13149_v12  ;;  %v4989_v57 = vld [vmem:[#allocation3] sm:$0xf] }
 0x1b9   : > { %4205 = vst.msk [vmem:[#allocation4 + $0x50] sm:$0xff] %vm4194_vm3, %v4167_v6 }
 0x1bc   : > { %v3848_v11 = vpop.permute.xlu1 %3847 }
 0x1bd   : > { %3885 = vst.msk [vmem:[#allocation4 + $0x58] sm:$0xff] %vm17936_vm6, %v3848_v11  ;;  %v1759_v63 = vpop.permute.xlu0 %1758  ;;  %vm4993_vm6 = vcmask 1040384  }
 0x1be   : > { %1795 = vst.msk [vmem:[#allocation4 + $0x60] sm:$0xff] %vm1782_vm1, %v1759_v63 }
 0x1c0   : > { %v4169_v28 = vpop.permute.xlu1 %4168  ;;  %v4221_v1 = vld [vmem:[#allocation4 + $0x50] sm:$0xff] }
 0x1c1   : > { %4206 = vst.msk [vmem:[#allocation4 + $0x58] sm:$0xff] %vm4194_vm3, %v4169_v28  ;;  %v2083_v4 = vpop.permute.xlu0 %2082  ;;  %12970 = vmatprep.mubr.msk.bf16.mxu0 %vm4247_vm2, %v4221_v1  ;;  %v5005_v28 = vld [vmem:[#allocation3 + $0x18] sm:$0xf] }
 0x1c2   : > { %2119 = vst.msk [vmem:[#allocation4 + $0x60] sm:$0xff] %vm2106_vm5, %v2083_v4 }
 0x1c4   : > { %v1761_v48 = vpop.permute.xlu1 %1760 }
 0x1c5   : > { %1796 = vst.msk [vmem:[#allocation4 + $0x68] sm:$0xff] %vm1782_vm1, %v1761_v48  ;;  %v2261_v3 = vpop.permute.xlu0 %2260 }
 0x1c6   : > { %2297 = vst.msk [vmem:[#allocation4 + $0x60] sm:$0xff] %vm2284_vm8, %v2261_v3 }
 0x1c8   : > { %v2085_v36 = vpop.permute.xlu1 %2084  ;;  %v4222_v29 = vld [vmem:[#allocation4 + $0x58] sm:$0xff] }
 0x1c9   : > { %2120 = vst.msk [vmem:[#allocation4 + $0x68] sm:$0xff] %vm2106_vm5, %v2085_v36  ;;  %12971 = vmatmul.mubr.msk.bf16.gmra.mrb[20].mxu0 %vm4247_vm2, %v4222_v29 }
 0x1cc   : > { %v2263_v47 = vpop.permute.xlu1 %2262 }
 0x1cd   : > { %v2806_v30 = vpop.permute.xlu0 %2805  ;;  %2298 = vst.msk [vmem:[#allocation4 + $0x68] sm:$0xff] %vm2284_vm8, %v2263_v47 }
 0x1ce   : > { %2842 = vst.msk [vmem:[#allocation4 + $0x60] sm:$0xff] %vm17937_vm9, %v2806_v30  ;;  %vm17941_vm9 = vsmask.f32 7938 }
 0x1d1   : > { %v3127_v0 = vpop.permute.xlu0 %3126 }
 0x1d2   : > { %3163 = vst.msk [vmem:[#allocation4 + $0x60] sm:$0xff] %vm3150_vm12, %v3127_v0  ;;  %v4995_v0 = vld [vmem:[#allocation3 + $0x8] sm:$0x1] }
 0x1d5   : > { %v3305_v22 = vpop.permute.xlu0 %3304 }
 0x1d6   : > { %3341 = vst.msk [vmem:[#allocation4 + $0x60] sm:$0xff] %vm3328_vm13, %v3305_v22  ;;  %v5009_v22 = vld [vmem:[#allocation3 + $0x20] sm:$0x1] }
 0x1dc   : > { %v2808_v53 = vpop.permute.xlu1 %2807 }
 0x1dd   : > { %2843 = vst.msk [vmem:[#allocation4 + $0x68] sm:$0xff] %vm17938_vm0, %v2808_v53  ;;  %vm15103_vm0 = vmand %vm4987_vm15, %vm17941_vm9  ;;  %vm17950_vm15 = vcmask 162944  }
 0x1de   : > { %v3850_v35 = vpop.permute.xlu0 %3849 }
 0x1df   : > { %3886 = vst.msk [vmem:[#allocation4 + $0x60] sm:$0xff] %vm17939_vm7, %v3850_v35  ;;  %v12952_v16 = vpop.f32.mrb[0].mxu0  ;;  %vm17944_vm7 = vsmask.f32 256 }
 0x1e0   : > { %v3129_v43 = vpop.permute.xlu1 %3128  ;;  %v4470_v44 = vmul.f32 %v12952_v16, %v15074_v46  ;;  %v4334_v42 = vpop.f32.mrb[1].mxu0 }
 0x1e1   : > { %3164 = vst.msk [vmem:[#allocation4 + $0x68] sm:$0xff] %vm3150_vm12, %v3129_v43  ;;  %v4468_v8 = vmul.f32 %v15074_v46, %v4334_v42  ;;  %v12953_v25 = vpop.f32.mrb[2].mxu0 }
 0x1e2   : > { %v4171_v10 = vpop.permute.xlu0 %4170  ;;  %v4509_v59 = vadd.f32 %v15080_v41, %v4470_v44  ;;  %v4471_v20 = vmul.f32 %v12953_v25, %v15074_v46  ;;  %v4337_v31 = vpop.f32.mrb[3].mxu0  ;;  %v5002_v44 = vld [vmem:[#allocation3 + $0x14] sm:$0x1] }
 0x1e3   : > { %4207 = vst.msk [vmem:[#allocation4 + $0x60] sm:$0xff] %vm4194_vm3, %v4171_v10  ;;  %v4507_v15 = vadd.f32 %v15080_v41, %v4468_v8  ;;  %v4469_v61 = vmul.f32 %v15074_v46, %v4337_v31 }
 0x1e4   : > { %v3307_v13 = vpop.permute.xlu1 %3306  ;;  %v4541_v49 = vmax.f32 %v4509_v59, 0.0  ;;  %v4510_v24 = vadd.f32 %v15080_v41, %v4471_v20 }
 0x1e5   : > { %3342 = vst.msk [vmem:[#allocation4 + $0x68] sm:$0xff] %vm3328_vm13, %v3307_v13  ;;  %v4539_v19 = vmax.f32 %v4507_v15, 0.0  ;;  %v4508_v32 = vadd.f32 %v15080_v41, %v4469_v61 }
 0x1e6   : > { %v12421_v7 = vpack.c.bf16 %v4541_v49, %v4541_v49  ;;  %v4542_v51 = vmax.f32 %v4510_v24, 0.0 }
 0x1e7   : > { %v15093_v58 = vpack.c.bf16 %v4539_v19, %v4539_v19  ;;  %v4540_v17 = vmax.f32 %v4508_v32, 0.0  ;;  %v12956_v2 = vpop.f32.mrb[4].mxu0 }
 0x1e8   : > { %v4668_v55 = vshrl.u32 %v12421_v7, 16  ;;  %v12422_v9 = vpack.c.bf16 %v4542_v51, %v4542_v51  ;;  %v4350_v56 = vpop.f32.mrb[5].mxu0  ;;  %v4474_v27 = vmul.f32 %v12956_v2, %v15074_v46  ;;  %v4671_v11 = vshll.u32 %v12421_v7, 16 }
 0x1e9   : > { %v4685_v6 = vshrl.u32 %v15093_v58, 16  ;;  %v15096_v39 = vpack.c.bf16 %v4540_v17, %v4540_v17  ;;  %v12957_v52 = vpop.f32.mrb[6].mxu0  ;;  %v4688_v45 = vshll.u32 %v15093_v58, 16  ;;  %v4472_v4 = vmul.f32 %v15074_v46, %v4350_v56 }
 0x1ea   : > { %v4223_v38 = vld [vmem:[#allocation4 + $0x60] sm:$0xff]  ;;  %v4670_v50 = vrot.slane %v4668_v55, 7  ;;  %v4676_v26 = vshrl.u32 %v12422_v9, 16  ;;  %v4353_v63 = vpop.f32.mrb[7].mxu0  ;;  %v15107_v1 = vrot.slane %v4668_v55, 4  ;;  %v4679_v12 = vshll.u32 %v12422_v9, 16 }
 0x1eb   : > { %v3852_v21 = vpop.permute.xlu1 %3851  ;;  %v1763_v37 = vpop.permute.xlu0 %1762  ;;  %12974 = vmatprep.mubr.msk.bf16.mxu0 %vm4247_vm2, %v4223_v38  ;;  %v4687_v62 = vrot.slane %v4685_v6, 7  ;;  %v4693_v54 = vshrl.u32 %v15096_v39, 16  ;;  %v4696_v3 = vshll.u32 %v15096_v39, 16  ;;  %v4513_v35 = vadd.f32 %v15080_v41, %v4474_v27 }
 0x1ec   : > { %3887 = vst.msk [vmem:[#allocation4 + $0x68] sm:$0xff] %vm17940_vm10, %v3852_v21  ;;  %v4673_v34 = vor.u32 %v4671_v11, %v4670_v50  ;;  %v4678_v48 = vrot.slane %v4676_v26, 7  ;;  %v4674_v29 = vrot.slane %v4670_v50, 4  ;;  %vm15117_vm10 = vmand %vm4993_vm6, %vm17944_vm7  ;;  %v5219_v38 = vrot.slane %v4679_v12, 7 }
 0x1ed   : > { %1797 = vst.msk [vmem:[#allocation4 + $0x70] sm:$0xff] %vm1782_vm1, %v1763_v37  ;;  %v4690_v30 = vor.u32 %v4688_v45, %v4687_v62  ;;  %v4695_v53 = vrot.slane %v4693_v54, 7  ;;  %v4691_v8 = vrot.slane %v4687_v62, 4  ;;  %v4545_v19 = vmax.f32 %v4513_v35, 0.0 }
 0x1ee   : > { %v4990_v43 = vsel %vm15103_vm0, %v4673_v34, %v4989_v57  ;;  %v5006_v10 = vsel %vm15103_vm0, %v4673_v34, %v5005_v28  ;;  %v4681_v13 = vor.u32 %v4679_v12, %v4678_v48  ;;  %v4683_v16 = vrot.slane %v4678_v48, 4 }
 0x1ef   : > { %v4173_v5 = vpop.permute.xlu1 %4172  ;;  %4991 = vst [vmem:[#allocation3] sm:$0xf] %v4990_v43  ;;  %5007 = vst [vmem:[#allocation3 + $0x18] sm:$0xf] %v5006_v10  ;;  %v4999_v25 = vsel %vm15103_vm0, %v4690_v30, %v4998_v33  ;;  %v4698_v59 = vor.u32 %v4696_v3, %v4695_v53  ;;  %v4700_v20 = vrot.slane %v4695_v53, 4  ;;  %v4511_v32 = vadd.f32 %v15080_v41, %v4472_v4 }
 0x1f0   : > { %4208 = vst.msk [vmem:[#allocation4 + $0x68] sm:$0xff] %vm4194_vm3, %v4173_v5  ;;  %5000 = vst [vmem:[#allocation3 + $0xc] sm:$0xf] %v4999_v25  ;;  %v4682_v31 = vsel %vm13337_vm4, %v4674_v29, %v4681_v13  ;;  %v4996_v15 = vsel %vm15117_vm10, %v4683_v16, %v4995_v0  ;;  %v5010_v61 = vsel %vm15117_vm10, %v4683_v16, %v5009_v22  ;;  %v5118_v55 = vrot.slane %v15107_v1, 4  ;;  %v5019_v4 = vld [vmem:[#allocation3 + $0x30] sm:$0xf] }
 0x1f1   : > { %v2087_v23 = vpop.permute.xlu0 %2086  ;;  %4992 = vst [vmem:[#allocation3 + $0x4] sm:$0xf] %v4682_v31  ;;  %4997 = vst [vmem:[#allocation3 + $0x8] sm:$0x1] %v4996_v15  ;;  %v4699_v21 = vsel %vm13337_vm4, %v4691_v8, %v4698_v59  ;;  %v5003_v37 = vsel %vm15117_vm10, %v4700_v20, %v5002_v44  ;;  %v4475_v7 = vmul.f32 %v12957_v52, %v15074_v46  ;;  %v4543_v2 = vmax.f32 %v4511_v32, 0.0 }
 0x1f2   : > { %2121 = vst.msk [vmem:[#allocation4 + $0x70] sm:$0xff] %vm2106_vm5, %v2087_v23  ;;  %5008 = vst [vmem:[#allocation3 + $0x1c] sm:$0xf] %v4682_v31  ;;  %v4473_v51 = vmul.f32 %v15074_v46, %v4353_v63  ;;  %v15147_v17 = vpack.c.bf16 %v4545_v19, %v4545_v19  ;;  %v5220_v5 = vrot.slane %v5219_v38, 4  ;;  %v5012_v13 = vld [vmem:[#allocation3 + $0x24] sm:$0xf] }
 0x1f3   : > { %v1765_v36 = vpop.permute.xlu1 %1764  ;;  %5011 = vst [vmem:[#allocation3 + $0x20] sm:$0x1] %v5010_v61  ;;  %5001 = vst [vmem:[#allocation3 + $0x10] sm:$0xf] %v4699_v21  ;;  %v4514_v9 = vadd.f32 %v15080_v41, %v4475_v7  ;;  %v15154_v50 = vpack.c.bf16 %v4543_v2, %v4543_v2  ;;  %v5023_v25 = vld [vmem:[#allocation3 + $0x38] sm:$0x1] }
 0x1f4   : > { %1798 = vst.msk [vmem:[#allocation4 + $0x78] sm:$0xff] %vm1782_vm1, %v1765_v36  ;;  %5004 = vst [vmem:[#allocation3 + $0x14] sm:$0x1] %v5003_v37  ;;  %v4512_v56 = vadd.f32 %v15080_v41, %v4473_v51  ;;  %v4719_v57 = vshrl.u32 %v15147_v17, 16  ;;  %v4722_v27 = vshll.u32 %v15147_v17, 16  ;;  %v11977_v36 = vrot.slane %v4696_v3, 11 }
 0x1f5   : > { %v2265_v42 = vpop.permute.xlu0 %2264  ;;  %vm17947_vm1 = vmmov %vm17941_vm9  ;;  %v4546_v63 = vmax.f32 %v4514_v9, 0.0  ;;  %v4702_v34 = vshrl.u32 %v15154_v50, 16  ;;  %v4705_v3 = vshll.u32 %v15154_v50, 16  ;;  %v5016_v37 = vld [vmem:[#allocation3 + $0x2c] sm:$0x1]  ;;  %vm11469_vm9 = vcmask 1047559  }
 0x1f6   : > { %2299 = vst.msk [vmem:[#allocation4 + $0x70] sm:$0xff] %vm2284_vm8, %v2265_v42  ;;  %v5165_v52 = vld [vmem:[#allocation3] sm:$0x1]  ;;  %v5171_v45 = vld [vmem:[#allocation3 + $0x18] sm:$0x1]  ;;  %v4544_v23 = vmax.f32 %v4512_v56, 0.0 }
 0x1f7   : > { %v2089_v49 = vpop.permute.xlu1 %2088  ;;  %v4224_v24 = vld [vmem:[#allocation4 + $0x68] sm:$0xff]  ;;  %v5166_v28 = vsel %vm15117_vm10, %v5118_v55, %v5165_v52  ;;  %v5172_v1 = vsel %vm15117_vm10, %v5118_v55, %v5171_v45  ;;  %v5168_v62 = vld [vmem:[#allocation3 + $0xc] sm:$0x1]  ;;  %v4721_v54 = vrot.slane %v4719_v57, 7  ;;  %v15176_v29 = vpack.c.bf16 %v4546_v63, %v4546_v63 }
 0x1f8   : > { %2122 = vst.msk [vmem:[#allocation4 + $0x78] sm:$0xff] %vm2106_vm5, %v2089_v49  ;;  %12975 = vmatmul.mubr.msk.bf16.gmra.mrb[24].mxu0 %vm4247_vm2, %v4224_v24  ;;  %vm15158_vm5 = vmand %vm4993_vm6, %vm17947_vm1  ;;  %v5169_v33 = vsel %vm15117_vm10, %v4685_v6, %v5168_v62  ;;  %v5268_v48 = vld [vmem:[#allocation3 + $0x8] sm:$0x1]  ;;  %v15178_v30 = vpack.c.bf16 %v4544_v23, %v4544_v23  ;;  %v4704_v39 = vrot.slane %v4702_v34, 7  ;;  %v5467_v59 = vld [vmem:[#allocation3 + $0x4] sm:$0xf] }
 0x1f9   : > { %5167 = vst [vmem:[#allocation3] sm:$0x1] %v5166_v28  ;;  %5173 = vst [vmem:[#allocation3 + $0x18] sm:$0x1] %v5172_v1  ;;  %v5269_v0 = vsel %vm15158_vm5, %v5220_v5, %v5268_v48  ;;  %v4724_v53 = vor.u32 %v4722_v27, %v4721_v54  ;;  %v4727_v43 = vshrl.u32 %v15176_v29, 16  ;;  %v4730_v8 = vshll.u32 %v15176_v29, 16 }
 0x1fa   : > { %v5274_v12 = vld [vmem:[#allocation3 + $0x20] sm:$0x1]  ;;  %5170 = vst [vmem:[#allocation3 + $0xc] sm:$0x1] %v5169_v33  ;;  %5270 = vst [vmem:[#allocation3 + $0x8] sm:$0x1] %v5269_v0  ;;  %v4707_v44 = vor.u32 %v4705_v3, %v4704_v39 }
 0x1fb   : > { %v5275_v22 = vsel %vm15158_vm5, %v5220_v5, %v5274_v12  ;;  %v5271_v58 = vld [vmem:[#allocation3 + $0x14] sm:$0x1]  ;;  %v5020_v10 = vsel %vm15103_vm0, %v4724_v53, %v5019_v4  ;;  %v4710_v16 = vshrl.u32 %v15178_v30, 16  ;;  %v4729_v42 = vrot.slane %v4727_v43, 7  ;;  %v5470_v55 = vld [vmem:[#allocation3 + $0x10] sm:$0xf] }
 0x1fc   : > { %v2810_v11 = vpop.permute.xlu0 %2809  ;;  %5276 = vst [vmem:[#allocation3 + $0x20] sm:$0x1] %v5275_v22  ;;  %v5272_v6 = vsel %vm15158_vm5, %v11977_v36, %v5271_v58  ;;  %5021 = vst [vmem:[#allocation3 + $0x30] sm:$0xf] %v5020_v10  ;;  %v4725_v20 = vrot.slane %v4721_v54, 4  ;;  %v4713_v15 = vshll.u32 %v15178_v30, 16  ;;  %v5013_v49 = vsel %vm15103_vm0, %v4707_v44, %v5012_v13 }
 0x1fd   : > { %2844 = vst.msk [vmem:[#allocation4 + $0x70] sm:$0xff] %vm17950_vm15, %v2810_v11  ;;  %5273 = vst [vmem:[#allocation3 + $0x14] sm:$0x1] %v5272_v6  ;;  %v4712_v31 = vrot.slane %v4710_v16, 7  ;;  %v5524_v61 = vshll.u32 %v5467_v59, 16  ;;  %v4732_v24 = vor.u32 %v4730_v8, %v4729_v42  ;;  %v4734_v21 = vrot.slane %v4729_v42, 4 }
 0x1fe   : > { %v5528_v19 = vshrl.u32 %v5467_v59, 16  ;;  %v4708_v7 = vrot.slane %v4704_v39, 4  ;;  %5014 = vst [vmem:[#allocation3 + $0x24] sm:$0xf] %v5013_v49  ;;  %v5548_v62 = vshll.u32 %v5470_v55, 16  ;;  %v11979_v36 = vrot.slane %v4730_v8, 11 }
 0x1ff   : > { %v4715_v51 = vor.u32 %v4713_v15, %v4712_v31  ;;  %v4717_v2 = vrot.slane %v4712_v31, 4  ;;  %v4733_v9 = vsel %vm13337_vm4, %v4725_v20, %v4732_v24  ;;  %v5024_v56 = vsel %vm15117_vm10, %v4734_v21, %v5023_v25  ;;  %v13164_v25 = vld [vmem:[%s17866_s4 + $0x1c0] sm:$0xff]  }
 0x200   : > { %v3131_v35 = vpop.permute.xlu0 %3130  ;;  %v5466_v5 = vld [vmem:[#allocation3] sm:$0xf]  ;;  %v5526_v27 = vrot.slane %v5524_v61, 5  ;;  %5022 = vst [vmem:[#allocation3 + $0x34] sm:$0xf] %v4733_v9  ;;  %v5530_v28 = vrot.slane %v5528_v19, 4  ;;  %12808 = vmatprep.subr.bf16.mxu0 %v13164_v25 }
 0x201   : > { %3165 = vst.msk [vmem:[#allocation4 + $0x70] sm:$0xff] %vm3150_vm12, %v3131_v35  ;;  %5025 = vst [vmem:[#allocation3 + $0x38] sm:$0x1] %v5024_v56  ;;  %v4716_v11 = vsel %vm13337_vm4, %v4708_v7, %v4715_v51  ;;  %v5017_v52 = vsel %vm15117_vm10, %v4717_v2, %v5016_v37  ;;  %v5468_v45 = vld [vmem:[#allocation3 + $0x8] sm:$0x1]  ;;  %v5515_v63 = vshrl.u32 %v5466_v5, 16 }
 0x202   : > { %v5518_v23 = vshll.u32 %v5466_v5, 16  ;;  %5015 = vst [vmem:[#allocation3 + $0x28] sm:$0xf] %v4716_v11  ;;  %5018 = vst [vmem:[#allocation3 + $0x2c] sm:$0x1] %v5017_v52  ;;  %v5534_v1 = vshll.u32 %v5468_v45, 16  ;;  %v5531_v29 = vor.u32 %v5530_v28, %v5526_v27 }
 0x203   : > { %v2267_v38 = vpop.permute.xlu1 %2266  ;;  %v5177_v54 = vld [vmem:[#allocation3 + $0x30] sm:$0x1]  ;;  %v5517_v4 = vrot.slane %v5515_v63, 4  ;;  %v5469_v48 = vld [vmem:[#allocation3 + $0xc] sm:$0xf]  ;;  %v5550_v39 = vrot.slane %v5548_v62, 5 }
 0x204   : > { %2300 = vst.msk [vmem:[#allocation4 + $0x78] sm:$0xff] %vm2284_vm8, %v2267_v38  ;;  %v5520_v33 = vrot.slane %v5518_v23, 5  ;;  %v5178_v12 = vsel %vm15117_vm10, %v4719_v57, %v5177_v54  ;;  %v5471_v30 = vld [vmem:[#allocation3 + $0x14] sm:$0x1]  ;;  %v5536_v22 = vrot.slane %v5534_v1, 5  ;;  %v5539_v58 = vshrl.u32 %v5469_v48, 16  ;;  %vm17951_vm8 = vmmov %vm17950_vm15 }
 0x205   : > { %v3309_v32 = vpop.permute.xlu0 %3308  ;;  %5179 = vst [vmem:[#allocation3 + $0x30] sm:$0x1] %v5178_v12  ;;  %v5542_v53 = vshll.u32 %v5469_v48, 16  ;;  %v5174_v35 = vld [vmem:[#allocation3 + $0x24] sm:$0x1]  ;;  %v5532_v6 = vrot.slane %v5531_v29, 4 }
 0x206   : > { %3343 = vst.msk [vmem:[#allocation4 + $0x70] sm:$0xff] %vm3328_vm13, %v3309_v32  ;;  %v5521_v0 = vor.u32 %v5520_v33, %v5517_v4  ;;  %v5552_v3 = vshrl.u32 %v5470_v55, 16  ;;  %v5558_v43 = vshll.u32 %v5471_v30, 16  ;;  %v5175_v17 = vsel %vm15117_vm10, %v4702_v34, %v5174_v35  ;;  %v5472_v61 = vld [vmem:[#allocation3 + $0x18] sm:$0xf]  ;;  %v13150_v51 = vld [vmem:[#allocation3] sm:$0xff]  }
 0x207   : > { %v5541_v57 = vrot.slane %v5539_v58, 4  ;;  %v5544_v13 = vrot.slane %v5542_v53, 5  ;;  %5176 = vst [vmem:[#allocation3 + $0x24] sm:$0x1] %v5175_v17  ;;  %v11978_v42 = vrot.slane %v4713_v15, 11  ;;  %v5537_v20 = vsel %vm13590_vm14, %v5532_v6, %v5536_v22 }
 0x208   : > { %v5522_v10 = vrot.slane %v5521_v0, 4  ;;  %v5280_v44 = vld [vmem:[#allocation3 + $0x38] sm:$0x1]  ;;  %v5554_v8 = vrot.slane %v5552_v3, 4  ;;  %v5560_v21 = vrot.slane %v5558_v43, 5  ;;  %v5563_v55 = vshrl.u32 %v5472_v61, 16 }
 0x209   : > { %v5281_v50 = vsel %vm15158_vm5, %v11979_v36, %v5280_v44  ;;  %v5277_v59 = vld [vmem:[#allocation3 + $0x2c] sm:$0x1]  ;;  %v5545_v31 = vor.u32 %v5544_v13, %v5541_v57  ;;  %v5473_v37 = vld [vmem:[#allocation3 + $0x1c] sm:$0xf]  ;;  %v5474_v19 = vld [vmem:[#allocation3 + $0x20] sm:$0x1] }
 0x20a   : > { %v5527_v34 = vsel %vm13590_vm14, %v5522_v10, %v5526_v27  ;;  %5282 = vst [vmem:[#allocation3 + $0x38] sm:$0x1] %v5281_v50  ;;  %v5278_v38 = vsel %vm15158_vm5, %v11978_v42, %v5277_v59  ;;  %v5555_v24 = vor.u32 %v5554_v8, %v5550_v39  ;;  %vm17952_vm6 = vcmask 261344   ;;  %v15234_v33 = vld [vmem:[#allocation3 + $0x4] sm:$0xf]  ;;  %v13151_v13 = vld [vmem:[#allocation3 + $0xc] sm:$0xff]  }
 0x20b   : > { %v12007_v49 = vcombine.low %v5527_v34, %v5537_v20  ;;  %5279 = vst [vmem:[#allocation3 + $0x2c] sm:$0x1] %v5278_v38  ;;  %v5546_v2 = vrot.slane %v5545_v31, 4  ;;  %v5566_v27 = vshll.u32 %v5472_v61, 16  ;;  %v5572_v11 = vshll.u32 %v5473_v37, 16 }
 0x20c   : > { %v5556_v5 = vrot.slane %v5555_v24, 4  ;;  %v5576_v52 = vshrl.u32 %v5473_v37, 16  ;;  %v5565_v23 = vrot.slane %v5563_v55, 4  ;;  %v5582_v28 = vshll.u32 %v5474_v19, 16  ;;  %v15247_v8 = vld [vmem:[#allocation3 + $0x8] sm:$0x1] }
 0x20d   : > { %8908 = vmatprep.mubr.bf16.mxu1 %v12007_v49  ;;  %v5551_v63 = vsel %vm13590_vm14, %v5546_v2, %v5550_v39  ;;  %v5568_v62 = vrot.slane %v5566_v27, 5  ;;  %v5574_v54 = vrot.slane %v5572_v11, 5  ;;  %v6076_v57 = vrot.slane %v15234_v33, 5  ;;  %v5033_v2 = vld [vmem:[#allocation3 + $0x48] sm:$0xf] }
 0x20e   : > { %v12960_v15 = vpop.f32.mrb[8].mxu0  ;;  %8909 = vmatmul.mubr.bf16.vlgmr.msra.gmra.mrb[0].mxu1 %v13150_v51  ;;  %v5561_v1 = vsel %vm13590_vm14, %v5556_v5, %v5560_v21  ;;  %v5578_v12 = vrot.slane %v5576_v52, 4  ;;  %v5584_v35 = vrot.slane %v5582_v28, 5  ;;  %v5475_v10 = vld [vmem:[#allocation3 + $0x24] sm:$0xf] }
 0x20f   : > { %v2812_v16 = vpop.permute.xlu1 %2811  ;;  %v4366_v32 = vpop.f32.mrb[9].mxu0  ;;  %v12008_v48 = vcombine.low %v5551_v63, %v5561_v1  ;;  %v4478_v36 = vmul.f32 %v12960_v15, %v15074_v46  ;;  %v5569_v30 = vor.u32 %v5568_v62, %v5565_v23  ;;  %v5587_v61 = vshrl.u32 %v5475_v10, 16  ;;  %v5026_v27 = vld [vmem:[#allocation3 + $0x3c] sm:$0xf]  ;;  %v5037_v28 = vld [vmem:[#allocation3 + $0x50] sm:$0x1] }
 0x210   : > { %2845 = vst.msk [vmem:[#allocation4 + $0x78] sm:$0xff] %vm17951_vm8, %v2812_v16  ;;  %v12961_v9 = vpop.f32.mrb[10].mxu0  ;;  %v4476_v0 = vmul.f32 %v15074_v46, %v4366_v32  ;;  %v5579_v53 = vor.u32 %v5578_v12, %v5574_v54  ;;  %v6078_v37 = vrot.slane %v6076_v57, 4  ;;  %v5590_v1 = vshll.u32 %v5475_v10, 16  ;;  %v13153_v12 = vld [vmem:[#allocation3 + $0x18] sm:$0xff]  }
 0x211   : > { %v4369_v45 = vpop.f32.mrb[11].mxu0  ;;  %v4479_v22 = vmul.f32 %v12961_v9, %v15074_v46  ;;  %8916 = vmatprep.mubr.bf16.mxu1 %v12008_v48  ;;  %v4517_v6 = vadd.f32 %v15080_v41, %v4478_v36  ;;  %v5570_v39 = vrot.slane %v5569_v30, 4  ;;  %v5589_v52 = vrot.slane %v5587_v61, 4  ;;  %v5476_v36 = vld [vmem:[#allocation3 + $0x28] sm:$0xf] }
 0x212   : > { %v3854_v7 = vpop.permute.xlu0 %3853  ;;  %v4477_v58 = vmul.f32 %v15074_v46, %v4369_v45  ;;  %v4515_v3 = vadd.f32 %v15080_v41, %v4476_v0  ;;  %v5580_v16 = vrot.slane %v5579_v53, 4  ;;  %v5978_v53 = vld [vmem:[#allocation3] sm:$0xe] }
 0x213   : > { %v3133_v56 = vpop.permute.xlu1 %3132  ;;  %3888 = vst.msk [vmem:[#allocation4 + $0x70] sm:$0xff] %vm17952_vm6, %v3854_v7  ;;  %v4518_v43 = vadd.f32 %v15080_v41, %v4479_v22  ;;  %v4549_v44 = vmax.f32 %v4517_v6, 0.0  ;;  %v5575_v25 = vsel %vm13590_vm14, %v5570_v39, %v5574_v54  ;;  %v6079_v7 = vrot.slane %v15247_v8, 5  ;;  %v15291_v8 = vld [vmem:[#allocation3 + $0x10] sm:$0xf] }
 0x214   : > { %3166 = vst.msk [vmem:[#allocation4 + $0x78] sm:$0xff] %vm3150_vm12, %v3133_v56  ;;  %v4516_v17 = vadd.f32 %v15080_v41, %v4477_v58  ;;  %v4547_v50 = vmax.f32 %v4515_v3, 0.0  ;;  %vm17953_vm12 = vmmov %vm17952_vm6  ;;  %v5585_v20 = vsel %vm13590_vm14, %v5580_v16, %v5584_v35  ;;  %v5030_v58 = vld [vmem:[#allocation3 + $0x44] sm:$0x1]  ;;  %v5477_v3 = vld [vmem:[#allocation3 + $0x2c] sm:$0x1] }
 0x215   : > { %v4550_v59 = vmax.f32 %v4518_v43, 0.0  ;;  %v15254_v31 = vpack.c.bf16 %v4549_v44, %v4549_v44  ;;  %v12009_v15 = vcombine.low %v5575_v25, %v5585_v20  ;;  %v5592_v43 = vrot.slane %v5590_v1, 5  ;;  %v15293_v25 = vld [vmem:[#allocation3 + $0x14] sm:$0x1] }
 0x216   : > { %v4175_v4 = vpop.permute.xlu0 %4174  ;;  %v4548_v34 = vmax.f32 %v4516_v17, 0.0  ;;  %8917 = vmatmul.mubr.bf16.gmra.mrb[4].mxu1 %v13151_v13  ;;  %v15256_v38 = vpack.c.bf16 %v4547_v50, %v4547_v50  ;;  %v13143_v17 = vld [vmem:[#allocation3 + $0xc] sm:$0xff]   ;;  %v5596_v44 = vshll.u32 %v5476_v36, 16  ;;  %v5600_v20 = vshrl.u32 %v5476_v36, 16 }
 0x217   : > { %v3311_v29 = vpop.permute.xlu1 %3310  ;;  %4209 = vst.msk [vmem:[#allocation4 + $0x70] sm:$0xff] %vm4194_vm3, %v4175_v4  ;;  %v15258_v49 = vpack.c.bf16 %v4550_v59, %v4550_v59  ;;  %v4753_v19 = vshrl.u32 %v15254_v31, 16  ;;  %8924 = vmatprep.mubr.bf16.mxu1 %v12009_v15  ;;  %v4756_v51 = vshll.u32 %v15254_v31, 16  ;;  %v12023_v15 = vrot.slane %v5978_v53, 9 }
 0x218   : > { %3344 = vst.msk [vmem:[#allocation4 + $0x78] sm:$0xff] %vm3328_vm13, %v3311_v29  ;;  %v15260_v24 = vpack.c.bf16 %v4548_v34, %v4548_v34  ;;  %v4736_v55 = vshrl.u32 %v15256_v38, 16  ;;  %v4739_v5 = vshll.u32 %v15256_v38, 16  ;;  %v5593_v34 = vor.u32 %v5592_v43, %v5589_v52 }
 0x219   : > { %v4761_v9 = vshrl.u32 %v15258_v49, 16  ;;  %v4755_v56 = vrot.slane %v4753_v19, 7  ;;  %v4764_v23 = vshll.u32 %v15258_v49, 16  ;;  %v6083_v52 = vrot.slane %v15291_v8, 5 }
 0x21a   : > { %v4744_v11 = vshrl.u32 %v15260_v24, 16  ;;  %v4738_v45 = vrot.slane %v4736_v55, 7  ;;  %v4747_v48 = vshll.u32 %v15260_v24, 16  ;;  %v13165_v24 = vld [vmem:[%s17866_s4 + $0x180] sm:$0xff]   ;;  %vm11465_vm13 = vcmask 1045509  }
 0x21b   : > { %v3856_v42 = vpop.permute.xlu1 %3855  ;;  %v4763_v63 = vrot.slane %v4761_v9, 7  ;;  %v4758_v62 = vor.u32 %v4756_v51, %v4755_v56  ;;  %v4759_v54 = vrot.slane %v4755_v56, 4  ;;  %v5606_v51 = vshll.u32 %v5477_v3, 16 }
 0x21c   : > { %3889 = vst.msk [vmem:[#allocation4 + $0x78] sm:$0xff] %vm17953_vm12, %v3856_v42  ;;  %v4746_v4 = vrot.slane %v4744_v11, 7  ;;  %v4741_v29 = vor.u32 %v4739_v5, %v4738_v45  ;;  %v4742_v30 = vrot.slane %v4738_v45, 4  ;;  %v5478_v42 = vld [vmem:[#allocation3 + $0x30] sm:$0xf]  ;;  %v5594_v9 = vrot.slane %v5593_v34, 4 }
 0x21d   : > { %v4766_v0 = vor.u32 %v4764_v23, %v4763_v63  ;;  %v4768_v22 = vrot.slane %v4763_v63, 4  ;;  %v5034_v35 = vsel %vm15103_vm0, %v4758_v62, %v5033_v2  ;;  %v5479_v2 = vld [vmem:[#allocation3 + $0x34] sm:$0xf]  ;;  %v5602_v56 = vrot.slane %v5600_v20, 4  ;;  %v5480_v5 = vld [vmem:[#allocation3 + $0x38] sm:$0x1] }
 0x21e   : > { %v4225_v21 = vld [vmem:[#allocation4 + $0x70] sm:$0xff]  ;;  %v4749_v6 = vor.u32 %v4747_v48, %v4746_v4  ;;  %v4751_v39 = vrot.slane %v4746_v4, 4  ;;  %8925 = vmatmul.mubr.bf16.gmra.mrb[8].mxu1 %v13153_v12  ;;  %5035 = vst [vmem:[#allocation3 + $0x48] sm:$0xf] %v5034_v35  ;;  %v5027_v10 = vsel %vm15103_vm0, %v4741_v29, %v5026_v27  ;;  %v5611_v27 = vshrl.u32 %v5478_v42, 16 }
 0x21f   : > { %v4177_v32 = vpop.permute.xlu1 %4176  ;;  %12978 = vmatprep.mubr.msk.bf16.mxu0 %vm4247_vm2, %v4225_v21  ;;  %v4767_v13 = vsel %vm13337_vm4, %v4759_v54, %v4766_v0  ;;  %v5038_v16 = vsel %vm15117_vm10, %v4768_v22, %v5037_v28  ;;  %5028 = vst [vmem:[#allocation3 + $0x3c] sm:$0xf] %v5027_v10  ;;  %v6080_v21 = vsel %vm13496_vm11, %v6078_v37, %v6079_v7  ;;  %v5608_v37 = vrot.slane %v5606_v51, 5  ;;  %v15310_v29 = vld [vmem:[#allocation3 + $0x1c] sm:$0xf] }
 0x220   : > { %4210 = vst.msk [vmem:[#allocation4 + $0x78] sm:$0xff] %vm4194_vm3, %v4177_v32  ;;  %5036 = vst [vmem:[#allocation3 + $0x4c] sm:$0xf] %v4767_v13  ;;  %v4750_v50 = vsel %vm13337_vm4, %v4742_v30, %v4749_v6  ;;  %v5031_v59 = vsel %vm15117_vm10, %v4751_v39, %v5030_v58  ;;  %v5598_v32 = vrot.slane %v5596_v44, 5  ;;  %v6077_v11 = vsel %vm13496_vm11, %v12023_v15, %v6076_v57  ;;  %v5986_v44 = vld [vmem:[#allocation3 + $0x20] sm:$0x1] }
 0x221   : > { %5039 = vst [vmem:[#allocation3 + $0x50] sm:$0x1] %v5038_v16  ;;  %5029 = vst [vmem:[#allocation3 + $0x40] sm:$0xf] %v4750_v50  ;;  %v5614_v7 = vshll.u32 %v5478_v42, 16  ;;  %v12039_v45 = vcombine.low %v6077_v11, %v6080_v21  ;;  %v5613_v28 = vrot.slane %v5611_v27, 4 }
 0x222   : > { %5032 = vst [vmem:[#allocation3 + $0x44] sm:$0x1] %v5031_v59  ;;  %v5603_v63 = vor.u32 %v5602_v56, %v5598_v32  ;;  %v5620_v1 = vshll.u32 %v5479_v2, 16  ;;  %v6086_v62 = vrot.slane %v15293_v25, 5  ;;  %v5624_v4 = vshrl.u32 %v5479_v2, 16  ;;  %v13155_v42 = vld [vmem:[#allocation3 + $0x24] sm:$0xff]  }
 0x223   : > { %v5616_v54 = vrot.slane %v5614_v7, 5  ;;  %v5630_v12 = vshll.u32 %v5480_v5, 16  ;;  %v11981_v33 = vrot.slane %v4764_v23, 11  ;;  %v5599_v57 = vsel %vm13590_vm14, %v5594_v9, %v5598_v32  ;;  %v5981_v23 = vld [vmem:[#allocation3 + $0xc] sm:$0xe]  ;;  %v13152_v9 = vld [vmem:[#allocation3 + $0x24] sm:$0xff]  }
 0x224   : > { %v5604_v30 = vrot.slane %v5603_v63, 4  ;;  %v5622_v0 = vrot.slane %v5620_v1, 5  ;;  %v11980_v35 = vrot.slane %v4747_v48, 11  ;;  %v5626_v49 = vrot.slane %v5624_v4, 4  ;;  %v13148_v48 = vld [vmem:[#allocation3 + $0x18] sm:$0xff]   ;;  %v13156_v1 = vld [vmem:[#allocation3 + $0x30] sm:$0xff]  }
 0x225   : > { %v5183_v36 = vld [vmem:[#allocation3 + $0x48] sm:$0x1]  ;;  %v5617_v6 = vor.u32 %v5616_v54, %v5613_v28  ;;  %v5632_v43 = vrot.slane %v5630_v12, 5  ;;  %v6085_v16 = vrot.slane %v6083_v52, 4  ;;  %v6090_v50 = vrot.slane %v15310_v29, 5 }
 0x226   : > { %v5184_v22 = vsel %vm15117_vm10, %v4753_v19, %v5183_v36  ;;  %v5180_v58 = vld [vmem:[#allocation3 + $0x3c] sm:$0x1]  ;;  %v5609_v19 = vsel %vm13590_vm14, %v5604_v30, %v5608_v37  ;;  %v5627_v10 = vor.u32 %v5626_v49, %v5622_v0  ;;  %v12024_v21 = vrot.slane %v5981_v23, 9  ;;  %v15348_v12 = vld [vmem:[#allocation3 + $0x28] sm:$0xf] }
 0x227   : > { %v4226_v61 = vld [vmem:[#allocation4 + $0x78] sm:$0xff]  ;;  %5185 = vst [vmem:[#allocation3 + $0x48] sm:$0x1] %v5184_v22  ;;  %v5181_v39 = vsel %vm15117_vm10, %v4736_v55, %v5180_v58  ;;  %v5618_v55 = vrot.slane %v5617_v6, 4  ;;  %v5485_v15 = vld [vmem:[#allocation3 + $0x4c] sm:$0xf]  ;;  %v6087_v32 = vsel %vm13496_vm11, %v6085_v16, %v6086_v62 }
 0x228   : > { %12979 = vmatmul.mubr.msk.bf16.gmra.mrb[28].mxu0 %vm4247_vm2, %v4226_v61  ;;  %v5286_v53 = vld [vmem:[#allocation3 + $0x50] sm:$0x1]  ;;  %5182 = vst [vmem:[#allocation3 + $0x3c] sm:$0x1] %v5181_v39  ;;  %v5482_v13 = vld [vmem:[#allocation3 + $0x40] sm:$0xf]  ;;  %v6084_v37 = vsel %vm13496_vm11, %v12024_v21, %v6083_v52 }
 0x229   : > { %9069 = vmatprep.mubr.bf16.mxu0 %v13143_v17  ;;  %v5287_v31 = vsel %vm15158_vm5, %v11981_v33, %v5286_v53  ;;  %v5283_v3 = vld [vmem:[#allocation3 + $0x44] sm:$0x1]  ;;  %v12010_v17 = vcombine.low %v5599_v57, %v5609_v19  ;;  %v5644_v25 = vshll.u32 %v5482_v13, 16  ;;  %v5623_v59 = vsel %vm13590_vm14, %v5618_v55, %v5622_v0  ;;  %v5984_v61 = vld [vmem:[#allocation3 + $0x18] sm:$0xe] }
 0x22a   : > { %5288 = vst [vmem:[#allocation3 + $0x50] sm:$0x1] %v5287_v31  ;;  %v5284_v38 = vsel %vm15158_vm5, %v11980_v35, %v5283_v3  ;;  %v5628_v34 = vrot.slane %v5627_v10, 4  ;;  %v5648_v20 = vshrl.u32 %v5482_v13, 16  ;;  %v6093_v51 = vrot.slane %v5986_v44, 5  ;;  %v13169_v44 = vld [vmem:[%s17866_s4 + $0x1c8] sm:$0xff]  }
 0x22b   : > { %5285 = vst [vmem:[#allocation3 + $0x44] sm:$0x1] %v5284_v38  ;;  %8932 = vmatprep.mubr.bf16.mxu1 %v12010_v17  ;;  %v15342_v5 = vrot.slane %v5644_v25, 5  ;;  %v5668_v11 = vshll.u32 %v5485_v15, 16  ;;  %v12025_v7 = vrot.slane %v5984_v61, 9  ;;  %v12040_v28 = vcombine.low %v6084_v37, %v6087_v32  ;;  %v13168_v38 = vld [vmem:[%s17866_s4 + $0x140] sm:$0xff]  }
 0x22c   : > { %8933 = vmatmul.mubr.bf16.gmra.mrb[12].mxu1 %v13155_v42  ;;  %v5633_v2 = vsel %vm13590_vm14, %v5628_v34, %v5632_v43  ;;  %v5650_v27 = vrot.slane %v5648_v20, 4  ;;  %v5672_v4 = vshrl.u32 %v5485_v15, 16  ;;  %v15352_v57 = vld [vmem:[#allocation3 + $0x2c] sm:$0x1]  ;;  %v6097_v19 = vrot.slane %v15348_v12, 5  ;;  %12696 = vmatprep.subr.bf16.mxu1 %v13168_v38 }
 0x22d   : > { %v12011_v56 = vcombine.low %v5623_v59, %v5633_v2  ;;  %v15355_v0 = vrot.slane %v5668_v11, 5  ;;  %v6091_v49 = vsel %vm13496_vm11, %v12025_v7, %v6090_v50  ;;  %v6100_v17 = vrot.slane %v15352_v57, 5  ;;  %v13170_v20 = vld [vmem:[%s17866_s4 + $0x100] sm:$0xff]   ;;  %v13171_v2 = vld [vmem:[%s17866_s4 + $0x188] sm:$0xff]   ;;  %v5047_v12 = vld [vmem:[#allocation3 + $0x60] sm:$0xf] }
 0x22e   : > { %v5484_v63 = vld [vmem:[#allocation3 + $0x48] sm:$0xf]  ;;  %v5651_v52 = vor.u32 %v5650_v27, %v15342_v5  ;;  %v5674_v39 = vrot.slane %v5672_v4, 4  ;;  %12697 = vmatpush3.bf16.msra.mxu1 %v13170_v20  ;;  %v5990_v38 = vld [vmem:[#allocation3 + $0x30] sm:$0xe]  ;;  %vm11457_vm3 = vcmask 1041409  }
 0x22f   : > { %8940 = vmatprep.mubr.bf16.mxu1 %v12011_v56  ;;  %v5481_v62 = vld [vmem:[#allocation3 + $0x3c] sm:$0xf]  ;;  %v5659_v54 = vshrl.u32 %v5484_v63, 16  ;;  %v5662_v6 = vshll.u32 %v5484_v63, 16  ;;  %v13154_v56 = vld [vmem:[#allocation3 + $0x30] sm:$0xff]   ;;  %vm11467_vm2 = vcmask 1046534  }
 0x230   : > { %9070 = vmatmul.mubr.bf16.vlgmr.msra.gmra.mrb[32].mxu0 %v12039_v45  ;;  %v6092_v45 = vrot.slane %v6090_v50, 4  ;;  %v5635_v33 = vshrl.u32 %v5481_v62, 16  ;;  %v5638_v29 = vshll.u32 %v5481_v62, 16  ;;  %v5652_v13 = vrot.slane %v5651_v52, 4  ;;  %v15389_v27 = vld [vmem:[%s17865_s3] ss:$0 sm:$0xff] }
 0x231   : > { %9077 = vmatprep.mubr.bf16.mxu0 %v13148_v48  ;;  %12809 = vmatpush3.bf16.msra.mxu0 %v13165_v24  ;;  %v5486_v53 = vld [vmem:[#allocation3 + $0x50] sm:$0x1]  ;;  %v5661_v35 = vrot.slane %v5659_v54, 4  ;;  %v5664_v48 = vrot.slane %v5662_v6, 5  ;;  %v5675_v16 = vor.u32 %v5674_v39, %v15355_v0  ;;  %v15395_v37 = vld [vmem:[%s17864_s2] ss:$0 sm:$0xff] }
 0x232   : > { %v5483_v36 = vld [vmem:[#allocation3 + $0x44] sm:$0x1]  ;;  %v6094_v8 = vsel %vm13496_vm11, %v6092_v45, %v6093_v51  ;;  %v5637_v22 = vrot.slane %v5635_v33, 4  ;;  %v5640_v58 = vrot.slane %v5638_v29, 5  ;;  %v5678_v31 = vshll.u32 %v5486_v53, 16  ;;  %12810 = vmatprep.subr.bf16.mxu0 %v13169_v44  ;;  %v13159_v29 = vld [vmem:[#allocation3 + $0x3c] sm:$0xff]  }
 0x233   : > { %v5654_v30 = vshll.u32 %v5483_v36, 16  ;;  %v12041_v3 = vcombine.low %v6091_v49, %v6094_v8  ;;  %v5665_v59 = vor.u32 %v5664_v48, %v5661_v35  ;;  %v5676_v51 = vrot.slane %v5675_v16, 4  ;;  %v15404_v54 = vld [vmem:[#allocation3 + $0x34] sm:$0xf]  ;;  %v13177_v52 = vld [vmem:[%s17866_s4 + $0x190] sm:$0xff]  }
 0x234   : > { %8941 = vmatmul.mubr.bf16.gmra.mrb[16].mxu1 %v13156_v1  ;;  %v5641_v24 = vor.u32 %v5640_v58, %v5637_v22  ;;  %v5680_v34 = vrot.slane %v5678_v31, 5  ;;  %v13176_v36 = vld [vmem:[%s17866_s4 + $0x108] sm:$0xff]   ;;  %v5992_v53 = vld [vmem:[#allocation3 + $0x38] sm:$0x1]  ;;  %v13157_v48 = vld [vmem:[#allocation3 + $0x3c] sm:$0xff]  }
 0x235   : > { %v5656_v23 = vrot.slane %v5654_v30, 5  ;;  %v5666_v63 = vrot.slane %v5665_v59, 4  ;;  %12811 = vmatpush3.bf16.msra.mxu0 %v13171_v2  ;;  %v5040_v59 = vld [vmem:[#allocation3 + $0x54] sm:$0xf] }
 0x236   : > { %v5642_v50 = vrot.slane %v5641_v24, 4  ;;  %v5681_v57 = vsel %vm13590_vm14, %v5676_v51, %v5680_v34 }
 0x237   : > { %v5657_v32 = vsel %vm13590_vm14, %v5652_v13, %v5656_v23  ;;  %v5671_v8 = vsel %vm13590_vm14, %v5666_v63, %v15355_v0  ;;  %v6104_v23 = vrot.slane %v15404_v54, 5 }
 0x238   : > { %9078 = vmatmul.mubr.bf16.gmra.mrb[36].mxu0 %v12040_v28  ;;  %v5647_v45 = vsel %vm13590_vm14, %v5642_v50, %v15342_v5  ;;  %v6099_v28 = vrot.slane %v6097_v19, 4  ;;  %v12013_v35 = vcombine.low %v5671_v8, %v5681_v57 }
 0x239   : > { %9085 = vmatprep.mubr.bf16.mxu0 %v13152_v9  ;;  %v13174_v9 = vld [vmem:[%s17866_s4 + $0x148] sm:$0xff]   ;;  %v12012_v4 = vcombine.low %v5647_v45, %v5657_v32  ;;  %v5994_v45 = vld [vmem:[#allocation3 + $0x40] sm:$0xf] }
 0x23a   : > { %12698 = vmatprep.subr.bf16.mxu1 %v13174_v9  ;;  %v6101_v6 = vsel %vm13496_vm11, %v6099_v28, %v6100_v17  ;;  %v6107_v17 = vrot.slane %v5992_v53, 5  ;;  %v13160_v9 = vld [vmem:[#allocation3 + $0x48] sm:$0xff]   ;;  %v6111_v8 = vrot.slane %v5994_v45, 5 }
 0x23b   : > { %v12964_v43 = vpop.f32.mrb[12].mxu0  ;;  %8948 = vmatprep.mubr.bf16.mxu1 %v12012_v4  ;;  %12699 = vmatpush3.bf16.msra.mxu1 %v13176_v36  ;;  %v5995_v36 = vld [vmem:[#allocation3 + $0x44] sm:$0x1] }
 0x23c   : > { %v4482_v55 = vmul.f32 %v12964_v43, %v15074_v46  ;;  %v4382_v10 = vpop.f32.mrb[13].mxu0  ;;  %8949 = vmatmul.mubr.bf16.gmra.mrb[20].mxu1 %v13159_v29  ;;  %v6113_v53 = vrot.slane %v6111_v8, 4 }
 0x23d   : > { %v4480_v42 = vmul.f32 %v15074_v46, %v4382_v10  ;;  %v12965_v25 = vpop.f32.mrb[14].mxu0  ;;  %8956 = vmatprep.mubr.bf16.mxu1 %v12013_v35  ;;  %v5997_v35 = vld [vmem:[#allocation3 + $0x4c] sm:$0xf] }
 0x23e   : > { %v4521_v61 = vadd.f32 %v15080_v41, %v4482_v55  ;;  %v4483_v15 = vmul.f32 %v12965_v25, %v15074_v46  ;;  %v4385_v21 = vpop.f32.mrb[15].mxu0  ;;  %v13175_v41 = vld [vmem:[%s17866_s4 + $0x1d0] sm:$0xff]   ;;  %v5987_v46 = vld [vmem:[#allocation3 + $0x24] sm:$0xe]  ;;  %v6106_v25 = vrot.slane %v6104_v23, 4 }
 0x23f   : > { %v4519_v11 = vadd.f32 %v15389_v27, %v4480_v42  ;;  %v4481_v7 = vmul.f32 %v15395_v37, %v4385_v21  ;;  %v12026_v30 = vrot.slane %v5987_v46, 9  ;;  %12812 = vmatprep.subr.bf16.mxu0 %v13175_v41  ;;  %v5051_v21 = vld [vmem:[#allocation3 + $0x68] sm:$0x1] }
 0x240   : > { %9086 = vmatmul.mubr.bf16.gmra.mrb[40].mxu0 %v12041_v3  ;;  %v4553_v1 = vmax.f32 %v4521_v61, 0.0  ;;  %v4522_v62 = vadd.f32 %v15389_v27, %v4483_v15  ;;  %v12027_v61 = vrot.slane %v5990_v38, 9  ;;  %v6108_v2 = vsel %vm13496_vm11, %v6106_v25, %v6107_v17 }
 0x241   : > { %9093 = vmatprep.mubr.bf16.mxu0 %v13154_v56  ;;  %v4551_v33 = vmax.f32 %v4519_v11, 0.0  ;;  %v4520_v5 = vadd.f32 %v15389_v27, %v4481_v7  ;;  %v6098_v3 = vsel %vm13496_vm11, %v12026_v30, %v6097_v19  ;;  %12813 = vmatpush3.bf16.msra.mxu0 %v13177_v52  ;;  %v5044_v7 = vld [vmem:[#allocation3 + $0x5c] sm:$0x1]  ;;  %v13158_v52 = vld [vmem:[#allocation3 + $0x48] sm:$0xff]   ;;  %v6114_v30 = vrot.slane %v5995_v36, 5 }
 0x242   : > { %v15418_v22 = vpack.c.bf16 %v4553_v1, %v4553_v1  ;;  %v4554_v58 = vmax.f32 %v4522_v62, 0.0  ;;  %v12042_v55 = vcombine.low %v6098_v3, %v6101_v6  ;;  %v6105_v29 = vsel %vm13496_vm11, %v12027_v61, %v6104_v23 }
 0x243   : > { %v15422_v0 = vpack.c.bf16 %v4551_v33, %v4551_v33  ;;  %v4552_v49 = vmax.f32 %v4520_v5, 0.0  ;;  %v12043_v57 = vcombine.low %v6105_v29, %v6108_v2 }
 0x244   : > { %v4787_v39 = vshrl.u32 %v15418_v22, 16  ;;  %v15426_v31 = vpack.c.bf16 %v4554_v58, %v4554_v58  ;;  %v4790_v13 = vshll.u32 %v15418_v22, 16  ;;  %8957 = vmatmul.mubr.bf16.gmra.mrb[24].mxu1 %v13160_v9  ;;  %v5993_v58 = vld [vmem:[#allocation3 + $0x3c] sm:$0xe] }
 0x245   : > { %v4770_v43 = vshrl.u32 %v15422_v0, 16  ;;  %v15433_v24 = vpack.c.bf16 %v4552_v49, %v4552_v49  ;;  %v4773_v44 = vshll.u32 %v15422_v0, 16  ;;  %v12028_v23 = vrot.slane %v5993_v58, 9 }
 0x246   : > { %v4789_v10 = vrot.slane %v4787_v39, 7  ;;  %v4795_v16 = vshrl.u32 %v15426_v31, 16  ;;  %v4798_v20 = vshll.u32 %v15426_v31, 16 }
 0x247   : > { %v4772_v19 = vrot.slane %v4770_v43, 7  ;;  %v4778_v42 = vshrl.u32 %v15433_v24, 16  ;;  %v4781_v51 = vshll.u32 %v15433_v24, 16  ;;  %v6115_v24 = vsel %vm13496_vm11, %v6113_v53, %v6114_v30 }
 0x248   : > { %9094 = vmatmul.mubr.bf16.gmra.mrb[44].mxu0 %v12042_v55  ;;  %v4792_v50 = vor.u32 %v4790_v13, %v4789_v10  ;;  %v4797_v34 = vrot.slane %v4795_v16, 7  ;;  %v4793_v41 = vrot.slane %v4789_v10, 4  ;;  %v11983_v3 = vrot.slane %v4798_v20, 11 }
 0x249   : > { %v4775_v15 = vor.u32 %v4773_v44, %v4772_v19  ;;  %v4780_v32 = vrot.slane %v4778_v42, 7  ;;  %9101 = vmatprep.mubr.bf16.mxu0 %v13157_v48  ;;  %v4776_v63 = vrot.slane %v4772_v19, 4  ;;  %v5998_v48 = vld [vmem:[#allocation3 + $0x50] sm:$0x1]  ;;  %v11982_v55 = vrot.slane %v4781_v51, 11 }
 0x24a   : > { %v5048_v56 = vsel %vm15103_vm0, %v4792_v50, %v5047_v12  ;;  %v4800_v46 = vor.u32 %v4798_v20, %v4797_v34  ;;  %v4802_v11 = vrot.slane %v4797_v34, 4  ;;  %v6118_v10 = vrot.slane %v5997_v35, 5  ;;  %v5996_v19 = vld [vmem:[#allocation3 + $0x48] sm:$0xe] }
 0x24b   : > { %5049 = vst [vmem:[#allocation3 + $0x60] sm:$0xf] %v5048_v56  ;;  %v5041_v28 = vsel %vm15103_vm0, %v4775_v15, %v5040_v59  ;;  %v4783_v1 = vor.u32 %v4781_v51, %v4780_v32  ;;  %v4785_v62 = vrot.slane %v4780_v32, 4  ;;  %v6112_v13 = vsel %vm13496_vm11, %v12028_v23, %v6111_v8 }
 0x24c   : > { %5042 = vst [vmem:[#allocation3 + $0x54] sm:$0xf] %v5041_v28  ;;  %v4801_v54 = vsel %vm13337_vm4, %v4793_v41, %v4800_v46  ;;  %v5052_v4 = vsel %vm15117_vm10, %v4802_v11, %v5051_v21  ;;  %v12044_v0 = vcombine.low %v6112_v13, %v6115_v24  ;;  %v6121_v42 = vrot.slane %v5998_v48, 5 }
 0x24d   : > { %5050 = vst [vmem:[#allocation3 + $0x64] sm:$0xf] %v4801_v54  ;;  %5053 = vst [vmem:[#allocation3 + $0x68] sm:$0x1] %v5052_v4  ;;  %v4784_v33 = vsel %vm13337_vm4, %v4776_v63, %v4783_v1  ;;  %v5045_v5 = vsel %vm15117_vm10, %v4785_v62, %v5044_v7  ;;  %v6120_v20 = vrot.slane %v6118_v10, 4  ;;  %v12029_v61 = vrot.slane %v5996_v19, 9 }
 0x24e   : > { %5043 = vst [vmem:[#allocation3 + $0x58] sm:$0xf] %v4784_v33  ;;  %5046 = vst [vmem:[#allocation3 + $0x5c] sm:$0x1] %v5045_v5 }
 0x24f   : > { %v6122_v32 = vsel %vm13496_vm11, %v6120_v20, %v6121_v42  ;;  %v6119_v11 = vsel %vm13496_vm11, %v12029_v61, %v6118_v10  ;;  %v13181_v42 = vld [vmem:[%s17866_s4 + $0x1d8] sm:$0xff]   ;;  %v13187_v20 = vld [vmem:[%s17866_s4 + $0x1e0] sm:$0xff]  }
 0x250   : > { %9102 = vmatmul.mubr.bf16.gmra.mrb[48].mxu0 %v12043_v57  ;;  %v12045_v1 = vcombine.low %v6119_v11, %v6122_v32  ;;  %12814 = vmatprep.subr.bf16.mxu0 %v13181_v42 }
 0x251   : > { %9109 = vmatprep.mubr.bf16.mxu0 %v13158_v52 }
 0x252   : > { %v5189_v6 = vld [vmem:[#allocation3 + $0x60] sm:$0x1] }
 0x253   : > { %v5190_v49 = vsel %vm15117_vm10, %v4787_v39, %v5189_v6  ;;  %v5186_v31 = vld [vmem:[#allocation3 + $0x54] sm:$0x1]  ;;  %v5999_v57 = vld [vmem:[#allocation3 + $0x54] sm:$0xe] }
 0x254   : > { %5191 = vst [vmem:[#allocation3 + $0x60] sm:$0x1] %v5190_v49  ;;  %v5187_v38 = vsel %vm15117_vm10, %v4770_v43, %v5186_v31  ;;  %v5292_v17 = vld [vmem:[#allocation3 + $0x68] sm:$0x1]  ;;  %v5491_v25 = vld [vmem:[#allocation3 + $0x64] sm:$0xf] }
 0x255   : > { %5188 = vst [vmem:[#allocation3 + $0x54] sm:$0x1] %v5187_v38  ;;  %v5293_v22 = vsel %vm15158_vm5, %v11983_v3, %v5292_v17  ;;  %v5289_v39 = vld [vmem:[#allocation3 + $0x5c] sm:$0x1]  ;;  %v5488_v16 = vld [vmem:[#allocation3 + $0x58] sm:$0xf] }
 0x256   : > { %5294 = vst [vmem:[#allocation3 + $0x68] sm:$0x1] %v5293_v22  ;;  %v5290_v12 = vsel %vm15158_vm5, %v11982_v55, %v5289_v39  ;;  %v5692_v44 = vshll.u32 %v5488_v16, 16  ;;  %v5696_v43 = vshrl.u32 %v5488_v16, 16  ;;  %v6000_v50 = vld [vmem:[#allocation3 + $0x58] sm:$0xf] }
 0x257   : > { %5291 = vst [vmem:[#allocation3 + $0x5c] sm:$0x1] %v5290_v12  ;;  %v5716_v59 = vshll.u32 %v5491_v25, 16  ;;  %v5720_v34 = vshrl.u32 %v5491_v25, 16  ;;  %v6125_v51 = vrot.slane %v6000_v50, 5  ;;  %v12030_v24 = vrot.slane %v5999_v57, 9 }
 0x258   : > { %9110 = vmatmul.mubr.bf16.gmra.mrb[52].mxu0 %v12044_v0  ;;  %v5694_v15 = vrot.slane %v5692_v44, 5  ;;  %v5698_v21 = vrot.slane %v5696_v43, 4  ;;  %v13180_v43 = vld [vmem:[%s17866_s4 + $0x150] sm:$0xff]  }
 0x259   : > { %v5718_v9 = vrot.slane %v5716_v59, 5  ;;  %v5722_v46 = vrot.slane %v5720_v34, 4  ;;  %v6127_v6 = vrot.slane %v6125_v51, 4  ;;  %v6126_v22 = vsel %vm13496_vm11, %v12030_v24, %v6125_v51  ;;  %v13182_v25 = vld [vmem:[%s17866_s4 + $0x110] sm:$0xff]   ;;  %v13183_v59 = vld [vmem:[%s17866_s4 + $0x198] sm:$0xff]   ;;  %12700 = vmatprep.subr.bf16.mxu1 %v13180_v43  ;;  %v13189_v51 = vld [vmem:[%s17866_s4 + $0x1a0] sm:$0xff]  }
 0x25a   : > { %v5699_v54 = vor.u32 %v5698_v21, %v5694_v15  ;;  %v13186_v34 = vld [vmem:[%s17866_s4 + $0x158] sm:$0xff]   ;;  %12701 = vmatpush3.bf16.msra.mxu1 %v13182_v25  ;;  %12815 = vmatpush3.bf16.msra.mxu0 %v13183_v59 }
 0x25b   : > { %v5490_v2 = vld [vmem:[#allocation3 + $0x60] sm:$0xf]  ;;  %v5723_v31 = vor.u32 %v5722_v46, %v5718_v9  ;;  %12702 = vmatprep.subr.bf16.mxu1 %v13186_v34  ;;  %12816 = vmatprep.subr.bf16.mxu0 %v13187_v20  ;;  %v6003_v59 = vld [vmem:[#allocation3 + $0x64] sm:$0xf] }
 0x25c   : > { %v13161_v41 = vld [vmem:[#allocation3 + $0x54] sm:$0xff]   ;;  %v13162_v7 = vld [vmem:[#allocation3 + $0x60] sm:$0xff]   ;;  %v5707_v28 = vshrl.u32 %v5490_v2, 16  ;;  %v5710_v30 = vshll.u32 %v5490_v2, 16  ;;  %v5700_v23 = vrot.slane %v5699_v54, 4 }
 0x25d   : > { %v5487_v56 = vld [vmem:[#allocation3 + $0x54] sm:$0xf]  ;;  %9117 = vmatprep.mubr.bf16.mxu0 %v13161_v41  ;;  %v5492_v36 = vld [vmem:[#allocation3 + $0x68] sm:$0x1]  ;;  %v5724_v12 = vrot.slane %v5723_v31, 4 }
 0x25e   : > { %v5683_v45 = vshrl.u32 %v5487_v56, 16  ;;  %v5686_v63 = vshll.u32 %v5487_v56, 16  ;;  %v5489_v62 = vld [vmem:[#allocation3 + $0x5c] sm:$0x1]  ;;  %v5709_v52 = vrot.slane %v5707_v28, 4  ;;  %v5726_v58 = vshll.u32 %v5492_v36, 16  ;;  %12817 = vmatpush3.bf16.msra.mxu0 %v13189_v51 }
 0x25f   : > { %v6001_v4 = vld [vmem:[#allocation3 + $0x5c] sm:$0x1]  ;;  %v5702_v29 = vshll.u32 %v5489_v62, 16  ;;  %v5712_v49 = vrot.slane %v5710_v30, 5  ;;  %v13163_v0 = vld [vmem:[#allocation3 + $0x54] sm:$0xff]  }
 0x260   : > { %v5685_v33 = vrot.slane %v5683_v45, 4  ;;  %v5688_v5 = vrot.slane %v5686_v63, 5  ;;  %v6128_v8 = vrot.slane %v6001_v4, 5  ;;  %9118 = vmatmul.mubr.bf16.gmra.mrb[56].mxu0 %v12045_v1  ;;  %v5728_v17 = vrot.slane %v5726_v58, 5  ;;  %v13166_v45 = vld [vmem:[#allocation3 + $0x60] sm:$0xff]  }
 0x261   : > { %9125 = vmatprep.mubr.bf16.mxu0 %v13162_v7  ;;  %v5704_v35 = vrot.slane %v5702_v29, 5  ;;  %v5713_v38 = vor.u32 %v5712_v49, %v5709_v52 }
 0x262   : > { %v5689_v53 = vor.u32 %v5688_v5, %v5685_v33  ;;  %v6129_v48 = vsel %vm13496_vm11, %v6127_v6, %v6128_v8  ;;  %v5729_v44 = vsel %vm13590_vm14, %v5724_v12, %v5728_v17 }
 0x263   : > { %v5705_v10 = vsel %vm13590_vm14, %v5700_v23, %v5704_v35  ;;  %v12046_v13 = vcombine.low %v6126_v22, %v6129_v48  ;;  %v5714_v16 = vrot.slane %v5713_v38, 4  ;;  %v5065_v38 = vld [vmem:[#allocation3 + $0x80] sm:$0x1] }
 0x264   : > { %v5690_v3 = vrot.slane %v5689_v53, 4  ;;  %v5061_v53 = vld [vmem:[#allocation3 + $0x78] sm:$0xf] }
 0x265   : > { %v5719_v19 = vsel %vm13590_vm14, %v5714_v16, %v5718_v9  ;;  %v5058_v16 = vld [vmem:[#allocation3 + $0x74] sm:$0x1] }
 0x266   : > { %v5695_v55 = vsel %vm13590_vm14, %v5690_v3, %v5694_v15  ;;  %v12015_v50 = vcombine.low %v5719_v19, %v5729_v44  ;;  %v13188_v15 = vld [vmem:[%s17866_s4 + $0x118] sm:$0xff]   ;;  %v5054_v3 = vld [vmem:[#allocation3 + $0x6c] sm:$0xf] }
 0x267   : > { %v12014_v39 = vcombine.low %v5695_v55, %v5705_v10  ;;  %12703 = vmatpush3.bf16.msra.mxu1 %v13188_v15 }
 0x268   : > { %9126 = vmatmul.mubr.bf16.gmra.mrb[60].mxu0 %v12046_v13 }
 0x269   : > { %8964 = vmatprep.mubr.bf16.mxu1 %v12014_v39  ;;  %v12968_v61 = vpop.f32.mrb[16].mxu0 }
 0x26a   : > { %8965 = vmatmul.mubr.bf16.gmra.mrb[28].mxu1 %v13163_v0  ;;  %v4486_v21 = vmul.f32 %v15395_v37, %v12968_v61  ;;  %v4398_v32 = vpop.f32.mrb[17].mxu0 }
 0x26b   : > { %8972 = vmatprep.mubr.bf16.mxu1 %v12015_v50  ;;  %v4484_v2 = vmul.f32 %v15395_v37, %v4398_v32  ;;  %v12969_v9 = vpop.f32.mrb[18].mxu0 }
 0x26c   : > { %v4525_v41 = vadd.f32 %v15389_v27, %v4486_v21  ;;  %v4487_v56 = vmul.f32 %v15395_v37, %v12969_v9  ;;  %v4401_v46 = vpop.f32.mrb[19].mxu0  ;;  %v6004_v21 = vld [vmem:[#allocation3 + $0x68] sm:$0x1]  ;;  %v6132_v9 = vrot.slane %v6003_v59, 5 }
 0x26d   : > { %v4523_v11 = vadd.f32 %v15389_v27, %v4484_v2  ;;  %v4485_v7 = vmul.f32 %v15395_v37, %v4401_v46 }
 0x26e   : > { %v4557_v63 = vmax.f32 %v4525_v41, 0.0  ;;  %v4526_v28 = vadd.f32 %v15389_v27, %v4487_v56 }
 0x26f   : > { %v4555_v1 = vmax.f32 %v4523_v11, 0.0  ;;  %v4524_v62 = vadd.f32 %v15389_v27, %v4485_v7  ;;  %v6135_v7 = vrot.slane %v6004_v21, 5 }
 0x270   : > { %v12439_v54 = vpack.c.bf16 %v4557_v63, %v4557_v63  ;;  %v4558_v4 = vmax.f32 %v4526_v28, 0.0  ;;  %v6002_v28 = vld [vmem:[#allocation3 + $0x60] sm:$0xe] }
 0x271   : > { %v12437_v36 = vpack.c.bf16 %v4555_v1, %v4555_v1  ;;  %v4556_v33 = vmax.f32 %v4524_v62, 0.0  ;;  %v6134_v62 = vrot.slane %v6132_v9, 4 }
 0x272   : > { %8973 = vmatmul.mubr.bf16.gmra.mrb[32].mxu1 %v13166_v45  ;;  %v4821_v5 = vshrl.u32 %v12439_v54, 16  ;;  %v12440_v29 = vpack.c.bf16 %v4558_v4, %v4558_v4  ;;  %v4824_v30 = vshll.u32 %v12439_v54, 16 }
 0x273   : > { %v4804_v8 = vshrl.u32 %v12437_v36, 16  ;;  %v12438_v57 = vpack.c.bf16 %v4556_v33, %v4556_v33  ;;  %v4807_v6 = vshll.u32 %v12437_v36, 16  ;;  %v12031_v33 = vrot.slane %v6002_v28, 9 }
 0x274   : > { %v4823_v52 = vrot.slane %v4821_v5, 7  ;;  %v4829_v58 = vshrl.u32 %v12440_v29, 16  ;;  %v4832_v24 = vshll.u32 %v12440_v29, 16 }
 0x275   : > { %v4806_v35 = vrot.slane %v4804_v8, 7  ;;  %v4812_v49 = vshrl.u32 %v12438_v57, 16  ;;  %v4815_v55 = vshll.u32 %v12438_v57, 16 }
 0x276   : > { %v4826_v31 = vor.u32 %v4824_v30, %v4823_v52  ;;  %v4831_v23 = vrot.slane %v4829_v58, 7  ;;  %v4827_v10 = vrot.slane %v4823_v52, 4  ;;  %v11985_v15 = vrot.slane %v4832_v24, 11 }
 0x277   : > { %v4809_v48 = vor.u32 %v4807_v6, %v4806_v35  ;;  %v4814_v17 = vrot.slane %v4812_v49, 7  ;;  %v4810_v12 = vrot.slane %v4806_v35, 4  ;;  %v11984_v2 = vrot.slane %v4815_v55, 11 }
 0x278   : > { %v5062_v22 = vsel %vm15103_vm0, %v4826_v31, %v5061_v53  ;;  %v4834_v39 = vor.u32 %v4832_v24, %v4831_v23  ;;  %v4836_v13 = vrot.slane %v4831_v23, 4  ;;  %v6133_v53 = vsel %vm13496_vm11, %v12031_v33, %v6132_v9  ;;  %v13200_v33 = vld [vmem:[%s17866_s4 + $0x128] sm:$0xff]  }
 0x279   : > { %5063 = vst [vmem:[#allocation3 + $0x78] sm:$0xf] %v5062_v22  ;;  %v5055_v0 = vsel %vm15103_vm0, %v4809_v48, %v5054_v3  ;;  %v4817_v19 = vor.u32 %v4815_v55, %v4814_v17  ;;  %v4819_v44 = vrot.slane %v4814_v17, 4 }
 0x27a   : > { %5056 = vst [vmem:[#allocation3 + $0x6c] sm:$0xf] %v5055_v0  ;;  %v4835_v43 = vsel %vm13337_vm4, %v4827_v10, %v4834_v39  ;;  %v5066_v42 = vsel %vm15117_vm10, %v4836_v13, %v5065_v38 }
 0x27b   : > { %5064 = vst [vmem:[#allocation3 + $0x7c] sm:$0xf] %v4835_v43  ;;  %5067 = vst [vmem:[#allocation3 + $0x80] sm:$0x1] %v5066_v42  ;;  %v4818_v25 = vsel %vm13337_vm4, %v4810_v12, %v4817_v19  ;;  %v5059_v50 = vsel %vm15117_vm10, %v4819_v44, %v5058_v16 }
 0x27c   : > { %5057 = vst [vmem:[#allocation3 + $0x70] sm:$0xf] %v4818_v25  ;;  %5060 = vst [vmem:[#allocation3 + $0x74] sm:$0x1] %v5059_v50 }
 0x280   : > { %v5195_v34 = vld [vmem:[#allocation3 + $0x78] sm:$0x1] }
 0x281   : > { %v5196_v20 = vsel %vm15117_vm10, %v4821_v5, %v5195_v34  ;;  %v5192_v61 = vld [vmem:[#allocation3 + $0x6c] sm:$0x1]  ;;  %v6136_v5 = vsel %vm13496_vm11, %v6134_v62, %v6135_v7  ;;  %v6005_v24 = vld [vmem:[#allocation3 + $0x6c] sm:$0xe]  ;;  %v13195_v62 = vld [vmem:[%s17866_s4 + $0x1a8] sm:$0xff]  }
 0x282   : > { %5197 = vst [vmem:[#allocation3 + $0x78] sm:$0x1] %v5196_v20  ;;  %v5193_v32 = vsel %vm15117_vm10, %v4804_v8, %v5192_v61  ;;  %v5298_v51 = vld [vmem:[#allocation3 + $0x80] sm:$0x1]  ;;  %v5497_v1 = vld [vmem:[#allocation3 + $0x7c] sm:$0xf]  ;;  %v12047_v49 = vcombine.low %v6133_v53, %v6136_v5 }
 0x283   : > { %5194 = vst [vmem:[#allocation3 + $0x6c] sm:$0x1] %v5193_v32  ;;  %v5299_v41 = vsel %vm15158_vm5, %v11985_v15, %v5298_v51  ;;  %v5295_v56 = vld [vmem:[#allocation3 + $0x74] sm:$0x1]  ;;  %v5494_v46 = vld [vmem:[#allocation3 + $0x70] sm:$0xf] }
 0x284   : > { %5300 = vst [vmem:[#allocation3 + $0x80] sm:$0x1] %v5299_v41  ;;  %v5296_v11 = vsel %vm15158_vm5, %v11984_v2, %v5295_v56  ;;  %v5740_v45 = vshll.u32 %v5494_v46, 16  ;;  %v5744_v63 = vshrl.u32 %v5494_v46, 16  ;;  %v6006_v54 = vld [vmem:[#allocation3 + $0x70] sm:$0xf] }
 0x285   : > { %5297 = vst [vmem:[#allocation3 + $0x74] sm:$0x1] %v5296_v11  ;;  %v5764_v4 = vshll.u32 %v5497_v1, 16  ;;  %v5768_v36 = vshrl.u32 %v5497_v1, 16  ;;  %v6139_v57 = vrot.slane %v6006_v54, 5  ;;  %v12032_v25 = vrot.slane %v6005_v24, 9 }
 0x286   : > { %v5742_v29 = vrot.slane %v5740_v45, 5  ;;  %v5746_v8 = vrot.slane %v5744_v63, 4  ;;  %v13192_v7 = vld [vmem:[%s17866_s4 + $0x160] sm:$0xff]   ;;  %v13193_v45 = vld [vmem:[%s17866_s4 + $0x1e8] sm:$0xff]   ;;  %v13201_v5 = vld [vmem:[%s17866_s4 + $0x1b0] sm:$0xff]  }
 0x287   : > { %v5766_v30 = vrot.slane %v5764_v4, 5  ;;  %v5770_v6 = vrot.slane %v5768_v36, 4  ;;  %v6141_v12 = vrot.slane %v6139_v57, 4  ;;  %v6140_v15 = vsel %vm13496_vm11, %v12032_v25, %v6139_v57  ;;  %v13194_v63 = vld [vmem:[%s17866_s4 + $0x120] sm:$0xff]   ;;  %v13198_v54 = vld [vmem:[%s17866_s4 + $0x168] sm:$0xff]   ;;  %v13199_v4 = vld [vmem:[%s17866_s4 + $0x1f0] sm:$0xff]   ;;  %12704 = vmatprep.subr.bf16.mxu1 %v13192_v7  ;;  %12818 = vmatprep.subr.bf16.mxu0 %v13193_v45 }
 0x288   : > { %v5747_v17 = vor.u32 %v5746_v8, %v5742_v29  ;;  %12705 = vmatpush3.bf16.msra.mxu1 %v13194_v63  ;;  %12819 = vmatpush3.bf16.msra.mxu0 %v13195_v62  ;;  %v13205_v53 = vld [vmem:[%s17866_s4 + $0x1f8] sm:$0xff]   ;;  %v5079_v7 = vld [vmem:[#allocation3 + $0x98] sm:$0x1] }
 0x289   : > { %v5496_v52 = vld [vmem:[#allocation3 + $0x78] sm:$0xf]  ;;  %v5771_v34 = vor.u32 %v5770_v6, %v5766_v30  ;;  %12706 = vmatprep.subr.bf16.mxu1 %v13198_v54  ;;  %12820 = vmatprep.subr.bf16.mxu0 %v13199_v4  ;;  %v13210_v54 = vld [vmem:[%s17866_s4 + $0x178] sm:$0xff]  }
 0x28a   : > { %v13167_v58 = vld [vmem:[#allocation3 + $0x6c] sm:$0xff]   ;;  %v13172_v31 = vld [vmem:[#allocation3 + $0x78] sm:$0xff]   ;;  %v5755_v48 = vshrl.u32 %v5496_v52, 16  ;;  %v5758_v19 = vshll.u32 %v5496_v52, 16  ;;  %v5748_v61 = vrot.slane %v5747_v17, 4  ;;  %v13211_v4 = vld [vmem:[%s17866_s4 + $0x138] sm:$0xff]  }
 0x28b   : > { %v5493_v35 = vld [vmem:[#allocation3 + $0x6c] sm:$0xf]  ;;  %9133 = vmatprep.mubr.bf16.mxu0 %v13167_v58  ;;  %v5498_v10 = vld [vmem:[#allocation3 + $0x80] sm:$0x1]  ;;  %v5772_v11 = vrot.slane %v5771_v34, 4  ;;  %v13204_v58 = vld [vmem:[%s17866_s4 + $0x170] sm:$0xff]  }
 0x28c   : > { %v5731_v3 = vshrl.u32 %v5493_v35, 16  ;;  %v5734_v23 = vshll.u32 %v5493_v35, 16  ;;  %v5495_v38 = vld [vmem:[#allocation3 + $0x74] sm:$0x1]  ;;  %9134 = vmatmul.mubr.bf16.gmra.mrb[64].mxu0 %v12047_v49  ;;  %v5757_v0 = vrot.slane %v5755_v48, 4  ;;  %v5774_v44 = vshll.u32 %v5498_v10, 16  ;;  %12707 = vmatpush3.bf16.msra.mxu1 %v13200_v33 }
 0x28d   : > { %v6007_v55 = vld [vmem:[#allocation3 + $0x74] sm:$0x1]  ;;  %v5750_v13 = vshll.u32 %v5495_v38, 16  ;;  %9141 = vmatprep.mubr.bf16.mxu0 %v13172_v31  ;;  %v5760_v59 = vrot.slane %v5758_v19, 5  ;;  %v13173_v56 = vld [vmem:[#allocation3 + $0x6c] sm:$0xff]   ;;  %v13178_v31 = vld [vmem:[#allocation3 + $0x78] sm:$0xff]   ;;  %12821 = vmatpush3.bf16.msra.mxu0 %v13201_v5 }
 0x28e   : > { %v5733_v22 = vrot.slane %v5731_v3, 4  ;;  %v5736_v39 = vrot.slane %v5734_v23, 5  ;;  %v6142_v16 = vrot.slane %v6007_v55, 5  ;;  %v5776_v32 = vrot.slane %v5774_v44, 5  ;;  %v13206_v3 = vld [vmem:[%s17866_s4 + $0x130] sm:$0xff]   ;;  %v13207_v23 = vld [vmem:[%s17866_s4 + $0x1b8] sm:$0xff]   ;;  %12708 = vmatprep.subr.bf16.mxu1 %v13204_v58  ;;  %12822 = vmatprep.subr.bf16.mxu0 %v13205_v53 }
 0x28f   : > { %v5752_v42 = vrot.slane %v5750_v13, 5  ;;  %v5761_v21 = vor.u32 %v5760_v59, %v5757_v0  ;;  %v7356_v38 = vld [vmem:[#allocation3 + $0x18] sm:$0xf] }
 0x290   : > { %v5737_v43 = vor.u32 %v5736_v39, %v5733_v22  ;;  %v6143_v50 = vsel %vm13496_vm11, %v6141_v12, %v6142_v16  ;;  %v5777_v1 = vsel %vm13590_vm14, %v5772_v11, %v5776_v32  ;;  %12709 = vmatpush3.bf16.msra.mxu1 %v13206_v3  ;;  %v7357_v39 = vld [vmem:[#allocation3 + $0x1c] sm:$0xf]  ;;  %v7405_v12 = vshrl.u32 %v7356_v38, 16 }
 0x291   : > { %v5753_v2 = vsel %vm13590_vm14, %v5748_v61, %v5752_v42  ;;  %v12048_v9 = vcombine.low %v6140_v15, %v6143_v50  ;;  %v5762_v46 = vrot.slane %v5761_v21, 4  ;;  %12823 = vmatpush3.bf16.msra.mxu0 %v13207_v23  ;;  %v7408_v19 = vshll.u32 %v7356_v38, 16  ;;  %12710 = vmatprep.subr.bf16.mxu1 %v13210_v54 }
 0x292   : > { %v5738_v20 = vrot.slane %v5737_v43, 4  ;;  %v7414_v42 = vshll.u32 %v7357_v39, 16  ;;  %v7407_v15 = vrot.slane %v7405_v12, 4  ;;  %v6413_v12 = vld [vmem:[#allocation3 + $0x14] sm:$0x1] }
 0x293   : > { %v5767_v28 = vsel %vm13590_vm14, %v5762_v46, %v5766_v30 }
 0x294   : > { %v5743_v51 = vsel %vm13590_vm14, %v5738_v20, %v5742_v29  ;;  %9142 = vmatmul.mubr.bf16.gmra.mrb[68].mxu0 %v12048_v9  ;;  %v12017_v36 = vcombine.low %v5767_v28, %v5777_v1  ;;  %v5075_v20 = vld [vmem:[#allocation3 + $0x90] sm:$0xf]  ;;  %v7358_v9 = vld [vmem:[#allocation3 + $0x20] sm:$0x1]  ;;  %v15624_v45 = vrot.slane %v7414_v42, 5  ;;  %12711 = vmatpush3.bf16.msra.mxu1 %v13211_v4 }
 0x295   : > { %v12016_v41 = vcombine.low %v5743_v51, %v5753_v2  ;;  %v5068_v51 = vld [vmem:[#allocation3 + $0x84] sm:$0xf]  ;;  %v7424_v23 = vshll.u32 %v7358_v9, 16  ;;  %v6009_v42 = vld [vmem:[#allocation3 + $0x7c] sm:$0xf] }
 0x297   : > { %8980 = vmatprep.mubr.bf16.mxu1 %v12016_v41  ;;  %v7410_v41 = vrot.slane %v7408_v19, 5 }
 0x298   : > { %8981 = vmatmul.mubr.bf16.gmra.mrb[36].mxu1 %v13173_v56 }
 0x299   : > { %8988 = vmatprep.mubr.bf16.mxu1 %v12017_v36  ;;  %v13212_v36 = vld [vmem:[%s17866_s4 + $0x200] sm:$0xff]   ;;  %v7411_v3 = vor.u32 %v7410_v41, %v7407_v15  ;;  %v6010_v41 = vld [vmem:[#allocation3 + $0x80] sm:$0x1] }
 0x29a   : > { %12982 = vmatprep.subr.bf16.mxu0 %v13212_v36  ;;  %13030 = vmatprep.subr.bf16.mxu1 %v13212_v36 }
 0x29b   : > { %v15654_v19 = vrot.slane %v7411_v3, 4 }
 0x29c   : > { %v12972_v29 = vpop.f32.mrb[20].mxu0 }
 0x29d   : > { %v4490_v8 = vmul.f32 %v15395_v37, %v12972_v29  ;;  %v4414_v57 = vpop.f32.mrb[21].mxu0 }
 0x29e   : > { %v4488_v52 = vmul.f32 %v15395_v37, %v4414_v57  ;;  %v12973_v30 = vpop.f32.mrb[22].mxu0  ;;  %v5072_v57 = vld [vmem:[#allocation3 + $0x8c] sm:$0x1] }
 0x29f   : > { %v4529_v35 = vadd.f32 %v15389_v27, %v4490_v8  ;;  %v4491_v6 = vmul.f32 %v15395_v37, %v12973_v30  ;;  %v4417_v49 = vpop.f32.mrb[23].mxu0 }
 0x2a0   : > { %v4527_v24 = vadd.f32 %v15389_v27, %v4488_v52  ;;  %v4489_v48 = vmul.f32 %v15395_v37, %v4417_v49  ;;  %8989 = vmatmul.mubr.bf16.gmra.mrb[40].mxu1 %v13178_v31  ;;  %v6411_v52 = vld [vmem:[#allocation3 + $0xc] sm:$0xf] }
 0x2a1   : > { %v4561_v17 = vmax.f32 %v4529_v35, 0.0  ;;  %v4530_v55 = vadd.f32 %v15389_v27, %v4491_v6  ;;  %v15640_v6 = vld [vmem:[#allocation3 + $0x10] sm:$0xf] }
 0x2a2   : > { %v4559_v10 = vmax.f32 %v4527_v24, 0.0  ;;  %v4528_v22 = vadd.f32 %v15389_v27, %v4489_v48  ;;  %v7418_v27 = vshrl.u32 %v7357_v39, 16  ;;  %v6412_v24 = vld [vmem:[#allocation3 + $0x10] sm:$0xf]  ;;  %v6925_v39 = vld [vmem:[#allocation3 + $0x14] sm:$0x1] }
 0x2a3   : > { %v15605_v13 = vpack.c.bf16 %v4561_v17, %v4561_v17  ;;  %v4562_v16 = vmax.f32 %v4530_v55, 0.0  ;;  %v15650_v17 = vld [vmem:[#allocation3 + $0xc] sm:$0xe]  ;;  %v6460_v55 = vshrl.u32 %v6411_v52, 16 }
 0x2a4   : > { %v15607_v0 = vpack.c.bf16 %v4559_v10, %v4559_v10  ;;  %v4560_v37 = vmax.f32 %v4528_v22, 0.0  ;;  %v7420_v62 = vrot.slane %v7418_v27, 4  ;;  %v6463_v10 = vshll.u32 %v6411_v52, 16 }
 0x2a5   : > { %v4855_v44 = vshrl.u32 %v15605_v13, 16  ;;  %v15610_v43 = vpack.c.bf16 %v4562_v16, %v4562_v16  ;;  %v4858_v34 = vshll.u32 %v15605_v13, 16  ;;  %v7021_v16 = vrot.slane %v15640_v6, 5 }
 0x2a6   : > { %v4838_v25 = vshrl.u32 %v15607_v0, 16  ;;  %v15613_v50 = vpack.c.bf16 %v4560_v37, %v4560_v37  ;;  %v4841_v32 = vshll.u32 %v15607_v0, 16  ;;  %v7421_v22 = vor.u32 %v7420_v62, %v15624_v45  ;;  %v15671_v62 = vld [vmem:[#allocation3 + $0x24] sm:$0xf] }
 0x2a7   : > { %v4857_v59 = vrot.slane %v4855_v44, 7  ;;  %v4863_v61 = vshrl.u32 %v15610_v43, 16  ;;  %v4866_v11 = vshll.u32 %v15610_v43, 16  ;;  %v6469_v37 = vshll.u32 %v6412_v24, 16 }
 0x2a8   : > { %v4840_v21 = vrot.slane %v4838_v25, 7  ;;  %v4846_v2 = vshrl.u32 %v15613_v50, 16  ;;  %v4849_v1 = vshll.u32 %v15613_v50, 16  ;;  %v12087_v43 = vrot.slane %v15650_v17, 9 }
 0x2a9   : > { %v4860_v56 = vor.u32 %v4858_v34, %v4857_v59  ;;  %v4865_v46 = vrot.slane %v4863_v61, 7  ;;  %v4861_v33 = vrot.slane %v4857_v59, 4  ;;  %v15657_v50 = vrot.slane %v7424_v23, 5 }
 0x2aa   : > { %v4843_v63 = vor.u32 %v4841_v32, %v4840_v21  ;;  %v4848_v28 = vrot.slane %v4846_v2, 7  ;;  %v4844_v30 = vrot.slane %v4840_v21, 4  ;;  %v7024_v27 = vrot.slane %v6925_v39, 5 }
 0x2ab   : > { %v5076_v5 = vsel %vm15103_vm0, %v4860_v56, %v5075_v20  ;;  %v4868_v29 = vor.u32 %v4866_v11, %v4865_v46  ;;  %v4870_v8 = vrot.slane %v4865_v46, 4  ;;  %v6462_v59 = vrot.slane %v6460_v55, 4 }
 0x2ac   : > { %5077 = vst [vmem:[#allocation3 + $0x90] sm:$0xf] %v5076_v5  ;;  %v5069_v58 = vsel %vm15103_vm0, %v4843_v63, %v5068_v51  ;;  %v4851_v53 = vor.u32 %v4849_v1, %v4848_v28  ;;  %v4853_v35 = vrot.slane %v4848_v28, 4  ;;  %v6465_v34 = vrot.slane %v6463_v10, 5 }
 0x2ad   : > { %5070 = vst [vmem:[#allocation3 + $0x84] sm:$0xf] %v5069_v58  ;;  %v4869_v49 = vsel %vm13337_vm4, %v4861_v33, %v4868_v29  ;;  %v5080_v31 = vsel %vm15117_vm10, %v4870_v8, %v5079_v7  ;;  %v15659_v61 = vrot.slane %v7421_v22, 4  ;;  %v7023_v15 = vrot.slane %v7021_v16, 4 }
 0x2ae   : > { %5078 = vst [vmem:[#allocation3 + $0x94] sm:$0xf] %v4869_v49  ;;  %5081 = vst [vmem:[#allocation3 + $0x98] sm:$0x1] %v5080_v31  ;;  %v4852_v48 = vsel %vm13337_vm4, %v4844_v30, %v4851_v53  ;;  %v5073_v38 = vsel %vm15117_vm10, %v4853_v35, %v5072_v57  ;;  %v6473_v21 = vshrl.u32 %v6412_v24, 16  ;;  %v6479_v32 = vshll.u32 %v6413_v12, 16 }
 0x2af   : > { %5071 = vst [vmem:[#allocation3 + $0x88] sm:$0xf] %v4852_v48  ;;  %5074 = vst [vmem:[#allocation3 + $0x8c] sm:$0x1] %v5073_v38  ;;  %v11987_v9 = vrot.slane %v4866_v11, 11  ;;  %v15665_v56 = vrot.slane %v6469_v37, 5  ;;  %v6466_v54 = vor.u32 %v6465_v34, %v6462_v59  ;;  %v7417_v5 = vsel %vm13590_vm14, %v15654_v19, %v15624_v45 }
 0x2b0   : > { %v11986_v63 = vrot.slane %v4849_v1, 11  ;;  %v6146_v28 = vrot.slane %v6009_v42, 5  ;;  %v6149_v0 = vrot.slane %v6010_v41, 5  ;;  %v6475_v30 = vrot.slane %v6473_v21, 4 }
 0x2b1   : > { %v15683_v58 = vrot.slane %v6466_v54, 4  ;;  %v15685_v53 = vrot.slane %v6479_v32, 5  ;;  %v7429_v35 = vshrl.u32 %v15671_v62, 16  ;;  %v7432_v6 = vshll.u32 %v15671_v62, 16 }
 0x2b2   : > { %v6148_v29 = vrot.slane %v6146_v28, 4  ;;  %v15698_v38 = vsel %vm13496_vm11, %v12087_v43, %v7021_v16  ;;  %v15702_v17 = vsel %vm13496_vm11, %v7023_v15, %v7024_v27  ;;  %v7427_v12 = vsel %vm13590_vm14, %v15659_v61, %v15657_v50 }
 0x2b3   : > { %v5201_v20 = vld [vmem:[#allocation3 + $0x90] sm:$0x1]  ;;  %17954 = vst [vmem:[#allocation8_spill] sm:$0xff] %v15698_v38  ;;  %17955 = vst [vmem:[#allocation7_spill] sm:$0xff] %v15702_v17  ;;  %v6476_v37 = vor.u32 %v6475_v30, %v15665_v56  ;;  %v15712_v32 = vcombine.low %v7417_v5, %v7427_v12  ;;  %v7431_v5 = vrot.slane %v7429_v35, 4 }
 0x2b4   : > { %v5202_v51 = vsel %vm15117_vm10, %v4855_v44, %v5201_v20  ;;  %v5198_v2 = vld [vmem:[#allocation3 + $0x84] sm:$0x1]  ;;  %v6150_v31 = vsel %vm13496_vm11, %v6148_v29, %v6149_v0  ;;  %v6011_v59 = vld [vmem:[#allocation3 + $0x84] sm:$0xe]  ;;  %v7434_v29 = vrot.slane %v7432_v6, 5 }
 0x2b5   : > { %5203 = vst [vmem:[#allocation3 + $0x90] sm:$0x1] %v5202_v51  ;;  %v5199_v46 = vsel %vm15117_vm10, %v4838_v25, %v5198_v2  ;;  %v5304_v7 = vld [vmem:[#allocation3 + $0x98] sm:$0x1]  ;;  %v6008_v25 = vld [vmem:[#allocation3 + $0x78] sm:$0xe] }
 0x2b6   : > { %5200 = vst [vmem:[#allocation3 + $0x84] sm:$0x1] %v5199_v46  ;;  %v5305_v13 = vsel %vm15158_vm5, %v11987_v9, %v5304_v7  ;;  %v5301_v44 = vld [vmem:[#allocation3 + $0x8c] sm:$0x1]  ;;  %v5500_v11 = vld [vmem:[#allocation3 + $0x88] sm:$0xf] }
 0x2b7   : > { %5306 = vst [vmem:[#allocation3 + $0x98] sm:$0x1] %v5305_v13  ;;  %v5302_v4 = vsel %vm15158_vm5, %v11986_v63, %v5301_v44  ;;  %v5788_v36 = vshll.u32 %v5500_v11, 16  ;;  %v5792_v33 = vshrl.u32 %v5500_v11, 16  ;;  %v5503_v1 = vld [vmem:[#allocation3 + $0x94] sm:$0xf]  ;;  %v6472_v13 = vsel %vm13590_vm14, %v15683_v58, %v15665_v56 }
 0x2b8   : > { %5303 = vst [vmem:[#allocation3 + $0x8c] sm:$0x1] %v5302_v4  ;;  %v15681_v8 = vld [vmem:[#allocation3 + $0x88] sm:$0xf]  ;;  %v5812_v57 = vshll.u32 %v5503_v1, 16  ;;  %v5816_v52 = vshrl.u32 %v5503_v1, 16 }
 0x2b9   : > { %v12033_v49 = vrot.slane %v6008_v25, 9  ;;  %v15691_v3 = vrot.slane %v5788_v36, 5  ;;  %v5794_v45 = vrot.slane %v5792_v33, 4  ;;  %v6153_v23 = vrot.slane %v15681_v8, 5  ;;  %17956 = vst [vmem:[#allocation6_spill] sm:$0xff] %v15712_v32 }
 0x2ba   : > { %v15694_v48 = vrot.slane %v5812_v57, 5  ;;  %v5818_v39 = vrot.slane %v5816_v52, 4  ;;  %v6477_v44 = vrot.slane %v6476_v37, 4  ;;  %v12034_v11 = vrot.slane %v6011_v59, 9  ;;  %v7360_v36 = vld [vmem:[#allocation3 + $0x28] sm:$0xf] }
 0x2bb   : > { %v6147_v10 = vsel %vm13496_vm11, %v12033_v49, %v6146_v28  ;;  %v5795_v20 = vor.u32 %v5794_v45, %v15691_v3  ;;  %v6155_v41 = vrot.slane %v6153_v23, 4  ;;  %v7361_v33 = vld [vmem:[#allocation3 + $0x2c] sm:$0x1]  ;;  %v6414_v8 = vld [vmem:[#allocation3 + $0x18] sm:$0xf]  ;;  %v7438_v6 = vshll.u32 %v7360_v36, 16 }
 0x2bc   : > { %v5502_v24 = vld [vmem:[#allocation3 + $0x90] sm:$0xf]  ;;  %v12049_v19 = vcombine.low %v6147_v10, %v6150_v31  ;;  %v5819_v0 = vor.u32 %v5818_v39, %v15694_v48  ;;  %v6154_v57 = vsel %vm13496_vm11, %v12034_v11, %v6153_v23  ;;  %v6482_v30 = vsel %vm13590_vm14, %v6477_v44, %v15685_v53  ;;  %v6927_v58 = vld [vmem:[#allocation3 + $0x1c] sm:$0xf]  ;;  %v6926_v45 = vld [vmem:[#allocation3 + $0x18] sm:$0xe] }
 0x2bd   : > { %v13179_v55 = vld [vmem:[#allocation3 + $0x84] sm:$0xff]   ;;  %v13184_v16 = vld [vmem:[#allocation3 + $0x90] sm:$0xff]   ;;  %v5803_v27 = vshrl.u32 %v5502_v24, 16  ;;  %v5806_v7 = vshll.u32 %v5502_v24, 16  ;;  %v5796_v1 = vrot.slane %v5795_v20, 4  ;;  %v7442_v12 = vshrl.u32 %v7360_v36, 16 }
 0x2be   : > { %v5499_v22 = vld [vmem:[#allocation3 + $0x84] sm:$0xf]  ;;  %9149 = vmatprep.mubr.bf16.mxu0 %v13179_v55  ;;  %v5504_v21 = vld [vmem:[#allocation3 + $0x98] sm:$0x1]  ;;  %v15733_v24 = vld [vmem:[#allocation3 + $0x20] sm:$0x1]  ;;  %v7435_v37 = vor.u32 %v7434_v29, %v7431_v5 }
 0x2bf   : > { %v5779_v43 = vshrl.u32 %v5499_v22, 16  ;;  %v5782_v42 = vshll.u32 %v5499_v22, 16  ;;  %v5501_v34 = vld [vmem:[#allocation3 + $0x8c] sm:$0x1]  ;;  %9150 = vmatmul.mubr.bf16.gmra.mrb[72].mxu0 %v12049_v19  ;;  %v5805_v46 = vrot.slane %v5803_v27, 4  ;;  %v5822_v63 = vshll.u32 %v5504_v21, 16 }
 0x2c0   : > { %v6013_v15 = vld [vmem:[#allocation3 + $0x8c] sm:$0x1]  ;;  %v5798_v2 = vshll.u32 %v5501_v34, 16  ;;  %9157 = vmatprep.mubr.bf16.mxu0 %v13184_v16  ;;  %v5808_v4 = vrot.slane %v5806_v7, 5  ;;  %v6415_v23 = vld [vmem:[#allocation3 + $0x1c] sm:$0xf] }
 0x2c1   : > { %v5781_v50 = vrot.slane %v5779_v43, 4  ;;  %v5784_v61 = vrot.slane %v5782_v42, 5  ;;  %v6156_v9 = vrot.slane %v6013_v15, 5  ;;  %v5824_v56 = vrot.slane %v5822_v63, 5  ;;  %v7362_v55 = vld [vmem:[#allocation3 + $0x30] sm:$0xf] }
 0x2c2   : > { %v5800_v62 = vrot.slane %v5798_v2, 5  ;;  %v5809_v52 = vor.u32 %v5808_v4, %v5805_v46  ;;  %v5820_v39 = vrot.slane %v5819_v0, 4  ;;  %v13185_v53 = vld [vmem:[#allocation3 + $0x84] sm:$0xff]   ;;  %v7448_v19 = vshll.u32 %v7361_v33, 16  ;;  %v5114_v32 = vld [vmem:[#allocation3 + $0xd4] sm:$0x1] }
 0x2c3   : > { %v5785_v28 = vor.u32 %v5784_v61, %v5781_v50  ;;  %v6157_v54 = vsel %vm13496_vm11, %v6155_v41, %v6156_v9  ;;  %v6484_v16 = vshrl.u32 %v6414_v8, 16  ;;  %v6493_v59 = vshll.u32 %v6415_v23, 16  ;;  %v7363_v41 = vld [vmem:[#allocation3 + $0x34] sm:$0xf]  ;;  %v15777_v5 = vld [vmem:[%s17865_s3] ss:$0 sm:$0xff] }
 0x2c4   : > { %v5801_v31 = vsel %vm13590_vm14, %v5796_v1, %v5800_v62  ;;  %v12050_v35 = vcombine.low %v6154_v57, %v6157_v54  ;;  %v5810_v22 = vrot.slane %v5809_v52, 4  ;;  %v5825_v42 = vsel %vm13590_vm14, %v5820_v39, %v5824_v56  ;;  %v15756_v62 = vld [vmem:[%s17864_s2] ss:$0 sm:$0xff]  ;;  %v15783_v56 = vld [vmem:[#allocation3 + $0x20] sm:$0x1] }
 0x2c5   : > { %v5786_v25 = vrot.slane %v5785_v28, 4  ;;  %v6497_v27 = vshrl.u32 %v6415_v23, 16  ;;  %v7028_v20 = vrot.slane %v6927_v58, 5  ;;  %v7453_v15 = vshrl.u32 %v7362_v55, 16 }
 0x2c6   : > { %v5815_v43 = vsel %vm13590_vm14, %v5810_v22, %v15694_v48  ;;  %v7456_v21 = vshll.u32 %v7362_v55, 16  ;;  %v15740_v50 = vcombine.low %v6472_v13, %v6482_v30  ;;  %v15742_v61 = vrot.slane %v7438_v6, 5  ;;  %v15794_v22 = vld [vmem:[#allocation3 + $0x38] sm:$0x1] }
 0x2c7   : > { %v5791_v49 = vsel %vm13590_vm14, %v5786_v25, %v15691_v3  ;;  %9158 = vmatmul.mubr.bf16.gmra.mrb[76].mxu0 %v12050_v35  ;;  %v6487_v3 = vshll.u32 %v6414_v8, 16  ;;  %v12019_v34 = vcombine.low %v5815_v43, %v5825_v42  ;;  %v12088_v2 = vrot.slane %v6926_v45, 9  ;;  %v6417_v45 = vld [vmem:[#allocation3 + $0x24] sm:$0xf] }
 0x2c8   : > { %v12018_v10 = vcombine.low %v5791_v49, %v5801_v31  ;;  %17957 = vst [vmem:[#allocation9_spill] sm:$0xff] %v15740_v50  ;;  %v7031_v9 = vrot.slane %v15733_v24, 5  ;;  %v15745_v48 = vrot.slane %v7442_v12, 4  ;;  %v15747_v7 = vrot.slane %v7448_v19, 5  ;;  %v13190_v31 = vld [vmem:[#allocation3 + $0x90] sm:$0xff]  }
 0x2c9   : > { %v15749_v63 = vrot.slane %v6484_v16, 4  ;;  %v15751_v28 = vrot.slane %v6487_v3, 5  ;;  %v15759_v11 = vrot.slane %v7435_v37, 4  ;;  %v15761_v54 = vrot.slane %v6493_v59, 5  ;;  %v6418_v16 = vld [vmem:[#allocation3 + $0x28] sm:$0xf] }
 0x2ca   : > { %8996 = vmatprep.mubr.bf16.mxu1 %v12018_v10  ;;  %v15763_v4 = vrot.slane %v6497_v27, 4  ;;  %v15768_v33 = vsel %vm13496_vm11, %v12088_v2, %v7028_v20  ;;  %v15770_v25 = vrot.slane %v7453_v15, 4  ;;  %v15772_v1 = vrot.slane %v7456_v21, 5  ;;  %v15804_v59 = vld [vmem:[#allocation3 + $0x28] sm:$0xf] }
 0x2cb   : > { %8997 = vmatmul.mubr.bf16.gmra.mrb[44].mxu1 %v13185_v53  ;;  %v12976_v46 = vpop.f32.mrb[24].mxu0  ;;  %17958 = vst [vmem:[#allocation10_spill] sm:$0xff] %v15768_v33  ;;  %v15781_v52 = vrot.slane %v7028_v20, 4  ;;  %v7462_v30 = vshll.u32 %v7363_v41, 16  ;;  %v7445_v35 = vor.u32 %v15745_v48, %v15742_v61  ;;  %v6490_v6 = vor.u32 %v15751_v28, %v15749_v63 }
 0x2cc   : > { %9004 = vmatprep.mubr.bf16.mxu1 %v12019_v34  ;;  %v4494_v13 = vmul.f32 %v15756_v62, %v12976_v46  ;;  %v4430_v44 = vpop.f32.mrb[25].mxu0  ;;  %v7466_v39 = vshrl.u32 %v7363_v41, 16  ;;  %v6508_v27 = vshrl.u32 %v6417_v45, 16  ;;  %v6511_v21 = vshll.u32 %v6417_v45, 16 }
 0x2cd   : > { %v4492_v0 = vmul.f32 %v15756_v62, %v4430_v44  ;;  %v12977_v36 = vpop.f32.mrb[26].mxu0  ;;  %v15802_v42 = vrot.slane %v7462_v30, 5  ;;  %v17961_v48 = vshll.u32 %v15783_v56, 16  ;;  %v17962_v24 = vor.u32 %v15772_v1, %v15770_v25  ;;  %v15882_v56 = vld [vmem:[#allocation3 + $0x94] sm:$0xf] }
 0x2ce   : > { %v4533_v29 = vadd.f32 %v15777_v5, %v4494_v13  ;;  %v4495_v8 = vmul.f32 %v15756_v62, %v12977_v36  ;;  %v4433_v57 = vpop.f32.mrb[27].mxu0  ;;  %v15812_v46 = vrot.slane %v7466_v39, 4  ;;  %v6517_v13 = vshll.u32 %v6418_v16, 16 }
 0x2cf   : > { %v4531_v58 = vadd.f32 %v15777_v5, %v4492_v0  ;;  %v4493_v49 = vmul.f32 %v15756_v62, %v4433_v57  ;;  %v6513_v39 = vrot.slane %v6511_v21, 5  ;;  %v5086_v21 = vld [vmem:[#allocation3 + $0xa4] sm:$0x1]  ;;  %v17964_v28 = vrot.slane %v15804_v59, 5 }
 0x2d0   : > { %v4565_v23 = vmax.f32 %v4533_v29, 0.0  ;;  %v4534_v55 = vadd.f32 %v15777_v5, %v4495_v8  ;;  %v6521_v29 = vshrl.u32 %v6418_v16, 16 }
 0x2d1   : > { %v4563_v12 = vmax.f32 %v4531_v58, 0.0  ;;  %v4532_v53 = vadd.f32 %v15777_v5, %v4493_v49  ;;  %v6510_v58 = vrot.slane %v6508_v27, 4  ;;  %v5089_v49 = vld [vmem:[#allocation3 + $0xa8] sm:$0xf] }
 0x2d2   : > { %v15800_v3 = vpack.c.bf16 %v4565_v23, %v4565_v23  ;;  %v4566_v43 = vmax.f32 %v4534_v55, 0.0  ;;  %v6419_v55 = vld [vmem:[#allocation3 + $0x2c] sm:$0x1]  ;;  %v6523_v15 = vrot.slane %v6521_v29, 4 }
 0x2d3   : > { %9005 = vmatmul.mubr.bf16.gmra.mrb[48].mxu1 %v13190_v31  ;;  %v15806_v34 = vpack.c.bf16 %v4563_v12, %v4563_v12  ;;  %v4564_v20 = vmax.f32 %v4532_v53, 0.0  ;;  %v5082_v53 = vld [vmem:[#allocation3 + $0x9c] sm:$0xf] }
 0x2d4   : > { %v17876_v2 = vshrl.u32 %v15800_v3, 16  ;;  %v15810_v41 = vpack.c.bf16 %v4566_v43, %v4566_v43  ;;  %v4892_v57 = vshll.u32 %v15800_v3, 16 }
 0x2d5   : > { %v17877_v44 = vshrl.u32 %v15806_v34, 16  ;;  %v15815_v0 = vpack.c.bf16 %v4564_v20, %v4564_v20  ;;  %v4875_v45 = vshll.u32 %v15806_v34, 16  ;;  %v15827_v20 = vrot.slane %v6517_v13, 5 }
 0x2d6   : > { %v4891_v8 = vrot.slane %v17876_v2, 7  ;;  %v4897_v30 = vshrl.u32 %v15810_v41, 16  ;;  %v4900_v43 = vshll.u32 %v15810_v41, 16  ;;  %v5093_v2 = vld [vmem:[#allocation3 + $0xb0] sm:$0x1] }
 0x2d7   : > { %v4874_v31 = vrot.slane %v17877_v44, 7  ;;  %v4880_v23 = vshrl.u32 %v15815_v0, 16  ;;  %v4883_v36 = vshll.u32 %v15815_v0, 16 }
 0x2d8   : > { %v4894_v12 = vor.u32 %v4892_v57, %v4891_v8  ;;  %v4899_v16 = vrot.slane %v4897_v30, 7  ;;  %v4895_v44 = vrot.slane %v4891_v8, 4  ;;  %v7469_v8 = vor.u32 %v15812_v46, %v15802_v42 }
 0x2d9   : > { %v4877_v51 = vor.u32 %v4875_v45, %v4874_v31  ;;  %v4882_v27 = vrot.slane %v4880_v23, 7  ;;  %v4878_v57 = vrot.slane %v4874_v31, 4  ;;  %v7365_v45 = vld [vmem:[#allocation3 + $0x3c] sm:$0xf]  ;;  %v15844_v31 = vld [vmem:[#allocation3 + $0x24] sm:$0xe] }
 0x2da   : > { %v5090_v19 = vsel %vm15103_vm0, %v4894_v12, %v5089_v49  ;;  %v4902_v37 = vor.u32 %v4900_v43, %v4899_v16  ;;  %v4904_v10 = vrot.slane %v4899_v16, 4  ;;  %v6527_v49 = vshll.u32 %v6419_v55, 16  ;;  %v15846_v23 = vld [vmem:[#allocation3 + $0x2c] sm:$0x1]  ;;  %v15880_v16 = vld [vmem:[#allocation3 + $0x44] sm:$0x1] }
 0x2db   : > { %5091 = vst [vmem:[#allocation3 + $0xa8] sm:$0xf] %v5090_v19  ;;  %v5083_v41 = vsel %vm15103_vm0, %v4877_v51, %v5082_v53  ;;  %v4885_v13 = vor.u32 %v4883_v36, %v4882_v27  ;;  %v4887_v30 = vrot.slane %v4882_v27, 4  ;;  %v7477_v46 = vshrl.u32 %v7365_v45, 16 }
 0x2dc   : > { %5084 = vst [vmem:[#allocation3 + $0x9c] sm:$0xf] %v5083_v41  ;;  %v4903_v0 = vsel %vm13337_vm4, %v4895_v44, %v4902_v37  ;;  %v5094_v29 = vsel %vm15117_vm10, %v4904_v10, %v5093_v2  ;;  %v6514_v37 = vor.u32 %v6513_v39, %v6510_v58  ;;  %v6524_v44 = vor.u32 %v6523_v15, %v15827_v20 }
 0x2dd   : > { %5092 = vst [vmem:[#allocation3 + $0xac] sm:$0xf] %v4903_v0  ;;  %5095 = vst [vmem:[#allocation3 + $0xb0] sm:$0x1] %v5094_v29  ;;  %v4886_v19 = vsel %vm13337_vm4, %v4878_v57, %v4885_v13  ;;  %v5087_v51 = vsel %vm15117_vm10, %v4887_v30, %v5086_v21  ;;  %v7446_v10 = vrot.slane %v7445_v35, 4  ;;  %v15857_v2 = vsel %vm13496_vm11, %v15781_v52, %v7031_v9 }
 0x2de   : > { %5085 = vst [vmem:[#allocation3 + $0xa0] sm:$0xf] %v4886_v19  ;;  %5088 = vst [vmem:[#allocation3 + $0xa4] sm:$0x1] %v5087_v51  ;;  %v7480_v55 = vshll.u32 %v7365_v45, 16  ;;  %v6491_v58 = vrot.slane %v6490_v6, 4  ;;  %v17960_v15 = vor.u32 %v15763_v4, %v15761_v54 }
 0x2df   : > { %17959 = vst [vmem:[#allocation11_spill] sm:$0xff] %v15857_v2  ;;  %v6505_v35 = vrot.slane %v17961_v48, 5  ;;  %v15870_v12 = vrot.slane %v17962_v24, 4  ;;  %v7366_v9 = vld [vmem:[#allocation3 + $0x40] sm:$0xf]  ;;  %v17963_v52 = vshll.u32 %v15794_v22, 16 }
 0x2e0   : > { %v6501_v39 = vrot.slane %v17960_v15, 4  ;;  %v12089_v63 = vrot.slane %v15844_v31, 9  ;;  %v7037_v6 = vrot.slane %v17964_v28, 4  ;;  %v7038_v4 = vrot.slane %v15846_v23, 5  ;;  %v6016_v19 = vld [vmem:[#allocation3 + $0x98] sm:$0x1] }
 0x2e1   : > { %v15874_v53 = vrot.slane %v17963_v52, 5  ;;  %v15884_v27 = vrot.slane %v7469_v8, 4  ;;  %v15886_v25 = vrot.slane %v6514_v37, 4  ;;  %v15888_v1 = vrot.slane %v6524_v44, 4  ;;  %v15913_v15 = vld [vmem:[#allocation3 + $0x34] sm:$0xf] }
 0x2e2   : > { %v15890_v22 = vrot.slane %v6527_v49, 5  ;;  %v5207_v21 = vld [vmem:[#allocation3 + $0xa8] sm:$0x1]  ;;  %v15892_v57 = vrot.slane %v7477_v46, 4  ;;  %v15894_v41 = vrot.slane %v7480_v55, 5  ;;  %v7486_v13 = vshll.u32 %v7366_v9, 16 }
 0x2e3   : > { %v7490_v30 = vshrl.u32 %v7366_v9, 16  ;;  %v17965_v45 = vshrl.u32 %v15800_v3, 16  ;;  %v5204_v29 = vld [vmem:[#allocation3 + $0x9c] sm:$0x1]  ;;  %v11989_v8 = vrot.slane %v4900_v43, 11  ;;  %v7441_v49 = vsel %vm13590_vm14, %v15759_v11, %v15742_v61 }
 0x2e4   : > { %v17966_v23 = vshrl.u32 %v15806_v34, 16  ;;  %v5310_v3 = vld [vmem:[#allocation3 + $0xb0] sm:$0x1]  ;;  %v11988_v44 = vrot.slane %v4883_v36, 11  ;;  %v6014_v46 = vld [vmem:[#allocation3 + $0x90] sm:$0xe]  ;;  %v6496_v43 = vsel %vm13590_vm14, %v6491_v58, %v15761_v54  ;;  %v7451_v36 = vsel %vm13590_vm14, %v7446_v10, %v15747_v7 }
 0x2e5   : > { %v5208_v0 = vsel %vm15117_vm10, %v17965_v45, %v5207_v21  ;;  %v6160_v55 = vrot.slane %v15882_v56, 5  ;;  %v15915_v61 = vld [vmem:[#allocation3 + $0x30] sm:$0xf]  ;;  %v5311_v11 = vsel %vm15158_vm5, %v11989_v8, %v5310_v3  ;;  %v5307_v34 = vld [vmem:[#allocation3 + $0xa4] sm:$0x1]  ;;  %v6506_v54 = vsel %vm13590_vm14, %v6501_v39, %v6505_v35  ;;  %v12488_v21 = vpop.f32.mrb[0].mxu1 }
 0x2e6   : > { %5209 = vst [vmem:[#allocation3 + $0xa8] sm:$0x1] %v5208_v0  ;;  %v5205_v37 = vsel %vm15117_vm10, %v17966_v23, %v5204_v29  ;;  %v5506_v48 = vld [vmem:[#allocation3 + $0xa0] sm:$0xf]  ;;  %5312 = vst [vmem:[#allocation3 + $0xb0] sm:$0x1] %v5311_v11  ;;  %v5308_v58 = vsel %vm15158_vm5, %v11988_v44, %v5307_v34  ;;  %v15928_v45 = vcombine.low %v7441_v49, %v7451_v36 }
 0x2e7   : > { %5206 = vst [vmem:[#allocation3 + $0x9c] sm:$0x1] %v5205_v37  ;;  %v6163_v9 = vrot.slane %v6016_v19, 5  ;;  %v5836_v52 = vshll.u32 %v5506_v48, 16  ;;  %v5840_v28 = vshrl.u32 %v5506_v48, 16  ;;  %v15930_v0 = vcombine.low %v6496_v43, %v6506_v54  ;;  %v12489_v37 = vpop.f32.mrb[1].mxu1 }
 0x2e8   : > { %5309 = vst [vmem:[#allocation3 + $0xa4] sm:$0x1] %v5308_v58  ;;  %v5509_v56 = vld [vmem:[#allocation3 + $0xac] sm:$0xf]  ;;  %17967 = vst [vmem:[#allocation12_spill] sm:$0xff] %v15928_v45  ;;  %v15934_v7 = vsel %vm13496_vm11, %v7037_v6, %v7038_v4  ;;  %v15936_v10 = vrot.slane %v7486_v13, 5  ;;  %v15949_v43 = vadd.f32 %v12489_v37, %v12488_v21 }
 0x2e9   : > { %17968 = vst [vmem:[#allocation13_spill] sm:$0xff] %v15930_v0  ;;  %17969 = vst [vmem:[#allocation14_spill] sm:$0xff] %v15934_v7  ;;  %v6162_v39 = vrot.slane %v6160_v55, 4  ;;  %v15938_v35 = vld [vmem:[#allocation3 + $0xa0] sm:$0xf]  ;;  %v5860_v29 = vshll.u32 %v5509_v56, 16 }
 0x2ea   : > { %v5864_v8 = vshrl.u32 %v5509_v56, 16  ;;  %v15940_v19 = vrot.slane %v7490_v30, 4  ;;  %v12035_v23 = vrot.slane %v6014_v46, 9  ;;  %v15947_v4 = vrot.slane %v5836_v52, 5  ;;  %v12491_v11 = vpop.f32.mrb[2].mxu1 }
 0x2eb   : > { %v6164_v6 = vsel %vm13496_vm11, %v6162_v39, %v6163_v9  ;;  %v5842_v13 = vrot.slane %v5840_v28, 4  ;;  %v6167_v30 = vrot.slane %v15938_v35, 5  ;;  %v15952_v46 = vrot.slane %v5860_v29, 5  ;;  %v15974_v21 = vld [vmem:[#allocation3 + $0x34] sm:$0xf]  ;;  %v12492_v44 = vpop.f32.mrb[3].mxu1 }
 0x2ec   : > { %v17970_v36 = vrot.slane %v15804_v59, 5  ;;  %v6161_v9 = vsel %vm13496_vm11, %v12035_v23, %v6160_v55  ;;  %v5866_v28 = vrot.slane %v5864_v8, 4  ;;  %v6017_v29 = vld [vmem:[#allocation3 + $0x9c] sm:$0xe]  ;;  %v15987_v49 = vld [vmem:[#allocation3 + $0x48] sm:$0xf] }
 0x2ed   : > { %v5508_v34 = vld [vmem:[#allocation3 + $0xa8] sm:$0xf]  ;;  %v12051_v31 = vcombine.low %v6161_v9, %v6164_v6  ;;  %v5843_v8 = vor.u32 %v5842_v13, %v15947_v4  ;;  %v6530_v6 = vsel %vm13590_vm14, %v15888_v1, %v15890_v22  ;;  %v7483_v9 = vor.u32 %v15894_v41, %v15892_v57  ;;  %v12494_v1 = vpop.f32.mrb[4].mxu1 }
 0x2ee   : > { %v15964_v54 = vsel %vm13496_vm11, %v12089_v63, %v17970_v36  ;;  %v13191_v58 = vld [vmem:[#allocation3 + $0x9c] sm:$0xff]   ;;  %v13196_v39 = vld [vmem:[#allocation3 + $0xa8] sm:$0xff]   ;;  %v5851_v37 = vshrl.u32 %v5508_v34, 16  ;;  %v5510_v36 = vld [vmem:[#allocation3 + $0xb0] sm:$0x1]  ;;  %v6169_v51 = vrot.slane %v6167_v30, 4 }
 0x2ef   : > { %17971 = vst [vmem:[#allocation15_spill] sm:$0xff] %v15964_v54  ;;  %v5505_v52 = vld [vmem:[#allocation3 + $0x9c] sm:$0xf]  ;;  %9165 = vmatprep.mubr.bf16.mxu0 %v13191_v58  ;;  %v5507_v55 = vld [vmem:[#allocation3 + $0xa4] sm:$0x1]  ;;  %v5854_v56 = vshll.u32 %v5508_v34, 16  ;;  %v15989_v54 = vadd.f32 %v12492_v44, %v12491_v11 }
 0x2f0   : > { %v5827_v63 = vshrl.u32 %v5505_v52, 16  ;;  %v5830_v35 = vshll.u32 %v5505_v52, 16  ;;  %v6019_v23 = vld [vmem:[#allocation3 + $0xa4] sm:$0x1]  ;;  %9166 = vmatmul.mubr.bf16.gmra.mrb[80].mxu0 %v12051_v31  ;;  %v5846_v59 = vshll.u32 %v5507_v55, 16  ;;  %v5853_v48 = vrot.slane %v5851_v37, 4 }
 0x2f1   : > { %v6170_v13 = vrot.slane %v6019_v23, 5  ;;  %9173 = vmatprep.mubr.bf16.mxu0 %v13196_v39  ;;  %v5870_v24 = vshll.u32 %v5510_v36, 16  ;;  %v6541_v22 = vshll.u32 %v15974_v21, 16  ;;  %v12036_v57 = vrot.slane %v6017_v29, 9  ;;  %v12495_v39 = vpop.f32.mrb[5].mxu1 }
 0x2f2   : > { %v5829_v58 = vrot.slane %v5827_v63, 4  ;;  %v5832_v52 = vrot.slane %v5830_v35, 5  ;;  %v5848_v7 = vrot.slane %v5846_v59, 5  ;;  %v5856_v31 = vrot.slane %v5854_v56, 5  ;;  %v12497_v55 = vpop.f32.mrb[6].mxu1 }
 0x2f3   : > { %v6171_v41 = vsel %vm13496_vm11, %v6169_v51, %v6170_v13  ;;  %v5867_v63 = vor.u32 %v5866_v28, %v15952_v46  ;;  %v5844_v37 = vrot.slane %v5843_v8, 4  ;;  %v15995_v34 = vadd.f32 %v12495_v39, %v12494_v1  ;;  %v12498_v29 = vpop.f32.mrb[7].mxu1  ;;  %v5107_v45 = vld [vmem:[#allocation3 + $0xc8] sm:$0x1] }
 0x2f4   : > { %v5833_v3 = vor.u32 %v5832_v52, %v5829_v58  ;;  %v6545_v59 = vshrl.u32 %v15974_v21, 16  ;;  %v6168_v44 = vsel %vm13496_vm11, %v12036_v57, %v6167_v30  ;;  %v5857_v11 = vor.u32 %v5856_v31, %v5853_v48  ;;  %v12500_v52 = vpop.f32.mrb[8].mxu1  ;;  %v16008_v30 = vld [vmem:[#allocation3 + $0x30] sm:$0xe]  ;;  %v13197_v48 = vld [vmem:[#allocation3 + $0x9c] sm:$0xff]  }
 0x2f5   : > { %v5872_v23 = vrot.slane %v5870_v24, 5  ;;  %v7501_v36 = vshrl.u32 %v15987_v49, 16  ;;  %v12052_v28 = vcombine.low %v6168_v44, %v6171_v41  ;;  %v16006_v56 = vadd.f32 %v12498_v29, %v12497_v55  ;;  %v12501_v13 = vpop.f32.mrb[9].mxu1  ;;  %v6422_v29 = vld [vmem:[#allocation3 + $0x38] sm:$0x1] }
 0x2f6   : > { %v5834_v35 = vrot.slane %v5833_v3, 4  ;;  %v5849_v3 = vsel %vm13590_vm14, %v5844_v37, %v5848_v7  ;;  %v5858_v21 = vrot.slane %v5857_v11, 4  ;;  %v5868_v58 = vrot.slane %v5867_v63, 4 }
 0x2f7   : > { %v7504_v24 = vshll.u32 %v15987_v49, 16  ;;  %v16011_v1 = vrot.slane %v7483_v9, 4  ;;  %v17973_v7 = vshll.u32 %v15915_v61, 16  ;;  %v16017_v31 = vrot.slane %v6541_v22, 5  ;;  %v12503_v9 = vpop.f32.mrb[10].mxu1 }
 0x2f8   : > { %v5839_v51 = vsel %vm13590_vm14, %v5834_v35, %v15947_v4  ;;  %9174 = vmatmul.mubr.bf16.gmra.mrb[84].mxu0 %v12052_v28  ;;  %v17972_v4 = vshrl.u32 %v15915_v61, 16  ;;  %v5863_v63 = vsel %vm13590_vm14, %v5858_v21, %v15952_v46  ;;  %v5873_v49 = vsel %vm13590_vm14, %v5868_v58, %v5872_v23  ;;  %v6934_v35 = vld [vmem:[#allocation3 + $0x38] sm:$0x1]  ;;  %v12504_v44 = vpop.f32.mrb[11].mxu1 }
 0x2f9   : > { %v12020_v8 = vcombine.low %v5839_v51, %v5849_v3  ;;  %v6537_v41 = vrot.slane %v17973_v7, 5  ;;  %v16024_v39 = vadd.f32 %v12501_v13, %v12500_v52  ;;  %v6547_v37 = vrot.slane %v6545_v59, 4 }
 0x2fa   : > { %v6534_v57 = vrot.slane %v17972_v4, 4  ;;  %v12021_v55 = vcombine.low %v5863_v63, %v5873_v49  ;;  %v17974_v61 = vsel %vm13590_vm14, %v15884_v27, %v15874_v53  ;;  %v17975_v46 = vsel %vm13590_vm14, %v15870_v12, %v15802_v42  ;;  %v7369_v27 = vld [vmem:[#allocation3 + $0x4c] sm:$0xf] }
 0x2fb   : > { %9012 = vmatprep.mubr.bf16.mxu1 %v12020_v8  ;;  %v16036_v22 = vcombine.low %v17975_v46, %v17974_v61  ;;  %v17977_v59 = vsel %vm13590_vm14, %v15886_v25, %v15827_v20  ;;  %v12980_v51 = vpop.f32.mrb[28].mxu0  ;;  %v16046_v3 = vadd.f32 %v12504_v44, %v12503_v9  ;;  %v7493_v53 = vor.u32 %v15940_v19, %v15936_v10 }
 0x2fc   : > { %9013 = vmatmul.mubr.bf16.gmra.mrb[52].mxu1 %v13197_v48  ;;  %v16043_v11 = vcombine.low %v17977_v59, %v6530_v6  ;;  %v7503_v42 = vrot.slane %v7501_v36, 4  ;;  %v7506_v12 = vrot.slane %v7504_v24, 5  ;;  %v4498_v28 = vmul.f32 %v15756_v62, %v12980_v51  ;;  %v4446_v8 = vpop.f32.mrb[29].mxu0 }
 0x2fd   : > { %17976 = vst [vmem:[#allocation16_spill] sm:$0xff] %v16036_v22  ;;  %9020 = vmatprep.mubr.bf16.mxu1 %v12021_v55  ;;  %v17979_v20 = vshll.u32 %v15880_v16, 16  ;;  %v17980_v6 = vrot.slane %v15913_v15, 5  ;;  %v7045_v58 = vrot.slane %v6934_v35, 5  ;;  %v4496_v52 = vmul.f32 %v15756_v62, %v4446_v8  ;;  %v12981_v48 = vpop.f32.mrb[30].mxu0 }
 0x2fe   : > { %17978 = vst [vmem:[#allocation17_spill] sm:$0xff] %v16043_v11  ;;  %v6538_v36 = vor.u32 %v6537_v41, %v6534_v57  ;;  %v6548_v24 = vor.u32 %v6547_v37, %v16017_v31  ;;  %v4537_v13 = vadd.f32 %v15777_v5, %v4498_v28  ;;  %v4499_v16 = vmul.f32 %v15756_v62, %v12981_v48  ;;  %v4449_v4 = vpop.f32.mrb[31].mxu0  ;;  %v13202_v57 = vld [vmem:[#allocation3 + $0xa8] sm:$0xff]   ;;  %v16074_v37 = vld [vmem:[#allocation3 + $0x50] sm:$0x1] }
 0x2ff   : > { %v16053_v25 = vrot.slane %v17979_v20, 5  ;;  %v7044_v21 = vrot.slane %v17980_v6, 4  ;;  %v6551_v7 = vshll.u32 %v6422_v29, 16  ;;  %v7510_v63 = vshll.u32 %v7369_v27, 16  ;;  %v16089_v20 = vld [vmem:[#allocation3 + $0x40] sm:$0xf] }
 0x300   : > { %v4535_v49 = vadd.f32 %v15777_v5, %v4496_v52  ;;  %v4497_v9 = vmul.f32 %v15756_v62, %v4449_v4  ;;  %v16067_v35 = vrot.slane %v7493_v53, 4  ;;  %v7507_v55 = vor.u32 %v7506_v12, %v7503_v42  ;;  %v16081_v53 = vld [vmem:[#allocation3 + $0x3c] sm:$0xe]  ;;  %v16102_v4 = vld [vmem:[#allocation3 + $0x40] sm:$0xf] }
 0x301   : > { %v4569_v44 = vmax.f32 %v4537_v13, 0.0  ;;  %v4538_v61 = vadd.f32 %v15777_v5, %v4499_v16  ;;  %v16072_v41 = vsel %vm13496_vm11, %v7044_v21, %v7045_v58  ;;  %v7514_v46 = vshrl.u32 %v7369_v27, 16  ;;  %v16094_v52 = vld [vmem:[#allocation3 + $0x3c] sm:$0xf]  ;;  %v5110_v11 = vld [vmem:[#allocation3 + $0xcc] sm:$0xf] }
 0x302   : > { %v4567_v59 = vmax.f32 %v4535_v49, 0.0  ;;  %v4536_v29 = vadd.f32 %v15777_v5, %v4497_v9  ;;  %v16077_v51 = vrot.slane %v6538_v36, 4  ;;  %v16079_v62 = vrot.slane %v6548_v24, 4 }
 0x303   : > { %v16083_v42 = vpack.c.bf16 %v4569_v44, %v4569_v44  ;;  %v4570_v12 = vmax.f32 %v4538_v61, 0.0  ;;  %v16085_v28 = vrot.slane %v6551_v7, 5  ;;  %v16087_v8 = vrot.slane %v7510_v63, 5  ;;  %v12600_v21 = vpop.f32.mrb[32].mxu0  ;;  %v5103_v7 = vld [vmem:[#allocation3 + $0xc0] sm:$0xf] }
 0x304   : > { %9021 = vmatmul.mubr.bf16.gmra.mrb[56].mxu1 %v13202_v57  ;;  %v12449_v27 = vpack.c.bf16 %v4567_v59, %v4567_v59  ;;  %v4568_v6 = vmax.f32 %v4536_v29, 0.0  ;;  %v16091_v5 = vrot.slane %v7507_v55, 4  ;;  %v12601_v24 = vpop.f32.mrb[33].mxu0  ;;  %v16099_v13 = vrot.slane %v7514_v46, 4  ;;  %v12506_v44 = vpop.f32.mrb[12].mxu1 }
 0x305   : > { %v17880_v48 = vshrl.u32 %v16083_v42, 16  ;;  %v16097_v36 = vpack.c.bf16 %v4570_v12, %v4570_v12  ;;  %v12602_v9 = vadd.f32 %v12601_v24, %v12600_v21  ;;  %v12603_v55 = vpop.f32.mrb[34].mxu0  ;;  %v4926_v59 = vshll.u32 %v16083_v42, 16  ;;  %v5096_v46 = vld [vmem:[#allocation3 + $0xb4] sm:$0xf]  ;;  %v12507_v16 = vpop.f32.mrb[13].mxu1 }
 0x306   : > { %v4906_v63 = vshrl.u32 %v12449_v27, 16  ;;  %v16104_v49 = vpack.c.bf16 %v4568_v6, %v4568_v6  ;;  %v12604_v12 = vpop.f32.mrb[35].mxu0  ;;  %v4909_v6 = vshll.u32 %v12449_v27, 16  ;;  %v12509_v24 = vpop.f32.mrb[14].mxu1  ;;  %v7499_v47 = vsel %vm13590_vm14, %v16067_v35, %v16053_v25 }
 0x307   : > { %v4925_v57 = vrot.slane %v17880_v48, 7  ;;  %v4931_v29 = vshrl.u32 %v16097_v36, 16  ;;  %v17885_v48 = vshll.u32 %v16097_v36, 16  ;;  %v12510_v22 = vpop.f32.mrb[15].mxu1  ;;  %v17990_v25 = vsel %vm13590_vm14, %v16011_v1, %v15936_v10 }
 0x308   : > { %v4908_v23 = vrot.slane %v4906_v63, 7  ;;  %v4914_v21 = vshrl.u32 %v16104_v49, 16  ;;  %v4917_v19 = vshll.u32 %v16104_v49, 16  ;;  %v16228_v35 = vcombine.low %v17990_v25, %v7499_v47 }
 0x309   : > { %v4928_v61 = vor.u32 %v4926_v59, %v4925_v57  ;;  %v4933_v0 = vrot.slane %v4931_v29, 7  ;;  %v4929_v33 = vrot.slane %v4925_v57, 4  ;;  %v5100_v29 = vld [vmem:[#allocation3 + $0xbc] sm:$0x1] }
 0x30a   : > { %v4911_v50 = vor.u32 %v4909_v6, %v4908_v23  ;;  %v4916_v17 = vrot.slane %v4914_v21, 7  ;;  %v4912_v38 = vrot.slane %v4908_v23, 4 }
 0x30b   : > { %v5104_v27 = vsel %vm15103_vm0, %v4928_v61, %v5103_v7  ;;  %v4936_v59 = vor.u32 %v17885_v48, %v4933_v0  ;;  %v4938_v58 = vrot.slane %v4933_v0, 4  ;;  %v12606_v49 = vpop.f32.mrb[36].mxu0  ;;  %v5145_v7 = vrot.slane %v4906_v63, 4  ;;  %v16129_v48 = vld [vmem:[#allocation3 + $0x44] sm:$0x1] }
 0x30c   : > { %5105 = vst [vmem:[#allocation3 + $0xc0] sm:$0xf] %v5104_v27  ;;  %v5097_v2 = vsel %vm15103_vm0, %v4911_v50, %v5096_v46  ;;  %v5111_v57 = vsel %vm15103_vm0, %v4911_v50, %v5110_v11  ;;  %v4919_v6 = vor.u32 %v4917_v19, %v4916_v17  ;;  %v4921_v21 = vrot.slane %v4916_v17, 4  ;;  %v12607_v27 = vpop.f32.mrb[37].mxu0 }
 0x30d   : > { %5098 = vst [vmem:[#allocation3 + $0xb4] sm:$0xf] %v5097_v2  ;;  %5112 = vst [vmem:[#allocation3 + $0xcc] sm:$0xf] %v5111_v57  ;;  %v4937_v23 = vsel %vm13337_vm4, %v4929_v33, %v4936_v59  ;;  %v5108_v0 = vsel %vm15117_vm10, %v4938_v58, %v5107_v45  ;;  %v12605_v61 = vadd.f32 %v12604_v12, %v12603_v55  ;;  %v12609_v2 = vpop.f32.mrb[38].mxu0  ;;  %v12512_v45 = vpop.f32.mrb[16].mxu1 }
 0x30e   : > { %5106 = vst [vmem:[#allocation3 + $0xc4] sm:$0xf] %v4937_v23  ;;  %5109 = vst [vmem:[#allocation3 + $0xc8] sm:$0x1] %v5108_v0  ;;  %v4920_v40 = vsel %vm13337_vm4, %v4912_v38, %v4919_v6  ;;  %v5101_v17 = vsel %vm15117_vm10, %v4921_v21, %v5100_v29  ;;  %v5115_v50 = vsel %vm15117_vm10, %v4921_v21, %v5114_v32  ;;  %v12610_v38 = vpop.f32.mrb[39].mxu0  ;;  %v12513_v55 = vpop.f32.mrb[17].mxu1 }
 0x30f   : > { %v16138_v33 = vadd.f32 %v12602_v9, %v15949_v43  ;;  %5099 = vst [vmem:[#allocation3 + $0xb8] sm:$0xf] %v4920_v40  ;;  %5102 = vst [vmem:[#allocation3 + $0xbc] sm:$0x1] %v5101_v17  ;;  %v16141_v11 = vadd.f32 %v12605_v61, %v15989_v54  ;;  %v12608_v18 = vadd.f32 %v12607_v27, %v12606_v49  ;;  %v16147_v32 = vld [vmem:[#allocation3 + $0x44] sm:$0x1] }
 0x310   : > { %5113 = vst [vmem:[#allocation3 + $0xd0] sm:$0xf] %v4920_v40  ;;  %5116 = vst [vmem:[#allocation3 + $0xd4] sm:$0x1] %v5115_v50  ;;  %v16143_v58 = vadd.f32 %v12507_v16, %v12506_v44  ;;  %v16145_v63 = vadd.f32 %v12510_v22, %v12509_v24  ;;  %v16149_v43 = vld [vmem:[#allocation3 + $0xac] sm:$0xf]  ;;  %v12611_v9 = vadd.f32 %v12610_v38, %v12609_v2 }
 0x311   : > { %v16151_v46 = vadd.f32 %v12513_v55, %v12512_v45  ;;  %v12515_v12 = vpop.f32.mrb[18].mxu1  ;;  %v17981_v59 = vshll.u32 %v16074_v37, 16  ;;  %v7052_v54 = vrot.slane %v16129_v48, 5  ;;  %v5247_v57 = vrot.slane %v4917_v19, 7  ;;  %v6022_v16 = vld [vmem:[#allocation3 + $0xb0] sm:$0x1] }
 0x312   : > { %v16159_v22 = vadd.f32 %v12608_v18, %v15995_v34  ;;  %v12516_v44 = vpop.f32.mrb[19].mxu1  ;;  %v17982_v24 = vrot.slane %v16089_v20, 5  ;;  %v6569_v21 = vshrl.u32 %v16102_v4, 16  ;;  %v16167_v49 = vadd.f32 %v12611_v9, %v16006_v56 }
 0x313   : > { %v16155_v29 = vrot.slane %v17981_v59, 5  ;;  %v16169_v37 = vadd.f32 %v12516_v44, %v12515_v12  ;;  %v17983_v23 = vshrl.u32 %v16094_v52, 16  ;;  %v17984_v19 = vshll.u32 %v16094_v52, 16  ;;  %v5213_v61 = vld [vmem:[#allocation3 + $0xc0] sm:$0x1]  ;;  %v12518_v10 = vpop.f32.mrb[20].mxu1 }
 0x314   : > { %v16163_v6 = vrot.slane %v17982_v24, 4  ;;  %v5146_v27 = vrot.slane %v5145_v7, 4  ;;  %v6174_v40 = vrot.slane %v16149_v43, 5  ;;  %v17985_v17 = vshll.u32 %v16102_v4, 16  ;;  %v5210_v18 = vld [vmem:[#allocation3 + $0xb4] sm:$0x1] }
 0x315   : > { %v16173_v0 = vrot.slane %v17983_v23, 4  ;;  %v16177_v34 = vrot.slane %v17984_v19, 5  ;;  %v6575_v56 = vshll.u32 %v16147_v32, 16  ;;  %v17986_v2 = vshrl.u32 %v16083_v42, 16  ;;  %v5216_v38 = vld [vmem:[#allocation3 + $0xcc] sm:$0x1] }
 0x316   : > { %v16182_v50 = vrot.slane %v17985_v17, 5  ;;  %v17987_v52 = vshll.u32 %v16097_v36, 16  ;;  %v6177_v9 = vrot.slane %v6022_v16, 5  ;;  %v7517_v7 = vor.u32 %v16099_v13, %v16087_v8  ;;  %v16193_v12 = vld [vmem:[#allocation3 + $0x54] sm:$0xf]  ;;  %v12612_v24 = vpop.f32.mrb[40].mxu0 }
 0x317   : > { %v5214_v45 = vsel %vm15117_vm10, %v17986_v2, %v5213_v61  ;;  %v5211_v4 = vsel %vm15117_vm10, %v5146_v27, %v5210_v18  ;;  %v5217_v42 = vsel %vm15117_vm10, %v5146_v27, %v5216_v38  ;;  %v5316_v59 = vld [vmem:[#allocation3 + $0xc8] sm:$0x1]  ;;  %v5248_v44 = vrot.slane %v5247_v57, 4  ;;  %v5313_v19 = vld [vmem:[#allocation3 + $0xbc] sm:$0x1]  ;;  %v12613_v38 = vpop.f32.mrb[41].mxu0 }
 0x318   : > { %v11990_v55 = vrot.slane %v17987_v52, 11  ;;  %5215 = vst [vmem:[#allocation3 + $0xc0] sm:$0x1] %v5214_v45  ;;  %v17988_v23 = vrot.slane %v15913_v15, 5  ;;  %v17989_v36 = vrot.slane %v16008_v30, 9  ;;  %v6544_v30 = vsel %vm13590_vm14, %v16077_v51, %v16017_v31 }
 0x319   : > { %5212 = vst [vmem:[#allocation3 + $0xb4] sm:$0x1] %v5211_v4  ;;  %5218 = vst [vmem:[#allocation3 + $0xcc] sm:$0x1] %v5217_v42  ;;  %v5319_v61 = vld [vmem:[#allocation3 + $0xd4] sm:$0x1]  ;;  %v5314_v57 = vsel %vm15158_vm5, %v5248_v44, %v5313_v19  ;;  %v6554_v31 = vsel %vm13590_vm14, %v16079_v62, %v16085_v28 }
 0x31a   : > { %v16205_v16 = vsel %vm13496_vm11, %v17989_v36, %v17988_v23  ;;  %v5317_v13 = vsel %vm15158_vm5, %v11990_v55, %v5316_v59  ;;  %v5320_v27 = vsel %vm15158_vm5, %v5248_v44, %v5319_v61  ;;  %v6020_v17 = vld [vmem:[#allocation3 + $0xa8] sm:$0xe]  ;;  %v5512_v2 = vld [vmem:[#allocation3 + $0xb8] sm:$0xf]  ;;  %5315 = vst [vmem:[#allocation3 + $0xbc] sm:$0x1] %v5314_v57  ;;  %v12614_v55 = vadd.f32 %v12613_v38, %v12612_v24 }
 0x31b   : > { %5318 = vst [vmem:[#allocation3 + $0xc8] sm:$0x1] %v5317_v13  ;;  %v16234_v51 = vld [vmem:[#allocation3 + $0x58] sm:$0xf]  ;;  %5321 = vst [vmem:[#allocation3 + $0xd4] sm:$0x1] %v5320_v27  ;;  %v16242_v42 = vcombine.low %v6544_v30, %v6554_v31 }
 0x31c   : > { %v6176_v26 = vrot.slane %v6174_v40, 4  ;;  %v5884_v45 = vshll.u32 %v5512_v2, 16  ;;  %v5888_v18 = vshrl.u32 %v5512_v2, 16  ;;  %v16238_v52 = vrot.slane %v7517_v7, 4  ;;  %v16240_v1 = vld [vmem:[#allocation3 + $0xb8] sm:$0xf] }
 0x31d   : > { %v12615_v4 = vpop.f32.mrb[42].mxu0  ;;  %v16244_v62 = vrot.slane %v6569_v21, 4  ;;  %v7525_v28 = vshrl.u32 %v16193_v12, 16  ;;  %v12519_v59 = vpop.f32.mrb[21].mxu1  ;;  %v12037_v44 = vrot.slane %v6020_v17, 9  ;;  %v7528_v13 = vshll.u32 %v16193_v12, 16 }
 0x31e   : > { %v6178_v23 = vsel %vm13496_vm11, %v6176_v26, %v6177_v9  ;;  %v16249_v36 = vrot.slane %v5884_v45, 5  ;;  %v12616_v7 = vpop.f32.mrb[43].mxu0  ;;  %v12521_v19 = vpop.f32.mrb[22].mxu1  ;;  %v5890_v61 = vrot.slane %v5888_v18, 4  ;;  %v16253_v24 = vadd.f32 %v12614_v55, %v16024_v39  ;;  %v6023_v55 = vld [vmem:[#allocation3 + $0xb4] sm:$0xe] }
 0x31f   : > { %v12617_v47 = vadd.f32 %v12616_v7, %v12615_v4  ;;  %v16255_v21 = vadd.f32 %v12519_v59, %v12518_v10  ;;  %v12522_v30 = vpop.f32.mrb[23].mxu1  ;;  %v6181_v57 = vrot.slane %v16240_v1, 5  ;;  %v12618_v27 = vpop.f32.mrb[44].mxu0  ;;  %v7534_v17 = vshll.u32 %v16234_v51, 16  ;;  %v13208_v10 = vld [vmem:[#allocation3 + $0xc0] sm:$0xff]  }
 0x320   : > { %v7538_v9 = vshrl.u32 %v16234_v51, 16  ;;  %v16260_v2 = vadd.f32 %v12522_v30, %v12521_v19  ;;  %v13203_v25 = vld [vmem:[#allocation3 + $0xb4] sm:$0xff]   ;;  %v6175_v39 = vsel %vm13496_vm11, %v12037_v44, %v6174_v40  ;;  %v12619_v45 = vpop.f32.mrb[45].mxu0  ;;  %v7513_v18 = vsel %vm13590_vm14, %v16091_v5, %v16087_v8 }
 0x321   : > { %v5511_v31 = vld [vmem:[#allocation3 + $0xb4] sm:$0xf]  ;;  %v16267_v26 = vadd.f32 %v12617_v47, %v16046_v3  ;;  %v6562_v51 = vor.u32 %v16177_v34, %v16173_v0  ;;  %v12053_v38 = vcombine.low %v6175_v39, %v6178_v23  ;;  %v12620_v4 = vadd.f32 %v12619_v45, %v12618_v27  ;;  %9181 = vmatprep.mubr.bf16.mxu0 %v13203_v25  ;;  %v5513_v40 = vld [vmem:[#allocation3 + $0xbc] sm:$0x1]  ;;  %v12621_v44 = vpop.f32.mrb[46].mxu0  ;;  %v12524_v23 = vpop.f32.mrb[24].mxu1 }
 0x322   : > { %v5875_v1 = vshrl.u32 %v5511_v31, 16  ;;  %v5878_v43 = vshll.u32 %v5511_v31, 16  ;;  %v5891_v3 = vor.u32 %v5890_v61, %v16249_v36  ;;  %v6025_v59 = vld [vmem:[#allocation3 + $0xbc] sm:$0x1]  ;;  %v17991_v7 = vrot.slane %v16089_v20, 5  ;;  %v12622_v27 = vpop.f32.mrb[47].mxu0 }
 0x323   : > { %v17992_v19 = vrot.slane %v16081_v53, 9  ;;  %v16289_v0 = vsel %vm13496_vm11, %v16163_v6, %v7052_v54  ;;  %v6572_v34 = vor.u32 %v16244_v62, %v16182_v50  ;;  %9182 = vmatmul.mubr.bf16.gmra.mrb[88].mxu0 %v12053_v38  ;;  %v5894_v30 = vshll.u32 %v5513_v40, 16  ;;  %v12525_v25 = vpop.f32.mrb[25].mxu1  ;;  %v6426_v45 = vld [vmem:[#allocation3 + $0x48] sm:$0xf] }
 0x324   : > { %v5877_v61 = vrot.slane %v5875_v1, 4  ;;  %v5880_v20 = vrot.slane %v5878_v43, 5  ;;  %v6184_v53 = vrot.slane %v6025_v59, 5  ;;  %9189 = vmatprep.mubr.bf16.mxu0 %v13208_v10  ;;  %v6183_v39 = vrot.slane %v6181_v57, 4  ;;  %v12527_v6 = vpop.f32.mrb[26].mxu1 }
 0x325   : > { %v16282_v47 = vsel %vm13496_vm11, %v17992_v19, %v17991_v7  ;;  %v16294_v48 = vadd.f32 %v12620_v4, %v16143_v58  ;;  %v12623_v31 = vadd.f32 %v12622_v27, %v12621_v44  ;;  %v16296_v54 = vadd.f32 %v12525_v25, %v12524_v23  ;;  %v12528_v1 = vpop.f32.mrb[27].mxu1  ;;  %v6427_v58 = vld [vmem:[#allocation3 + $0x4c] sm:$0xf]  ;;  %v12624_v23 = vpop.f32.mrb[48].mxu0 }
 0x326   : > { %v5881_v7 = vor.u32 %v5880_v20, %v5877_v61  ;;  %v5896_v62 = vrot.slane %v5894_v30, 5  ;;  %v16298_v19 = vrot.slane %v6562_v51, 4  ;;  %v7527_v38 = vrot.slane %v7525_v28, 4  ;;  %v7373_v28 = vld [vmem:[#allocation3 + $0x5c] sm:$0x1] }
 0x327   : > { %v12038_v43 = vrot.slane %v6023_v55, 9  ;;  %v6185_v40 = vsel %vm13496_vm11, %v6183_v39, %v6184_v53  ;;  %v16303_v10 = vadd.f32 %v12623_v31, %v16145_v63  ;;  %v16305_v4 = vadd.f32 %v12528_v1, %v12527_v6  ;;  %v12625_v63 = vpop.f32.mrb[49].mxu0  ;;  %v16318_v39 = vld [vmem:[#allocation3 + $0x4c] sm:$0xf] }
 0x328   : > { %v5882_v59 = vrot.slane %v5881_v7, 4  ;;  %v5892_v44 = vrot.slane %v5891_v3, 4  ;;  %v6580_v27 = vshrl.u32 %v6426_v45, 16  ;;  %v6583_v61 = vshll.u32 %v6426_v45, 16  ;;  %v7374_v45 = vld [vmem:[#allocation3 + $0x60] sm:$0xf] }
 0x329   : > { %v6182_v51 = vsel %vm13496_vm11, %v12038_v43, %v6181_v57  ;;  %v7530_v55 = vrot.slane %v7528_v13, 5  ;;  %v16311_v20 = vrot.slane %v7534_v17, 5  ;;  %v7540_v30 = vrot.slane %v7538_v9, 4  ;;  %v12627_v57 = vpop.f32.mrb[50].mxu0  ;;  %v13209_v7 = vld [vmem:[#allocation3 + $0xb4] sm:$0xff]  }
 0x32a   : > { %v5887_v53 = vsel %vm13590_vm14, %v5882_v59, %v16249_v36  ;;  %v5897_v3 = vsel %vm13590_vm14, %v5892_v44, %v5896_v62  ;;  %v12054_v25 = vcombine.low %v6182_v51, %v6185_v40  ;;  %v12626_v31 = vadd.f32 %v12625_v63, %v12624_v23  ;;  %v12628_v13 = vpop.f32.mrb[51].mxu0  ;;  %v17993_v40 = vld [vmem:[#allocation6_spill] sm:$0xff]  ;;  %v6938_v23 = vld [vmem:[#allocation3 + $0x48] sm:$0xe] }
 0x32b   : > { %v12022_v6 = vcombine.low %v5887_v53, %v5897_v3  ;;  %v6577_v12 = vrot.slane %v6575_v56, 5  ;;  %v6589_v17 = vshll.u32 %v6427_v58, 16  ;;  %v6593_v9 = vshrl.u32 %v6427_v58, 16  ;;  %v17994_v63 = vld [vmem:[#allocation8_spill] sm:$0xff]  ;;  %v17995_v53 = vld [vmem:[#allocation7_spill] sm:$0xff] }
 0x32c   : > { %9190 = vmatmul.mubr.bf16.gmra.mrb[92].mxu0 %v12054_v25  ;;  %v16323_v36 = vadd.f32 %v12626_v31, %v16151_v46  ;;  %v12629_v1 = vadd.f32 %v12628_v13, %v12627_v57  ;;  %v6582_v62 = vrot.slane %v6580_v27, 4  ;;  %v6585_v43 = vrot.slane %v6583_v61, 5  ;;  %v6940_v27 = vld [vmem:[#allocation3 + $0x50] sm:$0x1]  ;;  %v12630_v31 = vpop.f32.mrb[52].mxu0  ;;  %v13213_v13 = vld [vmem:[#allocation3 + $0x18] sm:$0xff]  }
 0x32d   : > { %9028 = vmatprep.mubr.bf16.mxu1 %v12022_v6  ;;  %9391 = vmatprep.mubr.bf16.mxu0 %v17993_v40  ;;  %v7523_v32 = vsel %vm13590_vm14, %v16238_v52, %v16155_v29  ;;  %v7531_v58 = vor.u32 %v7530_v55, %v7527_v38  ;;  %v7544_v59 = vshll.u32 %v7373_v28, 16  ;;  %v6573_v44 = vrot.slane %v6572_v34, 4  ;;  %v6428_v34 = vld [vmem:[#allocation3 + $0x50] sm:$0x1]  ;;  %v12631_v6 = vpop.f32.mrb[53].mxu0 }
 0x32e   : > { %9029 = vmatmul.mubr.bf16.gmra.mrb[60].mxu1 %v13209_v7  ;;  %v7541_v46 = vor.u32 %v7540_v30, %v16311_v20  ;;  %v7056_v61 = vrot.slane %v16318_v39, 5  ;;  %v16335_v51 = vadd.f32 %v12629_v1, %v16169_v37  ;;  %v17996_v3 = vcombine.low %v17994_v63, %v17995_v53  ;;  %v7375_v39 = vld [vmem:[#allocation3 + $0x64] sm:$0xf]  ;;  %v12633_v1 = vpop.f32.mrb[54].mxu0  ;;  %v6434_v56 = vld [vmem:[#allocation3 + $0x68] sm:$0x1] }
 0x32f   : > { %v16345_v29 = vcombine.low %v7513_v18, %v7523_v32  ;;  %v6568_v52 = vsel %vm13590_vm14, %v16298_v19, %v16182_v50  ;;  %v7549_v38 = vshrl.u32 %v7374_v45, 16  ;;  %v7552_v37 = vshll.u32 %v7374_v45, 16  ;;  %v13215_v50 = vld [vmem:[%s17866_s4 + $0x208] sm:$0xff]   ;;  %v12634_v32 = vpop.f32.mrb[55].mxu0 }
 0x330   : > { %9230 = vmatprep.mubr.bf16.mxu1 %v17996_v3  ;;  %v6578_v28 = vsel %vm13590_vm14, %v6573_v44, %v6577_v12  ;;  %v6586_v55 = vor.u32 %v6585_v43, %v6582_v62  ;;  %v16353_v30 = vrot.slane %v6589_v17, 5  ;;  %v6595_v25 = vrot.slane %v6593_v9, 4  ;;  %v16358_v12 = vld [vmem:[#allocation3 + $0x58] sm:$0xf] }
 0x331   : > { %v7532_v8 = vrot.slane %v7531_v58, 4  ;;  %v7546_v5 = vrot.slane %v7544_v59, 5  ;;  %v12092_v18 = vrot.slane %v6938_v23, 9  ;;  %v7059_v57 = vrot.slane %v6940_v27, 5  ;;  %v13240_v23 = vld [vmem:[%s17866_s4 + $0x200] sm:$0xff]  }
 0x332   : > { %v7542_v19 = vrot.slane %v7541_v46, 4  ;;  %v7058_v45 = vrot.slane %v7056_v61, 4  ;;  %v6599_v7 = vshll.u32 %v6428_v34, 16  ;;  %v12632_v17 = vadd.f32 %v12631_v6, %v12630_v31  ;;  %v17997_v27 = vld [vmem:[#allocation12_spill] sm:$0xff]  ;;  %v17998_v34 = vld [vmem:[#allocation9_spill] sm:$0xff]  ;;  %v18000_v31 = vld [vmem:[#allocation11_spill] sm:$0xff] }
 0x333   : > { %v7551_v9 = vrot.slane %v7549_v38, 4  ;;  %v7554_v62 = vrot.slane %v7552_v37, 5  ;;  %v7558_v43 = vshll.u32 %v7375_v39, 16  ;;  %v7562_v40 = vshrl.u32 %v7375_v39, 16  ;;  %v16383_v38 = vld [vmem:[%s17866_s4 + $0x210] sm:$0xff]  }
 0x334   : > { %9392 = vmatmul.mubr.bf16.vlgmr.msra.gmra.mrb[96].mxu0 %v13213_v13  ;;  %v16360_v58 = vrot.slane %v6586_v55, 4  ;;  %v6596_v59 = vor.u32 %v6595_v25, %v16353_v30  ;;  %v16364_v44 = vadd.f32 %v12632_v17, %v16255_v21  ;;  %v12635_v46 = vadd.f32 %v12634_v32, %v12633_v1  ;;  %v7376_v21 = vld [vmem:[#allocation3 + $0x68] sm:$0x1]  ;;  %v6429_v25 = vld [vmem:[#allocation3 + $0x54] sm:$0xf]  ;;  %v17999_v39 = vld [vmem:[#allocation10_spill] sm:$0xff] }
 0x335   : > { %12983 = vmatpush3.bf16.msra.mxu0 %v13240_v23  ;;  %9399 = vmatprep.mubr.bf16.mxu0 %v17997_v27  ;;  %v16370_v63 = vcombine.low %v6568_v52, %v6578_v28  ;;  %v7537_v53 = vsel %vm13590_vm14, %v7532_v8, %v16311_v20  ;;  %v16377_v3 = vsel %vm13496_vm11, %v7058_v45, %v7059_v57  ;;  %v16391_v20 = vrot.slane %v6599_v7, 5  ;;  %v6943_v28 = vld [vmem:[#allocation3 + $0x5c] sm:$0x1]  ;;  %v6941_v7 = vld [vmem:[#allocation3 + $0x54] sm:$0xe]  ;;  %v12636_v1 = vpop.f32.mrb[56].mxu0 }
 0x336   : > { %9231 = vmatmul.mubr.bf16.vlgmr.msra.gmra.mrb[64].mxu1 %v17998_v34  ;;  %12984 = vmatprep.subr.bf16.mxu0 %v13215_v50  ;;  %v7547_v52 = vsel %vm13590_vm14, %v7542_v19, %v7546_v5  ;;  %v16389_v37 = vsel %vm13496_vm11, %v12092_v18, %v7056_v61  ;;  %v16394_v55 = vadd.f32 %v12635_v46, %v16260_v2  ;;  %v16399_v6 = vrot.slane %v7558_v43, 5  ;;  %v6430_v61 = vld [vmem:[#allocation3 + $0x58] sm:$0xf]  ;;  %v7377_v17 = vld [vmem:[#allocation3 + $0x6c] sm:$0xf]  ;;  %v13214_v32 = vld [vmem:[#allocation3 + $0x24] sm:$0xff]  }
 0x337   : > { %v18001_v8 = vcombine.low %v17999_v39, %v18000_v31  ;;  %13038 = vmatpush3.bf16.msra.mxu1 %v13240_v23  ;;  %v7555_v57 = vor.u32 %v7554_v62, %v7551_v9  ;;  %v7564_v5 = vrot.slane %v7562_v40, 4  ;;  %v7063_v13 = vrot.slane %v16358_v12, 5  ;;  %v12637_v40 = vpop.f32.mrb[57].mxu0 }
 0x338   : > { %13031 = vmatprep.subr.bf16.mxu1 %v13215_v50  ;;  %v16402_v18 = vcombine.low %v7537_v53, %v7547_v52  ;;  %v6592_v19 = vsel %vm13590_vm14, %v16360_v58, %v16353_v30  ;;  %v6597_v45 = vrot.slane %v6596_v59, 4  ;;  %v7568_v9 = vshll.u32 %v7376_v21, 16  ;;  %v16417_v30 = vld [vmem:[%s17866_s4 + $0x218] sm:$0xff]   ;;  %v12639_v27 = vpop.f32.mrb[58].mxu0 }
 0x339   : > { %9238 = vmatprep.mubr.bf16.mxu1 %v18001_v8  ;;  %12985 = vmatpush3.bf16.msra.mxu0 %v13215_v50  ;;  %v7066_v62 = vrot.slane %v6943_v28, 5  ;;  %v6604_v12 = vshrl.u32 %v6429_v25, 16  ;;  %v6607_v43 = vshll.u32 %v6429_v25, 16  ;;  %v6613_v58 = vshll.u32 %v6430_v61, 16  ;;  %v6432_v28 = vld [vmem:[#allocation3 + $0x60] sm:$0xf] }
 0x33a   : > { %12986 = vmatprep.subr.bf16.mxu0 %v16383_v38  ;;  %v6602_v46 = vsel %vm13590_vm14, %v6597_v45, %v16391_v20  ;;  %v6617_v59 = vshrl.u32 %v6430_v61, 16  ;;  %v12638_v23 = vadd.f32 %v12637_v40, %v12636_v1  ;;  %v16419_v53 = vrot.slane %v7555_v57, 4  ;;  %v12640_v25 = vpop.f32.mrb[59].mxu0  ;;  %v18002_v61 = vld [vmem:[#allocation16_spill] sm:$0xff]  ;;  %v18003_v1 = vld [vmem:[#allocation13_spill] sm:$0xff] }
 0x33b   : > { %13039 = vmatpush3.bf16.msra.mxu1 %v13215_v50  ;;  %v7565_v21 = vor.u32 %v7564_v5, %v16399_v6  ;;  %v12093_v34 = vrot.slane %v6941_v7, 9  ;;  %v7065_v52 = vrot.slane %v7063_v13, 4  ;;  %v7573_v20 = vshrl.u32 %v7377_v17, 16  ;;  %v7378_v7 = vld [vmem:[#allocation3 + $0x70] sm:$0xf] }
 0x33c   : > { %9400 = vmatmul.mubr.bf16.gmra.mrb[100].mxu0 %v13214_v32  ;;  %13032 = vmatprep.subr.bf16.mxu1 %v16383_v38  ;;  %v7576_v39 = vshll.u32 %v7377_v17, 16  ;;  %v16424_v31 = vadd.f32 %v12638_v23, %v16296_v54  ;;  %v12641_v8 = vadd.f32 %v12640_v25, %v12639_v27  ;;  %v7570_v50 = vrot.slane %v7568_v9, 5  ;;  %v6431_v17 = vld [vmem:[#allocation3 + $0x5c] sm:$0x1]  ;;  %v16439_v9 = vld [vmem:[%s17866_s4 + $0x220] sm:$0xff]  }
 0x33d   : > { %9407 = vmatprep.mubr.bf16.mxu0 %v18002_v61  ;;  %12987 = vmatpush3.bf16.msra.mxu0 %v16383_v38  ;;  %v16430_v57 = vsel %vm13496_vm11, %v7065_v52, %v7066_v62  ;;  %v6606_v5 = vrot.slane %v6604_v12, 4  ;;  %v6609_v45 = vrot.slane %v6607_v43, 5  ;;  %v16434_v54 = vrot.slane %v6613_v58, 5  ;;  %v18005_v12 = vld [vmem:[#allocation15_spill] sm:$0xff]  ;;  %v18006_v43 = vld [vmem:[#allocation14_spill] sm:$0xff] }
 0x33e   : > { %9239 = vmatmul.mubr.bf16.gmra.mrb[68].mxu1 %v18003_v1  ;;  %12988 = vmatprep.subr.bf16.mxu0 %v16417_v30  ;;  %v6619_v40 = vrot.slane %v6617_v59, 4  ;;  %v6628_v32 = vshrl.u32 %v6432_v28, 16  ;;  %v16442_v62 = vadd.f32 %v12641_v8, %v16305_v4  ;;  %v18007_v23 = vcombine.low %v18005_v12, %v18006_v43  ;;  %v6433_v59 = vld [vmem:[#allocation3 + $0x64] sm:$0xf]  ;;  %v12642_v8 = vpop.f32.mrb[60].mxu0  ;;  %v13216_v12 = vld [vmem:[#allocation3 + $0x30] sm:$0xff]  }
 0x33f   : > { %v16447_v27 = vcombine.low %v6592_v19, %v6602_v46  ;;  %v7566_v52 = vrot.slane %v7565_v21, 4  ;;  %v16451_v58 = vsel %vm13496_vm11, %v12093_v34, %v7063_v13  ;;  %13040 = vmatpush3.bf16.msra.mxu1 %v16383_v38  ;;  %v6631_v25 = vshll.u32 %v6432_v28, 16  ;;  %v12530_v21 = vpop.f32.mrb[28].mxu1  ;;  %v12643_v34 = vpop.f32.mrb[61].mxu0 }
 0x340   : > { %18004 = vst [vmem:[#allocation6_spill] sm:$0xff] %v16442_v62  ;;  %9246 = vmatprep.mubr.bf16.mxu1 %v18007_v23  ;;  %v7575_v61 = vrot.slane %v7573_v20, 4  ;;  %v7578_v1 = vrot.slane %v7576_v39, 5  ;;  %v7582_v2 = vshll.u32 %v7378_v7, 16  ;;  %v7586_v4 = vshrl.u32 %v7378_v7, 16  ;;  %13033 = vmatprep.subr.bf16.mxu1 %v16417_v30  ;;  %v12645_v43 = vpop.f32.mrb[62].mxu0 }
 0x341   : > { %v7561_v19 = vsel %vm13590_vm14, %v16419_v53, %v16399_v6  ;;  %12989 = vmatpush3.bf16.msra.mxu0 %v16417_v30  ;;  %v6610_v38 = vor.u32 %v6609_v45, %v6606_v5  ;;  %v6623_v46 = vshll.u32 %v6431_v17, 16  ;;  %v7571_v28 = vsel %vm13590_vm14, %v7566_v52, %v7570_v50  ;;  %v7380_v7 = vld [vmem:[#allocation3 + $0x78] sm:$0xf]  ;;  %v12531_v53 = vpop.f32.mrb[29].mxu1  ;;  %v16471_v5 = vld [vmem:[%s17866_s4 + $0x228] sm:$0xff]   ;;  %v12646_v52 = vpop.f32.mrb[63].mxu0 }
 0x342   : > { %v6620_v20 = vor.u32 %v6619_v40, %v16434_v54  ;;  %v16465_v39 = vrot.slane %v6628_v32, 4  ;;  %12990 = vmatprep.subr.bf16.mxu0 %v16439_v9  ;;  %v12644_v6 = vadd.f32 %v12643_v34, %v12642_v8  ;;  %v16473_v45 = vld [vmem:[#allocation3 + $0x64] sm:$0xf]  ;;  %v6633_v17 = vrot.slane %v6631_v25, 5  ;;  %v12533_v32 = vpop.f32.mrb[30].mxu1 }
 0x343   : > { %v6637_v23 = vshll.u32 %v6433_v59, 16  ;;  %v6641_v50 = vshrl.u32 %v6433_v59, 16  ;;  %13041 = vmatpush3.bf16.msra.mxu1 %v16417_v30  ;;  %v12532_v40 = vadd.f32 %v12531_v53, %v12530_v21  ;;  %v7579_v13 = vor.u32 %v7578_v1, %v7575_v61  ;;  %v12534_v62 = vpop.f32.mrb[31].mxu1  ;;  %v7379_v30 = vld [vmem:[#allocation3 + $0x74] sm:$0x1] }
 0x344   : > { %9408 = vmatmul.mubr.bf16.gmra.mrb[104].mxu0 %v13216_v12  ;;  %v16476_v8 = vrot.slane %v7582_v2, 5  ;;  %v7588_v34 = vrot.slane %v7586_v4, 4  ;;  %v12647_v15 = vadd.f32 %v12646_v52, %v12645_v43  ;;  %13034 = vmatprep.subr.bf16.mxu1 %v16439_v9  ;;  %v16480_v25 = vcombine.low %v7561_v19, %v7571_v28  ;;  %v7381_v21 = vld [vmem:[#allocation3 + $0x7c] sm:$0xf]  ;;  %v18008_v61 = vld [vmem:[#allocation17_spill] sm:$0xff] }
 0x345   : > { %9415 = vmatprep.mubr.bf16.mxu0 %v16228_v35  ;;  %v16482_v59 = vrot.slane %v6610_v38, 4  ;;  %12991 = vmatpush3.bf16.msra.mxu0 %v16439_v9  ;;  %v16485_v12 = vadd.f32 %v12644_v6, %v12532_v40  ;;  %v12535_v2 = vadd.f32 %v12534_v62, %v12533_v32  ;;  %v16488_v1 = vrot.slane %v6620_v20, 4  ;;  %v13230_v35 = vld [vmem:[%s17866_s4 + $0x230] sm:$0xff]   ;;  %v6946_v38 = vld [vmem:[#allocation3 + $0x68] sm:$0x1] }
 0x346   : > { %9247 = vmatmul.mubr.bf16.gmra.mrb[72].mxu1 %v18008_v61  ;;  %v6625_v4 = vrot.slane %v6623_v46, 5  ;;  %v7597_v53 = vshrl.u32 %v7380_v7, 16  ;;  %v7600_v43 = vshll.u32 %v7380_v7, 16  ;;  %12992 = vmatprep.subr.bf16.mxu0 %v16471_v5  ;;  %v18009_v19 = vcombine.low %v16205_v16, %v16072_v41  ;;  %v6944_v32 = vld [vmem:[#allocation3 + $0x60] sm:$0xe] }
 0x347   : > { %v6634_v62 = vor.u32 %v6633_v17, %v16465_v39  ;;  %v16498_v28 = vrot.slane %v6637_v23, 5  ;;  %v6643_v20 = vrot.slane %v6641_v50, 4  ;;  %v16500_v6 = vadd.f32 %v12647_v15, %v12535_v2  ;;  %13042 = vmatpush3.bf16.msra.mxu1 %v16439_v9  ;;  %v12536_v9 = vpop.f32.mrb[32].mxu1 }
 0x348   : > { %9254 = vmatprep.mubr.bf16.mxu1 %v18009_v19  ;;  %v7580_v46 = vrot.slane %v7579_v13, 4  ;;  %v7589_v7 = vor.u32 %v7588_v34, %v16476_v8  ;;  %v7592_v40 = vshll.u32 %v7379_v30, 16  ;;  %v7070_v52 = vrot.slane %v16473_v45, 5  ;;  %13035 = vmatprep.subr.bf16.mxu1 %v16471_v5  ;;  %v13217_v13 = vld [vmem:[#allocation3 + $0x3c] sm:$0xff]   ;;  %v12537_v34 = vpop.f32.mrb[33].mxu1 }
 0x349   : > { %v6616_v41 = vsel %vm13590_vm14, %v16482_v59, %v16434_v54  ;;  %v6647_v16 = vshll.u32 %v6434_v56, 16  ;;  %v7606_v39 = vshll.u32 %v7381_v21, 16  ;;  %v7610_v15 = vshrl.u32 %v7381_v21, 16  ;;  %12993 = vmatpush3.bf16.msra.mxu0 %v16471_v5  ;;  %v13233_v54 = vld [vmem:[%s17866_s4 + $0x238] sm:$0xff]   ;;  %v6435_v21 = vld [vmem:[#allocation3 + $0x6c] sm:$0xf] }
 0x34a   : > { %v6626_v17 = vsel %vm13590_vm14, %v16488_v1, %v6625_v4  ;;  %v7073_v23 = vrot.slane %v6946_v38, 5  ;;  %v7599_v45 = vrot.slane %v7597_v53, 4  ;;  %v7602_v50 = vrot.slane %v7600_v43, 5  ;;  %12994 = vmatprep.subr.bf16.mxu0 %v13230_v35  ;;  %v12539_v61 = vpop.f32.mrb[34].mxu1  ;;  %v7382_v19 = vld [vmem:[#allocation3 + $0x80] sm:$0x1] }
 0x34b   : > { %v12094_v56 = vrot.slane %v6944_v32, 9  ;;  %v6635_v59 = vrot.slane %v6634_v62, 4  ;;  %v6644_v30 = vor.u32 %v6643_v20, %v16498_v28  ;;  %v16518_v2 = vadd.f32 %v12537_v34, %v12536_v9  ;;  %13043 = vmatpush3.bf16.msra.mxu1 %v16471_v5  ;;  %v12540_v38 = vpop.f32.mrb[35].mxu1  ;;  %v7383_v9 = vld [vmem:[#allocation3 + $0x84] sm:$0xf] }
 0x34c   : > { %9416 = vmatmul.mubr.bf16.gmra.mrb[108].mxu0 %v13217_v13  ;;  %v7585_v1 = vsel %vm13590_vm14, %v7580_v46, %v16476_v8  ;;  %v7590_v4 = vrot.slane %v7589_v7, 4  ;;  %v7594_v53 = vrot.slane %v7592_v40, 5  ;;  %v7072_v43 = vrot.slane %v7070_v52, 4  ;;  %13036 = vmatprep.subr.bf16.mxu1 %v13230_v35 }
 0x34d   : > { %9423 = vmatprep.mubr.bf16.mxu0 %v16345_v29  ;;  %v6649_v62 = vrot.slane %v6647_v16, 5  ;;  %v16525_v20 = vrot.slane %v7606_v39, 5  ;;  %v7612_v32 = vrot.slane %v7610_v15, 4  ;;  %v16527_v34 = vadd.f32 %v12540_v38, %v12539_v61  ;;  %12995 = vmatpush3.bf16.msra.mxu0 %v13230_v35 }
 0x34e   : > { %9255 = vmatmul.mubr.bf16.gmra.mrb[76].mxu1 %v16242_v42  ;;  %v16532_v5 = vsel %vm13496_vm11, %v7072_v43, %v7073_v23  ;;  %v7603_v8 = vor.u32 %v7602_v50, %v7599_v45  ;;  %v6652_v46 = vshrl.u32 %v6435_v21, 16  ;;  %v6655_v7 = vshll.u32 %v6435_v21, 16  ;;  %12996 = vmatprep.subr.bf16.mxu0 %v13233_v54  ;;  %v6948_v23 = vld [vmem:[#allocation3 + $0x70] sm:$0xf]  ;;  %v6947_v50 = vld [vmem:[#allocation3 + $0x6c] sm:$0xe] }
 0x34f   : > { %v18010_v29 = vcombine.low %v16282_v47, %v16289_v0  ;;  %v16537_v40 = vcombine.low %v6616_v41, %v6626_v17  ;;  %v6640_v16 = vsel %vm13590_vm14, %v6635_v59, %v16498_v28  ;;  %v6645_v39 = vrot.slane %v6644_v30, 4  ;;  %13044 = vmatpush3.bf16.msra.mxu1 %v13230_v35  ;;  %v6436_v45 = vld [vmem:[#allocation3 + $0x70] sm:$0xf]  ;;  %v6949_v59 = vld [vmem:[#allocation3 + $0x74] sm:$0x1] }
 0x350   : > { %v7616_v42 = vshll.u32 %v7382_v19, 16  ;;  %v7595_v15 = vsel %vm13590_vm14, %v7590_v4, %v7594_v53  ;;  %v16546_v13 = vsel %vm13496_vm11, %v12094_v56, %v7070_v52  ;;  %v7621_v47 = vshrl.u32 %v7383_v9, 16  ;;  %13037 = vmatprep.subr.bf16.mxu1 %v13233_v54  ;;  %v7384_v30 = vld [vmem:[#allocation3 + $0x88] sm:$0xf]  ;;  %v6437_v19 = vld [vmem:[#allocation3 + $0x74] sm:$0x1] }
 0x351   : > { %9262 = vmatprep.mubr.bf16.mxu1 %v18010_v29  ;;  %v7624_v0 = vshll.u32 %v7383_v9, 16  ;;  %v16548_v41 = vcombine.low %v7585_v1, %v7595_v15  ;;  %v12110_v28 = vcombine.low %v16546_v13, %v16532_v5  ;;  %v6650_v35 = vsel %vm13590_vm14, %v6645_v39, %v6649_v62  ;;  %12997 = vmatpush3.bf16.msra.mxu0 %v13233_v54  ;;  %v13219_v52 = vld [vmem:[#allocation3 + $0x48] sm:$0xff]   ;;  %v6438_v1 = vld [vmem:[#allocation3 + $0x78] sm:$0xf] }
 0x352   : > { %v7613_v17 = vor.u32 %v7612_v32, %v16525_v20  ;;  %v16555_v56 = vcombine.low %v6640_v16, %v6650_v35  ;;  %v7604_v21 = vrot.slane %v7603_v8, 4  ;;  %v6654_v61 = vrot.slane %v6652_v46, 4 }
 0x353   : > { %v6657_v4 = vrot.slane %v6655_v7, 5  ;;  %v7618_v53 = vrot.slane %v7616_v42, 5  ;;  %v7077_v43 = vrot.slane %v6948_v23, 5  ;;  %v6661_v38 = vshll.u32 %v6436_v45, 16  ;;  %13045 = vmatpush3.bf16.msra.mxu1 %v13233_v54  ;;  %v7386_v23 = vld [vmem:[#allocation3 + $0x90] sm:$0xf] }
 0x354   : > { %v6665_v9 = vshrl.u32 %v6436_v45, 16  ;;  %9424 = vmatmul.mubr.bf16.gmra.mrb[112].mxu0 %v13219_v52  ;;  %v7623_v62 = vrot.slane %v7621_v47, 4  ;;  %v7626_v32 = vrot.slane %v7624_v0, 5  ;;  %v7630_v29 = vshll.u32 %v7384_v30, 16 }
 0x355   : > { %v7634_v39 = vshrl.u32 %v7384_v30, 16  ;;  %9431 = vmatprep.mubr.bf16.mxu0 %v16402_v18  ;;  %v7614_v15 = vrot.slane %v7613_v17, 4  ;;  %v12095_v16 = vrot.slane %v6947_v50, 9  ;;  %v6676_v35 = vshrl.u32 %v6438_v1, 16  ;;  %v16573_v17 = vld [vmem:[#allocation3 + $0x78] sm:$0xe] }
 0x356   : > { %v6679_v8 = vshll.u32 %v6438_v1, 16  ;;  %9263 = vmatmul.mubr.bf16.gmra.mrb[80].mxu1 %v16370_v63  ;;  %v7609_v46 = vsel %vm13590_vm14, %v7604_v21, %v16525_v20  ;;  %v7080_v7 = vrot.slane %v6949_v59, 5  ;;  %v6658_v42 = vor.u32 %v6657_v4, %v6654_v61  ;;  %v16575_v20 = vld [vmem:[#allocation3 + $0x7c] sm:$0xf]  ;;  %v7385_v30 = vld [vmem:[#allocation3 + $0x8c] sm:$0x1] }
 0x357   : > { %v6671_v54 = vshll.u32 %v6437_v19, 16  ;;  %v18011_v45 = vcombine.low %v16389_v37, %v16377_v3  ;;  %v7619_v18 = vsel %vm13590_vm14, %v7614_v15, %v7618_v53  ;;  %v16569_v47 = vsel %vm13496_vm11, %v12095_v16, %v7077_v43  ;;  %v6439_v50 = vld [vmem:[#allocation3 + $0x7c] sm:$0xf]  ;;  %v6952_v61 = vld [vmem:[#allocation3 + $0x80] sm:$0x1] }
 0x358   : > { %v7079_v63 = vrot.slane %v7077_v43, 4  ;;  %v16571_v0 = vrot.slane %v6661_v38, 5  ;;  %v6667_v59 = vrot.slane %v6665_v9, 4  ;;  %v7627_v52 = vor.u32 %v7626_v32, %v7623_v62  ;;  %v13220_v43 = vld [vmem:[#allocation3 + $0x54] sm:$0xff]  }
 0x359   : > { %9270 = vmatprep.mubr.bf16.mxu1 %v18011_v45  ;;  %v16577_v3 = vrot.slane %v7630_v29, 5  ;;  %v7636_v37 = vrot.slane %v7634_v39, 4  ;;  %v16579_v21 = vcombine.low %v7609_v46, %v7619_v18  ;;  %v6678_v4 = vrot.slane %v6676_v35, 4  ;;  %v7387_v16 = vld [vmem:[#allocation3 + $0x94] sm:$0xf] }
 0x35a   : > { %v6681_v1 = vrot.slane %v6679_v8, 5  ;;  %v7645_v53 = vshrl.u32 %v7386_v23, 16  ;;  %v16583_v19 = vsel %vm13496_vm11, %v7079_v63, %v7080_v7  ;;  %v6659_v38 = vrot.slane %v6658_v42, 4  ;;  %v6441_v39 = vld [vmem:[#allocation3 + $0x84] sm:$0xf] }
 0x35b   : > { %v6673_v15 = vrot.slane %v6671_v54, 5  ;;  %v7648_v9 = vshll.u32 %v7386_v23, 16  ;;  %v7640_v45 = vshll.u32 %v7385_v30, 16  ;;  %v7084_v62 = vrot.slane %v16575_v20, 5  ;;  %v6440_v63 = vld [vmem:[#allocation3 + $0x80] sm:$0x1] }
 0x35c   : > { %v6685_v32 = vshll.u32 %v6439_v50, 16  ;;  %v6689_v29 = vshrl.u32 %v6439_v50, 16  ;;  %9432 = vmatmul.mubr.bf16.gmra.mrb[116].mxu0 %v13220_v43  ;;  %v6668_v35 = vor.u32 %v6667_v59, %v16571_v0  ;;  %v7628_v8 = vrot.slane %v7627_v52, 4 }
 0x35d   : > { %v7637_v46 = vor.u32 %v7636_v37, %v16577_v3  ;;  %v12096_v18 = vrot.slane %v16573_v17, 9  ;;  %9439 = vmatprep.mubr.bf16.mxu0 %v16480_v25  ;;  %v7087_v7 = vrot.slane %v6952_v61, 5  ;;  %v6682_v42 = vor.u32 %v6681_v1, %v6678_v4 }
 0x35e   : > { %v7647_v54 = vrot.slane %v7645_v53, 4  ;;  %v7654_v23 = vshll.u32 %v7387_v16, 16  ;;  %9271 = vmatmul.mubr.bf16.gmra.mrb[84].mxu1 %v16447_v27  ;;  %v7650_v20 = vrot.slane %v7648_v9, 5  ;;  %v7658_v50 = vshrl.u32 %v7387_v16, 16  ;;  %v7388_v16 = vld [vmem:[#allocation3 + $0x98] sm:$0x1] }
 0x35f   : > { %v6700_v30 = vshrl.u32 %v6441_v39, 16  ;;  %v6703_v43 = vshll.u32 %v6441_v39, 16  ;;  %v18012_v59 = vcombine.low %v16451_v58, %v16430_v57  ;;  %v6664_v17 = vsel %vm13590_vm14, %v6659_v38, %v16571_v0  ;;  %v13222_v38 = vld [vmem:[#allocation3 + $0x60] sm:$0xff]  }
 0x360   : > { %v7086_v25 = vrot.slane %v7084_v62, 4  ;;  %v16597_v52 = vrot.slane %v6685_v32, 5  ;;  %v6691_v37 = vrot.slane %v6689_v29, 4  ;;  %v6669_v61 = vrot.slane %v6668_v35, 4  ;;  %v6442_v29 = vld [vmem:[#allocation3 + $0x88] sm:$0xf] }
 0x361   : > { %9278 = vmatprep.mubr.bf16.mxu1 %v18012_v59  ;;  %v7633_v27 = vsel %vm13590_vm14, %v7628_v8, %v16577_v3  ;;  %v7638_v4 = vrot.slane %v7637_v46, 4  ;;  %v7642_v1 = vrot.slane %v7640_v45, 5  ;;  %v16606_v57 = vrot.slane %v6682_v42, 4 }
 0x362   : > { %v16604_v53 = vsel %vm13496_vm11, %v7086_v25, %v7087_v7  ;;  %v6695_v58 = vshll.u32 %v6440_v63, 16  ;;  %v16608_v0 = vrot.slane %v7654_v23, 5  ;;  %v7651_v9 = vor.u32 %v7650_v20, %v7647_v54  ;;  %v16619_v7 = vld [vmem:[#allocation3 + $0x84] sm:$0xe]  ;;  %v6954_v20 = vld [vmem:[#allocation3 + $0x88] sm:$0xf] }
 0x363   : > { %v7660_v32 = vrot.slane %v7658_v50, 4  ;;  %v6702_v39 = vrot.slane %v6700_v30, 4  ;;  %v6705_v35 = vrot.slane %v6703_v43, 5  ;;  %v12111_v3 = vcombine.low %v16569_v47, %v16583_v19  ;;  %v7390_v43 = vld [vmem:[#allocation3 + $0xa0] sm:$0xf]  ;;  %v13225_v47 = vld [vmem:[#allocation3 + $0x78] sm:$0xff]  }
 0x364   : > { %v6674_v45 = vsel %vm13590_vm14, %v6669_v61, %v6673_v15  ;;  %v16616_v8 = vsel %vm13496_vm11, %v12096_v18, %v7084_v62  ;;  %v6692_v46 = vor.u32 %v6691_v37, %v16597_v52  ;;  %9440 = vmatmul.mubr.bf16.gmra.mrb[120].mxu0 %v13222_v38  ;;  %v7643_v54 = vsel %vm13590_vm14, %v7638_v4, %v7642_v1  ;;  %v7389_v15 = vld [vmem:[#allocation3 + $0x9c] sm:$0xf]  ;;  %v6955_v37 = vld [vmem:[#allocation3 + $0x8c] sm:$0x1] }
 0x365   : > { %v16621_v42 = vcombine.low %v6664_v17, %v6674_v45  ;;  %v7664_v63 = vshll.u32 %v7388_v16, 16  ;;  %9447 = vmatprep.mubr.bf16.mxu0 %v16548_v41  ;;  %v16628_v62 = vcombine.low %v7633_v27, %v7643_v54  ;;  %v6697_v18 = vrot.slane %v6695_v58, 5  ;;  %v6443_v61 = vld [vmem:[#allocation3 + $0x8c] sm:$0x1]  ;;  %v12648_v58 = vpop.f32.mrb[64].mxu0 }
 0x366   : > { %v6709_v50 = vshll.u32 %v6442_v29, 16  ;;  %v6713_v30 = vshrl.u32 %v6442_v29, 16  ;;  %9279 = vmatmul.mubr.bf16.gmra.mrb[88].mxu1 %v16537_v40  ;;  %v6688_v59 = vsel %vm13590_vm14, %v16606_v57, %v16597_v52  ;;  %v7652_v17 = vrot.slane %v7651_v9, 4  ;;  %v12649_v57 = vpop.f32.mrb[65].mxu0  ;;  %v13223_v54 = vld [vmem:[#allocation3 + $0x6c] sm:$0xff]  }
 0x367   : > { %v7661_v25 = vor.u32 %v7660_v32, %v16608_v0  ;;  %v6706_v4 = vor.u32 %v6705_v35, %v6702_v39  ;;  %9286 = vmatprep.mubr.bf16.mxu1 %v12110_v28  ;;  %v6693_v41 = vrot.slane %v6692_v46, 4  ;;  %v12097_v27 = vrot.slane %v16619_v7, 9  ;;  %v12651_v35 = vpop.f32.mrb[66].mxu0 }
 0x368   : > { %v7669_v1 = vshrl.u32 %v7389_v15, 16  ;;  %v7672_v40 = vshll.u32 %v7389_v15, 16  ;;  %v7666_v16 = vrot.slane %v7664_v63, 5  ;;  %v7091_v38 = vrot.slane %v6954_v20, 5  ;;  %v12652_v7 = vpop.f32.mrb[67].mxu0 }
 0x369   : > { %v7678_v29 = vshll.u32 %v7390_v43, 16  ;;  %v7682_v52 = vshrl.u32 %v7390_v43, 16  ;;  %v7094_v9 = vrot.slane %v6955_v37, 5  ;;  %v16640_v32 = vrot.slane %v6709_v50, 5  ;;  %v7391_v63 = vld [vmem:[#allocation3 + $0xa4] sm:$0x1] }
 0x36a   : > { %v6715_v45 = vrot.slane %v6713_v30, 4  ;;  %v12650_v39 = vadd.f32 %v12649_v57, %v12648_v58  ;;  %v7657_v5 = vsel %vm13590_vm14, %v7652_v17, %v16608_v0  ;;  %v7662_v13 = vrot.slane %v7661_v25, 4  ;;  %v16654_v17 = vld [vmem:[#allocation3 + $0x94] sm:$0xf]  ;;  %v12654_v57 = vpop.f32.mrb[68].mxu0 }
 0x36b   : > { %v16645_v28 = vrot.slane %v6706_v4, 4  ;;  %v6719_v46 = vshll.u32 %v6443_v61, 16  ;;  %v7671_v20 = vrot.slane %v7669_v1, 4  ;;  %v7674_v15 = vrot.slane %v7672_v40, 5  ;;  %v6444_v4 = vld [vmem:[#allocation3 + $0x90] sm:$0xf] }
 0x36c   : > { %v16648_v43 = vadd.f32 %v12650_v39, %v16518_v2  ;;  %v12653_v50 = vadd.f32 %v12652_v7, %v12651_v35  ;;  %9448 = vmatmul.mubr.bf16.gmra.mrb[124].mxu0 %v13223_v54  ;;  %v6698_v30 = vsel %vm13590_vm14, %v6693_v41, %v6697_v18  ;;  %v7093_v37 = vrot.slane %v7091_v38, 4  ;;  %v6445_v1 = vld [vmem:[#allocation3 + $0x94] sm:$0xf]  ;;  %v7393_v54 = vld [vmem:[#allocation3 + $0xac] sm:$0xf]  ;;  %v12542_v7 = vpop.f32.mrb[36].mxu1 }
 0x36d   : > { %v16652_v58 = vrot.slane %v7678_v29, 5  ;;  %v7684_v0 = vrot.slane %v7682_v52, 4  ;;  %9455 = vmatprep.mubr.bf16.mxu0 %v16579_v21  ;;  %v16657_v25 = vcombine.low %v6688_v59, %v6698_v30  ;;  %v7667_v61 = vsel %vm13590_vm14, %v7662_v13, %v7666_v16  ;;  %v6956_v16 = vld [vmem:[#allocation3 + $0x90] sm:$0xe]  ;;  %v6958_v29 = vld [vmem:[#allocation3 + $0x98] sm:$0x1] }
 0x36e   : > { %v6716_v2 = vor.u32 %v6715_v45, %v16640_v32  ;;  %v16663_v40 = vadd.f32 %v12653_v50, %v16527_v34  ;;  %9287 = vmatmul.mubr.bf16.gmra.mrb[92].mxu1 %v16555_v56  ;;  %v16666_v18 = vcombine.low %v7657_v5, %v7667_v61  ;;  %v16670_v41 = vsel %vm13496_vm11, %v12097_v27, %v7091_v38  ;;  %v7392_v38 = vld [vmem:[#allocation3 + $0xa8] sm:$0xf]  ;;  %v12655_v5 = vpop.f32.mrb[69].mxu0  ;;  %v12543_v50 = vpop.f32.mrb[37].mxu1 }
 0x36f   : > { %v16674_v21 = vsel %vm13496_vm11, %v7093_v37, %v7094_v9  ;;  %v7688_v59 = vshll.u32 %v7391_v63, 16  ;;  %9294 = vmatprep.mubr.bf16.mxu1 %v12111_v3  ;;  %v6712_v34 = vsel %vm13590_vm14, %v16645_v28, %v16640_v32  ;;  %v6721_v56 = vrot.slane %v6719_v46, 5  ;;  %v12657_v32 = vpop.f32.mrb[70].mxu0 }
 0x370   : > { %v7675_v52 = vor.u32 %v7674_v15, %v7671_v20  ;;  %v7098_v27 = vrot.slane %v16654_v17, 5  ;;  %v7685_v9 = vor.u32 %v7684_v0, %v16652_v58  ;;  %v6724_v45 = vshrl.u32 %v6444_v4, 16  ;;  %v12658_v30 = vpop.f32.mrb[71].mxu0  ;;  %v6446_v17 = vld [vmem:[#allocation3 + $0x98] sm:$0x1] }
 0x371   : > { %v6727_v39 = vshll.u32 %v6444_v4, 16  ;;  %v6733_v35 = vshll.u32 %v6445_v1, 16  ;;  %v6717_v19 = vrot.slane %v6716_v2, 4  ;;  %v12098_v3 = vrot.slane %v6956_v16, 9  ;;  %v12545_v4 = vpop.f32.mrb[38].mxu1 }
 0x372   : > { %v6737_v13 = vshrl.u32 %v6445_v1, 16  ;;  %v12656_v63 = vadd.f32 %v12655_v5, %v12654_v57  ;;  %v16685_v28 = vrot.slane %v7688_v59, 5  ;;  %v7101_v46 = vrot.slane %v6958_v29, 5  ;;  %v12546_v59 = vpop.f32.mrb[39].mxu1 }
 0x373   : > { %v7693_v20 = vshrl.u32 %v7392_v38, 16  ;;  %v7696_v15 = vshll.u32 %v7392_v38, 16  ;;  %v16687_v37 = vrot.slane %v7675_v52, 4  ;;  %v7100_v0 = vrot.slane %v7098_v27, 4 }
 0x374   : > { %v12544_v61 = vadd.f32 %v12543_v50, %v12542_v7  ;;  %v12659_v23 = vadd.f32 %v12658_v30, %v12657_v32  ;;  %9456 = vmatmul.mubr.bf16.gmra.mrb[128].mxu0 %v13225_v47  ;;  %v16689_v2 = vrot.slane %v7685_v9, 4  ;;  %v6726_v1 = vrot.slane %v6724_v45, 4  ;;  %v13226_v32 = vld [vmem:[#allocation3 + $0x84] sm:$0xff]  }
 0x375   : > { %v6729_v16 = vrot.slane %v6727_v39, 5  ;;  %v16691_v57 = vrot.slane %v6733_v35, 5  ;;  %9463 = vmatprep.mubr.bf16.mxu0 %v16628_v62  ;;  %v6739_v29 = vrot.slane %v6737_v13, 4  ;;  %v7702_v38 = vshll.u32 %v7393_v54, 16  ;;  %v6961_v30 = vld [vmem:[#allocation3 + $0xa4] sm:$0x1] }
 0x376   : > { %v16694_v5 = vadd.f32 %v12656_v63, %v12544_v61  ;;  %v12547_v52 = vadd.f32 %v12546_v59, %v12545_v4  ;;  %9295 = vmatmul.mubr.bf16.gmra.mrb[96].mxu1 %v16621_v42  ;;  %v16699_v7 = vsel %vm13496_vm11, %v7100_v0, %v7101_v46  ;;  %v7695_v9 = vrot.slane %v7693_v20, 4  ;;  %v6447_v63 = vld [vmem:[#allocation3 + $0x9c] sm:$0xf]  ;;  %v7395_v20 = vld [vmem:[#allocation3 + $0xb4] sm:$0xf] }
 0x377   : > { %v7698_v47 = vrot.slane %v7696_v15, 5  ;;  %v7706_v45 = vshrl.u32 %v7393_v54, 16  ;;  %v18013_v39 = vcombine.low %v16616_v8, %v16604_v53  ;;  %v12113_v62 = vcombine.low %v16670_v41, %v16674_v21  ;;  %v16724_v41 = vld [vmem:[#allocation3 + $0xa0] sm:$0xf]  ;;  %v12548_v15 = vpop.f32.mrb[40].mxu1 }
 0x378   : > { %v6722_v35 = vsel %vm13590_vm14, %v6717_v19, %v6721_v56  ;;  %v6743_v13 = vshll.u32 %v6446_v17, 16  ;;  %v16708_v42 = vadd.f32 %v12659_v23, %v12547_v52  ;;  %v7681_v54 = vsel %vm13590_vm14, %v16687_v37, %v16652_v58  ;;  %v6448_v23 = vld [vmem:[#allocation3 + $0xa0] sm:$0xf]  ;;  %v7394_v19 = vld [vmem:[#allocation3 + $0xb0] sm:$0x1] }
 0x379   : > { %9302 = vmatprep.mubr.bf16.mxu1 %v18013_v39  ;;  %v16710_v46 = vcombine.low %v6712_v34, %v6722_v35  ;;  %v7691_v53 = vsel %vm13590_vm14, %v16689_v2, %v16685_v28  ;;  %v16722_v8 = vsel %vm13496_vm11, %v12098_v3, %v7098_v27  ;;  %v6730_v34 = vor.u32 %v6729_v16, %v6726_v1  ;;  %v12549_v3 = vpop.f32.mrb[41].mxu1  ;;  %v7396_v4 = vld [vmem:[#allocation3 + $0xb8] sm:$0xf] }
 0x37a   : > { %v12114_v21 = vcombine.low %v16722_v8, %v16699_v7  ;;  %v6740_v56 = vor.u32 %v6739_v29, %v16691_v57  ;;  %v16729_v58 = vrot.slane %v7702_v38, 5  ;;  %v7699_v50 = vor.u32 %v7698_v47, %v7695_v9  ;;  %v12551_v1 = vpop.f32.mrb[42].mxu1  ;;  %v6452_v8 = vld [vmem:[#allocation3 + $0xb0] sm:$0x1] }
 0x37b   : > { %v7708_v28 = vrot.slane %v7706_v45, 4  ;;  %v6748_v37 = vshrl.u32 %v6447_v63, 16  ;;  %v6751_v27 = vshll.u32 %v6447_v63, 16  ;;  %v6745_v0 = vrot.slane %v6743_v13, 5  ;;  %v12552_v52 = vpop.f32.mrb[43].mxu1 }
 0x37c   : > { %v6757_v17 = vshll.u32 %v6448_v23, 16  ;;  %v6761_v61 = vshrl.u32 %v6448_v23, 16  ;;  %v16731_v2 = vadd.f32 %v12549_v3, %v12548_v15  ;;  %9464 = vmatmul.mubr.bf16.gmra.mrb[132].mxu0 %v13226_v32  ;;  %v7712_v16 = vshll.u32 %v7394_v19, 16  ;;  %v6959_v63 = vld [vmem:[#allocation3 + $0x9c] sm:$0xe] }
 0x37d   : > { %v7105_v59 = vrot.slane %v16724_v41, 5  ;;  %v7717_v29 = vshrl.u32 %v7395_v20, 16  ;;  %v7720_v38 = vshll.u32 %v7395_v20, 16  ;;  %9471 = vmatprep.mubr.bf16.mxu0 %v16666_v18  ;;  %v6731_v9 = vrot.slane %v6730_v34, 4 }
 0x37e   : > { %v6741_v47 = vrot.slane %v6740_v56, 4  ;;  %v7108_v45 = vrot.slane %v6961_v30, 5  ;;  %v16735_v39 = vadd.f32 %v12552_v52, %v12551_v1  ;;  %9303 = vmatmul.mubr.bf16.gmra.mrb[100].mxu1 %v16657_v25  ;;  %v7700_v35 = vrot.slane %v7699_v50, 4  ;;  %v6449_v56 = vld [vmem:[#allocation3 + $0xa4] sm:$0x1] }
 0x37f   : > { %v7709_v13 = vor.u32 %v7708_v28, %v16729_v58  ;;  %v6750_v32 = vrot.slane %v6748_v37, 4  ;;  %v6753_v23 = vrot.slane %v6751_v27, 5  ;;  %9310 = vmatprep.mubr.bf16.mxu1 %v12113_v62  ;;  %v16739_v41 = vrot.slane %v6757_v17, 5  ;;  %v16746_v62 = vld [vmem:[#allocation3 + $0xac] sm:$0xf]  ;;  %v13228_v37 = vld [vmem:[#allocation3 + $0x90] sm:$0xff]  }
 0x380   : > { %v6763_v19 = vrot.slane %v6761_v61, 4  ;;  %v7726_v20 = vshll.u32 %v7396_v4, 16  ;;  %v7730_v15 = vshrl.u32 %v7396_v4, 16  ;;  %v7714_v18 = vrot.slane %v7712_v16, 5  ;;  %v6451_v4 = vld [vmem:[#allocation3 + $0xac] sm:$0xf] }
 0x381   : > { %v7107_v34 = vrot.slane %v7105_v59, 4  ;;  %v7719_v30 = vrot.slane %v7717_v29, 4  ;;  %v7722_v3 = vrot.slane %v7720_v38, 5  ;;  %v12146_v1 = vcombine.low %v7681_v54, %v7691_v53  ;;  %v6450_v53 = vld [vmem:[#allocation3 + $0xa8] sm:$0xf] }
 0x382   : > { %v6736_v25 = vsel %vm13590_vm14, %v6731_v9, %v16691_v57  ;;  %v6746_v50 = vsel %vm13590_vm14, %v6741_v47, %v6745_v0  ;;  %v12099_v28 = vrot.slane %v6959_v63, 9  ;;  %v7705_v27 = vsel %vm13590_vm14, %v7700_v35, %v16729_v58  ;;  %v7397_v0 = vld [vmem:[#allocation3 + $0xbc] sm:$0x1] }
 0x383   : > { %v7710_v17 = vrot.slane %v7709_v13, 4  ;;  %v16753_v61 = vsel %vm13496_vm11, %v7107_v34, %v7108_v45  ;;  %v6754_v54 = vor.u32 %v6753_v23, %v6750_v32  ;;  %v6764_v57 = vor.u32 %v6763_v19, %v16739_v41  ;;  %v6964_v45 = vld [vmem:[#allocation3 + $0xb0] sm:$0x1]  ;;  %v7398_v23 = vld [vmem:[#allocation3 + $0xc0] sm:$0xf] }
 0x384   : > { %v6767_v16 = vshll.u32 %v6449_v56, 16  ;;  %v16756_v29 = vrot.slane %v7726_v20, 5  ;;  %v7732_v38 = vrot.slane %v7730_v15, 4  ;;  %9472 = vmatmul.mubr.bf16.gmra.mrb[136].mxu0 %v13228_v37  ;;  %v12082_v52 = vcombine.low %v6736_v25, %v6746_v50  ;;  %v6962_v25 = vld [vmem:[#allocation3 + $0xa8] sm:$0xe]  ;;  %v13229_v37 = vld [vmem:[#allocation3 + $0x9c] sm:$0xff]  }
 0x385   : > { %v7715_v58 = vsel %vm13590_vm14, %v7710_v17, %v7714_v18  ;;  %v7106_v9 = vsel %vm13496_vm11, %v12099_v28, %v7105_v59  ;;  %v7723_v47 = vor.u32 %v7722_v3, %v7719_v30  ;;  %9479 = vmatprep.mubr.bf16.mxu0 %v12146_v1  ;;  %v6772_v35 = vshrl.u32 %v6450_v53, 16  ;;  %v7399_v3 = vld [vmem:[#allocation3 + $0xc4] sm:$0xf] }
 0x386   : > { %v6775_v13 = vshll.u32 %v6450_v53, 16  ;;  %v6781_v63 = vshll.u32 %v6451_v4, 16  ;;  %v6785_v32 = vshrl.u32 %v6451_v4, 16  ;;  %9311 = vmatmul.mubr.bf16.gmra.mrb[104].mxu1 %v16710_v46  ;;  %v12147_v19 = vcombine.low %v7705_v27, %v7715_v58 }
 0x387   : > { %v12115_v20 = vcombine.low %v7106_v9, %v16753_v61  ;;  %v7736_v15 = vshll.u32 %v7397_v0, 16  ;;  %v7112_v34 = vrot.slane %v16746_v62, 5  ;;  %9318 = vmatprep.mubr.bf16.mxu1 %v12114_v21  ;;  %v6755_v59 = vrot.slane %v6754_v54, 4 }
 0x388   : > { %v6765_v18 = vrot.slane %v6764_v57, 4  ;;  %v6769_v56 = vrot.slane %v6767_v16, 5  ;;  %v7733_v30 = vor.u32 %v7732_v38, %v16756_v29  ;;  %v7724_v1 = vrot.slane %v7723_v47, 4 }
 0x389   : > { %v7115_v50 = vrot.slane %v6964_v45, 5  ;;  %v7741_v46 = vshrl.u32 %v7398_v23, 16  ;;  %v7744_v28 = vshll.u32 %v7398_v23, 16  ;;  %v6774_v27 = vrot.slane %v6772_v35, 4  ;;  %v6453_v45 = vld [vmem:[#allocation3 + $0xb4] sm:$0xf] }
 0x38a   : > { %v6777_v17 = vrot.slane %v6775_v13, 5  ;;  %v16769_v61 = vrot.slane %v6781_v63, 5  ;;  %v6787_v62 = vrot.slane %v6785_v32, 4  ;;  %v7738_v53 = vrot.slane %v7736_v15, 5  ;;  %v16784_v32 = vld [vmem:[#allocation3 + $0xb8] sm:$0xf] }
 0x38b   : > { %v7114_v7 = vrot.slane %v7112_v34, 4  ;;  %v7750_v21 = vshll.u32 %v7399_v3, 16  ;;  %v7754_v54 = vshrl.u32 %v7399_v3, 16  ;;  %v6760_v4 = vsel %vm13590_vm14, %v6755_v59, %v16739_v41  ;;  %v7401_v23 = vld [vmem:[#allocation3 + $0xcc] sm:$0xf] }
 0x38c   : > { %v6770_v57 = vsel %vm13590_vm14, %v6765_v18, %v6769_v56  ;;  %v7734_v16 = vrot.slane %v7733_v30, 4  ;;  %v12100_v0 = vrot.slane %v6962_v25, 9  ;;  %9480 = vmatmul.mubr.bf16.gmra.mrb[140].mxu0 %v13229_v37  ;;  %v7729_v38 = vsel %vm13590_vm14, %v7724_v1, %v16756_v29  ;;  %v7400_v59 = vld [vmem:[#allocation3 + $0xc8] sm:$0x1]  ;;  %v6454_v3 = vld [vmem:[#allocation3 + $0xb8] sm:$0xf] }
 0x38d   : > { %v7116_v58 = vsel %vm13496_vm11, %v7114_v7, %v7115_v50  ;;  %v7743_v9 = vrot.slane %v7741_v46, 4  ;;  %v7746_v47 = vrot.slane %v7744_v28, 5  ;;  %9487 = vmatprep.mubr.bf16.mxu0 %v12147_v19  ;;  %v6778_v35 = vor.u32 %v6777_v17, %v6774_v27  ;;  %v7402_v28 = vld [vmem:[#allocation3 + $0xd0] sm:$0xf]  ;;  %v13231_v7 = vld [vmem:[#allocation3 + $0xa8] sm:$0xff]  }
 0x38e   : > { %v7113_v41 = vsel %vm13496_vm11, %v12100_v0, %v7112_v34  ;;  %v6788_v13 = vor.u32 %v6787_v62, %v16769_v61  ;;  %v6791_v63 = vshll.u32 %v6452_v8, 16  ;;  %9319 = vmatmul.mubr.bf16.gmra.mrb[108].mxu1 %v12082_v52  ;;  %v12083_v15 = vcombine.low %v6760_v4, %v6770_v57  ;;  %v6967_v34 = vld [vmem:[#allocation3 + $0xbc] sm:$0x1] }
 0x38f   : > { %v7739_v29 = vsel %vm13590_vm14, %v7734_v16, %v7738_v53  ;;  %v16788_v18 = vrot.slane %v7750_v21, 5  ;;  %v7756_v56 = vrot.slane %v7754_v54, 4  ;;  %9326 = vmatprep.mubr.bf16.mxu1 %v12115_v20  ;;  %v12116_v30 = vcombine.low %v7113_v41, %v7116_v58  ;;  %v6965_v20 = vld [vmem:[#allocation3 + $0xb4] sm:$0xe] }
 0x390   : > { %v12148_v19 = vcombine.low %v7729_v38, %v7739_v29  ;;  %v6796_v1 = vshrl.u32 %v6453_v45, 16  ;;  %v6799_v25 = vshll.u32 %v6453_v45, 16  ;;  %v7747_v50 = vor.u32 %v7746_v47, %v7743_v9  ;;  %v6455_v47 = vld [vmem:[#allocation3 + $0xbc] sm:$0x1] }
 0x391   : > { %v7119_v46 = vrot.slane %v16784_v32, 5  ;;  %v7765_v52 = vshrl.u32 %v7401_v23, 16  ;;  %v7768_v37 = vshll.u32 %v7401_v23, 16  ;;  %v6779_v27 = vrot.slane %v6778_v35, 4 }
 0x392   : > { %v6789_v17 = vrot.slane %v6788_v13, 4  ;;  %v6793_v62 = vrot.slane %v6791_v63, 5  ;;  %v7760_v53 = vshll.u32 %v7400_v59, 16  ;;  %v7757_v8 = vor.u32 %v7756_v56, %v16788_v18 }
 0x393   : > { %v7122_v21 = vrot.slane %v6967_v34, 5  ;;  %v6805_v54 = vshll.u32 %v6454_v3, 16  ;;  %v6809_v4 = vshrl.u32 %v6454_v3, 16  ;;  %v6798_v57 = vrot.slane %v6796_v1, 4  ;;  %v6456_v34 = vld [vmem:[#allocation3 + $0xc0] sm:$0xf] }
 0x394   : > { %v6801_v16 = vrot.slane %v6799_v25, 5  ;;  %v7774_v0 = vshll.u32 %v7402_v28, 16  ;;  %v7778_v38 = vshrl.u32 %v7402_v28, 16  ;;  %9488 = vmatmul.mubr.bf16.gmra.mrb[144].mxu0 %v13231_v7  ;;  %v7748_v58 = vrot.slane %v7747_v50, 4  ;;  %v7403_v1 = vld [vmem:[#allocation3 + $0xd4] sm:$0x1] }
 0x395   : > { %v7121_v9 = vrot.slane %v7119_v46, 4  ;;  %v7767_v45 = vrot.slane %v7765_v52, 4  ;;  %v7770_v41 = vrot.slane %v7768_v37, 5  ;;  %9495 = vmatprep.mubr.bf16.mxu0 %v12148_v19  ;;  %v6784_v35 = vsel %vm13590_vm14, %v6779_v27, %v16769_v61  ;;  %v12660_v52 = vpop.f32.mrb[72].mxu0  ;;  %v13232_v7 = vld [vmem:[#allocation3 + $0xb4] sm:$0xff]  }
 0x396   : > { %v6794_v13 = vsel %vm13590_vm14, %v6789_v17, %v6793_v62  ;;  %v7762_v63 = vrot.slane %v7760_v53, 5  ;;  %v12101_v32 = vrot.slane %v6965_v20, 9  ;;  %9327 = vmatmul.mubr.bf16.gmra.mrb[112].mxu1 %v12083_v15  ;;  %v7758_v23 = vrot.slane %v7757_v8, 4  ;;  %v12661_v53 = vpop.f32.mrb[73].mxu0 }
 0x397   : > { %v7123_v29 = vsel %vm13496_vm11, %v7121_v9, %v7122_v21  ;;  %v16799_v59 = vrot.slane %v6805_v54, 5  ;;  %v6811_v56 = vrot.slane %v6809_v4, 4  ;;  %9334 = vmatprep.mubr.bf16.mxu1 %v12116_v30  ;;  %v6802_v19 = vor.u32 %v6801_v16, %v6798_v57  ;;  %v6969_v30 = vld [vmem:[#allocation3 + $0xc4] sm:$0xf] }
 0x398   : > { %v6815_v3 = vshll.u32 %v6455_v47, 16  ;;  %v16801_v25 = vrot.slane %v7774_v0, 5  ;;  %v7780_v61 = vrot.slane %v7778_v38, 4  ;;  %v12084_v50 = vcombine.low %v6784_v35, %v6794_v13  ;;  %v6457_v54 = vld [vmem:[#allocation3 + $0xc4] sm:$0xf] }
 0x399   : > { %v7753_v15 = vsel %vm13590_vm14, %v7748_v58, %v16788_v18  ;;  %v7771_v28 = vor.u32 %v7770_v41, %v7767_v45  ;;  %v7763_v37 = vsel %vm13590_vm14, %v7758_v23, %v7762_v63  ;;  %v7120_v27 = vsel %vm13496_vm11, %v12101_v32, %v7119_v46  ;;  %v12663_v18 = vpop.f32.mrb[74].mxu0  ;;  %v6970_v58 = vld [vmem:[#allocation3 + $0xc8] sm:$0x1] }
 0x39a   : > { %v6820_v17 = vshrl.u32 %v6456_v34, 16  ;;  %v6823_v62 = vshll.u32 %v6456_v34, 16  ;;  %v12117_v8 = vcombine.low %v7120_v27, %v7123_v29  ;;  %v6812_v20 = vor.u32 %v6811_v56, %v16799_v59  ;;  %v12664_v9 = vpop.f32.mrb[75].mxu0  ;;  %v6968_v56 = vld [vmem:[#allocation3 + $0xc0] sm:$0xe] }
 0x39b   : > { %v7784_v21 = vshll.u32 %v7403_v1, 16  ;;  %v12662_v4 = vadd.f32 %v12661_v53, %v12660_v52  ;;  %v12149_v57 = vcombine.low %v7753_v15, %v7763_v37  ;;  %v6803_v16 = vrot.slane %v6802_v19, 4  ;;  %v7870_v1 = vld [vmem:[#allocation3 + $0x20] sm:$0x1]  ;;  %v6458_v52 = vld [vmem:[#allocation3 + $0xc8] sm:$0x1] }
 0x39c   : > { %v6817_v0 = vrot.slane %v6815_v3, 5  ;;  %v7781_v38 = vor.u32 %v7780_v61, %v16801_v25  ;;  %9496 = vmatmul.mubr.bf16.gmra.mrb[148].mxu0 %v13232_v7  ;;  %v7772_v46 = vrot.slane %v7771_v28, 4  ;;  %v7126_v47 = vrot.slane %v6969_v30, 5  ;;  %v7869_v3 = vld [vmem:[#allocation3 + $0x1c] sm:$0xf]  ;;  %v12666_v37 = vpop.f32.mrb[76].mxu0 }
 0x39d   : > { %v16813_v45 = vadd.f32 %v12662_v4, %v16731_v2  ;;  %v12665_v41 = vadd.f32 %v12664_v9, %v12663_v18  ;;  %9503 = vmatprep.mubr.bf16.mxu0 %v12149_v57  ;;  %v6822_v35 = vrot.slane %v6820_v17, 4  ;;  %v6825_v13 = vrot.slane %v6823_v62, 5  ;;  %v16828_v62 = vld [vmem:[#allocation3 + $0x34] sm:$0xf]  ;;  %v13234_v53 = vld [vmem:[#allocation3 + $0xc0] sm:$0xff]  }
 0x39e   : > { %v6829_v63 = vshll.u32 %v6457_v54, 16  ;;  %v6833_v32 = vshrl.u32 %v6457_v54, 16  ;;  %9335 = vmatmul.mubr.bf16.gmra.mrb[116].mxu1 %v12084_v50  ;;  %v6813_v23 = vrot.slane %v6812_v20, 4  ;;  %v7786_v29 = vrot.slane %v7784_v21, 5  ;;  %v12554_v20 = vpop.f32.mrb[44].mxu1 }
 0x39f   : > { %v7129_v34 = vrot.slane %v6970_v58, 5  ;;  %v16816_v19 = vadd.f32 %v12665_v41, %v16735_v39  ;;  %9342 = vmatprep.mubr.bf16.mxu1 %v12117_v8  ;;  %v6808_v2 = vsel %vm13590_vm14, %v6803_v16, %v16799_v59  ;;  %v7777_v50 = vsel %vm13590_vm14, %v7772_v46, %v16801_v25  ;;  %v12667_v59 = vpop.f32.mrb[77].mxu0 }
 0x3a0   : > { %v6818_v61 = vsel %vm13590_vm14, %v6813_v23, %v6817_v0  ;;  %v7782_v15 = vrot.slane %v7781_v38, 4  ;;  %v7128_v28 = vrot.slane %v7126_v47, 4  ;;  %v12102_v39 = vrot.slane %v6968_v56, 9  ;;  %v12669_v54 = vpop.f32.mrb[78].mxu0  ;;  %v7876_v0 = vld [vmem:[#allocation3 + $0x38] sm:$0x1] }
 0x3a1   : > { %v6826_v27 = vor.u32 %v6825_v13, %v6822_v35  ;;  %v16826_v30 = vrot.slane %v6829_v63, 5  ;;  %v6835_v17 = vrot.slane %v6833_v32, 4  ;;  %v7966_v25 = vrot.slane %v7869_v3, 5  ;;  %v12555_v38 = vpop.f32.mrb[45].mxu1  ;;  %v12670_v58 = vpop.f32.mrb[79].mxu0 }
 0x3a2   : > { %v7787_v7 = vsel %vm13590_vm14, %v7782_v15, %v7786_v29  ;;  %v7130_v8 = vsel %vm13496_vm11, %v7128_v28, %v7129_v34  ;;  %v12668_v21 = vadd.f32 %v12667_v59, %v12666_v37  ;;  %v12085_v4 = vcombine.low %v6808_v2, %v6818_v61  ;;  %v12557_v35 = vpop.f32.mrb[46].mxu1  ;;  %v7868_v29 = vld [vmem:[#allocation3 + $0x18] sm:$0xe]  ;;  %v7872_v2 = vld [vmem:[#allocation3 + $0x28] sm:$0xf] }
 0x3a3   : > { %v12150_v18 = vcombine.low %v7777_v50, %v7787_v7  ;;  %v7127_v57 = vsel %vm13496_vm11, %v12102_v39, %v7126_v47  ;;  %v6839_v16 = vshll.u32 %v6458_v52, 16  ;;  %v7969_v9 = vrot.slane %v7870_v1, 5  ;;  %v12558_v56 = vpop.f32.mrb[47].mxu1  ;;  %v7874_v50 = vld [vmem:[#allocation3 + $0x30] sm:$0xe] }
 0x3a4   : > { %9504 = vmatmul.mubr.bf16.gmra.mrb[152].mxu0 %v13234_v53  ;;  %v7980_v46 = vrot.slane %v16828_v62, 5  ;;  %v12556_v41 = vadd.f32 %v12555_v38, %v12554_v20  ;;  %v12671_v13 = vadd.f32 %v12670_v58, %v12669_v54  ;;  %v12118_v63 = vcombine.low %v7127_v57, %v7130_v8  ;;  %v7873_v37 = vld [vmem:[#allocation3 + $0x2c] sm:$0x1]  ;;  %v7878_v39 = vld [vmem:[#allocation3 + $0x40] sm:$0xf] }
 0x3a5   : > { %9511 = vmatprep.mubr.bf16.mxu0 %v12150_v18  ;;  %v6827_v32 = vrot.slane %v6826_v27, 4  ;;  %v6836_v23 = vor.u32 %v6835_v17, %v16826_v30  ;;  %v7968_v47 = vrot.slane %v7966_v25, 4  ;;  %v7983_v34 = vrot.slane %v7876_v0, 5  ;;  %v7881_v53 = vld [vmem:[#allocation3 + $0x4c] sm:$0xf] }
 0x3a6   : > { %9343 = vmatmul.mubr.bf16.gmra.mrb[120].mxu1 %v12085_v4  ;;  %v16838_v3 = vadd.f32 %v12668_v21, %v12556_v41  ;;  %v12559_v61 = vadd.f32 %v12558_v56, %v12557_v35  ;;  %v6841_v1 = vrot.slane %v6839_v16, 5  ;;  %v12151_v15 = vrot.slane %v7868_v29, 9  ;;  %v13235_v7 = vld [vmem:[#allocation3 + $0xcc] sm:$0xff]   ;;  %v7879_v54 = vld [vmem:[#allocation3 + $0x44] sm:$0x1]  ;;  %v12560_v4 = vpop.f32.mrb[48].mxu1 }
 0x3a7   : > { %9350 = vmatprep.mubr.bf16.mxu1 %v12118_v63  ;;  %v7970_v28 = vsel %vm13496_vm11, %v7968_v47, %v7969_v9  ;;  %v7982_v52 = vrot.slane %v7980_v46, 4  ;;  %v6832_v17 = vsel %vm13590_vm14, %v6827_v32, %v16826_v30  ;;  %v6837_v62 = vrot.slane %v6836_v23, 4  ;;  %v7882_v30 = vld [vmem:[#allocation3 + $0x50] sm:$0x1]  ;;  %v12561_v38 = vpop.f32.mrb[49].mxu1 }
 0x3a8   : > { %v16842_v27 = vadd.f32 %v12671_v13, %v12559_v61  ;;  %v7973_v59 = vrot.slane %v7872_v2, 5  ;;  %v7967_v8 = vsel %vm13496_vm11, %v12151_v15, %v7966_v25  ;;  %v12153_v20 = vrot.slane %v7874_v50, 9  ;;  %v7871_v25 = vld [vmem:[#allocation3 + $0x24] sm:$0xe]  ;;  %v12563_v13 = vpop.f32.mrb[50].mxu1 }
 0x3a9   : > { %v7984_v21 = vsel %vm13496_vm11, %v7982_v52, %v7983_v34  ;;  %v6842_v18 = vsel %vm13590_vm14, %v6837_v62, %v6841_v1  ;;  %v12167_v57 = vcombine.low %v7967_v8, %v7970_v28  ;;  %v7976_v16 = vrot.slane %v7873_v37, 5  ;;  %v12564_v23 = vpop.f32.mrb[51].mxu1  ;;  %v7877_v29 = vld [vmem:[#allocation3 + $0x3c] sm:$0xe]  ;;  %v7880_v61 = vld [vmem:[#allocation3 + $0x48] sm:$0xe] }
 0x3aa   : > { %v7987_v0 = vrot.slane %v7878_v39, 5  ;;  %v12086_v58 = vcombine.low %v6832_v17, %v6842_v18  ;;  %v7981_v9 = vsel %vm13496_vm11, %v12153_v20, %v7980_v46  ;;  %v7994_v41 = vrot.slane %v7881_v53, 5  ;;  %v7884_v50 = vld [vmem:[#allocation3 + $0x58] sm:$0xf]  ;;  %v7887_v37 = vld [vmem:[#allocation3 + $0x64] sm:$0xf] }
 0x3ab   : > { %v16855_v35 = vadd.f32 %v12561_v38, %v12560_v4  ;;  %v12169_v63 = vcombine.low %v7981_v9, %v7984_v21  ;;  %v7975_v32 = vrot.slane %v7973_v59, 4  ;;  %v7990_v60 = vrot.slane %v7879_v54, 5  ;;  %v7885_v53 = vld [vmem:[#allocation3 + $0x5c] sm:$0x1]  ;;  %v7888_v20 = vld [vmem:[#allocation3 + $0x68] sm:$0x1] }
 0x3ac   : > { %9512 = vmatmul.mubr.bf16.gmra.mrb[156].mxu0 %v13235_v7  ;;  %v7997_v56 = vrot.slane %v7882_v30, 5  ;;  %v16857_v47 = vadd.f32 %v12564_v23, %v12563_v13  ;;  %v12152_v34 = vrot.slane %v7871_v25, 9  ;;  %v7989_v2 = vrot.slane %v7987_v0, 4  ;;  %v7886_v38 = vld [vmem:[#allocation3 + $0x60] sm:$0xe] }
 0x3ad   : > { %12998 = vmatprep.mubr.bf16.mxu0 %v12167_v57  ;;  %v7977_v46 = vsel %vm13496_vm11, %v7975_v32, %v7976_v16  ;;  %v7996_v1 = vrot.slane %v7994_v41, 4  ;;  %v12154_v28 = vrot.slane %v7877_v29, 9  ;;  %v12155_v17 = vrot.slane %v7880_v61, 9  ;;  %v7883_v57 = vld [vmem:[#allocation3 + $0x54] sm:$0xe] }
 0x3ae   : > { %9351 = vmatmul.mubr.bf16.gmra.mrb[124].mxu1 %v12086_v58  ;;  %v7974_v15 = vsel %vm13496_vm11, %v12152_v34, %v7973_v59  ;;  %v7991_v52 = vsel %vm13496_vm11, %v7989_v2, %v7990_v60  ;;  %v8001_v8 = vrot.slane %v7884_v50, 5  ;;  %v8008_v54 = vrot.slane %v7887_v37, 5  ;;  %v7890_v9 = vld [vmem:[#allocation3 + $0x70] sm:$0xf]  ;;  %v7893_v13 = vld [vmem:[#allocation3 + $0x7c] sm:$0xf] }
 0x3af   : > { %13002 = vmatprep.mubr.bf16.mxu1 %v12169_v63  ;;  %v12168_v39 = vcombine.low %v7974_v15, %v7977_v46  ;;  %v7998_v62 = vsel %vm13496_vm11, %v7996_v1, %v7997_v56  ;;  %v7988_v7 = vsel %vm13496_vm11, %v12154_v28, %v7987_v0  ;;  %v7995_v59 = vsel %vm13496_vm11, %v12155_v17, %v7994_v41  ;;  %v7891_v32 = vld [vmem:[#allocation3 + $0x74] sm:$0x1]  ;;  %v7894_v29 = vld [vmem:[#allocation3 + $0x80] sm:$0x1]  ;;  %v7889_v1 = vld [vmem:[#allocation3 + $0x6c] sm:$0xe] }
 0x3b0   : > { %v12170_v21 = vcombine.low %v7988_v7, %v7991_v52  ;;  %v12171_v4 = vcombine.low %v7995_v59, %v7998_v62  ;;  %v8004_v18 = vrot.slane %v7885_v53, 5  ;;  %v8011_v16 = vrot.slane %v7888_v20, 5  ;;  %v7892_v28 = vld [vmem:[#allocation3 + $0x78] sm:$0xe]  ;;  %v7896_v37 = vld [vmem:[#allocation3 + $0x88] sm:$0xf] }
 0x3b1   : > { %v8003_v30 = vrot.slane %v8001_v8, 4  ;;  %v8010_v58 = vrot.slane %v8008_v54, 4  ;;  %v12156_v25 = vrot.slane %v7883_v57, 9  ;;  %v12157_v63 = vrot.slane %v7886_v38, 9  ;;  %v7899_v62 = vld [vmem:[#allocation3 + $0x94] sm:$0xf] }
 0x3b2   : > { %v8015_v23 = vrot.slane %v7890_v9, 5  ;;  %v8022_v46 = vrot.slane %v7893_v13, 5  ;;  %v8018_v61 = vrot.slane %v7891_v32, 5  ;;  %v8025_v50 = vrot.slane %v7894_v29, 5  ;;  %v7900_v59 = vld [vmem:[#allocation3 + $0x98] sm:$0x1] }
 0x3b3   : > { %v8005_v0 = vsel %vm13496_vm11, %v8003_v30, %v8004_v18  ;;  %v8012_v41 = vsel %vm13496_vm11, %v8010_v58, %v8011_v16  ;;  %v8002_v60 = vsel %vm13496_vm11, %v12156_v25, %v8001_v8  ;;  %v8009_v34 = vsel %vm13496_vm11, %v12157_v63, %v8008_v54  ;;  %v7897_v8 = vld [vmem:[#allocation3 + $0x8c] sm:$0x1]  ;;  %v7895_v30 = vld [vmem:[#allocation3 + $0x84] sm:$0xe]  ;;  %v7898_v38 = vld [vmem:[#allocation3 + $0x90] sm:$0xe] }
 0x3b4   : > { %12999 = vmatmul.mubr.bf16.vlgmr.msra.gmra.mrb[160].mxu0 %v12168_v39  ;;  %v12172_v56 = vcombine.low %v8002_v60, %v8005_v0  ;;  %v12173_v2 = vcombine.low %v8009_v34, %v8012_v41  ;;  %v8017_v15 = vrot.slane %v8015_v23, 4  ;;  %v8024_v52 = vrot.slane %v8022_v46, 4  ;;  %v7902_v0 = vld [vmem:[#allocation3 + $0xa0] sm:$0xf]  ;;  %v7905_v60 = vld [vmem:[#allocation3 + $0xac] sm:$0xf] }
 0x3b5   : > { %v12158_v39 = vrot.slane %v7889_v1, 9  ;;  %v12159_v53 = vrot.slane %v7892_v28, 9  ;;  %v8036_v18 = vrot.slane %v7899_v62, 5  ;;  %v8032_v16 = vrot.slane %v7897_v8, 5 }
 0x3b6   : > { %13003 = vmatmul.mubr.bf16.vlgmr.msra.gmra.mrb[128].mxu1 %v12170_v21  ;;  %v8019_v17 = vsel %vm13496_vm11, %v8017_v15, %v8018_v61  ;;  %v8026_v7 = vsel %vm13496_vm11, %v8024_v52, %v8025_v50  ;;  %v8029_v21 = vrot.slane %v7896_v37, 5  ;;  %v8039_v58 = vrot.slane %v7900_v59, 5  ;;  %v7906_v50 = vld [vmem:[#allocation3 + $0xb0] sm:$0x1] }
 0x3b7   : > { %13006 = vmatprep.mubr.bf16.mxu1 %v12171_v4  ;;  %v8016_v20 = vsel %vm13496_vm11, %v12158_v39, %v8015_v23  ;;  %v8023_v4 = vsel %vm13496_vm11, %v12159_v53, %v8022_v46  ;;  %v8038_v25 = vrot.slane %v8036_v18, 4  ;;  %v12160_v63 = vrot.slane %v7895_v30, 9  ;;  %v7901_v53 = vld [vmem:[#allocation3 + $0x9c] sm:$0xe] }
 0x3b8   : > { %v12174_v54 = vcombine.low %v8016_v20, %v8019_v17  ;;  %v12175_v57 = vcombine.low %v8023_v4, %v8026_v7  ;;  %v8031_v9 = vrot.slane %v8029_v21, 4  ;;  %v12161_v32 = vrot.slane %v7898_v38, 9  ;;  %v7904_v7 = vld [vmem:[#allocation3 + $0xa8] sm:$0xe] }
 0x3b9   : > { %v8040_v29 = vsel %vm13496_vm11, %v8038_v25, %v8039_v58  ;;  %v8043_v1 = vrot.slane %v7902_v0, 5  ;;  %v8050_v52 = vrot.slane %v7905_v60, 5  ;;  %v8053_v8 = vrot.slane %v7906_v50, 5  ;;  %v7909_v58 = vld [vmem:[#allocation3 + $0xbc] sm:$0x1] }
 0x3ba   : > { %v8033_v41 = vsel %vm13496_vm11, %v8031_v9, %v8032_v16  ;;  %v8037_v61 = vsel %vm13496_vm11, %v12161_v32, %v8036_v18  ;;  %v12162_v18 = vrot.slane %v7901_v53, 9  ;;  %v7911_v16 = vld [vmem:[#allocation3 + $0xc4] sm:$0xf]  ;;  %vm11459_vm4 = vcmask 1042434  }
 0x3bb   : > { %v12177_v17 = vcombine.low %v8037_v61, %v8040_v29  ;;  %v8052_v59 = vrot.slane %v8050_v52, 4  ;;  %v8064_v29 = vrot.slane %v7911_v16, 5  ;;  %v8060_v61 = vrot.slane %v7909_v58, 5 }
 0x3bc   : > { %v8044_v0 = vsel %vm13496_vm11, %v12162_v18, %v8043_v1  ;;  %vm11463_vm14 = vcmask 1044484   ;;  %vm11560_vm0 = vcmask 523264  }
 0x3bd   : > { %v8054_v38 = vsel %vm13496_vm11, %v8052_v59, %v8053_v8 }
 0x3be   : > { %13007 = vmatmul.mubr.bf16.gmra.mrb[132].mxu1 %v12172_v56  ;;  %v7903_v56 = vld [vmem:[#allocation3 + $0xa4] sm:$0x1] }
 0x3bf   : > { %13010 = vmatprep.mubr.bf16.mxu1 %v12173_v2  ;;  %v8030_v2 = vsel %vm13496_vm11, %v12160_v63, %v8029_v21  ;;  %v8046_v62 = vrot.slane %v7903_v56, 5  ;;  %v8045_v21 = vrot.slane %v8043_v1, 4 }
 0x3c0   : > { %v12176_v28 = vcombine.low %v8030_v2, %v8033_v41  ;;  %v7912_v41 = vld [vmem:[#allocation3 + $0xc8] sm:$0x1] }
 0x3c3   : > { %v12672_v13 = vpop.f32.mrb[80].mxu0 }
 0x3c4   : > { %v12673_v23 = vpop.f32.mrb[81].mxu0 }
 0x3c5   : > { %v12674_v34 = vadd.f32 %v12673_v23, %v12672_v13  ;;  %v12675_v46 = vpop.f32.mrb[82].mxu0 }
 0x3c6   : > { %13011 = vmatmul.mubr.bf16.gmra.mrb[136].mxu1 %v12174_v54  ;;  %v12676_v15 = vpop.f32.mrb[83].mxu0  ;;  %v7908_v54 = vld [vmem:[#allocation3 + $0xb8] sm:$0xf] }
 0x3c7   : > { %13014 = vmatprep.mubr.bf16.mxu1 %v12175_v57  ;;  %v16896_v37 = vadd.f32 %v12674_v34, %v16855_v35  ;;  %v12677_v39 = vadd.f32 %v12676_v15, %v12675_v46  ;;  %v8047_v35 = vsel %vm13496_vm11, %v8045_v21, %v8046_v62  ;;  %v12163_v57 = vrot.slane %v7904_v7, 9  ;;  %v7907_v15 = vld [vmem:[#allocation3 + $0xb4] sm:$0xe]  ;;  %v7914_v7 = vld [vmem:[#allocation3 + $0xd0] sm:$0xf] }
 0x3c8   : > { %v8057_v63 = vrot.slane %v7908_v54, 5  ;;  %v12178_v23 = vcombine.low %v8044_v0, %v8047_v35  ;;  %v8066_v62 = vrot.slane %v8064_v29, 4  ;;  %v12164_v8 = vrot.slane %v7907_v15, 9 }
 0x3c9   : > { %v16899_v20 = vadd.f32 %v12677_v39, %v16857_v47  ;;  %v8051_v13 = vsel %vm13496_vm11, %v12163_v57, %v8050_v52  ;;  %v8071_v57 = vrot.slane %v7914_v7, 5 }
 0x3ca   : > { %v12179_v2 = vcombine.low %v8051_v13, %v8054_v38  ;;  %v8059_v52 = vrot.slane %v8057_v63, 4  ;;  %v8058_v35 = vsel %vm13496_vm11, %v12164_v8, %v8057_v63  ;;  %v7913_v13 = vld [vmem:[#allocation3 + $0xcc] sm:$0xe] }
 0x3cb   : > { %v12678_v4 = vpop.f32.mrb[84].mxu0 }
 0x3cc   : > { %v12679_v30 = vpop.f32.mrb[85].mxu0  ;;  %v8061_v21 = vsel %vm13496_vm11, %v8059_v52, %v8060_v61 }
 0x3cd   : > { %v12680_v25 = vadd.f32 %v12679_v30, %v12678_v4  ;;  %v12681_v47 = vpop.f32.mrb[86].mxu0  ;;  %v7915_v4 = vld [vmem:[#allocation3 + $0xd4] sm:$0x1]  ;;  %v12180_v30 = vcombine.low %v8058_v35, %v8061_v21 }
 0x3ce   : > { %13015 = vmatmul.mubr.bf16.gmra.mrb[140].mxu1 %v12176_v28  ;;  %v12682_v60 = vpop.f32.mrb[87].mxu0  ;;  %v8067_v28 = vrot.slane %v7912_v41, 5 }
 0x3cf   : > { %13018 = vmatprep.mubr.bf16.mxu1 %v12177_v17  ;;  %v12566_v9 = vpop.f32.mrb[52].mxu1  ;;  %v12683_v46 = vadd.f32 %v12682_v60, %v12681_v47  ;;  %v7910_v17 = vld [vmem:[#allocation3 + $0xc0] sm:$0xe]  ;;  %v8074_v47 = vrot.slane %v7915_v4, 5  ;;  %v12166_v60 = vrot.slane %v7913_v13, 9 }
 0x3d0   : > { %v12567_v32 = vpop.f32.mrb[53].mxu1  ;;  %v12165_v59 = vrot.slane %v7910_v17, 9  ;;  %v8068_v54 = vsel %vm13496_vm11, %v8066_v62, %v8067_v28 }
 0x3d1   : > { %v12568_v56 = vadd.f32 %v12567_v32, %v12566_v9  ;;  %v12569_v34 = vpop.f32.mrb[54].mxu1  ;;  %v8073_v32 = vrot.slane %v8071_v57, 4 }
 0x3d2   : > { %v12570_v50 = vpop.f32.mrb[55].mxu1  ;;  %v8065_v38 = vsel %vm13496_vm11, %v12165_v59, %v8064_v29 }
 0x3d3   : > { %v16909_v39 = vadd.f32 %v12680_v25, %v12568_v56  ;;  %v12571_v1 = vadd.f32 %v12570_v50, %v12569_v34  ;;  %v12181_v25 = vcombine.low %v8065_v38, %v8068_v54  ;;  %v8075_v63 = vsel %vm13496_vm11, %v8073_v32, %v8074_v47 }
 0x3d5   : > { %v16911_v53 = vadd.f32 %v12683_v46, %v12571_v1 }
 0x3d6   : > { %13019 = vmatmul.mubr.bf16.gmra.mrb[144].mxu1 %v12178_v23  ;;  %v8072_v23 = vsel %vm13496_vm11, %v12166_v60, %v8071_v57  ;;  %vm11461_vm11 = vcmask 1043459  }
 0x3d7   : > { %13022 = vmatprep.mubr.bf16.mxu1 %v12179_v2  ;;  %v12572_v18 = vpop.f32.mrb[56].mxu1  ;;  %v12182_v56 = vcombine.low %v8072_v23, %v8075_v63 }
 0x3d8   : > { %v12573_v16 = vpop.f32.mrb[57].mxu1 }
 0x3d9   : > { %v12574_v58 = vadd.f32 %v12573_v16, %v12572_v18  ;;  %v12575_v9 = vpop.f32.mrb[58].mxu1 }
 0x3da   : > { %v12576_v0 = vpop.f32.mrb[59].mxu1 }
 0x3db   : > { %v12577_v41 = vadd.f32 %v12576_v0, %v12575_v9 }
 0x3de   : > { %13023 = vmatmul.mubr.bf16.gmra.mrb[148].mxu1 %v12180_v30 }
 0x3df   : > { %13026 = vmatprep.mubr.bf16.mxu1 %v12181_v25 }
 0x3e6   : > { %13027 = vmatmul.mubr.bf16.gmra.mrb[152].mxu1 %v12182_v56 }
 0x3f6   : > { %v12684_v29 = vpop.f32.mrb[88].mxu0 }
 0x3f7   : > { %v12685_v34 = vpop.f32.mrb[89].mxu0 }
 0x3f8   : > { %v12686_v46 = vadd.f32 %v12685_v34, %v12684_v29  ;;  %v12687_v2 = vpop.f32.mrb[90].mxu0 }
 0x3f9   : > { %v12688_v61 = vpop.f32.mrb[91].mxu0 }
 0x3fa   : > { %v16925_v50 = vadd.f32 %v12686_v46, %v12574_v58  ;;  %v12689_v15 = vadd.f32 %v12688_v61, %v12687_v2 }
 0x3fc   : > { %v16927_v28 = vadd.f32 %v12689_v15, %v12577_v41 }
 0x3ff   : > { %v12690_v1 = vpop.f32.mrb[92].mxu0 }
 0x400   : > { %v12691_v52 = vpop.f32.mrb[93].mxu0 }
 0x401   : > { %v12578_v17 = vpop.f32.mrb[60].mxu1  ;;  %v12692_v62 = vadd.f32 %v12691_v52, %v12690_v1  ;;  %v12693_v7 = vpop.f32.mrb[94].mxu0 }
 0x402   : > { %v12579_v8 = vpop.f32.mrb[61].mxu1  ;;  %v12694_v14 = vpop.f32.mrb[95].mxu0 }
 0x403   : > { %v12580_v21 = vadd.f32 %v12579_v8, %v12578_v17  ;;  %v12581_v59 = vpop.f32.mrb[62].mxu1  ;;  %v12695_v54 = vadd.f32 %v12694_v14, %v12693_v7 }
 0x404   : > { %v12582_v4 = vpop.f32.mrb[63].mxu1 }
 0x405   : > { %v16929_v18 = vadd.f32 %v12692_v62, %v12580_v21  ;;  %v12583_v35 = vadd.f32 %v12582_v4, %v12581_v59 }
 0x407   : > { %v16931_v57 = vadd.f32 %v12695_v54, %v12583_v35  ;;  %v12824_v16 = vpop.f32.mrb[96].mxu0 }
 0x408   : > { %v12825_v30 = vpop.f32.mrb[97].mxu0 }
 0x409   : > { %v12712_v38 = vpop.f32.mrb[64].mxu1  ;;  %v12826_v58 = vadd.f32 %v12825_v30, %v12824_v16  ;;  %v12827_v9 = vpop.f32.mrb[98].mxu0 }
 0x40a   : > { %v12713_v25 = vpop.f32.mrb[65].mxu1  ;;  %v12828_v47 = vpop.f32.mrb[99].mxu0 }
 0x40b   : > { %v12714_v0 = vadd.f32 %v12713_v25, %v12712_v38  ;;  %v12715_v13 = vpop.f32.mrb[66].mxu1  ;;  %v12829_v41 = vadd.f32 %v12828_v47, %v12827_v9 }
 0x40c   : > { %v12716_v32 = vpop.f32.mrb[67].mxu1 }
 0x40d   : > { %v9233_v60 = vadd.f32 %v12714_v0, %v16138_v33  ;;  %v12717_v63 = vadd.f32 %v12716_v32, %v12715_v13 }
 0x40f   : > { %v9236_v23 = vadd.f32 %v12717_v63, %v16141_v11  ;;  %v12830_v56 = vpop.f32.mrb[100].mxu0  ;;  %v16935_v29 = vadd.f32 %v12826_v58, %v9233_v60 }
 0x410   : > { %v12831_v34 = vpop.f32.mrb[101].mxu0 }
 0x411   : > { %v12718_v46 = vpop.f32.mrb[68].mxu1  ;;  %v12832_v2 = vadd.f32 %v12831_v34, %v12830_v56  ;;  %v12833_v61 = vpop.f32.mrb[102].mxu0  ;;  %v16937_v15 = vadd.f32 %v12829_v41, %v9236_v23 }
 0x412   : > { %v12719_v1 = vpop.f32.mrb[69].mxu1  ;;  %v12834_v52 = vpop.f32.mrb[103].mxu0 }
 0x413   : > { %v12720_v17 = vadd.f32 %v12719_v1, %v12718_v46  ;;  %v12721_v62 = vpop.f32.mrb[70].mxu1  ;;  %v12835_v7 = vadd.f32 %v12834_v52, %v12833_v61 }
 0x414   : > { %v12722_v8 = vpop.f32.mrb[71].mxu1 }
 0x415   : > { %v9241_v33 = vadd.f32 %v12720_v17, %v16159_v22  ;;  %v12723_v14 = vadd.f32 %v12722_v8, %v12721_v62 }
 0x417   : > { %v9244_v11 = vadd.f32 %v12723_v14, %v16167_v49  ;;  %v12836_v21 = vpop.f32.mrb[104].mxu0  ;;  %v16941_v59 = vadd.f32 %v12832_v2, %v9241_v33 }
 0x418   : > { %v12837_v54 = vpop.f32.mrb[105].mxu0 }
 0x419   : > { %v12724_v4 = vpop.f32.mrb[72].mxu1  ;;  %v12838_v35 = vadd.f32 %v12837_v54, %v12836_v21  ;;  %v12839_v16 = vpop.f32.mrb[106].mxu0  ;;  %v16943_v30 = vadd.f32 %v12835_v7, %v9244_v11 }
 0x41a   : > { %v12725_v38 = vpop.f32.mrb[73].mxu1  ;;  %v12840_v58 = vpop.f32.mrb[107].mxu0 }
 0x41b   : > { %v12726_v9 = vadd.f32 %v12725_v38, %v12724_v4  ;;  %v12727_v25 = vpop.f32.mrb[74].mxu1  ;;  %v12841_v47 = vadd.f32 %v12840_v58, %v12839_v16 }
 0x41c   : > { %v12728_v0 = vpop.f32.mrb[75].mxu1 }
 0x41d   : > { %v9249_v22 = vadd.f32 %v12726_v9, %v16253_v24  ;;  %v12729_v13 = vadd.f32 %v12728_v0, %v12727_v25 }
 0x41f   : > { %v9252_v49 = vadd.f32 %v12729_v13, %v16267_v26  ;;  %v12842_v41 = vpop.f32.mrb[108].mxu0  ;;  %v16947_v32 = vadd.f32 %v12838_v35, %v9249_v22 }
 0x420   : > { %v12843_v60 = vpop.f32.mrb[109].mxu0 }
 0x421   : > { %v12730_v63 = vpop.f32.mrb[76].mxu1  ;;  %v12844_v23 = vadd.f32 %v12843_v60, %v12842_v41  ;;  %v12845_v56 = vpop.f32.mrb[110].mxu0  ;;  %v16949_v34 = vadd.f32 %v12841_v47, %v9252_v49 }
 0x422   : > { %v12731_v46 = vpop.f32.mrb[77].mxu1  ;;  %v12846_v2 = vpop.f32.mrb[111].mxu0 }
 0x423   : > { %v12732_v61 = vadd.f32 %v12731_v46, %v12730_v63  ;;  %v12733_v1 = vpop.f32.mrb[78].mxu1  ;;  %v12847_v52 = vadd.f32 %v12846_v2, %v12845_v56 }
 0x424   : > { %v12734_v17 = vpop.f32.mrb[79].mxu1 }
 0x425   : > { %v9257_v24 = vadd.f32 %v12732_v61, %v16294_v48  ;;  %v12735_v62 = vadd.f32 %v12734_v17, %v12733_v1 }
 0x427   : > { %v9260_v26 = vadd.f32 %v12735_v62, %v16303_v10  ;;  %v12848_v7 = vpop.f32.mrb[112].mxu0  ;;  %v16953_v8 = vadd.f32 %v12844_v23, %v9257_v24 }
 0x428   : > { %v12849_v33 = vpop.f32.mrb[113].mxu0 }
 0x429   : > { %v12736_v14 = vpop.f32.mrb[80].mxu1  ;;  %v12850_v11 = vadd.f32 %v12849_v33, %v12848_v7  ;;  %v12851_v21 = vpop.f32.mrb[114].mxu0  ;;  %v16955_v54 = vadd.f32 %v12847_v52, %v9260_v26 }
 0x42a   : > { %v12737_v4 = vpop.f32.mrb[81].mxu1  ;;  %v12852_v35 = vpop.f32.mrb[115].mxu0 }
 0x42b   : > { %v12738_v16 = vadd.f32 %v12737_v4, %v12736_v14  ;;  %v12739_v38 = vpop.f32.mrb[82].mxu1  ;;  %v12853_v58 = vadd.f32 %v12852_v35, %v12851_v21 }
 0x42c   : > { %v12740_v9 = vpop.f32.mrb[83].mxu1 }
 0x42d   : > { %v9265_v48 = vadd.f32 %v12738_v16, %v16323_v36  ;;  %v12741_v25 = vadd.f32 %v12740_v9, %v12739_v38 }
 0x42f   : > { %v9268_v10 = vadd.f32 %v12741_v25, %v16335_v51  ;;  %v12854_v47 = vpop.f32.mrb[116].mxu0  ;;  %v16959_v0 = vadd.f32 %v12850_v11, %v9265_v48 }
 0x430   : > { %v12855_v22 = vpop.f32.mrb[117].mxu0 }
 0x431   : > { %v12742_v13 = vpop.f32.mrb[84].mxu1  ;;  %v12856_v49 = vadd.f32 %v12855_v22, %v12854_v47  ;;  %v12857_v41 = vpop.f32.mrb[118].mxu0  ;;  %v16961_v60 = vadd.f32 %v12853_v58, %v9268_v10  ;;  %v18014_v58 = vld [vmem:[#allocation6_spill] sm:$0xff] }
 0x432   : > { %v12743_v63 = vpop.f32.mrb[85].mxu1  ;;  %v12858_v23 = vpop.f32.mrb[119].mxu0 }
 0x433   : > { %v12744_v56 = vadd.f32 %v12743_v63, %v12742_v13  ;;  %v12745_v46 = vpop.f32.mrb[86].mxu1  ;;  %v12859_v2 = vadd.f32 %v12858_v23, %v12857_v41 }
 0x434   : > { %v12746_v61 = vpop.f32.mrb[87].mxu1 }
 0x435   : > { %v9273_v36 = vadd.f32 %v12744_v56, %v16364_v44  ;;  %v12747_v1 = vadd.f32 %v12746_v61, %v12745_v46 }
 0x437   : > { %v9276_v51 = vadd.f32 %v12747_v1, %v16394_v55  ;;  %v12860_v52 = vpop.f32.mrb[120].mxu0  ;;  %v16965_v17 = vadd.f32 %v12856_v49, %v9273_v36 }
 0x438   : > { %v12861_v24 = vpop.f32.mrb[121].mxu0 }
 0x439   : > { %v12748_v62 = vpop.f32.mrb[88].mxu1  ;;  %v12862_v26 = vadd.f32 %v12861_v24, %v12860_v52  ;;  %v12863_v7 = vpop.f32.mrb[122].mxu0  ;;  %v16967_v33 = vadd.f32 %v12859_v2, %v9276_v51 }
 0x43a   : > { %v12749_v14 = vpop.f32.mrb[89].mxu1  ;;  %v12864_v11 = vpop.f32.mrb[123].mxu0 }
 0x43b   : > { %v12750_v21 = vadd.f32 %v12749_v14, %v12748_v62  ;;  %v12751_v4 = vpop.f32.mrb[90].mxu1  ;;  %v12865_v35 = vadd.f32 %v12864_v11, %v12863_v7 }
 0x43c   : > { %v12752_v16 = vpop.f32.mrb[91].mxu1 }
 0x43d   : > { %v9281_v44 = vadd.f32 %v12750_v21, %v16424_v31  ;;  %v12753_v38 = vadd.f32 %v12752_v16, %v12751_v4 }
 0x43f   : > { %v9284_v55 = vadd.f32 %v12753_v38, %v18014_v58  ;;  %v12866_v9 = vpop.f32.mrb[124].mxu0  ;;  %v16971_v48 = vadd.f32 %v12862_v26, %v9281_v44 }
 0x440   : > { %v12867_v25 = vpop.f32.mrb[125].mxu0 }
 0x441   : > { %v12754_v10 = vpop.f32.mrb[92].mxu1  ;;  %v12868_v47 = vadd.f32 %v12867_v25, %v12866_v9  ;;  %v12869_v22 = vpop.f32.mrb[126].mxu0  ;;  %v16973_v13 = vadd.f32 %v12865_v35, %v9284_v55 }
 0x442   : > { %v12755_v49 = vpop.f32.mrb[93].mxu1  ;;  %v12870_v41 = vpop.f32.mrb[127].mxu0 }
 0x443   : > { %v12756_v63 = vadd.f32 %v12755_v49, %v12754_v10  ;;  %v12757_v23 = vpop.f32.mrb[94].mxu1  ;;  %v12871_v56 = vadd.f32 %v12870_v41, %v12869_v22 }
 0x444   : > { %v12758_v46 = vpop.f32.mrb[95].mxu1 }
 0x445   : > { %v9289_v31 = vadd.f32 %v12756_v63, %v16485_v12  ;;  %v12759_v2 = vadd.f32 %v12758_v46, %v12757_v23 }
 0x447   : > { %v9292_v61 = vadd.f32 %v12759_v2, %v16500_v6  ;;  %v12872_v36 = vpop.f32.mrb[128].mxu0  ;;  %v16977_v1 = vadd.f32 %v12868_v47, %v9289_v31 }
 0x448   : > { %v12873_v51 = vpop.f32.mrb[129].mxu0 }
 0x449   : > { %v12760_v52 = vpop.f32.mrb[96].mxu1  ;;  %v12874_v24 = vadd.f32 %v12873_v51, %v12872_v36  ;;  %v12875_v62 = vpop.f32.mrb[130].mxu0  ;;  %v16979_v26 = vadd.f32 %v12871_v56, %v9292_v61 }
 0x44a   : > { %v12761_v7 = vpop.f32.mrb[97].mxu1  ;;  %v12876_v14 = vpop.f32.mrb[131].mxu0 }
 0x44b   : > { %v12762_v11 = vadd.f32 %v12761_v7, %v12760_v52  ;;  %v12763_v21 = vpop.f32.mrb[98].mxu1  ;;  %v12877_v4 = vadd.f32 %v12876_v14, %v12875_v62 }
 0x44c   : > { %v12764_v35 = vpop.f32.mrb[99].mxu1 }
 0x44d   : > { %v9297_v12 = vadd.f32 %v12762_v11, %v16648_v43  ;;  %v12765_v16 = vadd.f32 %v12764_v35, %v12763_v21 }
 0x44f   : > { %v9300_v6 = vadd.f32 %v12765_v16, %v16663_v40  ;;  %v12878_v44 = vpop.f32.mrb[132].mxu0  ;;  %v16983_v38 = vadd.f32 %v12874_v24, %v9297_v12 }
 0x450   : > { %v12879_v58 = vpop.f32.mrb[133].mxu0 }
 0x451   : > { %v12766_v55 = vpop.f32.mrb[100].mxu1  ;;  %v12880_v9 = vadd.f32 %v12879_v58, %v12878_v44  ;;  %v12881_v25 = vpop.f32.mrb[134].mxu0  ;;  %v16985_v10 = vadd.f32 %v12877_v4, %v9300_v6 }
 0x452   : > { %v12767_v47 = vpop.f32.mrb[101].mxu1  ;;  %v12882_v22 = vpop.f32.mrb[135].mxu0 }
 0x453   : > { %v12768_v49 = vadd.f32 %v12767_v47, %v12766_v55  ;;  %v12769_v41 = vpop.f32.mrb[102].mxu1  ;;  %v12883_v63 = vadd.f32 %v12882_v22, %v12881_v25 }
 0x454   : > { %v12770_v23 = vpop.f32.mrb[103].mxu1 }
 0x455   : > { %v9305_v43 = vadd.f32 %v12768_v49, %v16694_v5  ;;  %v12771_v56 = vadd.f32 %v12770_v23, %v12769_v41 }
 0x457   : > { %v9308_v40 = vadd.f32 %v12771_v56, %v16708_v42  ;;  %v12884_v46 = vpop.f32.mrb[136].mxu0  ;;  %v16989_v31 = vadd.f32 %v12880_v9, %v9305_v43 }
 0x458   : > { %v12885_v2 = vpop.f32.mrb[137].mxu0 }
 0x459   : > { %v12772_v61 = vpop.f32.mrb[104].mxu1  ;;  %v12886_v36 = vadd.f32 %v12885_v2, %v12884_v46  ;;  %v12887_v51 = vpop.f32.mrb[138].mxu0  ;;  %v16991_v52 = vadd.f32 %v12883_v63, %v9308_v40 }
 0x45a   : > { %v12773_v24 = vpop.f32.mrb[105].mxu1  ;;  %v12888_v62 = vpop.f32.mrb[139].mxu0 }
 0x45b   : > { %v12774_v7 = vadd.f32 %v12773_v24, %v12772_v61  ;;  %v12775_v14 = vpop.f32.mrb[106].mxu1  ;;  %v12889_v11 = vadd.f32 %v12888_v62, %v12887_v51 }
 0x45c   : > { %v12776_v21 = vpop.f32.mrb[107].mxu1 }
 0x45d   : > { %v9313_v5 = vadd.f32 %v12774_v7, %v16813_v45  ;;  %v12777_v4 = vadd.f32 %v12776_v21, %v12775_v14 }
 0x45f   : > { %v9316_v42 = vadd.f32 %v12777_v4, %v16816_v19  ;;  %v12890_v35 = vpop.f32.mrb[140].mxu0  ;;  %v16995_v12 = vadd.f32 %v12886_v36, %v9313_v5 }
 0x460   : > { %v12891_v16 = vpop.f32.mrb[141].mxu0 }
 0x461   : > { %v12778_v6 = vpop.f32.mrb[108].mxu1  ;;  %v12892_v44 = vadd.f32 %v12891_v16, %v12890_v35  ;;  %v12893_v58 = vpop.f32.mrb[142].mxu0  ;;  %v16997_v55 = vadd.f32 %v12889_v11, %v9316_v42 }
 0x462   : > { %v12779_v9 = vpop.f32.mrb[109].mxu1  ;;  %v12894_v25 = vpop.f32.mrb[143].mxu0 }
 0x463   : > { %v12780_v47 = vadd.f32 %v12779_v9, %v12778_v6  ;;  %v12781_v22 = vpop.f32.mrb[110].mxu1  ;;  %v12895_v49 = vadd.f32 %v12894_v25, %v12893_v58 }
 0x464   : > { %v12782_v41 = vpop.f32.mrb[111].mxu1 }
 0x465   : > { %v9321_v45 = vadd.f32 %v12780_v47, %v16838_v3  ;;  %v12783_v63 = vadd.f32 %v12782_v41, %v12781_v22 }
 0x467   : > { %v9324_v19 = vadd.f32 %v12783_v63, %v16842_v27  ;;  %v12896_v23 = vpop.f32.mrb[144].mxu0  ;;  %v17001_v43 = vadd.f32 %v12892_v44, %v9321_v45 }
 0x468   : > { %v12897_v56 = vpop.f32.mrb[145].mxu0 }
 0x469   : > { %v12784_v40 = vpop.f32.mrb[112].mxu1  ;;  %v12898_v46 = vadd.f32 %v12897_v56, %v12896_v23  ;;  %v12899_v2 = vpop.f32.mrb[146].mxu0  ;;  %v17003_v61 = vadd.f32 %v12895_v49, %v9324_v19 }
 0x46a   : > { %v12785_v36 = vpop.f32.mrb[113].mxu1  ;;  %v12900_v51 = vpop.f32.mrb[147].mxu0 }
 0x46b   : > { %v12786_v24 = vadd.f32 %v12785_v36, %v12784_v40  ;;  %v12787_v62 = vpop.f32.mrb[114].mxu1  ;;  %v12901_v7 = vadd.f32 %v12900_v51, %v12899_v2 }
 0x46c   : > { %v12788_v14 = vpop.f32.mrb[115].mxu1 }
 0x46d   : > { %v9329_v3 = vadd.f32 %v12786_v24, %v16896_v37  ;;  %v12789_v11 = vadd.f32 %v12788_v14, %v12787_v62 }
 0x46f   : > { %v9332_v27 = vadd.f32 %v12789_v11, %v16899_v20  ;;  %v12902_v21 = vpop.f32.mrb[148].mxu0  ;;  %v17007_v5 = vadd.f32 %v12898_v46, %v9329_v3 }
 0x470   : > { %v12903_v4 = vpop.f32.mrb[149].mxu0 }
 0x471   : > { %v12790_v42 = vpop.f32.mrb[116].mxu1  ;;  %v12904_v35 = vadd.f32 %v12903_v4, %v12902_v21  ;;  %v12905_v16 = vpop.f32.mrb[150].mxu0  ;;  %v17009_v6 = vadd.f32 %v12901_v7, %v9332_v27 }
 0x472   : > { %v12791_v44 = vpop.f32.mrb[117].mxu1  ;;  %v12906_v58 = vpop.f32.mrb[151].mxu0 }
 0x473   : > { %v12792_v9 = vadd.f32 %v12791_v44, %v12790_v42  ;;  %v12793_v25 = vpop.f32.mrb[118].mxu1  ;;  %v12907_v47 = vadd.f32 %v12906_v58, %v12905_v16  ;;  %v13258_v44 = vmov 1983009808  }
 0x474   : > { %v12794_v22 = vpop.f32.mrb[119].mxu1  ;;  %v9891_v58 = vunpack.c.l.s4 %v13258_v44 }
 0x475   : > { %v9337_v37 = vadd.f32 %v12792_v9, %v16909_v39  ;;  %v12795_v49 = vadd.f32 %v12794_v22, %v12793_v25  ;;  %v9893_v9 = vlaneseq }
 0x477   : > { %v9340_v20 = vadd.f32 %v12795_v49, %v16911_v53  ;;  %v12908_v41 = vpop.f32.mrb[152].mxu0  ;;  %v17013_v45 = vadd.f32 %v12904_v35, %v9337_v37  ;;  %v9892_v49 = vunpack.c.0.s8 %v9891_v58 }
 0x478   : > { %v12909_v63 = vpop.f32.mrb[153].mxu0 }
 0x479   : > { %v12796_v19 = vpop.f32.mrb[120].mxu1  ;;  %v12910_v23 = vadd.f32 %v12909_v63, %v12908_v41  ;;  %v12911_v56 = vpop.f32.mrb[154].mxu0  ;;  %v17015_v40 = vadd.f32 %v12907_v47, %v9340_v20  ;;  %v9894_v20 = vshrl.u32 %v9893_v9, 7 }
 0x47a   : > { %v12797_v46 = vpop.f32.mrb[121].mxu1  ;;  %v12912_v2 = vpop.f32.mrb[155].mxu0 }
 0x47b   : > { %v12798_v36 = vadd.f32 %v12797_v46, %v12796_v19  ;;  %v12799_v51 = vpop.f32.mrb[122].mxu1  ;;  %v12913_v24 = vadd.f32 %v12912_v2, %v12911_v56  ;;  %v17028_v19 = vld [vmem:[%s17867_s5] ss:$0 sm:$0xff] }
 0x47c   : > { %v12800_v62 = vpop.f32.mrb[123].mxu1 }
 0x47d   : > { %v9345_v39 = vadd.f32 %v12798_v36, %v16925_v50  ;;  %v12801_v7 = vadd.f32 %v12800_v62, %v12799_v51  ;;  %v17037_v51 = vld [vmem:[%s17868_s6] ss:$0 sm:$0xff] }
 0x47f   : > { %v9348_v53 = vadd.f32 %v12801_v7, %v16927_v28  ;;  %v12914_v14 = vpop.f32.mrb[156].mxu0  ;;  %v17019_v3 = vadd.f32 %v12910_v23, %v9345_v39 }
 0x480   : > { %v12915_v11 = vpop.f32.mrb[157].mxu0 }
 0x481   : > { %v12802_v27 = vpop.f32.mrb[124].mxu1  ;;  %v12916_v21 = vadd.f32 %v12915_v11, %v12914_v14  ;;  %v12917_v4 = vpop.f32.mrb[158].mxu0  ;;  %v17021_v42 = vadd.f32 %v12913_v24, %v9348_v53  ;;  %v17044_v53 = vsub.s32 %v9892_v49, %v9894_v20 }
 0x482   : > { %v12803_v35 = vpop.f32.mrb[125].mxu1  ;;  %v12918_v16 = vpop.f32.mrb[159].mxu0 }
 0x483   : > { %v12804_v25 = vadd.f32 %v12803_v35, %v12802_v27  ;;  %v12805_v47 = vpop.f32.mrb[126].mxu1  ;;  %v12919_v50 = vadd.f32 %v12918_v16, %v12917_v4 }
 0x484   : > { %v12806_v22 = vpop.f32.mrb[127].mxu1 }
 0x485   : > { %v9353_v28 = vadd.f32 %v12804_v25, %v16929_v18  ;;  %v12807_v37 = vadd.f32 %v12806_v22, %v12805_v47 }
 0x487   : > { %v9356_v41 = vadd.f32 %v12807_v37, %v16931_v57  ;;  %v13000_v63 = vpop.f32.mrb[160].mxu0  ;;  %v17030_v23 = vadd.f32 %v12916_v21, %v9353_v28  ;;  %v17049_v21 = vsub.s32 0, %v9894_v20 }
 0x488   : > { %v9563_v56 = vadd.f32 %v13000_v63, %v16941_v59  ;;  %v9554_v46 = vpop.f32.mrb[161].mxu0 }
 0x489   : > { %v9555_v2 = vadd.f32 %v9554_v46, %v16935_v29  ;;  %v13004_v36 = vpop.f32.mrb[128].mxu1  ;;  %v13001_v18 = vpop.f32.mrb[162].mxu0  ;;  %v17039_v57 = vadd.f32 %v12919_v50, %v9356_v41 }
 0x48a   : > { %v9690_v24 = vmul.f32 %v17028_v19, %v9563_v56  ;;  %v9579_v62 = vadd.f32 %v13004_v36, %v16953_v8  ;;  %v9566_v39 = vadd.f32 %v13001_v18, %v16943_v30  ;;  %v9570_v7 = vpop.f32.mrb[129].mxu1  ;;  %v9557_v59 = vpop.f32.mrb[163].mxu0 }
 0x48b   : > { %v9688_v29 = vmul.f32 %v17028_v19, %v9555_v2  ;;  %v9571_v14 = vadd.f32 %v9570_v7, %v16947_v32  ;;  %v9558_v11 = vadd.f32 %v9557_v59, %v16937_v15  ;;  %v13005_v27 = vpop.f32.mrb[130].mxu1 }
 0x48c   : > { %v9694_v4 = vmul.f32 %v17028_v19, %v9579_v62  ;;  %v9691_v35 = vmul.f32 %v17028_v19, %v9566_v39  ;;  %v9582_v8 = vadd.f32 %v13005_v27, %v16955_v54  ;;  %v9573_v30 = vpop.f32.mrb[131].mxu1  ;;  %v9729_v16 = vadd.f32 %v17037_v51, %v9690_v24 }
 0x48d   : > { %v9692_v44 = vmul.f32 %v17028_v19, %v9571_v14  ;;  %v9689_v58 = vmul.f32 %v17028_v19, %v9558_v11  ;;  %v9574_v32 = vadd.f32 %v9573_v30, %v16949_v34  ;;  %v9727_v15 = vadd.f32 %v17037_v51, %v9688_v29 }
 0x48e   : > { %v17060_v9 = vmul.f32 %v17028_v19, %v9582_v8  ;;  %v9761_v25 = vmax.f32 %v9729_v16, 0.0  ;;  %v9730_v47 = vadd.f32 %v17037_v51, %v9691_v35  ;;  %v9733_v50 = vadd.f32 %v17037_v51, %v9694_v4 }
 0x48f   : > { %v17065_v54 = vmul.f32 %v17028_v19, %v9574_v32  ;;  %v9759_v22 = vmax.f32 %v9727_v15, 0.0  ;;  %v9728_v28 = vadd.f32 %v17037_v51, %v9689_v58  ;;  %v9731_v37 = vadd.f32 %v17037_v51, %v9692_v44 }
 0x490   : > { %v9923_v49 = vcombine.high %v9761_v25, %v9761_v25  ;;  %v9930_v34 = vrot.slane %v9761_v25, %v17044_v53  ;;  %v17070_v20 = vmax.f32 %v9730_v47, 0.0  ;;  %v17072_v41 = vmax.f32 %v9733_v50, 0.0 }
 0x491   : > { %v13008_v63 = vpop.f32.mrb[132].mxu1  ;;  %9791 = vxpose.xlu0.b32.start [1/16] (narrow) %v9759_v22, 8  ;;  %v9889_v56 = vcombine.high %v9759_v22, %v9759_v22  ;;  %v9896_v46 = vrot.slane %v9759_v22, %v17044_v53  ;;  %v9760_v2 = vmax.f32 %v9728_v28, 0.0  ;;  %v17075_v36 = vmax.f32 %v9731_v37, 0.0 }
 0x492   : > { %v9595_v18 = vadd.f32 %v13008_v63, %v16965_v17  ;;  %v9586_v24 = vpop.f32.mrb[133].mxu1  ;;  %v9937_v62 = vrot.slane %v9923_v49, %v17044_v53  ;;  %v9938_v39 = vcombine.high %v9930_v34, %v9930_v34  ;;  %v12265_v7 = vrot.slane %v9930_v34, 9 }
 0x493   : > { %v9587_v59 = vadd.f32 %v9586_v24, %v16959_v0  ;;  %v9903_v29 = vrot.slane %v9889_v56, %v17044_v53  ;;  %v9904_v14 = vcombine.high %v9896_v46, %v9896_v46  ;;  %v12257_v11 = vrot.slane %v9896_v46, 9  ;;  %v13009_v27 = vpop.f32.mrb[134].mxu1 }
 0x494   : > { %v17082_v4 = vmul.f32 %v17028_v19, %v9595_v18  ;;  %v9598_v35 = vadd.f32 %v13009_v27, %v16967_v33  ;;  %v9589_v8 = vpop.f32.mrb[135].mxu1  ;;  %v9906_v30 = vcombine.high %v9760_v2, %v9760_v2  ;;  %v9913_v17 = vrot.slane %v9760_v2, %v17044_v53 }
 0x495   : > { %v17087_v16 = vmul.f32 %v17028_v19, %v9587_v59  ;;  %v9905_v44 = vcombine.high %v9903_v29, %v9903_v29  ;;  %v12258_v58 = vrot.slane %v9904_v14, 9  ;;  %v12259_v0 = vrot.slane %v9903_v29, 9  ;;  %9792 = vxpose.xlu0.b32.cont [2/16] (narrow) %v9760_v2, 8 }
 0x496   : > { %v10945_v32 = vmax.f32 %v9896_v46, %v12257_v11  ;;  %v17090_v15 = vmul.f32 %v17028_v19, %v9598_v35  ;;  %v9590_v47 = vadd.f32 %v9589_v8, %v16961_v60  ;;  %v17094_v50 = vrot.slane %v9906_v30, %v17044_v53 }
 0x497   : > { %v12260_v33 = vrot.slane %v9905_v44, 9  ;;  %v10946_v22 = vmax.f32 %v9904_v14, %v12258_v58  ;;  %v17096_v28 = vmax.f32 %v9903_v29, %v12259_v0  ;;  %v17098_v37 = vcombine.high %v9913_v17, %v9913_v17 }
 0x498   : > { %v17101_v49 = vmul.f32 %v17028_v19, %v9590_v47  ;;  %v12261_v63 = vrot.slane %v9913_v17, 9  ;;  %v9939_v56 = vcombine.high %v9937_v62, %v9937_v62  ;;  %v12266_v46 = vrot.slane %v9938_v39, 9 }
 0x499   : > { %18015 = vst [vmem:[#allocation8_spill] sm:$0xff] %v17096_v28  ;;  %v17103_v2 = vmax.f32 %v9905_v44, %v12260_v33  ;;  %v13012_v60 = vpop.f32.mrb[136].mxu1  ;;  %v12267_v24 = vrot.slane %v9937_v62, 9  ;;  %v10953_v59 = vmax.f32 %v9930_v34, %v12265_v7  ;;  %9793 = vxpose.xlu0.b32.cont [3/16] (narrow) %v9761_v25, 8  ;;  %v9940_v0 = vcombine.high %v17070_v20, %v17070_v20 }
 0x49a   : > { %v17106_v11 = vmax.f32 %v9913_v17, %v12261_v63  ;;  %v9611_v29 = vadd.f32 %v13012_v60, %v16977_v1  ;;  %v9602_v14 = vpop.f32.mrb[137].mxu1  ;;  %v12268_v27 = vrot.slane %v9939_v56, 9  ;;  %v10954_v35 = vmax.f32 %v9938_v39, %v12266_v46 }
 0x49b   : > { %v9603_v8 = vadd.f32 %v9602_v14, %v16971_v48  ;;  %v17110_v30 = vmax.f32 %v9937_v62, %v12267_v24  ;;  %v11073_v58 = vmax.f32 %v10945_v32, %v10953_v59  ;;  %v13013_v44 = vpop.f32.mrb[138].mxu1  ;;  %v9732_v46 = vadd.f32 %v17037_v51, %v17065_v54 }
 0x49c   : > { %v17115_v47 = vmul.f32 %v17028_v19, %v9611_v29  ;;  %v17117_v25 = vmax.f32 %v9939_v56, %v12268_v27  ;;  %v11074_v34 = vmax.f32 %v10946_v22, %v10954_v35  ;;  %v9614_v1 = vadd.f32 %v13013_v44, %v16979_v26  ;;  %v9605_v7 = vpop.f32.mrb[139].mxu1 }
 0x49d   : > { %18016 = vst [vmem:[#allocation7_spill] sm:$0xff] %v17110_v30  ;;  %v17121_v39 = vmul.f32 %v17028_v19, %v9603_v8  ;;  %v17126_v62 = vrot.slane %v11073_v58, %v17049_v21  ;;  %v9606_v17 = vadd.f32 %v9605_v7, %v16973_v13  ;;  %9794 = vxpose.xlu0.b32.cont [4/16] (narrow) %v17070_v20, 8  ;;  %v9764_v8 = vmax.f32 %v9732_v46, 0.0 }
 0x49e   : > { %v17131_v32 = vrot.slane %v11074_v34, %v17049_v21  ;;  %v17134_v33 = vmul.f32 %v17028_v19, %v9614_v1  ;;  %v9947_v26 = vrot.slane %v17070_v20, %v17044_v53  ;;  %v17139_v22 = vrot.slane %v9940_v0, %v17044_v53 }
 0x49f   : > { %18017 = vst [vmem:[#allocation12_spill] sm:$0xff] %v17126_v62  ;;  %v17142_v63 = vmul.f32 %v17028_v19, %v9606_v17  ;;  %v9957_v13 = vcombine.high %v17075_v36, %v17075_v36  ;;  %v9964_v56 = vrot.slane %v17075_v36, %v17044_v53  ;;  %v9991_v20 = vcombine.high %v17072_v41, %v17072_v41 }
 0x4a0   : > { %18018 = vst [vmem:[#allocation9_spill] sm:$0xff] %v17131_v32  ;;  %v17150_v60 = vcombine.high %v9947_v26, %v9947_v26  ;;  %v12269_v24 = vrot.slane %v9947_v26, 9  ;;  %v9998_v59 = vrot.slane %v17072_v41, %v17044_v53 }
 0x4a1   : > { %v13016_v29 = vpop.f32.mrb[140].mxu1  ;;  %v9971_v14 = vrot.slane %v9957_v13, %v17044_v53  ;;  %v9972_v27 = vcombine.high %v9964_v56, %v9964_v56  ;;  %v12273_v35 = vrot.slane %v9964_v56, 9  ;;  %9795 = vxpose.xlu0.b32.cont [5/16] (narrow) %v17075_v36, 8  ;;  %v10005_v34 = vrot.slane %v9991_v20, %v17044_v53 }
 0x4a2   : > { %v17159_v54 = vmax.f32 %v9947_v26, %v12269_v24  ;;  %v9627_v44 = vadd.f32 %v13016_v29, %v16989_v31  ;;  %v9618_v0 = vpop.f32.mrb[141].mxu1  ;;  %v9974_v26 = vcombine.high %v9764_v8, %v9764_v8 }
 0x4a3   : > { %v9619_v1 = vadd.f32 %v9618_v0, %v16983_v38  ;;  %v9973_v7 = vcombine.high %v9971_v14, %v9971_v14  ;;  %v12274_v17 = vrot.slane %v9972_v27, 9  ;;  %v12275_v48 = vrot.slane %v9971_v14, 9  ;;  %v13017_v13 = vpop.f32.mrb[142].mxu1 }
 0x4a4   : > { %v17165_v18 = vmul.f32 %v17028_v19, %v9627_v44  ;;  %v10961_v36 = vmax.f32 %v9964_v56, %v12273_v35  ;;  %v9630_v46 = vadd.f32 %v13017_v13, %v16991_v52  ;;  %v9621_v58 = vpop.f32.mrb[143].mxu1  ;;  %v9981_v44 = vrot.slane %v9764_v8, %v17044_v53 }
 0x4a5   : > { %v9704_v24 = vmul.f32 %v17028_v19, %v9619_v1  ;;  %v12276_v31 = vrot.slane %v9973_v7, 9  ;;  %v10962_v29 = vmax.f32 %v9972_v27, %v12274_v17  ;;  %v17169_v32 = vmax.f32 %v9971_v14, %v12275_v48  ;;  %9796 = vxpose.xlu0.b32.cont [6/16] (narrow) %v9764_v8, 8 }
 0x4a6   : > { %v17172_v38 = vmul.f32 %v17028_v19, %v9630_v46  ;;  %v9622_v20 = vadd.f32 %v9621_v58, %v16985_v10  ;;  %v17177_v56 = vrot.slane %v9974_v26, %v17044_v53  ;;  %v10006_v35 = vcombine.high %v9998_v59, %v9998_v59 }
 0x4a7   : > { %18019 = vst [vmem:[#allocation10_spill] sm:$0xff] %v17169_v32  ;;  %v17179_v52 = vmax.f32 %v9973_v7, %v12276_v31  ;;  %v10007_v0 = vcombine.high %v10005_v34, %v10005_v34  ;;  %v12281_v1 = vrot.slane %v9998_v59, 9  ;;  %v17182_v48 = vcombine.high %v9981_v44, %v9981_v44 }
 0x4a8   : > { %18020 = vst [vmem:[#allocation11_spill] sm:$0xff] %v17177_v56  ;;  %v9705_v27 = vmul.f32 %v17028_v19, %v9622_v20  ;;  %v12277_v14 = vrot.slane %v9981_v44, 9  ;;  %v12283_v17 = vrot.slane %v10005_v34, 9  ;;  %v12282_v46 = vrot.slane %v10006_v35, 9 }
 0x4a9   : > { %18021 = vst [vmem:[#allocation16_spill] sm:$0xff] %v17179_v52  ;;  %v13020_v13 = vpop.f32.mrb[144].mxu1  ;;  %v12284_v62 = vrot.slane %v10007_v0, 9  ;;  %v10969_v10 = vmax.f32 %v9998_v59, %v12281_v1  ;;  %9797 = vxpose.xlu0.b32.cont [7/16] (narrow) %v17072_v41, 8  ;;  %v9743_v8 = vadd.f32 %v17037_v51, %v9704_v24 }
 0x4aa   : > { %v17187_v7 = vmax.f32 %v9981_v44, %v12277_v14  ;;  %v9643_v26 = vadd.f32 %v13020_v13, %v17001_v43  ;;  %v9634_v31 = vpop.f32.mrb[145].mxu1  ;;  %v17190_v20 = vmax.f32 %v10005_v34, %v12283_v17  ;;  %v10970_v56 = vmax.f32 %v10006_v35, %v12282_v46 }
 0x4ab   : > { %v9635_v52 = vadd.f32 %v9634_v31, %v16995_v12  ;;  %v17193_v30 = vmax.f32 %v10007_v0, %v12284_v62  ;;  %v11081_v28 = vmax.f32 %v10961_v36, %v10969_v10  ;;  %v13021_v59 = vpop.f32.mrb[146].mxu1  ;;  %v9775_v1 = vmax.f32 %v9743_v8, 0.0 }
 0x4ac   : > { %18022 = vst [vmem:[#allocation13_spill] sm:$0xff] %v17187_v7  ;;  %18023 = vst [vmem:[#allocation15_spill] sm:$0xff] %v17190_v20  ;;  %v17196_v41 = vmul.f32 %v17028_v19, %v9643_v26  ;;  %v9646_v44 = vadd.f32 %v13021_v59, %v17003_v61  ;;  %v9637_v43 = vpop.f32.mrb[147].mxu1  ;;  %v11082_v14 = vmax.f32 %v10962_v29, %v10970_v56 }
 0x4ad   : > { %18024 = vst [vmem:[#allocation14_spill] sm:$0xff] %v17193_v30  ;;  %v17202_v34 = vmul.f32 %v17028_v19, %v9635_v52  ;;  %v17205_v12 = vrot.slane %v11081_v28, %v17049_v21  ;;  %v9638_v62 = vadd.f32 %v9637_v43, %v16997_v55  ;;  %9823 = vxpose.xlu1.b32.start [1/16] (narrow) %v9775_v1, 8 }
 0x4ae   : > { %v17209_v36 = vmul.f32 %v17028_v19, %v9646_v44  ;;  %v10161_v35 = vcombine.high %v9775_v1, %v9775_v1  ;;  %v10168_v0 = vrot.slane %v9775_v1, %v17044_v53  ;;  %v9734_v61 = vadd.f32 %v17037_v51, %v17060_v9 }
 0x4af   : > { %18025 = vst [vmem:[#allocation17_spill] sm:$0xff] %v17205_v12  ;;  %v17215_v17 = vrot.slane %v11082_v14, %v17049_v21  ;;  %v17218_v29 = vmul.f32 %v17028_v19, %v9638_v62  ;;  %v9744_v28 = vadd.f32 %v17037_v51, %v9705_v27  ;;  %v9735_v55 = vadd.f32 %v17037_v51, %v17087_v16 }
 0x4b0   : > { %v10175_v56 = vrot.slane %v10161_v35, %v17044_v53  ;;  %v10176_v52 = vcombine.high %v10168_v0, %v10168_v0  ;;  %v12321_v13 = vrot.slane %v10168_v0, 9  ;;  %v9766_v46 = vmax.f32 %v9734_v61, 0.0 }
 0x4b1   : > { %18026 = vst [vmem:[#allocation6_spill] sm:$0xff] %v17215_v17  ;;  %v9776_v10 = vmax.f32 %v9744_v28, 0.0  ;;  %v13024_v8 = vpop.f32.mrb[148].mxu1  ;;  %v9767_v26 = vmax.f32 %v9735_v55, 0.0  ;;  %v9745_v9 = vadd.f32 %v17037_v51, %v17165_v18  ;;  %v9736_v31 = vadd.f32 %v17037_v51, %v17101_v49 }
 0x4b2   : > { %v10177_v59 = vcombine.high %v10175_v56, %v10175_v56  ;;  %v12322_v44 = vrot.slane %v10176_v52, 9  ;;  %v12323_v27 = vrot.slane %v10175_v56, 9  ;;  %v17228_v1 = vmax.f32 %v10168_v0, %v12321_v13  ;;  %9798 = vxpose.xlu0.b32.cont [8/16] (narrow) %v9766_v46, 8  ;;  %v9650_v16 = vpop.f32.mrb[149].mxu1 }
 0x4b3   : > { %v10008_v43 = vcombine.high %v9766_v46, %v9766_v46  ;;  %v10015_v14 = vrot.slane %v9766_v46, %v17044_v53  ;;  %v10178_v62 = vcombine.high %v9776_v10, %v9776_v10  ;;  %v10185_v35 = vrot.slane %v9776_v10, %v17044_v53  ;;  %9824 = vxpose.xlu1.b32.cont [2/16] (narrow) %v9776_v10, 8  ;;  %v13025_v61 = vpop.f32.mrb[150].mxu1 }
 0x4b4   : > { %v12324_v28 = vrot.slane %v10177_v59, 9  ;;  %v17232_v18 = vmax.f32 %v10176_v52, %v12322_v44  ;;  %v17234_v55 = vmax.f32 %v10175_v56, %v12323_v27  ;;  %v9659_v49 = vadd.f32 %v13024_v8, %v17013_v45  ;;  %v9653_v24 = vpop.f32.mrb[151].mxu1 }
 0x4b5   : > { %v17238_v0 = vrot.slane %v10008_v43, %v17044_v53  ;;  %v17240_v13 = vcombine.high %v10015_v14, %v10015_v14  ;;  %v12285_v58 = vrot.slane %v10015_v14, 9  ;;  %v17243_v46 = vrot.slane %v10178_v62, %v17044_v53 }
 0x4b6   : > { %18027 = vst [vmem:[#allocation18_spill] sm:$0xff] %v17234_v55  ;;  %v17245_v17 = vmax.f32 %v10177_v59, %v12324_v28  ;;  %v17247_v10 = vcombine.high %v10185_v35, %v10185_v35  ;;  %v12325_v52 = vrot.slane %v10185_v35, 9  ;;  %v17250_v56 = vmul.f32 %v17028_v19, %v9659_v49  ;;  %9799 = vxpose.xlu0.b32.cont [9/16] (narrow) %v9767_v26, 8 }
 0x4b7   : > { %18028 = vst [vmem:[#allocation19_spill] sm:$0xff] %v17243_v46  ;;  %v17253_v8 = vmax.f32 %v10015_v14, %v12285_v58  ;;  %v9651_v44 = vadd.f32 %v9650_v16, %v17007_v5  ;;  %v10025_v27 = vcombine.high %v9767_v26, %v9767_v26  ;;  %v10032_v59 = vrot.slane %v9767_v26, %v17044_v53 }
 0x4b8   : > { %18029 = vst [vmem:[#allocation20_spill] sm:$0xff] %v17245_v17  ;;  %18030 = vst [vmem:[#allocation21_spill] sm:$0xff] %v17247_v10  ;;  %v17257_v62 = vmax.f32 %v10185_v35, %v12325_v52  ;;  %v9662_v28 = vadd.f32 %v13025_v61, %v17015_v40  ;;  %v9777_v46 = vmax.f32 %v9745_v9, 0.0  ;;  %v9654_v58 = vadd.f32 %v9653_v24, %v17009_v6 }
 0x4b9   : > { %18031 = vst [vmem:[#allocation22_spill] sm:$0xff] %v17253_v8  ;;  %v17262_v17 = vmul.f32 %v17028_v19, %v9651_v44  ;;  %v10039_v49 = vrot.slane %v10025_v27, %v17044_v53  ;;  %v13028_v14 = vpop.f32.mrb[152].mxu1  ;;  %v10040_v45 = vcombine.high %v10032_v59, %v10032_v59  ;;  %v12289_v5 = vrot.slane %v10032_v59, 9 }
 0x4ba   : > { %18032 = vst [vmem:[#allocation23_spill] sm:$0xff] %v17257_v62  ;;  %v17267_v16 = vmul.f32 %v17028_v19, %v9662_v28  ;;  %v9768_v35 = vmax.f32 %v9736_v31, 0.0  ;;  %v9666_v52 = vpop.f32.mrb[153].mxu1  ;;  %v10195_v62 = vcombine.high %v9777_v46, %v9777_v46  ;;  %v10202_v40 = vrot.slane %v9777_v46, %v17044_v53  ;;  %9825 = vxpose.xlu1.b32.cont [3/16] (narrow) %v9777_v46, 8 }
 0x4bb   : > { %v10041_v43 = vcombine.high %v10039_v49, %v10039_v49  ;;  %v12291_v26 = vrot.slane %v10039_v49, 9  ;;  %v13029_v61 = vpop.f32.mrb[154].mxu1  ;;  %v12290_v44 = vrot.slane %v10040_v45, 9  ;;  %v17270_v27 = vmax.f32 %v10032_v59, %v12289_v5 }
 0x4bc   : > { %18033 = vst [vmem:[#allocation24_spill] sm:$0xff] %v17267_v16  ;;  %v17273_v6 = vmul.f32 %v17028_v19, %v9654_v58  ;;  %v10042_v24 = vcombine.high %v9768_v35, %v9768_v35  ;;  %9800 = vxpose.xlu0.b32.cont [10/16] (narrow) %v9768_v35, 8  ;;  %v9669_v9 = vpop.f32.mrb[155].mxu1  ;;  %v10209_v31 = vrot.slane %v10195_v62, %v17044_v53  ;;  %v12329_v20 = vrot.slane %v10202_v40, 9 }
 0x4bd   : > { %v12292_v28 = vrot.slane %v10041_v43, 9  ;;  %v17275_v10 = vmax.f32 %v10039_v49, %v12291_v26  ;;  %v10210_v16 = vcombine.high %v10202_v40, %v10202_v40  ;;  %v17278_v12 = vmax.f32 %v10040_v45, %v12290_v44 }
 0x4be   : > { %v10049_v46 = vrot.slane %v9768_v35, %v17044_v53  ;;  %v17282_v59 = vrot.slane %v10042_v24, %v17044_v53  ;;  %v10211_v58 = vcombine.high %v10209_v31, %v10209_v31  ;;  %v12331_v7 = vrot.slane %v10209_v31, 9 }
 0x4bf   : > { %v17284_v5 = vmax.f32 %v10041_v43, %v12292_v28  ;;  %v12330_v32 = vrot.slane %v10210_v16, 9  ;;  %v11017_v8 = vmax.f32 %v10202_v40, %v12329_v20  ;;  %v9746_v62 = vadd.f32 %v17037_v51, %v17172_v38 }
 0x4c0   : > { %v17286_v30 = vcombine.high %v10049_v46, %v10049_v46  ;;  %v12293_v49 = vrot.slane %v10049_v46, 9  ;;  %v12332_v45 = vrot.slane %v10211_v58, 9  ;;  %v17290_v44 = vmax.f32 %v10209_v31, %v12331_v7 }
 0x4c1   : > { %18034 = vst [vmem:[#allocation25_spill] sm:$0xff] %v17284_v5  ;;  %v11018_v26 = vmax.f32 %v10210_v16, %v12330_v32  ;;  %v9675_v35 = vadd.f32 %v13028_v14, %v17030_v23  ;;  %v11105_v24 = vmax.f32 %v17228_v1, %v11017_v8  ;;  %v9778_v5 = vmax.f32 %v9746_v62, 0.0 }
 0x4c2   : > { %18035 = vst [vmem:[#allocation26_spill] sm:$0xff] %v17290_v44  ;;  %v17295_v28 = vmax.f32 %v10049_v46, %v12293_v49  ;;  %v17297_v20 = vmax.f32 %v10211_v58, %v12332_v45  ;;  %v9667_v8 = vadd.f32 %v9666_v52, %v17019_v3  ;;  %v9678_v16 = vadd.f32 %v13029_v61, %v17039_v57 }
 0x4c3   : > { %v11106_v40 = vmax.f32 %v17232_v18, %v11018_v26  ;;  %v17303_v32 = vmul.f32 %v17028_v19, %v9675_v35  ;;  %v17306_v7 = vrot.slane %v11105_v24, %v17049_v21  ;;  %v10212_v23 = vcombine.high %v9778_v5, %v9778_v5  ;;  %9826 = vxpose.xlu1.b32.cont [4/16] (narrow) %v9778_v5, 8 }
 0x4c4   : > { %18036 = vst [vmem:[#allocation27_spill] sm:$0xff] %v17297_v20  ;;  %v10219_v1 = vrot.slane %v9778_v5, %v17044_v53  ;;  %v9737_v18 = vadd.f32 %v17037_v51, %v17082_v4  ;;  %v9747_v31 = vadd.f32 %v17037_v51, %v17202_v34  ;;  %v17324_v5 = vmul.f32 %v17028_v19, %v9667_v8 }
 0x4c5   : > { %18037 = vst [vmem:[#allocation28_spill] sm:$0xff] %v17303_v32  ;;  %18038 = vst [vmem:[#allocation29_spill] sm:$0xff] %v17306_v7  ;;  %v17311_v14 = vrot.slane %v11106_v40, %v17049_v21  ;;  %v17319_v46 = vrot.slane %v10212_v23, %v17044_v53  ;;  %v17327_v52 = vmul.f32 %v17028_v19, %v9678_v16 }
 0x4c6   : > { %v17321_v58 = vcombine.high %v10219_v1, %v10219_v1  ;;  %v12333_v49 = vrot.slane %v10219_v1, 9  ;;  %v9769_v3 = vmax.f32 %v9737_v18, 0.0  ;;  %v9779_v62 = vmax.f32 %v9747_v31, 0.0 }
 0x4c7   : > { %18039 = vst [vmem:[#allocation30_spill] sm:$0xff] %v17311_v14  ;;  %18041 = vst [vmem:[#allocation32_spill] sm:$0xff] %v17327_v52  ;;  %v9670_v4 = vadd.f32 %v9669_v9, %v17021_v42  ;;  %v9738_v34 = vadd.f32 %v17037_v51, %v17090_v15  ;;  %v9748_v45 = vadd.f32 %v17037_v51, %v17218_v29 }
 0x4c8   : > { %18040 = vst [vmem:[#allocation31_spill] sm:$0xff] %v17321_v58  ;;  %v17331_v61 = vmax.f32 %v10219_v1, %v12333_v49  ;;  %v10059_v26 = vcombine.high %v9769_v3, %v9769_v3  ;;  %v10066_v35 = vrot.slane %v9769_v3, %v17044_v53  ;;  %9801 = vxpose.xlu0.b32.cont [11/16] (narrow) %v9769_v3, 8 }
 0x4c9   : > { %v10229_v24 = vcombine.high %v9779_v62, %v9779_v62  ;;  %v10236_v40 = vrot.slane %v9779_v62, %v17044_v53  ;;  %9827 = vxpose.xlu1.b32.cont [5/16] (narrow) %v9779_v62, 8  ;;  %v17340_v42 = vmul.f32 %v17028_v19, %v9670_v4  ;;  %v9770_v9 = vmax.f32 %v9738_v34, 0.0 }
 0x4ca   : > { %18042 = vst [vmem:[#allocation33_spill] sm:$0xff] %v17331_v61  ;;  %v9780_v23 = vmax.f32 %v9748_v45, 0.0  ;;  %v9739_v1 = vadd.f32 %v17037_v51, %v17121_v39  ;;  %v10073_v15 = vrot.slane %v10059_v26, %v17044_v53  ;;  %v10074_v8 = vcombine.high %v10066_v35, %v10066_v35 }
 0x4cb   : > { %v12297_v29 = vrot.slane %v10066_v35, 9  ;;  %v10243_v18 = vrot.slane %v10229_v24, %v17044_v53  ;;  %v10244_v16 = vcombine.high %v10236_v40, %v10236_v40  ;;  %v12337_v31 = vrot.slane %v10236_v40, 9 }
 0x4cc   : > { %v10076_v49 = vcombine.high %v9770_v9, %v9770_v9  ;;  %v10083_v3 = vrot.slane %v9770_v9, %v17044_v53  ;;  %v10075_v62 = vcombine.high %v10073_v15, %v10073_v15  ;;  %v12298_v38 = vrot.slane %v10074_v8, 9  ;;  %9802 = vxpose.xlu0.b32.cont [12/16] (narrow) %v9770_v9, 8 }
 0x4cd   : > { %v12299_v19 = vrot.slane %v10073_v15, 9  ;;  %v10985_v4 = vmax.f32 %v10066_v35, %v12297_v29  ;;  %v10245_v34 = vcombine.high %v10243_v18, %v10243_v18  ;;  %v12338_v45 = vrot.slane %v10244_v16, 9  ;;  %9828 = vxpose.xlu1.b32.cont [6/16] (narrow) %v9780_v23, 8 }
 0x4ce   : > { %v12339_v57 = vrot.slane %v10243_v18, 9  ;;  %v17347_v39 = vmax.f32 %v10236_v40, %v12337_v31  ;;  %v12300_v26 = vrot.slane %v10075_v62, 9  ;;  %v10986_v43 = vmax.f32 %v10074_v8, %v12298_v38 }
 0x4cf   : > { %v17349_v52 = vmax.f32 %v10073_v15, %v12299_v19  ;;  %v11089_v24 = vmax.f32 %v17270_v27, %v10985_v4  ;;  %v12340_v32 = vrot.slane %v10245_v34, 9  ;;  %v17352_v14 = vmax.f32 %v10244_v16, %v12338_v45 }
 0x4d0   : > { %v17354_v7 = vmax.f32 %v10243_v18, %v12339_v57  ;;  %v17357_v35 = vrot.slane %v10076_v49, %v17044_v53  ;;  %v17359_v9 = vmax.f32 %v10075_v62, %v12300_v26  ;;  %v11090_v40 = vmax.f32 %v17278_v12, %v10986_v43 }
 0x4d1   : > { %v17365_v38 = vrot.slane %v11089_v24, %v17049_v21  ;;  %v17367_v15 = vmax.f32 %v10245_v34, %v12340_v32  ;;  %v17369_v27 = vcombine.high %v10083_v3, %v10083_v3  ;;  %v12301_v8 = vrot.slane %v10083_v3, 9 }
 0x4d2   : > { %18043 = vst [vmem:[#allocation34_spill] sm:$0xff] %v17354_v7  ;;  %v10246_v57 = vcombine.high %v9780_v23, %v9780_v23  ;;  %v17372_v18 = vrot.slane %v11090_v40, %v17049_v21  ;;  %v10253_v16 = vrot.slane %v9780_v23, %v17044_v53  ;;  %v9771_v31 = vmax.f32 %v9739_v1, 0.0 }
 0x4d3   : > { %18044 = vst [vmem:[#allocation35_spill] sm:$0xff] %v17367_v15  ;;  %v9749_v12 = vadd.f32 %v17037_v51, %v17196_v41  ;;  %v17378_v49 = vmax.f32 %v10083_v3, %v12301_v8  ;;  %v9740_v62 = vadd.f32 %v17037_v51, %v17142_v63  ;;  %v9750_v41 = vadd.f32 %v17037_v51, %v17209_v36 }
 0x4d4   : > { %v17381_v32 = vrot.slane %v10246_v57, %v17044_v53  ;;  %v17385_v19 = vcombine.high %v10253_v16, %v10253_v16  ;;  %v12341_v4 = vrot.slane %v10253_v16, 9  ;;  %v10093_v34 = vcombine.high %v9771_v31, %v9771_v31  ;;  %9803 = vxpose.xlu0.b32.cont [13/16] (narrow) %v9771_v31, 8 }
 0x4d5   : > { %v10100_v23 = vrot.slane %v9771_v31, %v17044_v53  ;;  %v9781_v1 = vmax.f32 %v9749_v12, 0.0  ;;  %v9772_v45 = vmax.f32 %v9740_v62, 0.0  ;;  %v9741_v3 = vadd.f32 %v17037_v51, %v17115_v47 }
 0x4d6   : > { %18045 = vst [vmem:[#allocation36_spill] sm:$0xff] %v17381_v32  ;;  %18046 = vst [vmem:[#allocation37_spill] sm:$0xff] %v17385_v19  ;;  %v17393_v24 = vmax.f32 %v10253_v16, %v12341_v4  ;;  %v10107_v63 = vrot.slane %v10093_v34, %v17044_v53 }
 0x4d7   : > { %v10108_v40 = vcombine.high %v10100_v23, %v10100_v23  ;;  %v12305_v8 = vrot.slane %v10100_v23, 9  ;;  %v10263_v57 = vcombine.high %v9781_v1, %v9781_v1  ;;  %v10270_v29 = vrot.slane %v9781_v1, %v17044_v53  ;;  %9829 = vxpose.xlu1.b32.cont [7/16] (narrow) %v9781_v1, 8 }
 0x4d8   : > { %18047 = vst [vmem:[#allocation38_spill] sm:$0xff] %v17393_v24  ;;  %v10110_v31 = vcombine.high %v9772_v45, %v9772_v45  ;;  %v10109_v12 = vcombine.high %v10107_v63, %v10107_v63  ;;  %v12307_v43 = vrot.slane %v10107_v63, 9  ;;  %v10117_v36 = vrot.slane %v9772_v45, %v17044_v53  ;;  %9804 = vxpose.xlu0.b32.cont [14/16] (narrow) %v9772_v45, 8 }
 0x4d9   : > { %v12306_v62 = vrot.slane %v10108_v40, 9  ;;  %v17398_v47 = vmax.f32 %v10100_v23, %v12305_v8  ;;  %v10277_v16 = vrot.slane %v10263_v57, %v17044_v53  ;;  %v10278_v4 = vcombine.high %v10270_v29, %v10270_v29 }
 0x4da   : > { %v12345_v26 = vrot.slane %v10270_v29, 9  ;;  %v12308_v34 = vrot.slane %v10109_v12, 9  ;;  %v17403_v15 = vmax.f32 %v10107_v63, %v12307_v43  ;;  %v17406_v1 = vrot.slane %v10110_v31, %v17044_v53 }
 0x4db   : > { %v17401_v24 = vmax.f32 %v10108_v40, %v12306_v62  ;;  %v10279_v19 = vcombine.high %v10277_v16, %v10277_v16  ;;  %v12346_v32 = vrot.slane %v10278_v4, 9  ;;  %v12347_v44 = vrot.slane %v10277_v16, 9 }
 0x4dc   : > { %v11033_v55 = vmax.f32 %v10270_v29, %v12345_v26  ;;  %v17408_v61 = vmax.f32 %v10109_v12, %v12308_v34  ;;  %v17410_v23 = vcombine.high %v10117_v36, %v10117_v36  ;;  %v12309_v45 = vrot.slane %v10117_v36, 9 }
 0x4dd   : > { %v9782_v8 = vmax.f32 %v9750_v41, 0.0  ;;  %v12348_v57 = vrot.slane %v10279_v19, 9  ;;  %v11034_v20 = vmax.f32 %v10278_v4, %v12346_v32  ;;  %v17412_v58 = vmax.f32 %v10277_v16, %v12347_v44 }
 0x4de   : > { %v11113_v43 = vmax.f32 %v17347_v39, %v11033_v55  ;;  %v17416_v40 = vmax.f32 %v10117_v36, %v12309_v45  ;;  %v9773_v12 = vmax.f32 %v9741_v3, 0.0 }
 0x4df   : > { %18048 = vst [vmem:[#allocation39_spill] sm:$0xff] %v17412_v58  ;;  %v10280_v31 = vcombine.high %v9782_v8, %v9782_v8  ;;  %v10287_v62 = vrot.slane %v9782_v8, %v17044_v53  ;;  %9830 = vxpose.xlu1.b32.cont [8/16] (narrow) %v9782_v8, 8  ;;  %v17419_v29 = vmax.f32 %v10279_v19, %v12348_v57 }
 0x4e0   : > { %v11114_v26 = vmax.f32 %v17352_v14, %v11034_v20  ;;  %v17425_v44 = vrot.slane %v11113_v43, %v17049_v21  ;;  %v9751_v19 = vadd.f32 %v17037_v51, %v17262_v17  ;;  %v9742_v20 = vadd.f32 %v17037_v51, %v17134_v33  ;;  %9805 = vxpose.xlu0.b32.cont [15/16] (narrow) %v9773_v12, 8 }
 0x4e1   : > { %18049 = vst [vmem:[#allocation40_spill] sm:$0xff] %v17419_v29  ;;  %v17428_v55 = vrot.slane %v10280_v31, %v17044_v53  ;;  %v17430_v39 = vcombine.high %v10287_v62, %v10287_v62  ;;  %v12349_v32 = vrot.slane %v10287_v62, 9  ;;  %v9752_v14 = vadd.f32 %v17037_v51, %v17273_v6 }
 0x4e2   : > { %18050 = vst [vmem:[#allocation41_spill] sm:$0xff] %v17425_v44  ;;  %v17433_v36 = vrot.slane %v11114_v26, %v17049_v21  ;;  %v10127_v34 = vcombine.high %v9773_v12, %v9773_v12  ;;  %v10134_v45 = vrot.slane %v9773_v12, %v17044_v53  ;;  %v9783_v3 = vmax.f32 %v9751_v19, 0.0 }
 0x4e3   : > { %18051 = vst [vmem:[#allocation42_spill] sm:$0xff] %v17428_v55  ;;  %18052 = vst [vmem:[#allocation43_spill] sm:$0xff] %v17430_v39  ;;  %v17442_v4 = vmax.f32 %v10287_v62, %v12349_v32  ;;  %v9774_v8 = vmax.f32 %v9742_v20, 0.0  ;;  %v9784_v57 = vmax.f32 %v9752_v14, 0.0  ;;  %v9922_v17 = vcombine.high %v17094_v50, %v17094_v50 }
 0x4e4   : > { %18053 = vst [vmem:[#allocation44_spill] sm:$0xff] %v17433_v36  ;;  %v10141_v43 = vrot.slane %v10127_v34, %v17044_v53  ;;  %v10142_v33 = vcombine.high %v10134_v45, %v10134_v45  ;;  %v12313_v31 = vrot.slane %v10134_v45, 9  ;;  %v9956_v6 = vcombine.high %v17139_v22, %v17139_v22  ;;  %9831 = vxpose.xlu1.b32.cont [9/16] (narrow) %v9783_v3, 8 }
 0x4e5   : > { %18054 = vst [vmem:[#allocation45_spill] sm:$0xff] %v17442_v4  ;;  %v10297_v26 = vcombine.high %v9783_v3, %v9783_v3  ;;  %v10304_v62 = vrot.slane %v9783_v3, %v17044_v53  ;;  %v10144_v32 = vcombine.high %v9774_v8, %v9774_v8  ;;  %v10151_v12 = vrot.slane %v9774_v8, %v17044_v53 }
 0x4e6   : > { %v10143_v19 = vcombine.high %v10141_v43, %v10141_v43  ;;  %v12314_v20 = vrot.slane %v10142_v33, 9  ;;  %v12315_v14 = vrot.slane %v10141_v43, 9  ;;  %v11001_v41 = vmax.f32 %v10134_v45, %v12313_v31  ;;  %9806 = vxpose.xlu0.b32.end [16/16] (narrow) %v9774_v8, 8 }
 0x4e7   : > { %v10311_v16 = vrot.slane %v10297_v26, %v17044_v53  ;;  %v10312_v34 = vcombine.high %v10304_v62, %v10304_v62  ;;  %v12353_v63 = vrot.slane %v10304_v62, 9  ;;  %v17454_v36 = vrot.slane %v10144_v32, %v17044_v53 }
 0x4e8   : > { %v12316_v44 = vrot.slane %v10143_v19, 9  ;;  %v11002_v58 = vmax.f32 %v10142_v33, %v12314_v20  ;;  %v17456_v7 = vmax.f32 %v10141_v43, %v12315_v14  ;;  %v11097_v3 = vmax.f32 %v17398_v47, %v11001_v41  ;;  %9832 = vxpose.xlu1.b32.cont [10/16] (narrow) %v9784_v57, 8 }
 0x4e9   : > { %v10313_v4 = vcombine.high %v10311_v16, %v10311_v16  ;;  %v12354_v29 = vrot.slane %v10312_v34, 9  ;;  %v12355_v39 = vrot.slane %v10311_v16, 9  ;;  %v17459_v55 = vmax.f32 %v10304_v62, %v12353_v63 }
 0x4ea   : > { %v17461_v45 = vmax.f32 %v10143_v19, %v12316_v44  ;;  %v11098_v8 = vmax.f32 %v17401_v24, %v11002_v58  ;;  %v17467_v33 = vrot.slane %v11097_v3, %v17049_v21  ;;  %v17473_v63 = vcombine.high %v10151_v12, %v10151_v12 }
 0x4eb   : > { %v12356_v43 = vrot.slane %v10313_v4, 9  ;;  %v17469_v47 = vmax.f32 %v10312_v34, %v12354_v29  ;;  %v17471_v41 = vmax.f32 %v10311_v16, %v12355_v39  ;;  %v12317_v26 = vrot.slane %v10151_v12, 9 }
 0x4ec   : > { %v17476_v44 = vrot.slane %v11098_v8, %v17049_v21  ;;  %v10314_v58 = vcombine.high %v9784_v57, %v9784_v57  ;;  %v10321_v24 = vrot.slane %v9784_v57, %v17044_v53  ;;  %v12263_v29 = vrot.slane %v17094_v50, 9 }
 0x4ed   : > { %v17479_v62 = vmax.f32 %v10313_v4, %v12356_v43  ;;  %v12264_v19 = vrot.slane %v9922_v17, 9  ;;  %v17483_v39 = vmax.f32 %v10151_v12, %v12317_v26  ;;  %v12271_v57 = vrot.slane %v17139_v22, 9 }
 0x4ee   : > { %v17486_v16 = vrot.slane %v10314_v58, %v17044_v53  ;;  %v17488_v20 = vcombine.high %v10321_v24, %v10321_v24  ;;  %v12357_v14 = vrot.slane %v10321_v24, 9  ;;  %v12272_v34 = vrot.slane %v9956_v6, 9 }
 0x4ef   : > { %18055 = vst [vmem:[#allocation46_spill] sm:$0xff] %v17479_v62  ;;  %v18057_v4 = vrot.slane %v17098_v37, 9  ;;  %v10951_v8 = vmax.f32 %v17094_v50, %v12263_v29  ;;  %v10952_v26 = vmax.f32 %v9922_v17, %v12264_v19  ;;  %v18059_v58 = vrot.slane %v17150_v60, 9  ;;  %v18060_v50 = vld [vmem:[#allocation8_spill] sm:$0xff]  ;;  %v18061_v29 = vld [vmem:[#allocation7_spill] sm:$0xff]  ;;  %v18064_v19 = vld [vmem:[#allocation9_spill] sm:$0xff] }
 0x4f0   : > { %18056 = vst [vmem:[#allocation47_spill] sm:$0xff] %v17486_v16  ;;  %v17496_v12 = vmax.f32 %v10321_v24, %v12357_v14  ;;  %v10959_v32 = vmax.f32 %v17139_v22, %v12271_v57  ;;  %v10960_v62 = vmax.f32 %v9956_v6, %v12272_v34  ;;  %v11076_v16 = vmax.f32 %v17103_v2, %v17117_v25  ;;  %v18063_v17 = vld [vmem:[#allocation12_spill] sm:$0xff]  ;;  %v18065_v57 = vld [vmem:[#allocation11_spill] sm:$0xff] }
 0x4f1   : > { %v10950_v3 = vmax.f32 %v17098_v37, %v18057_v4  ;;  %v10958_v31 = vmax.f32 %v17150_v60, %v18059_v58  ;;  %v11077_v37 = vmax.f32 %v17106_v11, %v17159_v54  ;;  %v18062_v24 = vmax.f32 %v18060_v50, %v18061_v29 }
 0x4f2   : > { %18058 = vst [vmem:[#allocation48_spill] sm:$0xff] %v17496_v12  ;;  %v11458_v43 = vsel %vm11457_vm3, %v18064_v19, %v18063_v17  ;;  %v9753_v22 = vadd.f32 %v17037_v51, %v17250_v56  ;;  %v11079_v60 = vmax.f32 %v10951_v8, %v10959_v32  ;;  %v11080_v6 = vmax.f32 %v10952_v26, %v10960_v62 }
 0x4f3   : > { %v11078_v4 = vmax.f32 %v10950_v3, %v10958_v31  ;;  %v11212_v14 = vrot.slane %v18062_v24, %v17049_v21  ;;  %v11216_v2 = vrot.slane %v11076_v16, %v17049_v21  ;;  %v11220_v25 = vrot.slane %v11077_v37, %v17049_v21 }
 0x4f4   : > { %v9785_v31 = vmax.f32 %v9753_v22, 0.0  ;;  %v9990_v34 = vcombine.high %v18065_v57, %v18065_v57  ;;  %v11228_v3 = vrot.slane %v11079_v60, %v17049_v21  ;;  %v11232_v58 = vrot.slane %v11080_v6, %v17049_v21 }
 0x4f5   : > { %v11224_v11 = vrot.slane %v11078_v4, %v17049_v21  ;;  %v11460_v54 = vsel %vm11459_vm4, %v11212_v14, %v11458_v43  ;;  %v10024_v56 = vcombine.high %v17238_v0, %v17238_v0  ;;  %v12279_v8 = vrot.slane %v18065_v57, 9 }
 0x4f6   : > { %v11462_v51 = vsel %vm11461_vm11, %v11216_v2, %v11460_v54  ;;  %v10331_v32 = vcombine.high %v9785_v31, %v9785_v31  ;;  %v10338_v16 = vrot.slane %v9785_v31, %v17044_v53  ;;  %9833 = vxpose.xlu1.b32.cont [11/16] (narrow) %v9785_v31, 8  ;;  %v12280_v26 = vrot.slane %v9990_v34, 9 }
 0x4f7   : > { %v11464_v62 = vsel %vm11463_vm14, %v11220_v25, %v11462_v51  ;;  %v12287_v37 = vrot.slane %v17238_v0, 9  ;;  %v12288_v4 = vrot.slane %v10024_v56, 9  ;;  %v18066_v19 = vrot.slane %v17182_v48, 9 }
 0x4f8   : > { %v11466_v43 = vsel %vm11465_vm13, %v11224_v11, %v11464_v62  ;;  %v10345_v29 = vrot.slane %v10331_v32, %v17044_v53  ;;  %v10346_v24 = vcombine.high %v10338_v16, %v10338_v16  ;;  %v12361_v14 = vrot.slane %v10338_v16, 9  ;;  %v18069_v32 = vld [vmem:[#allocation16_spill] sm:$0xff] }
 0x4f9   : > { %v11468_v50 = vsel %vm11467_vm2, %v11228_v3, %v11466_v43  ;;  %v10966_v22 = vmax.f32 %v17182_v48, %v18066_v19  ;;  %v10967_v60 = vmax.f32 %v18065_v57, %v12279_v8  ;;  %v10968_v6 = vmax.f32 %v9990_v34, %v12280_v26  ;;  %v18070_v34 = vld [vmem:[#allocation22_spill] sm:$0xff]  ;;  %v18071_v8 = vld [vmem:[#allocation13_spill] sm:$0xff] }
 0x4fa   : > { %v11470_v17 = vsel %vm11469_vm9, %v11232_v58, %v11468_v50  ;;  %v10347_v2 = vcombine.high %v10345_v29, %v10345_v29  ;;  %v12362_v25 = vrot.slane %v10346_v24, 9  ;;  %v12363_v11 = vrot.slane %v10345_v29, 9  ;;  %v18068_v58 = vld [vmem:[#allocation14_spill] sm:$0xff] }
 0x4fb   : > { %11528 = vxpose.xlu0.b32.start [1/8] (short) (narrow) %v11470_v17, 8  ;;  %v11049_v54 = vmax.f32 %v10338_v16, %v12361_v14  ;;  %v18067_v31 = vrot.slane %v17240_v13, 9  ;;  %v10975_v51 = vmax.f32 %v17238_v0, %v12287_v37  ;;  %v10976_v62 = vmax.f32 %v10024_v56, %v12288_v4  ;;  %v18072_v37 = vld [vmem:[#allocation10_spill] sm:$0xff]  ;;  %v18073_v4 = vld [vmem:[#allocation15_spill] sm:$0xff] }
 0x4fc   : > { %v11084_v43 = vmax.f32 %v18069_v32, %v18068_v58  ;;  %v12364_v50 = vrot.slane %v10347_v2, 9  ;;  %v11050_v48 = vmax.f32 %v10346_v24, %v12362_v25  ;;  %v17544_v19 = vmax.f32 %v10345_v29, %v12363_v11  ;;  %v18075_v25 = vld [vmem:[#allocation17_spill] sm:$0xff]  ;;  %v18076_v11 = vld [vmem:[#allocation6_spill] sm:$0xff] }
 0x4fd   : > { %v10974_v3 = vmax.f32 %v17240_v13, %v18067_v31  ;;  %v11121_v57 = vmax.f32 %v17459_v55, %v11049_v54  ;;  %v11085_v26 = vmax.f32 %v18071_v8, %v18070_v34  ;;  %v11087_v14 = vmax.f32 %v10967_v60, %v10975_v51  ;;  %v18077_v51 = vld [vmem:[#allocation24_spill] sm:$0xff] }
 0x4fe   : > { %v11088_v17 = vmax.f32 %v10968_v6, %v10976_v62  ;;  %v17549_v12 = vmax.f32 %v10347_v2, %v12364_v50  ;;  %v11122_v0 = vmax.f32 %v17469_v47, %v11050_v48  ;;  %v11123_v13 = vmax.f32 %v17471_v41, %v17544_v19 }
 0x4ff   : > { %v11086_v16 = vmax.f32 %v10966_v22, %v10974_v3  ;;  %v17555_v56 = vrot.slane %v11121_v57, %v17049_v21  ;;  %v18074_v55 = vmax.f32 %v18072_v37, %v18073_v4  ;;  %v11248_v24 = vrot.slane %v11084_v43, %v17049_v21  ;;  %v17576_v3 = vld [vmem:[%s17868_s6] ss:$0 sm:$0xff] }
 0x500   : > { %v11252_v22 = vrot.slane %v11085_v26, %v17049_v21  ;;  %v17565_v6 = vrot.slane %v11122_v0, %v17049_v21  ;;  %v11260_v47 = vrot.slane %v11087_v14, %v17049_v21  ;;  %v11264_v2 = vrot.slane %v11088_v17, %v17049_v21 }
 0x501   : > { %v11244_v29 = vrot.slane %v18074_v55, %v17049_v21  ;;  %v11256_v60 = vrot.slane %v11086_v16, %v17049_v21  ;;  %v11471_v54 = vsel %vm11457_vm3, %v18076_v11, %v18075_v25  ;;  %v9754_v62 = vadd.f32 %v17576_v3, %v18077_v51 }
 0x502   : > { %v10058_v58 = vcombine.high %v17282_v59, %v17282_v59  ;;  %v10092_v32 = vcombine.high %v17357_v35, %v17357_v35  ;;  %v12295_v50 = vrot.slane %v17282_v59, 9  ;;  %v12303_v48 = vrot.slane %v17357_v35, 9 }
 0x503   : > { %v11472_v31 = vsel %vm11459_vm4, %v11244_v29, %v11471_v54  ;;  %v18078_v57 = vrot.slane %v17286_v30, 9  ;;  %v9786_v26 = vmax.f32 %v9754_v62, 0.0  ;;  %v18079_v37 = vrot.slane %v17369_v27, 9 }
 0x504   : > { %v11473_v43 = vsel %vm11461_vm11, %v11248_v24, %v11472_v31  ;;  %v12296_v16 = vrot.slane %v10058_v58, 9  ;;  %v12304_v14 = vrot.slane %v10092_v32, 9  ;;  %v10983_v0 = vmax.f32 %v17282_v59, %v12295_v50 }
 0x505   : > { %v10982_v34 = vmax.f32 %v17286_v30, %v18078_v57  ;;  %v11474_v8 = vsel %vm11463_vm14, %v11252_v22, %v11473_v43  ;;  %v10990_v4 = vmax.f32 %v17369_v27, %v18079_v37  ;;  %v10991_v55 = vmax.f32 %v17357_v35, %v12303_v48  ;;  %9834 = vxpose.xlu1.b32.cont [12/16] (narrow) %v9786_v26, 8 }
 0x506   : > { %v11475_v17 = vsel %vm11465_vm13, %v11256_v60, %v11474_v8  ;;  %v10348_v24 = vcombine.high %v9786_v26, %v9786_v26  ;;  %v10355_v30 = vrot.slane %v9786_v26, %v17044_v53  ;;  %v10984_v22 = vmax.f32 %v10058_v58, %v12296_v16  ;;  %v18080_v60 = vld [vmem:[#allocation25_spill] sm:$0xff] }
 0x507   : > { %v11476_v29 = vsel %vm11467_vm2, %v11260_v47, %v11475_v17  ;;  %v10992_v11 = vmax.f32 %v10092_v32, %v12304_v14  ;;  %v11092_v54 = vmax.f32 %v18080_v60, %v17359_v9  ;;  %v11093_v59 = vmax.f32 %v17295_v28, %v17378_v49 }
 0x508   : > { %v11477_v25 = vsel %vm11469_vm9, %v11264_v2, %v11476_v29  ;;  %v17605_v27 = vrot.slane %v10348_v24, %v17044_v53  ;;  %v17607_v35 = vcombine.high %v10355_v30, %v10355_v30  ;;  %v12365_v47 = vrot.slane %v10355_v30, 9 }
 0x509   : > { %11529 = vxpose.xlu0.b32.cont [2/8] (short) (narrow) %v11477_v25, 8  ;;  %v11094_v31 = vmax.f32 %v10982_v34, %v10990_v4  ;;  %v11095_v51 = vmax.f32 %v10983_v0, %v10991_v55  ;;  %v11096_v62 = vmax.f32 %v10984_v22, %v10992_v11  ;;  %v18081_v2 = vmax.f32 %v17275_v10, %v17349_v52 }
 0x50a   : > { %v11280_v9 = vrot.slane %v11092_v54, %v17049_v21  ;;  %v12366_v32 = vrot.slane %v17607_v35, 9  ;;  %v17615_v28 = vmax.f32 %v10355_v30, %v12365_v47  ;;  %v11284_v49 = vrot.slane %v11093_v59, %v17049_v21 }
 0x50b   : > { %v11276_v58 = vrot.slane %v18081_v2, %v17049_v21  ;;  %v11288_v43 = vrot.slane %v11094_v31, %v17049_v21  ;;  %v11292_v50 = vrot.slane %v11095_v51, %v17049_v21  ;;  %v11296_v48 = vrot.slane %v11096_v62, %v17049_v21 }
 0x50c   : > { %v11478_v57 = vsel %vm11457_vm3, %v17372_v18, %v17365_v38  ;;  %v9755_v10 = vadd.f32 %v17576_v3, %v17324_v5  ;;  %v10126_v34 = vcombine.high %v17406_v1, %v17406_v1  ;;  %v10160_v8 = vcombine.high %v17454_v36, %v17454_v36 }
 0x50d   : > { %v11479_v52 = vsel %vm11459_vm4, %v11276_v58, %v11478_v57  ;;  %v12311_v26 = vrot.slane %v17406_v1, 9  ;;  %v12319_v17 = vrot.slane %v17454_v36, 9  ;;  %v18082_v38 = vrot.slane %v17410_v23, 9 }
 0x50e   : > { %v11480_v16 = vsel %vm11461_vm11, %v11280_v9, %v11479_v52  ;;  %v9787_v14 = vmax.f32 %v9755_v10, 0.0  ;;  %v12312_v0 = vrot.slane %v10126_v34, 9  ;;  %v12320_v37 = vrot.slane %v10160_v8, 9 }
 0x50f   : > { %v10998_v18 = vmax.f32 %v17410_v23, %v18082_v38  ;;  %v11481_v5 = vsel %vm11463_vm14, %v11284_v49, %v11480_v16  ;;  %v10999_v4 = vmax.f32 %v17406_v1, %v12311_v26  ;;  %v18083_v30 = vrot.slane %v17473_v63, 9  ;;  %v18085_v26 = vld [vmem:[#allocation19_spill] sm:$0xff] }
 0x510   : > { %v11482_v55 = vsel %vm11465_vm13, %v11288_v43, %v11481_v5  ;;  %v10365_v29 = vcombine.high %v9787_v14, %v9787_v14  ;;  %v10372_v24 = vrot.slane %v9787_v14, %v17044_v53  ;;  %9835 = vxpose.xlu1.b32.cont [13/16] (narrow) %v9787_v14, 8  ;;  %v11000_v11 = vmax.f32 %v10126_v34, %v12312_v0  ;;  %v18086_v0 = vld [vmem:[#allocation21_spill] sm:$0xff] }
 0x511   : > { %v11006_v22 = vmax.f32 %v17473_v63, %v18083_v30  ;;  %v11483_v25 = vsel %vm11467_vm2, %v11292_v50, %v11482_v55  ;;  %v11007_v23 = vmax.f32 %v17454_v36, %v12319_v17  ;;  %v11008_v60 = vmax.f32 %v10160_v8, %v12320_v37 }
 0x512   : > { %v11484_v54 = vsel %vm11469_vm9, %v11296_v48, %v11483_v25  ;;  %v10379_v1 = vrot.slane %v10365_v29, %v17044_v53  ;;  %v10380_v59 = vcombine.high %v10372_v24, %v10372_v24  ;;  %v12369_v47 = vrot.slane %v10372_v24, 9 }
 0x513   : > { %11530 = vxpose.xlu0.b32.cont [3/8] (short) (narrow) %v11484_v54, 8  ;;  %v11100_v31 = vmax.f32 %v17408_v61, %v17461_v45  ;;  %v11101_v51 = vmax.f32 %v17416_v40, %v17483_v39  ;;  %v11102_v63 = vmax.f32 %v10998_v18, %v11006_v22  ;;  %v11103_v62 = vmax.f32 %v10999_v4, %v11007_v23 }
 0x514   : > { %v10381_v2 = vcombine.high %v10379_v1, %v10379_v1  ;;  %v12370_v58 = vrot.slane %v10380_v59, 9  ;;  %v12371_v9 = vrot.slane %v10379_v1, 9  ;;  %v17652_v36 = vmax.f32 %v10372_v24, %v12369_v47 }
 0x515   : > { %v11104_v49 = vmax.f32 %v11000_v11, %v11008_v60  ;;  %v18084_v43 = vmax.f32 %v17403_v15, %v17456_v7  ;;  %v11312_v48 = vrot.slane %v11100_v31, %v17049_v21  ;;  %v11316_v61 = vrot.slane %v11101_v51, %v17049_v21  ;;  %v18088_v11 = vld [vmem:[#allocation31_spill] sm:$0xff] }
 0x516   : > { %v12372_v45 = vrot.slane %v10381_v2, 9  ;;  %v17660_v57 = vmax.f32 %v10380_v59, %v12370_v58  ;;  %v17662_v40 = vmax.f32 %v10379_v1, %v12371_v9  ;;  %v11320_v39 = vrot.slane %v11102_v63, %v17049_v21  ;;  %v18090_v63 = vld [vmem:[#allocation27_spill] sm:$0xff]  ;;  %v18092_v58 = vld [vmem:[#allocation33_spill] sm:$0xff] }
 0x517   : > { %v11308_v50 = vrot.slane %v18084_v43, %v17049_v21  ;;  %v11324_v10 = vrot.slane %v11103_v62, %v17049_v21  ;;  %v11328_v52 = vrot.slane %v11104_v49, %v17049_v21  ;;  %v11485_v7 = vsel %vm11457_vm3, %v17476_v44, %v17467_v33  ;;  %v18091_v62 = vld [vmem:[#allocation20_spill] sm:$0xff]  ;;  %v18093_v9 = vld [vmem:[#allocation23_spill] sm:$0xff] }
 0x518   : > { %v9756_v15 = vadd.f32 %v17576_v3, %v17340_v42  ;;  %v17672_v34 = vmax.f32 %v10381_v2, %v12372_v45  ;;  %v10194_v16 = vcombine.high %v18085_v26, %v18085_v26  ;;  %v10228_v14 = vcombine.high %v17319_v46, %v17319_v46  ;;  %v18095_v45 = vld [vmem:[#allocation26_spill] sm:$0xff] }
 0x519   : > { %v11486_v8 = vsel %vm11459_vm4, %v11308_v50, %v11485_v7  ;;  %v12327_v18 = vrot.slane %v18085_v26, 9  ;;  %v12335_v33 = vrot.slane %v17319_v46, 9  ;;  %v18087_v37 = vrot.slane %v18086_v0, 9 }
 0x51a   : > { %v11487_v17 = vsel %vm11461_vm11, %v11312_v48, %v11486_v8  ;;  %v9788_v38 = vmax.f32 %v9756_v15, 0.0  ;;  %v12328_v42 = vrot.slane %v10194_v16, 9  ;;  %v12336_v5 = vrot.slane %v10228_v14, 9 }
 0x51b   : > { %v11488_v44 = vsel %vm11463_vm14, %v11316_v61, %v11487_v17  ;;  %v11014_v4 = vmax.f32 %v18086_v0, %v18087_v37  ;;  %v11015_v30 = vmax.f32 %v18085_v26, %v12327_v18  ;;  %v18089_v23 = vrot.slane %v18088_v11, 9  ;;  %v18094_v61 = vld [vmem:[#allocation18_spill] sm:$0xff] }
 0x51c   : > { %v11489_v55 = vsel %vm11465_vm13, %v11320_v39, %v11488_v44  ;;  %v10382_v29 = vcombine.high %v9788_v38, %v9788_v38  ;;  %v10389_v24 = vrot.slane %v9788_v38, %v17044_v53  ;;  %9836 = vxpose.xlu1.b32.cont [14/16] (narrow) %v9788_v38, 8  ;;  %v11016_v25 = vmax.f32 %v10194_v16, %v12328_v42  ;;  %v18097_v16 = vld [vmem:[#allocation29_spill] sm:$0xff]  ;;  %v18099_v38 = vld [vmem:[#allocation28_spill] sm:$0xff]  ;;  %v18101_v0 = vld [vmem:[#allocation42_spill] sm:$0xff] }
 0x51d   : > { %v11490_v22 = vsel %vm11467_vm2, %v11324_v10, %v11489_v55  ;;  %v11022_v60 = vmax.f32 %v18088_v11, %v18089_v23  ;;  %v11023_v54 = vmax.f32 %v17319_v46, %v12335_v33  ;;  %v11024_v51 = vmax.f32 %v10228_v14, %v12336_v5  ;;  %v18098_v14 = vld [vmem:[#allocation30_spill] sm:$0xff]  ;;  %v18100_v33 = vld [vmem:[#allocation36_spill] sm:$0xff]  ;;  %v18102_v11 = vld [vmem:[#allocation37_spill] sm:$0xff] }
 0x51e   : > { %v11491_v1 = vsel %vm11469_vm9, %v11328_v52, %v11490_v22  ;;  %v17696_v59 = vrot.slane %v10382_v29, %v17044_v53  ;;  %v17698_v47 = vcombine.high %v10389_v24, %v10389_v24  ;;  %v12373_v31 = vrot.slane %v10389_v24, 9 }
 0x51f   : > { %11531 = vxpose.xlu0.b32.cont [4/8] (short) (narrow) %v11491_v1, 8  ;;  %v11108_v2 = vmax.f32 %v18091_v62, %v18090_v63  ;;  %v11109_v49 = vmax.f32 %v18093_v9, %v18092_v58  ;;  %v11110_v43 = vmax.f32 %v11014_v4, %v11022_v60  ;;  %v11111_v48 = vmax.f32 %v11015_v30, %v11023_v54 }
 0x520   : > { %v12374_v50 = vrot.slane %v17698_v47, 9  ;;  %v17705_v46 = vmax.f32 %v10389_v24, %v12373_v31  ;;  %v18096_v39 = vmax.f32 %v18094_v61, %v18095_v45  ;;  %v11112_v52 = vmax.f32 %v11016_v25, %v11024_v51 }
 0x521   : > { %v11344_v7 = vrot.slane %v11108_v2, %v17049_v21  ;;  %v11348_v15 = vrot.slane %v11109_v49, %v17049_v21  ;;  %v11352_v8 = vrot.slane %v11110_v43, %v17049_v21  ;;  %v11356_v26 = vrot.slane %v11111_v48, %v17049_v21  ;;  %v18104_v2 = vld [vmem:[#allocation43_spill] sm:$0xff] }
 0x522   : > { %v11340_v10 = vrot.slane %v18096_v39, %v17049_v21  ;;  %v11492_v17 = vsel %vm11457_vm3, %v18098_v14, %v18097_v16  ;;  %v9757_v18 = vadd.f32 %v17576_v3, %v18099_v38  ;;  %v10262_v44 = vcombine.high %v18100_v33, %v18100_v33 }
 0x523   : > { %v11360_v42 = vrot.slane %v11112_v52, %v17049_v21  ;;  %v10296_v37 = vcombine.high %v18101_v0, %v18101_v0  ;;  %v12343_v4 = vrot.slane %v18100_v33, 9  ;;  %v12351_v30 = vrot.slane %v18101_v0, 9  ;;  %v18107_v52 = vld [vmem:[#allocation35_spill] sm:$0xff] }
 0x524   : > { %v11493_v5 = vsel %vm11459_vm4, %v11340_v10, %v11492_v17  ;;  %v9789_v29 = vmax.f32 %v9757_v18, 0.0  ;;  %v12344_v24 = vrot.slane %v10262_v44, 9  ;;  %v18103_v23 = vrot.slane %v18102_v11, 9  ;;  %v18106_v10 = vld [vmem:[#allocation40_spill] sm:$0xff] }
 0x525   : > { %v11494_v55 = vsel %vm11461_vm11, %v11344_v7, %v11493_v5  ;;  %v12352_v25 = vrot.slane %v10296_v37, 9  ;;  %v11031_v54 = vmax.f32 %v18100_v33, %v12343_v4  ;;  %v18105_v58 = vrot.slane %v18104_v2, 9  ;;  %v18111_v5 = vld [vmem:[#allocation39_spill] sm:$0xff] }
 0x526   : > { %v11495_v22 = vsel %vm11463_vm14, %v11348_v15, %v11494_v55  ;;  %v11030_v60 = vmax.f32 %v18102_v11, %v18103_v23  ;;  %9837 = vxpose.xlu1.b32.cont [15/16] (narrow) %v9789_v29, 8  ;;  %v10399_v31 = vcombine.high %v9789_v29, %v9789_v29  ;;  %v10406_v51 = vrot.slane %v9789_v29, %v17044_v53  ;;  %v18108_v15 = vld [vmem:[#allocation45_spill] sm:$0xff] }
 0x527   : > { %v11496_v1 = vsel %vm11465_vm13, %v11352_v8, %v11495_v22  ;;  %v11032_v63 = vmax.f32 %v10262_v44, %v12344_v24  ;;  %v11038_v9 = vmax.f32 %v18104_v2, %v18105_v58  ;;  %v11039_v49 = vmax.f32 %v18101_v0, %v12351_v30  ;;  %v18109_v8 = vld [vmem:[#allocation38_spill] sm:$0xff]  ;;  %v18115_v58 = vld [vmem:[#allocation32_spill] sm:$0xff] }
 0x528   : > { %v11497_v62 = vsel %vm11467_vm2, %v11356_v26, %v11496_v1  ;;  %v11040_v43 = vmax.f32 %v10296_v37, %v12352_v25  ;;  %v10413_v61 = vrot.slane %v10399_v31, %v17044_v53  ;;  %v10414_v45 = vcombine.high %v10406_v51, %v10406_v51 }
 0x529   : > { %v11498_v48 = vsel %vm11469_vm9, %v11360_v42, %v11497_v62  ;;  %v12377_v39 = vrot.slane %v10406_v51, 9  ;;  %v11116_v7 = vmax.f32 %v18107_v52, %v18106_v10  ;;  %v11117_v26 = vmax.f32 %v18109_v8, %v18108_v15  ;;  %v18110_v42 = vld [vmem:[#allocation34_spill] sm:$0xff] }
 0x52a   : > { %11532 = vxpose.xlu0.b32.cont [5/8] (short) (narrow) %v11498_v48, 8  ;;  %v11118_v16 = vmax.f32 %v11030_v60, %v11038_v9  ;;  %v11119_v14 = vmax.f32 %v11031_v54, %v11039_v49  ;;  %v10415_v17 = vcombine.high %v10413_v61, %v10413_v61  ;;  %v12378_v38 = vrot.slane %v10414_v45, 9  ;;  %v18113_v60 = vld [vmem:[#allocation41_spill] sm:$0xff]  ;;  %v18114_v54 = vld [vmem:[#allocation44_spill] sm:$0xff]  ;;  %v9807_v31 = vpop.trf.xlu0  ;;  %v18116_v49 = vld [vmem:[#allocation47_spill] sm:$0xff] }
 0x52b   : > { %v12379_v18 = vrot.slane %v10413_v61, 9  ;;  %v11065_v33 = vmax.f32 %v10406_v51, %v12377_v39  ;;  %v11120_v44 = vmax.f32 %v11032_v63, %v11040_v43  ;;  %v18112_v0 = vmax.f32 %v18110_v42, %v18111_v5  ;;  %9855 = vst [vmem:[%s17757_s12] sm:$0xff] %v9807_v31 }
 0x52c   : > { %v11376_v4 = vrot.slane %v11116_v7, %v17049_v21  ;;  %v11380_v55 = vrot.slane %v11117_v26, %v17049_v21  ;;  %v12380_v29 = vrot.slane %v10415_v17, 9  ;;  %v11066_v24 = vmax.f32 %v10414_v45, %v12378_v38 }
 0x52d   : > { %v11372_v37 = vrot.slane %v18112_v0, %v17049_v21  ;;  %v17759_v30 = vmax.f32 %v10413_v61, %v12379_v18  ;;  %v11129_v22 = vmax.f32 %v17652_v36, %v11065_v33  ;;  %v11384_v25 = vrot.slane %v11118_v16, %v17049_v21 }
 0x52e   : > { %v11388_v11 = vrot.slane %v11119_v14, %v17049_v21  ;;  %v11392_v23 = vrot.slane %v11120_v44, %v17049_v21  ;;  %v11499_v1 = vsel %vm11457_vm3, %v18114_v54, %v18113_v60  ;;  %v17768_v51 = vmax.f32 %v10415_v17, %v12380_v29 }
 0x52f   : > { %v11130_v63 = vmax.f32 %v17660_v57, %v11066_v24  ;;  %v11131_v62 = vmax.f32 %v17662_v40, %v17759_v30  ;;  %v17774_v36 = vrot.slane %v11129_v22, %v17049_v21  ;;  %v11500_v2 = vsel %vm11459_vm4, %v11372_v37, %v11499_v1 }
 0x530   : > { %v9758_v9 = vadd.f32 %v17576_v3, %v18115_v58  ;;  %v10330_v43 = vcombine.high %v18116_v49, %v18116_v49  ;;  %v10364_v48 = vcombine.high %v17605_v27, %v17605_v27  ;;  %v11501_v61 = vsel %vm11461_vm11, %v11376_v4, %v11500_v2 }
 0x531   : > { %v17785_v57 = vrot.slane %v11130_v63, %v17049_v21  ;;  %v12359_v45 = vrot.slane %v18116_v49, 9  ;;  %v12367_v39 = vrot.slane %v17605_v27, 9  ;;  %v11502_v10 = vsel %vm11463_vm14, %v11380_v55, %v11501_v61 }
 0x532   : > { %v9790_v52 = vmax.f32 %v9758_v9, 0.0  ;;  %v12360_v7 = vrot.slane %v10330_v43, 9  ;;  %v12368_v3 = vrot.slane %v10364_v48, 9  ;;  %v11503_v15 = vsel %vm11465_vm13, %v11384_v25, %v11502_v10 }
 0x533   : > { %v18117_v8 = vrot.slane %v17488_v20, 9  ;;  %v11047_v16 = vmax.f32 %v18116_v49, %v12359_v45  ;;  %v11054_v14 = vmax.f32 %v17607_v35, %v12366_v32  ;;  %v11504_v17 = vsel %vm11467_vm2, %v11388_v11, %v11503_v15  ;;  %v18119_v32 = vld [vmem:[#allocation48_spill] sm:$0xff] }
 0x534   : > { %v10416_v38 = vcombine.high %v9790_v52, %v9790_v52  ;;  %v10423_v18 = vrot.slane %v9790_v52, %v17044_v53  ;;  %9838 = vxpose.xlu1.b32.end [16/16] (narrow) %v9790_v52, 8  ;;  %v11048_v33 = vmax.f32 %v10330_v43, %v12360_v7  ;;  %v11505_v44 = vsel %vm11469_vm9, %v11392_v23, %v11504_v17 }
 0x535   : > { %v11046_v26 = vmax.f32 %v17488_v20, %v18117_v8  ;;  %v11055_v42 = vmax.f32 %v17605_v27, %v12367_v39  ;;  %v11056_v5 = vmax.f32 %v10364_v48, %v12368_v3  ;;  %v18118_v20 = vld [vmem:[#allocation46_spill] sm:$0xff]  ;;  %11533 = vxpose.xlu0.b32.cont [6/8] (short) (narrow) %v11505_v44, 8  ;;  %v11125_v55 = vmax.f32 %v18119_v32, %v17615_v28 }
 0x536   : > { %v11124_v0 = vmax.f32 %v18118_v20, %v17549_v12  ;;  %v10430_v37 = vrot.slane %v10416_v38, %v17044_v53  ;;  %v10431_v4 = vcombine.high %v10423_v18, %v10423_v18  ;;  %v12381_v35 = vrot.slane %v10423_v18, 9 }
 0x537   : > { %v11126_v29 = vmax.f32 %v11046_v26, %v11054_v14  ;;  %v11127_v24 = vmax.f32 %v11047_v16, %v11055_v42  ;;  %v11128_v22 = vmax.f32 %v11048_v33, %v11056_v5  ;;  %v11404_v27 = vrot.slane %v11123_v13, %v17049_v21 }
 0x538   : > { %v12382_v25 = vrot.slane %v10431_v4, 9  ;;  %v11069_v11 = vmax.f32 %v10423_v18, %v12381_v35  ;;  %v11408_v12 = vrot.slane %v11124_v0, %v17049_v21  ;;  %v11412_v23 = vrot.slane %v11125_v55, %v17049_v21 }
 0x539   : > { %v11416_v53 = vrot.slane %v11126_v29, %v17049_v21  ;;  %v11420_v60 = vrot.slane %v11127_v24, %v17049_v21  ;;  %v11424_v28 = vrot.slane %v11128_v22, %v17049_v21  ;;  %v11506_v54 = vsel %vm11457_vm3, %v17565_v6, %v17555_v56 }
 0x53a   : > { %v11507_v1 = vsel %vm11459_vm4, %v11404_v27, %v11506_v54  ;;  %v10398_v41 = vcombine.high %v17696_v59, %v17696_v59  ;;  %v10432_v19 = vcombine.high %v10430_v37, %v10430_v37  ;;  %v12375_v13 = vrot.slane %v17696_v59, 9 }
 0x53b   : > { %v11508_v31 = vsel %vm11461_vm11, %v11408_v12, %v11507_v1  ;;  %v12383_v63 = vrot.slane %v10430_v37, 9  ;;  %v11062_v2 = vmax.f32 %v17698_v47, %v12374_v50  ;;  %v11070_v58 = vmax.f32 %v10431_v4, %v12382_v25 }
 0x53c   : > { %v11509_v9 = vsel %vm11463_vm14, %v11412_v23, %v11508_v31  ;;  %v12376_v49 = vrot.slane %v10398_v41, 9  ;;  %v12384_v56 = vrot.slane %v10432_v19, 9  ;;  %v11063_v6 = vmax.f32 %v17696_v59, %v12375_v13 }
 0x53d   : > { %v11510_v43 = vsel %vm11465_vm13, %v11416_v53, %v11509_v9  ;;  %v11071_v48 = vmax.f32 %v10430_v37, %v12383_v63  ;;  %v11132_v61 = vmax.f32 %v17672_v34, %v17768_v51  ;;  %v11133_v45 = vmax.f32 %v17705_v46, %v11069_v11 }
 0x53e   : > { %v11511_v39 = vsel %vm11467_vm2, %v11420_v60, %v11510_v43  ;;  %v11064_v10 = vmax.f32 %v10398_v41, %v12376_v49  ;;  %v11072_v52 = vmax.f32 %v10432_v19, %v12384_v56  ;;  %v11134_v47 = vmax.f32 %v11062_v2, %v11070_v58 }
 0x53f   : > { %v11512_v50 = vsel %vm11469_vm9, %v11424_v28, %v11511_v39  ;;  %v11135_v7 = vmax.f32 %v11063_v6, %v11071_v48  ;;  %v11436_v59 = vrot.slane %v11131_v62, %v17049_v21  ;;  %v11440_v3 = vrot.slane %v11132_v61, %v17049_v21 }
 0x540   : > { %11534 = vxpose.xlu0.b32.cont [7/8] (short) (narrow) %v11512_v50, 8  ;;  %v11136_v34 = vmax.f32 %v11064_v10, %v11072_v52  ;;  %v11513_v46 = vsel %vm11457_vm3, %v17785_v57, %v17774_v36  ;;  %v11444_v51 = vrot.slane %v11133_v45, %v17049_v21  ;;  %v11448_v8 = vrot.slane %v11134_v47, %v17049_v21 }
 0x541   : > { %v11514_v15 = vsel %vm11459_vm4, %v11436_v59, %v11513_v46  ;;  %v11452_v40 = vrot.slane %v11135_v7, %v17049_v21 }
 0x542   : > { %v11515_v26 = vsel %vm11461_vm11, %v11440_v3, %v11514_v15  ;;  %v11456_v62 = vrot.slane %v11136_v34, %v17049_v21 }
 0x543   : > { %v11516_v30 = vsel %vm11463_vm14, %v11444_v51, %v11515_v26 }
 0x544   : > { %v11517_v16 = vsel %vm11465_vm13, %v11448_v8, %v11516_v30 }
 0x545   : > { %v11518_v14 = vsel %vm11467_vm2, %v11452_v40, %v11517_v16 }
 0x546   : > { %v11519_v36 = vsel %vm11469_vm9, %v11456_v62, %v11518_v14 }
 0x547   : > { %11535 = vxpose.xlu0.b32.end [8/8] (short) (narrow) %v11519_v36, 8 }
 0x578   : > { %v9839_v57 = vpop.trf.xlu1 }
 0x579   : > { %9856 = vst [vmem:[%s17757_s12 + $0x8] sm:$0xff] %v9839_v57 }
 0x5ab   : > { %v11544_v17 = vpop.trf.xlu0 }
 0x5ac   : > { %11561 = vst.msk [vmem:[%s316_s17] sm:$0xff] %vm11560_vm0, %v11544_v17 }
 0x5ad PF: > { %s19_s27 = sadd.s32 1, %s13248_s27  }
 0x5ae   : > { %p16_p4 = scmp.ge.s32.totalorder %s19_s27, 4  }
 0x5b0   :  { %18 = sbr.rel (!%p16_p4) target bundleno = 1 (0x1), region = 94 }

</bundles_post_ra>
